<compile_context>
chip_gen: v6e
topology: v6e:2x2x1
jax: 0.10.0
libtpu: 0.0.40
codegen_flags: <defaults>
</compile_context>

<pallas_src>
import functools

import jax
import jax.numpy as jnp
import numpy as np
from jax.experimental import pallas as pl
from jax.experimental.pallas import tpu as pltpu

_HI = jax.lax.Precision.HIGHEST


# ------------------------------ fused kernel --------------------------------


def _fused_kernel(x_ref, w1_ref, b1_ref, w2_ref, b2_ref, wf_ref, bf_ref,
                  wfc_ref, bfc_ref,
                  feat_ref, fc_ref,
                  a1_ref, xp2_ref, a2_ref, p2_ref, *, tb):
    """Whole forward for one batch tile, all intermediates in VMEM.

    x_ref:   (tb, 18, 18, 1)  pre-padded NHWC input
    w1_ref:  (9, 8)           conv1 weight, rows ordered (kh, kw, cin)
    w2_ref:  (72, 16)         conv2 weight, rows ordered (kh, kw, cin)
    wf_ref:  (256, 2)         feature weight, rows permuted to (h, w, c) order
    wfc_ref: (2, 10)          fc weight (transposed)
    """
    f32 = jnp.float32

    # ---------------- conv1 (1->8, 3x3, pad pre-applied) + ReLU -------------
    # im2col: 9 shifted static slices concatenated along the channel axis.
    cols1 = [x_ref[:, i:i + 16, j:j + 16, :] for i in range(3) for j in range(3)]
    pat1 = jnp.concatenate(cols1, axis=-1).reshape(tb * 256, 9)   # rows (n,h,w)
    y1 = jnp.dot(pat1, w1_ref[...], preferred_element_type=f32, precision=_HI)
    y1 = jnp.maximum(y1 + b1_ref[...], 0.0)                       # (tb*256, 8)
    a1_ref[...] = y1

    # ---------------- max-pool 2x2 #1 ----------------------------------------
    # w-pairs: adjacent rows (w is the fastest row index) via strided reads.
    m1 = tb * 128
    tw = jnp.maximum(a1_ref[pl.ds(0, m1, stride=2), :],
                     a1_ref[pl.ds(1, m1, stride=2), :])            # (tb*128, 8)
    # rows are now (n, h, w2); regroup 16-row blocks = (dh*8 + w2).
    tw = tw.reshape(tb * 8, 16, 8)
    p1 = jnp.maximum(tw[:, 0:8, :], tw[:, 8:16, :])                # (tb*8, 8, 8)

    # ---------------- conv2 (8->16, 3x3, pad=1) + ReLU ----------------------
    xp2_ref[...] = jnp.zeros(xp2_ref.shape, f32)
    xp2_ref[:, 1:9, 1:9, :] = p1.reshape(tb, 8, 8, 8)
    cols2 = [xp2_ref[:, i:i + 8, j:j + 8, :] for i in range(3) for j in range(3)]
    pat2 = jnp.concatenate(cols2, axis=-1).reshape(tb * 64, 72)    # rows (n,h,w)
    y2 = jnp.dot(pat2, w2_ref[...], preferred_element_type=f32, precision=_HI)
    y2 = jnp.maximum(y2 + b2_ref[...], 0.0)                        # (tb*64, 16)
    a2_ref[...] = y2

    # ---------------- max-pool 2x2 #2 ----------------------------------------
    m2 = tb * 32
    tw2 = jnp.maximum(a2_ref[pl.ds(0, m2, stride=2), :],
                      a2_ref[pl.ds(1, m2, stride=2), :])           # (tb*32, 16)
    tw2 = tw2.reshape(tb * 4, 8, 16)                               # (dh*4 + w2)
    p2 = jnp.maximum(tw2[:, 0:4, :], tw2[:, 4:8, :])               # (tb*4, 4, 16)
    p2_ref[...] = p2.reshape(tb, 4, 4, 16)                         # (n,h2,w2,c)

    # ---------------- flatten + feature + fc (fused) ------------------------
    # Kernel flattens in (h, w, c) order; wf columns were pre-permuted in the
    # wrapper so this matches PyTorch's x.view(N, -1) on an NCHW tensor.
    flat = jnp.concatenate(
        [p2_ref[:, i, j, :] for i in range(4) for j in range(4)], axis=-1
    )                                                              # (tb, 256)
    feat = jnp.dot(flat, wf_ref[...], preferred_element_type=f32,
                   precision=_HI) + bf_ref[...]                    # (tb, 2)
    feat_ref[...] = feat
    fc_ref[...] = jnp.dot(feat, wfc_ref[...], preferred_element_type=f32,
                          precision=_HI) + bfc_ref[...]            # (tb, 10)


# ------------------------------ wrapper --------------------------------------


def feature_extractor_forward(params, x_nchw,
                              extracted_layers=("feature", "fc"),
                              block_batch=None):
    N, Cin, H, W = x_nchw.shape
    assert (Cin, H, W) == (1, 16, 16), "kernel is specialized to the MNIST config"
    TB = N if block_batch is None else block_batch
    assert N % TB == 0 and (TB == N or TB % 8 == 0)

    # Cheap trace-time / input-side prep (no intermediate-activation HBM hops).
    x = jnp.transpose(x_nchw, (0, 2, 3, 1))                 # NHWC (C=1 -> reshape)
    xp = jnp.pad(x, ((0, 0), (1, 1), (1, 1), (0, 0)))       # (N, 18, 18, 1)

    w1 = jnp.transpose(params["conv1_w"], (2, 3, 1, 0)).reshape(9, 8)
    b1 = params["conv1_b"].reshape(1, 8)
    w2 = jnp.transpose(params["conv2_w"], (2, 3, 1, 0)).reshape(72, 16)
    b2 = params["conv2_b"].reshape(1, 16)
    # Fold PyTorch's NCHW (c,h,w) flatten order into the feature weight: the
    # kernel flattens pool2 in (h,w,c) order, so permute columns once here.
    wf = jnp.transpose(params["feature_w"].reshape(2, 16, 4, 4),
                       (2, 3, 1, 0)).reshape(256, 2)
    bf = params["feature_b"].reshape(1, 2)
    wfc = params["fc_w"].T                                   # (2, 10)
    bfc = params["fc_b"].reshape(1, 10)

    grid = (N // TB,)
    feat, fc = pl.pallas_call(
        functools.partial(_fused_kernel, tb=TB),
        out_shape=(jax.ShapeDtypeStruct((N, 2), jnp.float32),
                   jax.ShapeDtypeStruct((N, 10), jnp.float32)),
        grid_spec=pltpu.PrefetchScalarGridSpec(
            num_scalar_prefetch=0,
            grid=grid,
            in_specs=[
                pl.BlockSpec((TB, 18, 18, 1), lambda b: (b, 0, 0, 0)),
                pl.BlockSpec((9, 8), lambda b: (0, 0)),
                pl.BlockSpec((1, 8), lambda b: (0, 0)),
                pl.BlockSpec((72, 16), lambda b: (0, 0)),
                pl.BlockSpec((1, 16), lambda b: (0, 0)),
                pl.BlockSpec((256, 2), lambda b: (0, 0)),
                pl.BlockSpec((1, 2), lambda b: (0, 0)),
                pl.BlockSpec((2, 10), lambda b: (0, 0)),
                pl.BlockSpec((1, 10), lambda b: (0, 0)),
            ],
            out_specs=(pl.BlockSpec((TB, 2), lambda b: (b, 0)),
                       pl.BlockSpec((TB, 10), lambda b: (b, 0))),
            scratch_shapes=[
                pltpu.VMEM((TB * 256, 8), jnp.float32),      # conv1+relu out
                pltpu.VMEM((TB, 10, 10, 8), jnp.float32),    # padded conv2 input
                pltpu.VMEM((TB * 64, 16), jnp.float32),      # conv2+relu out
                pltpu.VMEM((TB, 4, 4, 16), jnp.float32),     # pool2 out
            ],
        ),
        compiler_params=pltpu.CompilerParams(
            dimension_semantics=("parallel",)),
    )(xp, w1, b1, w2, b2, wf, bf, wfc, bfc)

    outputs = {}
    if "feature" in extracted_layers:
        outputs["feature"] = feat
    if "fc" in extracted_layers:
        outputs["fc"] = fc
    return outputs


# ------------------------------ pure-JAX reference ---------------------------


def reference_forward(params, x_nchw):
    def conv(x, w, b):
        y = jax.lax.conv_general_dilated(
            x, w, (1, 1), ((1, 1), (1, 1)),
            dimension_numbers=("NCHW", "OIHW", "NCHW"), precision=_HI)
        return y + b[None, :, None, None]

    def pool(x):
        return jax.lax.reduce_window(x, -jnp.inf, jax.lax.max,
                                     (1, 1, 2, 2), (1, 1, 2, 2), "VALID")

    x = jax.nn.relu(conv(x_nchw, params["conv1_w"], params["conv1_b"]))
    x = pool(x)
    x = jax.nn.relu(conv(x, params["conv2_w"], params["conv2_b"]))
    x = pool(x)
    x = x.reshape(x.shape[0], -1)                        # NCHW flatten (c,h,w)
    feat = jnp.dot(x, params["feature_w"].T, precision=_HI) + params["feature_b"]
    fc = jnp.dot(feat, params["fc_w"].T, precision=_HI) + params["fc_b"]
    return {"feature": feat, "fc": fc}


# ------------------------------------ main ------------------------------------

if __name__ == "__main__":
    key = jax.random.PRNGKey(0)
    ks = jax.random.split(key, 9)

    N, Cin, H, W = 2, 1, 16, 16
    feat_in = 16 * (H // 4) * (W // 4)                   # 256

    params = {
        "conv1_w": 0.1 * jax.random.normal(ks[0], (8, Cin, 3, 3), jnp.float32),
        "conv1_b": 0.1 * jax.random.normal(ks[1], (8,), jnp.float32),
        "conv2_w": 0.1 * jax.random.normal(ks[2], (16, 8, 3, 3), jnp.float32),
        "conv2_b": 0.1 * jax.random.normal(ks[3], (16,), jnp.float32),
        "feature_w": 0.1 * jax.random.normal(ks[4], (2, feat_in), jnp.float32),
        "feature_b": 0.1 * jax.random.normal(ks[5], (2,), jnp.float32),
        "fc_w": 0.1 * jax.random.normal(ks[6], (10, 2), jnp.float32),
        "fc_b": 0.1 * jax.random.normal(ks[7], (10,), jnp.float32),
    }
    x = jax.random.normal(ks[8], (N, Cin, H, W), jnp.float32)

    fwd = jax.jit(lambda p, xx: feature_extractor_forward(p, xx))
    outs = jax.block_until_ready(fwd(params, x))
    ref = jax.block_until_ready(reference_forward(params, x))

    np.testing.assert_allclose(np.asarray(outs["feature"]),
                               np.asarray(ref["feature"]), rtol=1e-4, atol=1e-4)
    np.testing.assert_allclose(np.asarray(outs["fc"]),
                               np.asarray(ref["fc"]), rtol=1e-4, atol=1e-4)

    # TODO(synk): the original `submodule` (and its ArcFace head) is not defined
    # in the provided snippet; a representative MNIST CNN is instantiated here.
    print("KERNEL_OK")
</pallas_src>

<mosaic_0001>
module attributes {stable_mosaic.version = 11 : i64} {
  func.func @_fused_kernel(%arg0: i32, %arg1: memref<2x18x18x1xf32, #tpu.memory_space<vmem>>, %arg2: memref<9x8xf32, #tpu.memory_space<vmem>>, %arg3: memref<1x8xf32, #tpu.memory_space<vmem>>, %arg4: memref<72x16xf32, #tpu.memory_space<vmem>>, %arg5: memref<1x16xf32, #tpu.memory_space<vmem>>, %arg6: memref<256x2xf32, #tpu.memory_space<vmem>>, %arg7: memref<1x2xf32, #tpu.memory_space<vmem>>, %arg8: memref<2x10xf32, #tpu.memory_space<vmem>>, %arg9: memref<1x10xf32, #tpu.memory_space<vmem>>, %arg10: memref<2x2xf32, #tpu.memory_space<vmem>>, %arg11: memref<2x10xf32, #tpu.memory_space<vmem>>, %arg12: memref<512x8xf32, #tpu.memory_space<vmem>>, %arg13: memref<2x10x10x8xf32, #tpu.memory_space<vmem>>, %arg14: memref<128x16xf32, #tpu.memory_space<vmem>>, %arg15: memref<2x4x4x16xf32, #tpu.memory_space<vmem>>) attributes {dimension_semantics = [#tpu.dimension_semantics<parallel>], iteration_bounds = array<i64: 1>, scalar_prefetch = 0 : i64, scratch_operands = 4 : i64, tpu.core_type = #tpu.core_type<tc>, window_params = [{transform_indices = @transform_0, window_bounds = array<i64: 2, 18, 18, 1>}, {pipeline_mode = #tpu.pipeline_mode<synchronous>, transform_indices = @transform_1, window_bounds = array<i64: 9, 8>}, {pipeline_mode = #tpu.pipeline_mode<synchronous>, transform_indices = @transform_2, window_bounds = array<i64: 1, 8>}, {pipeline_mode = #tpu.pipeline_mode<synchronous>, transform_indices = @transform_3, window_bounds = array<i64: 72, 16>}, {pipeline_mode = #tpu.pipeline_mode<synchronous>, transform_indices = @transform_4, window_bounds = array<i64: 1, 16>}, {pipeline_mode = #tpu.pipeline_mode<synchronous>, transform_indices = @transform_5, window_bounds = array<i64: 256, 2>}, {pipeline_mode = #tpu.pipeline_mode<synchronous>, transform_indices = @transform_6, window_bounds = array<i64: 1, 2>}, {pipeline_mode = #tpu.pipeline_mode<synchronous>, transform_indices = @transform_7, window_bounds = array<i64: 2, 10>}, {pipeline_mode = #tpu.pipeline_mode<synchronous>, transform_indices = @transform_8, window_bounds = array<i64: 1, 10>}, {transform_indices = @transform_9, window_bounds = array<i64: 2, 2>}, {transform_indices = @transform_10, window_bounds = array<i64: 2, 10>}]} {
    %c0 = arith.constant 0 : index
    %c0_0 = arith.constant 0 : index
    %c0_1 = arith.constant 0 : index
    %c0_2 = arith.constant 0 : index
    %0 = vector.load %arg1[%c0, %c0_0, %c0_1, %c0_2] : memref<2x18x18x1xf32, #tpu.memory_space<vmem>>, vector<2x16x16x1xf32>
    %c0_3 = arith.constant 0 : index
    %c0_4 = arith.constant 0 : index
    %c1 = arith.constant 1 : index
    %c0_5 = arith.constant 0 : index
    %1 = vector.load %arg1[%c0_3, %c0_4, %c1, %c0_5] : memref<2x18x18x1xf32, #tpu.memory_space<vmem>>, vector<2x16x16x1xf32>
    %c0_6 = arith.constant 0 : index
    %c0_7 = arith.constant 0 : index
    %c2 = arith.constant 2 : index
    %c0_8 = arith.constant 0 : index
    %2 = vector.load %arg1[%c0_6, %c0_7, %c2, %c0_8] : memref<2x18x18x1xf32, #tpu.memory_space<vmem>>, vector<2x16x16x1xf32>
    %c0_9 = arith.constant 0 : index
    %c1_10 = arith.constant 1 : index
    %c0_11 = arith.constant 0 : index
    %c0_12 = arith.constant 0 : index
    %3 = vector.load %arg1[%c0_9, %c1_10, %c0_11, %c0_12] : memref<2x18x18x1xf32, #tpu.memory_space<vmem>>, vector<2x16x16x1xf32>
    %c0_13 = arith.constant 0 : index
    %c1_14 = arith.constant 1 : index
    %c1_15 = arith.constant 1 : index
    %c0_16 = arith.constant 0 : index
    %4 = vector.load %arg1[%c0_13, %c1_14, %c1_15, %c0_16] : memref<2x18x18x1xf32, #tpu.memory_space<vmem>>, vector<2x16x16x1xf32>
    %c0_17 = arith.constant 0 : index
    %c1_18 = arith.constant 1 : index
    %c2_19 = arith.constant 2 : index
    %c0_20 = arith.constant 0 : index
    %5 = vector.load %arg1[%c0_17, %c1_18, %c2_19, %c0_20] : memref<2x18x18x1xf32, #tpu.memory_space<vmem>>, vector<2x16x16x1xf32>
    %c0_21 = arith.constant 0 : index
    %c2_22 = arith.constant 2 : index
    %c0_23 = arith.constant 0 : index
    %c0_24 = arith.constant 0 : index
    %6 = vector.load %arg1[%c0_21, %c2_22, %c0_23, %c0_24] : memref<2x18x18x1xf32, #tpu.memory_space<vmem>>, vector<2x16x16x1xf32>
    %c0_25 = arith.constant 0 : index
    %c2_26 = arith.constant 2 : index
    %c1_27 = arith.constant 1 : index
    %c0_28 = arith.constant 0 : index
    %7 = vector.load %arg1[%c0_25, %c2_26, %c1_27, %c0_28] : memref<2x18x18x1xf32, #tpu.memory_space<vmem>>, vector<2x16x16x1xf32>
    %c0_29 = arith.constant 0 : index
    %c2_30 = arith.constant 2 : index
    %c2_31 = arith.constant 2 : index
    %c0_32 = arith.constant 0 : index
    %8 = vector.load %arg1[%c0_29, %c2_30, %c2_31, %c0_32] : memref<2x18x18x1xf32, #tpu.memory_space<vmem>>, vector<2x16x16x1xf32>
    %9 = tpu.concatenate %0, %1, %2, %3, %4, %5, %6, %7, %8 in 3 : vector<2x16x16x1xf32>, vector<2x16x16x1xf32>, vector<2x16x16x1xf32>, vector<2x16x16x1xf32>, vector<2x16x16x1xf32>, vector<2x16x16x1xf32>, vector<2x16x16x1xf32>, vector<2x16x16x1xf32>, vector<2x16x16x1xf32> -> vector<2x16x16x9xf32>
    %10 = vector.shape_cast %9 : vector<2x16x16x9xf32> to vector<512x9xf32>
    %c0_33 = arith.constant 0 : index
    %c0_34 = arith.constant 0 : index
    %11 = vector.load %arg2[%c0_33, %c0_34] : memref<9x8xf32, #tpu.memory_space<vmem>>, vector<9x8xf32>
    %cst = arith.constant dense<0.000000e+00> : vector<512x8xf32>
    %12 = tpu.matmul %10, %11, %cst {dimension_numbers = #tpu.dot_dimension_numbers<[1], [0], [0], [1], [0, 0, 1, 1], [], []>, precision = #tpu.contract_precision<fp32>} : vector<512x9xf32>, vector<9x8xf32>, vector<512x8xf32> -> vector<512x8xf32>
    %c0_35 = arith.constant 0 : index
    %c0_36 = arith.constant 0 : index
    %13 = vector.load %arg3[%c0_35, %c0_36] : memref<1x8xf32, #tpu.memory_space<vmem>>, vector<1x8xf32>
    %14 = vector.broadcast %13 : vector<1x8xf32> to vector<512x8xf32>
    %15 = arith.addf %12, %14 : vector<512x8xf32>
    %cst_37 = arith.constant 0.000000e+00 : f32
    %16 = vector.broadcast %cst_37 : f32 to vector<512x8xf32>
    %17 = arith.maximumf %15, %16 : vector<512x8xf32>
    %c0_38 = arith.constant 0 : index
    %c0_39 = arith.constant 0 : index
    %18 = vector.load %arg12[%c0_38, %c0_39] : memref<512x8xf32, #tpu.memory_space<vmem>>, vector<512x8xf32>
    tpu.vector_store %arg12[%c0_38, %c0_39], %17 {strides = array<i32>} : memref<512x8xf32, #tpu.memory_space<vmem>>, vector<512x8xf32>,
    %c0_40 = arith.constant 0 : index
    %c0_41 = arith.constant 0 : index
    %19 = tpu.strided_load %arg12[%c0_40, %c0_41] {strides = array<i32: 2, 1>} : memref<512x8xf32, #tpu.memory_space<vmem>>, vector<256x8xf32>
    %c1_42 = arith.constant 1 : index
    %c0_43 = arith.constant 0 : index
    %20 = tpu.strided_load %arg12[%c1_42, %c0_43] {strides = array<i32: 2, 1>} : memref<512x8xf32, #tpu.memory_space<vmem>>, vector<256x8xf32>
    %21 = arith.maximumf %19, %20 : vector<256x8xf32>
    %22 = vector.shape_cast %21 : vector<256x8xf32> to vector<16x16x8xf32>
    %23 = vector.extract_strided_slice %22 {offsets = [0, 0, 0], sizes = [16, 8, 8], strides = [1, 1, 1]} : vector<16x16x8xf32> to vector<16x8x8xf32>
    %24 = vector.extract_strided_slice %22 {offsets = [0, 8, 0], sizes = [16, 8, 8], strides = [1, 1, 1]} : vector<16x16x8xf32> to vector<16x8x8xf32>
    %25 = arith.maximumf %23, %24 : vector<16x8x8xf32>
    %cst_44 = arith.constant 0.000000e+00 : f32
    %26 = vector.broadcast %cst_44 : f32 to vector<2x10x10x8xf32>
    %c0_45 = arith.constant 0 : index
    %c0_46 = arith.constant 0 : index
    %c0_47 = arith.constant 0 : index
    %c0_48 = arith.constant 0 : index
    %27 = vector.load %arg13[%c0_45, %c0_46, %c0_47, %c0_48] : memref<2x10x10x8xf32, #tpu.memory_space<vmem>>, vector<2x10x10x8xf32>
    tpu.vector_store %arg13[%c0_45, %c0_46, %c0_47, %c0_48], %26 {strides = array<i32>} : memref<2x10x10x8xf32, #tpu.memory_space<vmem>>, vector<2x10x10x8xf32>,
    %28 = vector.shape_cast %25 : vector<16x8x8xf32> to vector<2x8x8x8xf32>
    %c0_49 = arith.constant 0 : index
    %c1_50 = arith.constant 1 : index
    %c1_51 = arith.constant 1 : index
    %c0_52 = arith.constant 0 : index
    %29 = vector.load %arg13[%c0_49, %c1_50, %c1_51, %c0_52] : memref<2x10x10x8xf32, #tpu.memory_space<vmem>>, vector<2x8x8x8xf32>
    tpu.vector_store %arg13[%c0_49, %c1_50, %c1_51, %c0_52], %28 {strides = array<i32>} : memref<2x10x10x8xf32, #tpu.memory_space<vmem>>, vector<2x8x8x8xf32>,
    %c0_53 = arith.constant 0 : index
    %c0_54 = arith.constant 0 : index
    %c0_55 = arith.constant 0 : index
    %c0_56 = arith.constant 0 : index
    %30 = vector.load %arg13[%c0_53, %c0_54, %c0_55, %c0_56] : memref<2x10x10x8xf32, #tpu.memory_space<vmem>>, vector<2x8x8x8xf32>
    %c0_57 = arith.constant 0 : index
    %c0_58 = arith.constant 0 : index
    %c1_59 = arith.constant 1 : index
    %c0_60 = arith.constant 0 : index
    %31 = vector.load %arg13[%c0_57, %c0_58, %c1_59, %c0_60] : memref<2x10x10x8xf32, #tpu.memory_space<vmem>>, vector<2x8x8x8xf32>
    %c0_61 = arith.constant 0 : index
    %c0_62 = arith.constant 0 : index
    %c2_63 = arith.constant 2 : index
    %c0_64 = arith.constant 0 : index
    %32 = vector.load %arg13[%c0_61, %c0_62, %c2_63, %c0_64] : memref<2x10x10x8xf32, #tpu.memory_space<vmem>>, vector<2x8x8x8xf32>
    %c0_65 = arith.constant 0 : index
    %c1_66 = arith.constant 1 : index
    %c0_67 = arith.constant 0 : index
    %c0_68 = arith.constant 0 : index
    %33 = vector.load %arg13[%c0_65, %c1_66, %c0_67, %c0_68] : memref<2x10x10x8xf32, #tpu.memory_space<vmem>>, vector<2x8x8x8xf32>
    %c0_69 = arith.constant 0 : index
    %c1_70 = arith.constant 1 : index
    %c1_71 = arith.constant 1 : index
    %c0_72 = arith.constant 0 : index
    %34 = vector.load %arg13[%c0_69, %c1_70, %c1_71, %c0_72] : memref<2x10x10x8xf32, #tpu.memory_space<vmem>>, vector<2x8x8x8xf32>
    %c0_73 = arith.constant 0 : index
    %c1_74 = arith.constant 1 : index
    %c2_75 = arith.constant 2 : index
    %c0_76 = arith.constant 0 : index
    %35 = vector.load %arg13[%c0_73, %c1_74, %c2_75, %c0_76] : memref<2x10x10x8xf32, #tpu.memory_space<vmem>>, vector<2x8x8x8xf32>
    %c0_77 = arith.constant 0 : index
    %c2_78 = arith.constant 2 : index
    %c0_79 = arith.constant 0 : index
    %c0_80 = arith.constant 0 : index
    %36 = vector.load %arg13[%c0_77, %c2_78, %c0_79, %c0_80] : memref<2x10x10x8xf32, #tpu.memory_space<vmem>>, vector<2x8x8x8xf32>
    %c0_81 = arith.constant 0 : index
    %c2_82 = arith.constant 2 : index
    %c1_83 = arith.constant 1 : index
    %c0_84 = arith.constant 0 : index
    %37 = vector.load %arg13[%c0_81, %c2_82, %c1_83, %c0_84] : memref<2x10x10x8xf32, #tpu.memory_space<vmem>>, vector<2x8x8x8xf32>
    %c0_85 = arith.constant 0 : index
    %c2_86 = arith.constant 2 : index
    %c2_87 = arith.constant 2 : index
    %c0_88 = arith.constant 0 : index
    %38 = vector.load %arg13[%c0_85, %c2_86, %c2_87, %c0_88] : memref<2x10x10x8xf32, #tpu.memory_space<vmem>>, vector<2x8x8x8xf32>
    %39 = tpu.concatenate %30, %31, %32, %33, %34, %35, %36, %37, %38 in 3 : vector<2x8x8x8xf32>, vector<2x8x8x8xf32>, vector<2x8x8x8xf32>, vector<2x8x8x8xf32>, vector<2x8x8x8xf32>, vector<2x8x8x8xf32>, vector<2x8x8x8xf32>, vector<2x8x8x8xf32>, vector<2x8x8x8xf32> -> vector<2x8x8x72xf32>
    %40 = vector.shape_cast %39 : vector<2x8x8x72xf32> to vector<128x72xf32>
    %c0_89 = arith.constant 0 : index
    %c0_90 = arith.constant 0 : index
    %41 = vector.load %arg4[%c0_89, %c0_90] : memref<72x16xf32, #tpu.memory_space<vmem>>, vector<72x16xf32>
    %cst_91 = arith.constant dense<0.000000e+00> : vector<128x16xf32>
    %42 = tpu.matmul %40, %41, %cst_91 {dimension_numbers = #tpu.dot_dimension_numbers<[1], [0], [0], [1], [0, 0, 1, 1], [], []>, precision = #tpu.contract_precision<fp32>} : vector<128x72xf32>, vector<72x16xf32>, vector<128x16xf32> -> vector<128x16xf32>
    %c0_92 = arith.constant 0 : index
    %c0_93 = arith.constant 0 : index
    %43 = vector.load %arg5[%c0_92, %c0_93] : memref<1x16xf32, #tpu.memory_space<vmem>>, vector<1x16xf32>
    %44 = vector.broadcast %43 : vector<1x16xf32> to vector<128x16xf32>
    %45 = arith.addf %42, %44 : vector<128x16xf32>
    %cst_94 = arith.constant 0.000000e+00 : f32
    %46 = vector.broadcast %cst_94 : f32 to vector<128x16xf32>
    %47 = arith.maximumf %45, %46 : vector<128x16xf32>
    %c0_95 = arith.constant 0 : index
    %c0_96 = arith.constant 0 : index
    %48 = vector.load %arg14[%c0_95, %c0_96] : memref<128x16xf32, #tpu.memory_space<vmem>>, vector<128x16xf32>
    tpu.vector_store %arg14[%c0_95, %c0_96], %47 {strides = array<i32>} : memref<128x16xf32, #tpu.memory_space<vmem>>, vector<128x16xf32>,
    %c0_97 = arith.constant 0 : index
    %c0_98 = arith.constant 0 : index
    %49 = tpu.strided_load %arg14[%c0_97, %c0_98] {strides = array<i32: 2, 1>} : memref<128x16xf32, #tpu.memory_space<vmem>>, vector<64x16xf32>
    %c1_99 = arith.constant 1 : index
    %c0_100 = arith.constant 0 : index
    %50 = tpu.strided_load %arg14[%c1_99, %c0_100] {strides = array<i32: 2, 1>} : memref<128x16xf32, #tpu.memory_space<vmem>>, vector<64x16xf32>
    %51 = arith.maximumf %49, %50 : vector<64x16xf32>
    %52 = vector.shape_cast %51 : vector<64x16xf32> to vector<8x8x16xf32>
    %53 = vector.extract_strided_slice %52 {offsets = [0, 0, 0], sizes = [8, 4, 16], strides = [1, 1, 1]} : vector<8x8x16xf32> to vector<8x4x16xf32>
    %54 = vector.extract_strided_slice %52 {offsets = [0, 4, 0], sizes = [8, 4, 16], strides = [1, 1, 1]} : vector<8x8x16xf32> to vector<8x4x16xf32>
    %55 = arith.maximumf %53, %54 : vector<8x4x16xf32>
    %56 = vector.shape_cast %55 : vector<8x4x16xf32> to vector<2x4x4x16xf32>
    %c0_101 = arith.constant 0 : index
    %c0_102 = arith.constant 0 : index
    %c0_103 = arith.constant 0 : index
    %c0_104 = arith.constant 0 : index
    %57 = vector.load %arg15[%c0_101, %c0_102, %c0_103, %c0_104] : memref<2x4x4x16xf32, #tpu.memory_space<vmem>>, vector<2x4x4x16xf32>
    tpu.vector_store %arg15[%c0_101, %c0_102, %c0_103, %c0_104], %56 {strides = array<i32>} : memref<2x4x4x16xf32, #tpu.memory_space<vmem>>, vector<2x4x4x16xf32>,
    %c0_105 = arith.constant 0 : index
    %c0_106 = arith.constant 0 : index
    %c0_107 = arith.constant 0 : index
    %c0_108 = arith.constant 0 : index
    %58 = vector.load %arg15[%c0_105, %c0_106, %c0_107, %c0_108] : memref<2x4x4x16xf32, #tpu.memory_space<vmem>>, vector<2x1x1x16xf32>
    %59 = vector.shape_cast %58 : vector<2x1x1x16xf32> to vector<2x16xf32>
    %c0_109 = arith.constant 0 : index
    %c0_110 = arith.constant 0 : index
    %c1_111 = arith.constant 1 : index
    %c0_112 = arith.constant 0 : index
    %60 = vector.load %arg15[%c0_109, %c0_110, %c1_111, %c0_112] : memref<2x4x4x16xf32, #tpu.memory_space<vmem>>, vector<2x1x1x16xf32>
    %61 = vector.shape_cast %60 : vector<2x1x1x16xf32> to vector<2x16xf32>
    %c0_113 = arith.constant 0 : index
    %c0_114 = arith.constant 0 : index
    %c2_115 = arith.constant 2 : index
    %c0_116 = arith.constant 0 : index
    %62 = vector.load %arg15[%c0_113, %c0_114, %c2_115, %c0_116] : memref<2x4x4x16xf32, #tpu.memory_space<vmem>>, vector<2x1x1x16xf32>
    %63 = vector.shape_cast %62 : vector<2x1x1x16xf32> to vector<2x16xf32>
    %c0_117 = arith.constant 0 : index
    %c0_118 = arith.constant 0 : index
    %c3 = arith.constant 3 : index
    %c0_119 = arith.constant 0 : index
    %64 = vector.load %arg15[%c0_117, %c0_118, %c3, %c0_119] : memref<2x4x4x16xf32, #tpu.memory_space<vmem>>, vector<2x1x1x16xf32>
    %65 = vector.shape_cast %64 : vector<2x1x1x16xf32> to vector<2x16xf32>
    %c0_120 = arith.constant 0 : index
    %c1_121 = arith.constant 1 : index
    %c0_122 = arith.constant 0 : index
    %c0_123 = arith.constant 0 : index
    %66 = vector.load %arg15[%c0_120, %c1_121, %c0_122, %c0_123] : memref<2x4x4x16xf32, #tpu.memory_space<vmem>>, vector<2x1x1x16xf32>
    %67 = vector.shape_cast %66 : vector<2x1x1x16xf32> to vector<2x16xf32>
    %c0_124 = arith.constant 0 : index
    %c1_125 = arith.constant 1 : index
    %c1_126 = arith.constant 1 : index
    %c0_127 = arith.constant 0 : index
    %68 = vector.load %arg15[%c0_124, %c1_125, %c1_126, %c0_127] : memref<2x4x4x16xf32, #tpu.memory_space<vmem>>, vector<2x1x1x16xf32>
    %69 = vector.shape_cast %68 : vector<2x1x1x16xf32> to vector<2x16xf32>
    %c0_128 = arith.constant 0 : index
    %c1_129 = arith.constant 1 : index
    %c2_130 = arith.constant 2 : index
    %c0_131 = arith.constant 0 : index
    %70 = vector.load %arg15[%c0_128, %c1_129, %c2_130, %c0_131] : memref<2x4x4x16xf32, #tpu.memory_space<vmem>>, vector<2x1x1x16xf32>
    %71 = vector.shape_cast %70 : vector<2x1x1x16xf32> to vector<2x16xf32>
    %c0_132 = arith.constant 0 : index
    %c1_133 = arith.constant 1 : index
    %c3_134 = arith.constant 3 : index
    %c0_135 = arith.constant 0 : index
    %72 = vector.load %arg15[%c0_132, %c1_133, %c3_134, %c0_135] : memref<2x4x4x16xf32, #tpu.memory_space<vmem>>, vector<2x1x1x16xf32>
    %73 = vector.shape_cast %72 : vector<2x1x1x16xf32> to vector<2x16xf32>
    %c0_136 = arith.constant 0 : index
    %c2_137 = arith.constant 2 : index
    %c0_138 = arith.constant 0 : index
    %c0_139 = arith.constant 0 : index
    %74 = vector.load %arg15[%c0_136, %c2_137, %c0_138, %c0_139] : memref<2x4x4x16xf32, #tpu.memory_space<vmem>>, vector<2x1x1x16xf32>
    %75 = vector.shape_cast %74 : vector<2x1x1x16xf32> to vector<2x16xf32>
    %c0_140 = arith.constant 0 : index
    %c2_141 = arith.constant 2 : index
    %c1_142 = arith.constant 1 : index
    %c0_143 = arith.constant 0 : index
    %76 = vector.load %arg15[%c0_140, %c2_141, %c1_142, %c0_143] : memref<2x4x4x16xf32, #tpu.memory_space<vmem>>, vector<2x1x1x16xf32>
    %77 = vector.shape_cast %76 : vector<2x1x1x16xf32> to vector<2x16xf32>
    %c0_144 = arith.constant 0 : index
    %c2_145 = arith.constant 2 : index
    %c2_146 = arith.constant 2 : index
    %c0_147 = arith.constant 0 : index
    %78 = vector.load %arg15[%c0_144, %c2_145, %c2_146, %c0_147] : memref<2x4x4x16xf32, #tpu.memory_space<vmem>>, vector<2x1x1x16xf32>
    %79 = vector.shape_cast %78 : vector<2x1x1x16xf32> to vector<2x16xf32>
    %c0_148 = arith.constant 0 : index
    %c2_149 = arith.constant 2 : index
    %c3_150 = arith.constant 3 : index
    %c0_151 = arith.constant 0 : index
    %80 = vector.load %arg15[%c0_148, %c2_149, %c3_150, %c0_151] : memref<2x4x4x16xf32, #tpu.memory_space<vmem>>, vector<2x1x1x16xf32>
    %81 = vector.shape_cast %80 : vector<2x1x1x16xf32> to vector<2x16xf32>
    %c0_152 = arith.constant 0 : index
    %c3_153 = arith.constant 3 : index
    %c0_154 = arith.constant 0 : index
    %c0_155 = arith.constant 0 : index
    %82 = vector.load %arg15[%c0_152, %c3_153, %c0_154, %c0_155] : memref<2x4x4x16xf32, #tpu.memory_space<vmem>>, vector<2x1x1x16xf32>
    %83 = vector.shape_cast %82 : vector<2x1x1x16xf32> to vector<2x16xf32>
    %c0_156 = arith.constant 0 : index
    %c3_157 = arith.constant 3 : index
    %c1_158 = arith.constant 1 : index
    %c0_159 = arith.constant 0 : index
    %84 = vector.load %arg15[%c0_156, %c3_157, %c1_158, %c0_159] : memref<2x4x4x16xf32, #tpu.memory_space<vmem>>, vector<2x1x1x16xf32>
    %85 = vector.shape_cast %84 : vector<2x1x1x16xf32> to vector<2x16xf32>
    %c0_160 = arith.constant 0 : index
    %c3_161 = arith.constant 3 : index
    %c2_162 = arith.constant 2 : index
    %c0_163 = arith.constant 0 : index
    %86 = vector.load %arg15[%c0_160, %c3_161, %c2_162, %c0_163] : memref<2x4x4x16xf32, #tpu.memory_space<vmem>>, vector<2x1x1x16xf32>
    %87 = vector.shape_cast %86 : vector<2x1x1x16xf32> to vector<2x16xf32>
    %c0_164 = arith.constant 0 : index
    %c3_165 = arith.constant 3 : index
    %c3_166 = arith.constant 3 : index
    %c0_167 = arith.constant 0 : index
    %88 = vector.load %arg15[%c0_164, %c3_165, %c3_166, %c0_167] : memref<2x4x4x16xf32, #tpu.memory_space<vmem>>, vector<2x1x1x16xf32>
    %89 = vector.shape_cast %88 : vector<2x1x1x16xf32> to vector<2x16xf32>
    %90 = tpu.concatenate %59, %61, %63, %65, %67, %69, %71, %73, %75, %77, %79, %81, %83, %85, %87, %89 in 1 : vector<2x16xf32>, vector<2x16xf32>, vector<2x16xf32>, vector<2x16xf32>, vector<2x16xf32>, vector<2x16xf32>, vector<2x16xf32>, vector<2x16xf32>, vector<2x16xf32>, vector<2x16xf32>, vector<2x16xf32>, vector<2x16xf32>, vector<2x16xf32>, vector<2x16xf32>, vector<2x16xf32>, vector<2x16xf32> -> vector<2x256xf32>
    %c0_168 = arith.constant 0 : index
    %c0_169 = arith.constant 0 : index
    %91 = vector.load %arg6[%c0_168, %c0_169] : memref<256x2xf32, #tpu.memory_space<vmem>>, vector<256x2xf32>
    %cst_170 = arith.constant dense<0.000000e+00> : vector<2x2xf32>
    %92 = tpu.matmul %90, %91, %cst_170 {dimension_numbers = #tpu.dot_dimension_numbers<[1], [0], [0], [1], [0, 0, 1, 1], [], []>, precision = #tpu.contract_precision<fp32>} : vector<2x256xf32>, vector<256x2xf32>, vector<2x2xf32> -> vector<2x2xf32>
    %c0_171 = arith.constant 0 : index
    %c0_172 = arith.constant 0 : index
    %93 = vector.load %arg7[%c0_171, %c0_172] : memref<1x2xf32, #tpu.memory_space<vmem>>, vector<1x2xf32>
    %94 = vector.broadcast %93 : vector<1x2xf32> to vector<2x2xf32>
    %95 = arith.addf %92, %94 : vector<2x2xf32>
    %c0_173 = arith.constant 0 : index
    %c0_174 = arith.constant 0 : index
    %96 = vector.load %arg10[%c0_173, %c0_174] : memref<2x2xf32, #tpu.memory_space<vmem>>, vector<2x2xf32>
    tpu.vector_store %arg10[%c0_173, %c0_174], %95 {strides = array<i32>} : memref<2x2xf32, #tpu.memory_space<vmem>>, vector<2x2xf32>,
    %c0_175 = arith.constant 0 : index
    %c0_176 = arith.constant 0 : index
    %97 = vector.load %arg8[%c0_175, %c0_176] : memref<2x10xf32, #tpu.memory_space<vmem>>, vector<2x10xf32>
    %cst_177 = arith.constant dense<0.000000e+00> : vector<2x10xf32>
    %98 = tpu.matmul %95, %97, %cst_177 {dimension_numbers = #tpu.dot_dimension_numbers<[1], [0], [0], [1], [0, 0, 1, 1], [], []>, precision = #tpu.contract_precision<fp32>} : vector<2x2xf32>, vector<2x10xf32>, vector<2x10xf32> -> vector<2x10xf32>
    %c0_178 = arith.constant 0 : index
    %c0_179 = arith.constant 0 : index
    %99 = vector.load %arg9[%c0_178, %c0_179] : memref<1x10xf32, #tpu.memory_space<vmem>>, vector<1x10xf32>
    %100 = vector.broadcast %99 : vector<1x10xf32> to vector<2x10xf32>
    %101 = arith.addf %98, %100 : vector<2x10xf32>
    %c0_180 = arith.constant 0 : index
    %c0_181 = arith.constant 0 : index
    %102 = vector.load %arg11[%c0_180, %c0_181] : memref<2x10xf32, #tpu.memory_space<vmem>>, vector<2x10xf32>
    tpu.vector_store %arg11[%c0_180, %c0_181], %101 {strides = array<i32>} : memref<2x10xf32, #tpu.memory_space<vmem>>, vector<2x10xf32>,
    return
  }
  func.func @transform_0(%arg0: i32) -> (i32, i32, i32, i32) {
    %c0_i32 = arith.constant 0 : i32
    %c0_i32_0 = arith.constant 0 : i32
    %c0_i32_1 = arith.constant 0 : i32
    %c0_i32_2 = arith.constant 0 : i32
    return %arg0, %c0_i32, %c0_i32_0, %c0_i32_1 : i32, i32, i32, i32
  }
  func.func @transform_1(%arg0: i32) -> (i32, i32) {
    %c0_i32 = arith.constant 0 : i32
    %c0_i32_0 = arith.constant 0 : i32
    %c0_i32_1 = arith.constant 0 : i32
    return %c0_i32, %c0_i32_0 : i32, i32
  }
  func.func @transform_2(%arg0: i32) -> (i32, i32) {
    %c0_i32 = arith.constant 0 : i32
    %c0_i32_0 = arith.constant 0 : i32
    %c0_i32_1 = arith.constant 0 : i32
    return %c0_i32, %c0_i32_0 : i32, i32
  }
  func.func @transform_3(%arg0: i32) -> (i32, i32) {
    %c0_i32 = arith.constant 0 : i32
    %c0_i32_0 = arith.constant 0 : i32
    %c0_i32_1 = arith.constant 0 : i32
    return %c0_i32, %c0_i32_0 : i32, i32
  }
  func.func @transform_4(%arg0: i32) -> (i32, i32) {
    %c0_i32 = arith.constant 0 : i32
    %c0_i32_0 = arith.constant 0 : i32
    %c0_i32_1 = arith.constant 0 : i32
    return %c0_i32, %c0_i32_0 : i32, i32
  }
  func.func @transform_5(%arg0: i32) -> (i32, i32) {
    %c0_i32 = arith.constant 0 : i32
    %c0_i32_0 = arith.constant 0 : i32
    %c0_i32_1 = arith.constant 0 : i32
    return %c0_i32, %c0_i32_0 : i32, i32
  }
  func.func @transform_6(%arg0: i32) -> (i32, i32) {
    %c0_i32 = arith.constant 0 : i32
    %c0_i32_0 = arith.constant 0 : i32
    %c0_i32_1 = arith.constant 0 : i32
    return %c0_i32, %c0_i32_0 : i32, i32
  }
  func.func @transform_7(%arg0: i32) -> (i32, i32) {
    %c0_i32 = arith.constant 0 : i32
    %c0_i32_0 = arith.constant 0 : i32
    %c0_i32_1 = arith.constant 0 : i32
    return %c0_i32, %c0_i32_0 : i32, i32
  }
  func.func @transform_8(%arg0: i32) -> (i32, i32) {
    %c0_i32 = arith.constant 0 : i32
    %c0_i32_0 = arith.constant 0 : i32
    %c0_i32_1 = arith.constant 0 : i32
    return %c0_i32, %c0_i32_0 : i32, i32
  }
  func.func @transform_9(%arg0: i32) -> (i32, i32) {
    %c0_i32 = arith.constant 0 : i32
    %c0_i32_0 = arith.constant 0 : i32
    return %arg0, %c0_i32 : i32, i32
  }
  func.func @transform_10(%arg0: i32) -> (i32, i32) {
    %c0_i32 = arith.constant 0 : i32
    %c0_i32_0 = arith.constant 0 : i32
    return %arg0, %c0_i32 : i32, i32
  }
}

</mosaic_0001>

<bundles_post_ra>
// kernel: _lambda_.1
= control target key start
LH: loop header
LB: loop body
LE: loop exit
PB: predicated region body
PF: predicated region fallthrough
CT: control target
= control target key end

     0   :  { %16 = vsyncpa [#allocation7], 0  ;;  %s12747_s17 = smov 2   ;;  %s12748_s18 = smov 1   ;;  %s19403_s0 = inlined_call_operand.vmem [shape: f32[2,18,18,1], index: 0, kind: input, shape index: {}]   ;;  %s19404_s1 = inlined_call_operand.vmem [shape: f32[9,8], index: 1, kind: input, shape index: {}]   ;;  %s19405_s2 = inlined_call_operand.vmem [shape: f32[1,8], index: 2, kind: input, shape index: {}]   ;;  %s19406_s3 = inlined_call_operand.vmem [shape: f32[72,16], index: 3, kind: input, shape index: {}]   ;;  %s19407_s4 = inlined_call_operand.vmem [shape: f32[1,16], index: 4, kind: input, shape index: {}]   ;;  %s19408_s5 = inlined_call_operand.vmem [shape: f32[256,2], index: 5, kind: input, shape index: {}]   ;;  %s19409_s6 = inlined_call_operand.vmem [shape: f32[1,2], index: 6, kind: input, shape index: {}]   ;;  %s19410_s7 = inlined_call_operand.vmem [shape: f32[2,10], index: 7, kind: input, shape index: {}]   ;;  %s19411_s8 = inlined_call_operand.vmem [shape: f32[1,10], index: 8, kind: input, shape index: {}]   ;;  %s19412_s9 = inlined_call_operand.hbm [shape: f32[2,2], index: 9, kind: output, shape index: {0}]   ;;  %s19413_s10 = inlined_call_operand.hbm [shape: f32[2,10], index: 10, kind: output, shape index: {1}]  }
   0x1   :  { %v164_v0 = vld [vmem:[%s19403_s0 + $0x2] sm:$0xff]  ;;  %v165_v2 = vld [vmem:[%s19403_s0 + $0xa] sm:$0xff]  ;;  %v12848_v5 = vld [vmem:[%s19403_s0 + $0x18] sm:$0xff]  ;;  %s12749_s27 = smov 3  }
   0x2   :  { %v100_v1 = vld [vmem:[%s19403_s0 + $0x1] sm:$0xff]  ;;  %934 = vrot.lane.b32.xlu1 %v164_v0, %s12747_s17  ;;  %v101_v3 = vld [vmem:[%s19403_s0 + $0x9] sm:$0xff]  ;;  %v102_v6 = vld [vmem:[%s19403_s0 + $0x19] sm:$0xff] }
   0x3   :  { %678 = vrot.lane.b32.xlu0 %v100_v1, %s12748_s18  ;;  %v12843_v4 = vld [vmem:[%s19403_s0 + $0x20] sm:$0xff] }
   0x6   :  { %936 = vrot.lane.b32.xlu1 %v165_v2, %s12747_s17 }
   0x7   :  { %680 = vrot.lane.b32.xlu0 %v101_v3, %s12748_s18 }
   0xa   :  { %1192 = vrot.lane.b32.xlu1 %v12843_v4, %s12749_s27 }
   0xb   :  { %1190 = vrot.lane.b32.xlu0 %v12848_v5, %s12749_s27 }
   0xc   :  { %17 = vsyncpa [#allocation9], 0  ;;  %s12750_s30 = smov 4   ;;  %v10764_v7 = vld [vmem:[%s19403_s0 + $0x1a] sm:$0xff]  ;;  %s12751_s15 = smov 5   ;;  %v12872_v9 = vld [vmem:[%s19403_s0 + $0x30] sm:$0xff] }
   0xd   :  { %v10701_v8 = vld [vmem:[%s19403_s0 + $0x21] sm:$0xff]  ;;  %vm3384_vm0 = vcmask 1040384   ;;  %s12752_s24 = smov 6   ;;  %v10892_v17 = vld [vmem:[%s19403_s0 + $0x31] sm:$0xff]  ;;  %v10893_v27 = vld [vmem:[%s19403_s0 + $0x39] sm:$0xff]  ;;  %s12754_s20 = smov 8  }
   0xe   :  { %682 = vrot.lane.b32.xlu1 %v102_v6, %s12748_s18  ;;  %v10765_v10 = vld [vmem:[%s19403_s0 + $0x22] sm:$0xff]  ;;  %v12903_v18 = vld [vmem:[%s19403_s0 + $0x38] sm:$0xff]  ;;  %v12963_v31 = vld [vmem:[%s19403_s0 + $0x50] sm:$0xff]  ;;  %vm2662_vm1 = vcmask 7168   ;;  %vm2727_vm2 = vcmask 15360   ;;  %vm2792_vm3 = vcmask 23552  }
   0xf   :  { %1446 = vrot.lane.b32.xlu0 %v102_v6, %s12750_s30  ;;  %v3183_v11 = vld [vmem:[%s19404_s1 + $0x8] sm:$0x1]  ;;  %v3182_v14 = vld [vmem:[%s19404_s1] sm:$0xff]  ;;  %s12753_s1 = smov 7   ;;  %v10956_v26 = vld [vmem:[%s19403_s0 + $0x32] sm:$0xff]  ;;  %vm2857_vm4 = vcmask 31744  }
  0x10   :  { %v3386_v12 = vsel %vm3384_vm0, %v3183_v11, 0  ;;  %v12891_v16 = vand.u32 4294901760, %v3182_v14  ;;  %v10957_v28 = vld [vmem:[%s19403_s0 + $0x3a] sm:$0xff]  ;;  %v12949_v29 = vld [vmem:[%s19403_s0 + $0x48] sm:$0xff]  ;;  %v10895_v33 = vld [vmem:[%s19403_s0 + $0x51] sm:$0xff]  ;;  %vm2922_vm5 = vcmask 39936  }
  0x11   :  { %v12883_v13 = vand.u32 4294901760, %v3386_v12  ;;  %v10894_v30 = vld [vmem:[%s19403_s0 + $0x49] sm:$0xff]  ;;  %v10959_v34 = vld [vmem:[%s19403_s0 + $0x52] sm:$0xff]  ;;  %v12991_v35 = vld [vmem:[%s19403_s0 + $0x60] sm:$0xff]  ;;  %vm2987_vm6 = vcmask 48128   ;;  %vm3052_vm7 = vcmask 56320  }
  0x12   :  { %1702 = vrot.lane.b32.xlu1 %v10764_v7, %s12751_s15  ;;  %v12909_v20 = vsub.f32 %v3182_v14, %v12891_v16  ;;  %v10958_v32 = vld [vmem:[%s19403_s0 + $0x4a] sm:$0xff]  ;;  %v10896_v36 = vld [vmem:[%s19403_s0 + $0x61] sm:$0xff]  ;;  %v13033_v43 = vld [vmem:[%s19403_s0 + $0x78] sm:$0xff]  ;;  %vm3117_vm8 = vcmask 64512   ;;  %vm3191_vm9 = vcmask 72704   ;;  %vm6860_vm10 = vcmask 58368  }
  0x13   :  { %1448 = vrot.lane.b32.xlu0 %v10701_v8, %s12750_s30  ;;  %v12889_v15 = vsub.f32 %v3386_v12, %v12883_v13  ;;  %11792 = vmatprep.subr.mxu0 %v12883_v13  ;;  %v13005_v37 = vld [vmem:[%s19403_s0 + $0x68] sm:$0xff]  ;;  %v10898_v48 = vld [vmem:[%s19403_s0 + $0x79] sm:$0xff]  ;;  %v13094_v6 = vld [vmem:[%s19403_s0 + $0x90] sm:$0xff]  ;;  %s12756_s19 = smov 16   ;;  %s12757_s21 = smov 24   ;;  %vm7590_vm11 = vcmask 130048  }
  0x14   :  { %11793 = vmatpush3.msra.mxu0 %v12883_v13  ;;  %v12916_v22 = vand.u32 4294901760, %v12909_v20  ;;  %v10960_v38 = vld [vmem:[%s19403_s0 + $0x62] sm:$0xff]  ;;  %v10961_v40 = vld [vmem:[%s19403_s0 + $0x6a] sm:$0xff]  ;;  %v10962_v54 = vld [vmem:[%s19403_s0 + $0x7a] sm:$0xff]  ;;  %s12758_s22 = smov 32   ;;  %s12759_s26 = smov 40  }
  0x15   :  { %v12906_v19 = vand.u32 4294901760, %v12889_v15  ;;  %11794 = vmatprep.subr.mxu0 %v12891_v16  ;;  %v10897_v39 = vld [vmem:[%s19403_s0 + $0x69] sm:$0xff]  ;;  %v13051_v49 = vld [vmem:[%s19403_s0 + $0x80] sm:$0xff]  ;;  %s12762_s28 = smov 64   ;;  %vm7607_vm12 = vcmask 195584   ;;  %vm7624_vm13 = vcmask 261120  }
  0x16   :  { %938 = vrot.lane.b32.xlu1 %v10764_v7, %s12747_s17  ;;  %11795 = vmatpush3.msra.mxu0 %v12891_v16  ;;  %v4134_v24 = vsub.f32 %v12909_v20, %v12916_v22  ;;  %v10899_v55 = vld [vmem:[%s19403_s0 + $0x81] sm:$0xff]  ;;  %vm7641_vm14 = vcmask 326656   ;;  %vm7658_vm15 = vcmask 392192   ;;  %vm7675_vm0 = vcmask 457728   ;;  %s12765_s11 = smov 112  }
  0x17   :  { %684 = vrot.lane.b32.xlu0 %v10701_v8, %s12748_s18  ;;  %v4127_v21 = vsub.f32 %v12889_v15, %v12906_v19  ;;  %11992 = vmatprep.subr.mxu0 %v12889_v15  ;;  %v10963_v60 = vld [vmem:[%s19403_s0 + $0x82] sm:$0xff] }
  0x18   :  { %v4135_v25 = vand.u32 4294901760, %v4134_v24  ;;  %v36_v63 = vld [vmem:[%s19403_s0] sm:$0xff]  ;;  %v37_v11 = vld [vmem:[%s19403_s0 + $0x8] sm:$0xff] }
  0x19   :  { %v4128_v23 = vand.u32 4294901760, %v4127_v21 }
  0x1a   :  { %1958 = vrot.lane.b32.xlu1 %v12872_v9, %s12752_s24 }
  0x1b   :  { %1704 = vrot.lane.b32.xlu0 %v10765_v10, %s12751_s15  ;;  %11892 = vmatprep.subr.mxu1 %v4128_v23 }
  0x1c   :  { %11893 = vmatpush3.msra.mxu1 %v4128_v23 }
  0x1d   :  { %11894 = vmatprep.subr.mxu1 %v4135_v25 }
  0x1e   :  { %1194 = vrot.lane.b32.xlu1 %v12872_v9, %s12749_s27  ;;  %11895 = vmatpush3.msra.mxu1 %v4135_v25 }
  0x1f   :  { %940 = vrot.lane.b32.xlu0 %v10765_v10, %s12747_s17  ;;  %12092 = vmatprep.subr.mxu1 %v12883_v13 }
  0x22   :  { %2214 = vrot.lane.b32.xlu1 %v10892_v17, %s12753_s1 }
  0x23   :  { %1960 = vrot.lane.b32.xlu0 %v12903_v18, %s12752_s24 }
  0x26   :  { %1450 = vrot.lane.b32.xlu1 %v10892_v17, %s12750_s30 }
  0x27   :  { %1196 = vrot.lane.b32.xlu0 %v12903_v18, %s12749_s27 }
  0x2a   :  { %2470 = vrot.lane.b32.xlu1 %v10956_v26, %s12754_s20 }
  0x2b   :  { %2216 = vrot.lane.b32.xlu0 %v10893_v27, %s12753_s1 }
  0x2e   :  { %1452 = vrot.lane.b32.xlu1 %v10893_v27, %s12750_s30 }
  0x2f   :  { %686 = vrot.lane.b32.xlu0 %v10892_v17, %s12748_s18 }
  0x32   :  { %2472 = vrot.lane.b32.xlu1 %v10957_v28, %s12754_s20 }
  0x33   :  { %1706 = vrot.lane.b32.xlu0 %v10956_v26, %s12751_s15 }
  0x36   :  { %942 = vrot.lane.b32.xlu1 %v10956_v26, %s12747_s17 }
  0x37   :  { %688 = vrot.lane.b32.xlu0 %v10893_v27, %s12748_s18 }
  0x3a   :  { %1962 = vrot.lane.b32.xlu1 %v12949_v29, %s12752_s24 }
  0x3b   :  { %1708 = vrot.lane.b32.xlu0 %v10957_v28, %s12751_s15 }
  0x3e   :  { %1198 = vrot.lane.b32.xlu1 %v12949_v29, %s12749_s27 }
  0x3f   :  { %944 = vrot.lane.b32.xlu0 %v10957_v28, %s12747_s17 }
  0x42   :  { %2218 = vrot.lane.b32.xlu1 %v10894_v30, %s12753_s1 }
  0x43   :  { %1964 = vrot.lane.b32.xlu0 %v12963_v31, %s12752_s24 }
  0x46   :  { %1454 = vrot.lane.b32.xlu1 %v10894_v30, %s12750_s30 }
  0x47   :  { %1200 = vrot.lane.b32.xlu0 %v12963_v31, %s12749_s27 }
  0x4a   :  { %2474 = vrot.lane.b32.xlu1 %v10958_v32, %s12754_s20 }
  0x4b   :  { %2220 = vrot.lane.b32.xlu0 %v10895_v33, %s12753_s1 }
  0x4e   :  { %1456 = vrot.lane.b32.xlu1 %v10895_v33, %s12750_s30 }
  0x4f   :  { %690 = vrot.lane.b32.xlu0 %v10894_v30, %s12748_s18 }
  0x52   :  { %2476 = vrot.lane.b32.xlu1 %v10959_v34, %s12754_s20 }
  0x53   :  { %1710 = vrot.lane.b32.xlu0 %v10958_v32, %s12751_s15 }
  0x56   :  { %946 = vrot.lane.b32.xlu1 %v10958_v32, %s12747_s17  ;;  %v10900_v32 = vld [vmem:[%s19403_s0 + $0x91] sm:$0xff] }
  0x57   :  { %692 = vrot.lane.b32.xlu0 %v10895_v33, %s12748_s18  ;;  %v13127_v33 = vld [vmem:[%s19403_s0 + $0x98] sm:$0xff] }
  0x5a   :  { %1966 = vrot.lane.b32.xlu1 %v12991_v35, %s12752_s24 }
  0x5b   :  { %1712 = vrot.lane.b32.xlu0 %v10959_v34, %s12751_s15 }
  0x5e   :  { %1202 = vrot.lane.b32.xlu1 %v12991_v35, %s12749_s27 }
  0x5f   :  { %948 = vrot.lane.b32.xlu0 %v10959_v34, %s12747_s17 }
  0x62   :  { %2222 = vrot.lane.b32.xlu1 %v10896_v36, %s12753_s1 }
  0x63   :  { %1968 = vrot.lane.b32.xlu0 %v13005_v37, %s12752_s24 }
  0x66   :  { %1458 = vrot.lane.b32.xlu1 %v10896_v36, %s12750_s30 }
  0x67   :  { %1204 = vrot.lane.b32.xlu0 %v13005_v37, %s12749_s27 }
  0x6a   :  { %2478 = vrot.lane.b32.xlu1 %v10960_v38, %s12754_s20 }
  0x6b   :  { %2224 = vrot.lane.b32.xlu0 %v10897_v39, %s12753_s1 }
  0x6e   :  { %1460 = vrot.lane.b32.xlu1 %v10897_v39, %s12750_s30 }
  0x6f   :  { %694 = vrot.lane.b32.xlu0 %v10896_v36, %s12748_s18 }
  0x72   :  { %2480 = vrot.lane.b32.xlu1 %v10961_v40, %s12754_s20 }
  0x73   :  { %1714 = vrot.lane.b32.xlu0 %v10960_v38, %s12751_s15 }
  0x74   :  { %v935_v41 = vpop.permute.xlu1 %934 }
  0x75   :  { %v679_v42 = vpop.permute.xlu0 %678 }
  0x76   :  { %950 = vrot.lane.b32.xlu1 %v10960_v38, %s12747_s17  ;;  %v2663_v0 = vsel %vm2662_vm1, %v36_v63, %v679_v42 }
  0x77   :  { %696 = vrot.lane.b32.xlu0 %v10897_v39, %s12748_s18  ;;  %v2728_v3 = vsel %vm2727_vm2, %v2663_v0, %v935_v41 }
  0x78   :  { %v13035_v44 = vpop.permute.xlu1 %936 }
  0x79   :  { %v681_v45 = vpop.permute.xlu0 %680 }
  0x7a   :  { %1970 = vrot.lane.b32.xlu1 %v13033_v43, %s12752_s24  ;;  %v2664_v21 = vsel %vm2662_vm1, %v37_v11, %v681_v45  ;;  %v10965_v11 = vld [vmem:[%s19403_s0 + $0x9a] sm:$0xff] }
  0x7b   :  { %1716 = vrot.lane.b32.xlu0 %v10961_v40, %s12751_s15  ;;  %v2729_v28 = vsel %vm2727_vm2, %v2664_v21, %v13035_v44 }
  0x7c   :  { %v13040_v46 = vpop.permute.xlu1 %1192 }
  0x7d   :  { %v1191_v47 = vpop.permute.xlu0 %1190  ;;  %v2794_v34 = vsel %vm2792_vm3, %v2729_v28, %v13040_v46 }
  0x7e   :  { %1206 = vrot.lane.b32.xlu1 %v13033_v43, %s12749_s27  ;;  %v2793_v7 = vsel %vm2792_vm3, %v2728_v3, %v1191_v47 }
  0x7f   :  { %952 = vrot.lane.b32.xlu0 %v10961_v40, %s12747_s17 }
  0x80   :  { %v13053_v50 = vpop.permute.xlu1 %682 }
  0x81   :  { %v1447_v51 = vpop.permute.xlu0 %1446 }
  0x82   :  { %2226 = vrot.lane.b32.xlu1 %v10898_v48, %s12753_s1  ;;  %v2858_v12 = vsel %vm2857_vm4, %v2793_v7, %v1447_v51 }
  0x83   :  { %1972 = vrot.lane.b32.xlu0 %v13051_v49, %s12752_s24 }
  0x84   :  { %v1703_v52 = vpop.permute.xlu1 %1702 }
  0x85   :  { %v1449_v53 = vpop.permute.xlu0 %1448  ;;  %v2923_v14 = vsel %vm2922_vm5, %v2858_v12, %v1703_v52 }
  0x86   :  { %1462 = vrot.lane.b32.xlu1 %v10898_v48, %s12750_s30  ;;  %v2859_v39 = vsel %vm2857_vm4, %v2794_v34, %v1449_v53 }
  0x87   :  { %1208 = vrot.lane.b32.xlu0 %v13051_v49, %s12749_s27 }
  0x88   :  { %v13067_v56 = vpop.permute.xlu1 %938 }
  0x89   :  { %v13069_v57 = vpop.permute.xlu0 %684 }
  0x8a   :  { %2482 = vrot.lane.b32.xlu1 %v10962_v54, %s12754_s20  ;;  %v2666_v34 = vsel %vm2662_vm1, %v12843_v4, %v13069_v57  ;;  %v13240_v4 = vld [vmem:[%s19403_s0 + $0xb0] sm:$0xff] }
  0x8b   :  { %2228 = vrot.lane.b32.xlu0 %v10899_v55, %s12753_s1 }
  0x8c   :  { %v1959_v58 = vpop.permute.xlu1 %1958 }
  0x8d   :  { %v1705_v59 = vpop.permute.xlu0 %1704  ;;  %v2988_v17 = vsel %vm2987_vm6, %v2923_v14, %v1959_v58  ;;  %v10901_v58 = vld [vmem:[%s19403_s0 + $0x99] sm:$0xff] }
  0x8e   :  { %1464 = vrot.lane.b32.xlu1 %v10899_v55, %s12750_s30  ;;  %v2924_v41 = vsel %vm2922_vm5, %v2859_v39, %v1705_v59 }
  0x8f   :  { %698 = vrot.lane.b32.xlu0 %v10898_v48, %s12748_s18 }
  0x90   :  { %v13078_v61 = vpop.permute.xlu1 %1194 }
  0x91   :  { %v13080_v62 = vpop.permute.xlu0 %940 }
  0x92   :  { %2484 = vrot.lane.b32.xlu1 %v10963_v60, %s12754_s20  ;;  %v2731_v39 = vsel %vm2727_vm2, %v2666_v34, %v13080_v62 }
  0x93   :  { %1718 = vrot.lane.b32.xlu0 %v10962_v54, %s12751_s15 }
  0x94   :  { %v2215_v1 = vpop.permute.xlu1 %2214 }
  0x95   :  { %v1961_v2 = vpop.permute.xlu0 %1960  ;;  %v3053_v23 = vsel %vm3052_vm7, %v2988_v17, %v2215_v1 }
  0x96   :  { %954 = vrot.lane.b32.xlu1 %v10962_v54, %s12747_s17  ;;  %v2989_v42 = vsel %vm2987_vm6, %v2924_v41, %v1961_v2 }
  0x97   :  { %700 = vrot.lane.b32.xlu0 %v10899_v55, %s12748_s18  ;;  %v10964_v55 = vld [vmem:[%s19403_s0 + $0x92] sm:$0xff] }
  0x98   :  { %v13097_v8 = vpop.permute.xlu1 %1450 }
  0x99   :  { %v13099_v10 = vpop.permute.xlu0 %1196 }
  0x9a   :  { %1974 = vrot.lane.b32.xlu1 %v13094_v6, %s12752_s24  ;;  %v2796_v57 = vsel %vm2792_vm3, %v2731_v39, %v13099_v10 }
  0x9b   :  { %1720 = vrot.lane.b32.xlu0 %v10963_v60, %s12751_s15 }
  0x9c   :  { %v2471_v24 = vpop.permute.xlu1 %2470 }
  0x9d   :  { %v2217_v25 = vpop.permute.xlu0 %2216  ;;  %v3118_v26 = vsel %vm3117_vm8, %v3053_v23, %v2471_v24  ;;  %v2665_v23 = vsel %vm2662_vm1, %v12848_v5, %v13053_v50 }
  0x9e   :  { %v3193_v27 = vsel %vm3191_vm9, %v3118_v26, 0  ;;  %1210 = vrot.lane.b32.xlu1 %v13094_v6, %s12749_s27  ;;  %v3054_v45 = vsel %vm3052_vm7, %v2989_v42, %v2217_v25  ;;  %v2730_v24 = vsel %vm2727_vm2, %v2665_v23, %v13067_v56  ;;  %v10902_v42 = vld [vmem:[%s19403_s0 + $0xa9] sm:$0xff] }
  0x9f   :  { %956 = vrot.lane.b32.xlu0 %v10963_v60, %s12747_s17  ;;  %v13119_v30 = vand.u32 4294901760, %v3193_v27 }
  0xa0   :  { %v13131_v36 = vpop.permute.xlu1 %1452 }
  0xa1   :  { %19766 = vst [vmem:[#allocation12_spill] sm:$0xff] %v13119_v30  ;;  %v13133_v38 = vpop.permute.xlu0 %686  ;;  %v13137_v40 = vsub.f32 %v3193_v27, %v13119_v30  ;;  %11896 = vmatprep.mubr.f32.mxu1 %v13119_v30  ;;  %v2861_v62 = vsel %vm2857_vm4, %v2796_v57, %v13131_v36 }
  0xa2   :  { %2230 = vrot.lane.b32.xlu1 %v10900_v32, %s12753_s1 }
  0xa3   :  { %1976 = vrot.lane.b32.xlu0 %v13127_v33, %s12752_s24  ;;  %v19424_v44 = vand.u32 4294901760, %v13137_v40 }
  0xa4   :  { %v2473_v46 = vpop.permute.xlu1 %2472 }
  0xa5   :  { %v1707_v47 = vpop.permute.xlu0 %1706  ;;  %v3119_v48 = vsel %vm3117_vm8, %v3054_v45, %v2473_v46  ;;  %v3458_v51 = vsub.f32 %v13137_v40, %v19424_v44 }
  0xa6   :  { %v3196_v52 = vsel %vm3191_vm9, %v3119_v48, 0  ;;  %1466 = vrot.lane.b32.xlu1 %v10900_v32, %s12750_s30 }
  0xa7   :  { %1212 = vrot.lane.b32.xlu0 %v13127_v33, %s12749_s27  ;;  %v13155_v53 = vand.u32 4294901760, %v3196_v52  ;;  %v3459_v54 = vand.u32 4294901760, %v3458_v51 }
  0xa8   :  { %v13163_v59 = vpop.permute.xlu1 %942 }
  0xa9   :  { %19767 = vst [vmem:[#allocation13_spill] sm:$0xff] %v13155_v53  ;;  %v13165_v60 = vpop.permute.xlu0 %688  ;;  %v13168_v63 = vsub.f32 %v3196_v52, %v13155_v53  ;;  %11796 = vmatprep.mubr.f32.mxu0 %v3459_v54  ;;  %11897 = vmatmul.mubr.f32.vlgmr.msra.gmra.mxu1 %v13155_v53 }
  0xaa   :  { %2486 = vrot.lane.b32.xlu1 %v10964_v55, %s12754_s20  ;;  %12093 = vmatpush3.msra.mxu1 %v12883_v13 }
  0xab   :  { %2232 = vrot.lane.b32.xlu0 %v10901_v58, %s12753_s1  ;;  %v19422_v0 = vand.u32 4294901760, %v13168_v63  ;;  %12094 = vmatprep.subr.mxu1 %v12891_v16 }
  0xac   :  { %v1963_v1 = vpop.permute.xlu1 %1962  ;;  %12095 = vmatpush3.msra.mxu1 %v12891_v16 }
  0xad   :  { %v1709_v2 = vpop.permute.xlu0 %1708  ;;  %v3468_v3 = vsub.f32 %v13168_v63, %v19422_v0  ;;  %12292 = vmatprep.subr.mxu1 %v12883_v13 }
  0xae   :  { %1468 = vrot.lane.b32.xlu1 %v10901_v58, %s12750_s30  ;;  %v2926_v48 = vsel %vm2922_vm5, %v2861_v62, %v1709_v2 }
  0xaf   :  { %702 = vrot.lane.b32.xlu0 %v10900_v32, %s12748_s18  ;;  %v3469_v7 = vand.u32 4294901760, %v3468_v3 }
  0xb0   :  { %v13186_v12 = vpop.permute.xlu1 %1198 }
  0xb1   :  { %v13188_v14 = vpop.permute.xlu0 %944  ;;  %11797 = vmatmul.mubr.f32.vlgmr.msra.gmra.mxu0 %v3469_v7  ;;  %v10966_v7 = vld [vmem:[%s19403_s0 + $0xaa] sm:$0xff] }
  0xb2   :  { %2488 = vrot.lane.b32.xlu1 %v10965_v11, %s12754_s20  ;;  %11993 = vmatpush3.msra.mxu0 %v12889_v15  ;;  %v13205_v15 = vld [vmem:[%s19403_s0 + $0xa8] sm:$0xff] }
  0xb3   :  { %1722 = vrot.lane.b32.xlu0 %v10964_v55, %s12751_s15  ;;  %11994 = vmatprep.subr.mxu0 %v12909_v20 }
  0xb4   :  { %v2219_v17 = vpop.permute.xlu1 %2218  ;;  %11995 = vmatpush3.msra.mxu0 %v12909_v20  ;;  %v2795_v20 = vsel %vm2792_vm3, %v2730_v24, %v13078_v61 }
  0xb5   :  { %v1965_v21 = vpop.permute.xlu0 %1964  ;;  %12192 = vmatprep.subr.mxu0 %v12906_v19  ;;  %v2860_v50 = vsel %vm2857_vm4, %v2795_v20, %v13097_v8 }
  0xb6   :  { %958 = vrot.lane.b32.xlu1 %v10964_v55, %s12747_s17  ;;  %v2925_v26 = vsel %vm2922_vm5, %v2860_v50, %v1707_v47  ;;  %v2991_v10 = vsel %vm2987_vm6, %v2926_v48, %v1965_v21 }
  0xb7   :  { %704 = vrot.lane.b32.xlu0 %v10901_v58, %s12748_s18  ;;  %v2990_v56 = vsel %vm2987_vm6, %v2925_v26, %v1963_v1 }
  0xb8   :  { %v13210_v25 = vpop.permute.xlu1 %1454  ;;  %v3055_v27 = vsel %vm3052_vm7, %v2990_v56, %v2219_v17 }
  0xb9   :  { %v13212_v5 = vpop.permute.xlu0 %1200 }
  0xba   :  { %1978 = vrot.lane.b32.xlu1 %v13205_v15, %s12752_s24 }
  0xbb   :  { %1724 = vrot.lane.b32.xlu0 %v10965_v11, %s12751_s15 }
  0xbc   :  { %v2475_v28 = vpop.permute.xlu1 %2474 }
  0xbd   :  { %v2221_v61 = vpop.permute.xlu0 %2220  ;;  %v3120_v32 = vsel %vm3117_vm8, %v3055_v27, %v2475_v28  ;;  %v10967_v27 = vld [vmem:[%s19403_s0 + $0xb2] sm:$0xff] }
  0xbe   :  { %v3199_v8 = vsel %vm3191_vm9, %v3120_v32, 0  ;;  %1214 = vrot.lane.b32.xlu1 %v13205_v15, %s12749_s27  ;;  %v3056_v52 = vsel %vm3052_vm7, %v2991_v10, %v2221_v61 }
  0xbf   :  { %960 = vrot.lane.b32.xlu0 %v10965_v11, %s12747_s17  ;;  %v13232_v41 = vand.u32 4294901760, %v3199_v8  ;;  %v10903_v11 = vld [vmem:[%s19403_s0 + $0xb1] sm:$0xff] }
  0xc0   :  { %v13244_v45 = vpop.permute.xlu1 %1456 }
  0xc1   :  { %19768 = vst [vmem:[#allocation14_spill] sm:$0xff] %v13232_v41  ;;  %v13246_v46 = vpop.permute.xlu0 %690  ;;  %v13251_v47 = vsub.f32 %v3199_v8, %v13232_v41  ;;  %11899 = vmatprep.mubr.f32.mxu1 %v13232_v41  ;;  %v2667_v8 = vsel %vm2662_vm1, %v12872_v9, %v13133_v38 }
  0xc2   :  { %2234 = vrot.lane.b32.xlu1 %v10902_v42, %s12753_s1  ;;  %v2732_v39 = vsel %vm2727_vm2, %v2667_v8, %v13163_v59 }
  0xc3   :  { %1980 = vrot.lane.b32.xlu0 %v13240_v4, %s12752_s24  ;;  %v19421_v51 = vand.u32 4294901760, %v13251_v47  ;;  %v2797_v57 = vsel %vm2792_vm3, %v2732_v39, %v13186_v12 }
  0xc4   :  { %v2477_v54 = vpop.permute.xlu1 %2476  ;;  %v2862_v9 = vsel %vm2857_vm4, %v2797_v57, %v13210_v25  ;;  %v10968_v57 = vld [vmem:[%s19403_s0 + $0xc2] sm:$0xff] }
  0xc5   :  { %v1711_v36 = vpop.permute.xlu0 %1710  ;;  %v3121_v55 = vsel %vm3117_vm8, %v3056_v52, %v2477_v54  ;;  %v3478_v58 = vsub.f32 %v13251_v47, %v19421_v51 }
  0xc6   :  { %v3202_v1 = vsel %vm3191_vm9, %v3121_v55, 0  ;;  %1470 = vrot.lane.b32.xlu1 %v10902_v42, %s12750_s30  ;;  %v2927_v38 = vsel %vm2922_vm5, %v2862_v9, %v1711_v36  ;;  %v2668_v55 = vsel %vm2662_vm1, %v12903_v18, %v13165_v60  ;;  %v13346_v18 = vld [vmem:[%s19403_s0 + $0xc8] sm:$0xff] }
  0xc7   :  { %1216 = vrot.lane.b32.xlu0 %v13240_v4, %s12749_s27  ;;  %v13269_v2 = vand.u32 4294901760, %v3202_v1  ;;  %v3479_v3 = vand.u32 4294901760, %v3478_v58  ;;  %v2733_v36 = vsel %vm2727_vm2, %v2668_v55, %v13188_v14  ;;  %v10905_v9 = vld [vmem:[%s19403_s0 + $0xc9] sm:$0xff] }
  0xc8   :  { %v13277_v17 = vpop.permute.xlu1 %946  ;;  %v2798_v60 = vsel %vm2792_vm3, %v2733_v36, %v13212_v5  ;;  %v10969_v36 = vld [vmem:[%s19403_s0 + $0xca] sm:$0xff] }
  0xc9   :  { %19769 = vst [vmem:[#allocation15_spill] sm:$0xff] %v13269_v2  ;;  %v13279_v21 = vpop.permute.xlu0 %692  ;;  %v13282_v23 = vsub.f32 %v3202_v1, %v13269_v2  ;;  %11799 = vmatprep.mubr.f32.mxu0 %v3479_v3  ;;  %11900 = vmatmul.mubr.f32.gmra.mxu1 %v13269_v2  ;;  %v10904_v1 = vld [vmem:[%s19403_s0 + $0xc1] sm:$0xff]  ;;  %v2863_v14 = vsel %vm2857_vm4, %v2798_v60, %v13244_v45 }
  0xca   :  { %2490 = vrot.lane.b32.xlu1 %v10966_v7, %s12754_s20 }
  0xcb   :  { %2236 = vrot.lane.b32.xlu0 %v10903_v11, %s12753_s1  ;;  %v19420_v24 = vand.u32 4294901760, %v13282_v23 }
  0xcc   :  { %v1967_v20 = vpop.permute.xlu1 %1966 }
  0xcd   :  { %v1713_v50 = vpop.permute.xlu0 %1712  ;;  %v3488_v26 = vsub.f32 %v13282_v23, %v19420_v24  ;;  %v2992_v59 = vsel %vm2987_vm6, %v2927_v38, %v1967_v20 }
  0xce   :  { %1472 = vrot.lane.b32.xlu1 %v10903_v11, %s12750_s30  ;;  %v2928_v20 = vsel %vm2922_vm5, %v2863_v14, %v1713_v50 }
  0xcf   :  { %706 = vrot.lane.b32.xlu0 %v10902_v42, %s12748_s18  ;;  %v3489_v56 = vand.u32 4294901760, %v3488_v26  ;;  %v13312_v42 = vld [vmem:[%s19403_s0 + $0xc0] sm:$0xff] }
  0xd0   :  { %v13296_v28 = vpop.permute.xlu1 %1202 }
  0xd1   :  { %v13298_v61 = vpop.permute.xlu0 %948  ;;  %11800 = vmatmul.mubr.f32.gmra.mxu0 %v3489_v56 }
  0xd2   :  { %2492 = vrot.lane.b32.xlu1 %v10967_v27, %s12754_s20 }
  0xd3   :  { %1726 = vrot.lane.b32.xlu0 %v10966_v7, %s12751_s15 }
  0xd4   :  { %v2223_v32 = vpop.permute.xlu1 %2222 }
  0xd5   :  { %v1969_v34 = vpop.permute.xlu0 %1968  ;;  %v3057_v10 = vsel %vm3052_vm7, %v2992_v59, %v2223_v32 }
  0xd6   :  { %962 = vrot.lane.b32.xlu1 %v10966_v7, %s12747_s17  ;;  %v2993_v5 = vsel %vm2987_vm6, %v2928_v20, %v1969_v34 }
  0xd7   :  { %708 = vrot.lane.b32.xlu0 %v10903_v11, %s12748_s18 }
  0xd8   :  { %v13316_v62 = vpop.permute.xlu1 %1458 }
  0xd9   :  { %v13318_v48 = vpop.permute.xlu0 %1204 }
  0xda   :  { %1982 = vrot.lane.b32.xlu1 %v13312_v42, %s12752_s24 }
  0xdb   :  { %1728 = vrot.lane.b32.xlu0 %v10967_v27, %s12751_s15 }
  0xdc   :  { %v2479_v52 = vpop.permute.xlu1 %2478 }
  0xdd   :  { %v2225_v12 = vpop.permute.xlu0 %2224  ;;  %v3122_v54 = vsel %vm3117_vm8, %v3057_v10, %v2479_v52 }
  0xde   :  { %v3205_v25 = vsel %vm3191_vm9, %v3122_v54, 0  ;;  %1218 = vrot.lane.b32.xlu1 %v13312_v42, %s12749_s27  ;;  %v3058_v56 = vsel %vm3052_vm7, %v2993_v5, %v2225_v12 }
  0xdf   :  { %964 = vrot.lane.b32.xlu0 %v10967_v27, %s12747_s17  ;;  %v13338_v58 = vand.u32 4294901760, %v3205_v25 }
  0xe0   :  { %v13350_v3 = vpop.permute.xlu1 %1460 }
  0xe1   :  { %19770 = vst [vmem:[#allocation16_spill] sm:$0xff] %v13338_v58  ;;  %v13352_v7 = vpop.permute.xlu0 %694  ;;  %v13357_v11 = vsub.f32 %v3205_v25, %v13338_v58  ;;  %11902 = vmatprep.mubr.f32.mxu1 %v13338_v58 }
  0xe2   :  { %2238 = vrot.lane.b32.xlu1 %v10904_v1, %s12753_s1 }
  0xe3   :  { %1984 = vrot.lane.b32.xlu0 %v13346_v18, %s12752_s24  ;;  %v19418_v26 = vand.u32 4294901760, %v13357_v11 }
  0xe4   :  { %v2481_v27 = vpop.permute.xlu1 %2480 }
  0xe5   :  { %v1715_v45 = vpop.permute.xlu0 %1714  ;;  %v3123_v32 = vsel %vm3117_vm8, %v3058_v56, %v2481_v27  ;;  %v3498_v8 = vsub.f32 %v13357_v11, %v19418_v26  ;;  %v13418_v27 = vld [vmem:[%s19403_s0 + $0xd8] sm:$0xff] }
  0xe6   :  { %v3208_v50 = vsel %vm3191_vm9, %v3123_v32, 0  ;;  %1474 = vrot.lane.b32.xlu1 %v10904_v1, %s12750_s30 }
  0xe7   :  { %1220 = vrot.lane.b32.xlu0 %v13346_v18, %s12749_s27  ;;  %v13375_v34 = vand.u32 4294901760, %v3208_v50  ;;  %v3499_v39 = vand.u32 4294901760, %v3498_v8 }
  0xe8   :  { %v13383_v38 = vpop.permute.xlu1 %950 }
  0xe9   :  { %19771 = vst [vmem:[#allocation17_spill] sm:$0xff] %v13375_v34  ;;  %v13385_v59 = vpop.permute.xlu0 %696  ;;  %v13388_v10 = vsub.f32 %v3208_v50, %v13375_v34  ;;  %11802 = vmatprep.mubr.f32.mxu0 %v3499_v39  ;;  %11903 = vmatmul.mubr.f32.gmra.mxu1 %v13375_v34 }
  0xea   :  { %2494 = vrot.lane.b32.xlu1 %v10968_v57, %s12754_s20 }
  0xeb   :  { %2240 = vrot.lane.b32.xlu0 %v10905_v9, %s12753_s1  ;;  %v19416_v52 = vand.u32 4294901760, %v13388_v10 }
  0xec   :  { %v1971_v12 = vpop.permute.xlu1 %1970 }
  0xed   :  { %v1717_v54 = vpop.permute.xlu0 %1716  ;;  %v3508_v55 = vsub.f32 %v13388_v10, %v19416_v52 }
  0xee   :  { %1476 = vrot.lane.b32.xlu1 %v10905_v9, %s12750_s30 }
  0xef   :  { %710 = vrot.lane.b32.xlu0 %v10904_v1, %s12748_s18  ;;  %v3509_v25 = vand.u32 4294901760, %v3508_v55  ;;  %v2669_v1 = vsel %vm2662_vm1, %v12949_v29, %v13246_v46  ;;  %v2670_v55 = vsel %vm2662_vm1, %v12963_v31, %v13279_v21  ;;  %v13452_v31 = vld [vmem:[%s19403_s0 + $0xe0] sm:$0xff] }
  0xf0   :  { %v13402_v60 = vpop.permute.xlu1 %1206  ;;  %v2734_v56 = vsel %vm2727_vm2, %v2669_v1, %v13277_v17 }
  0xf1   :  { %v13404_v14 = vpop.permute.xlu0 %952  ;;  %11803 = vmatmul.mubr.f32.gmra.mxu0 %v3509_v25  ;;  %v2799_v32 = vsel %vm2792_vm3, %v2734_v56, %v13296_v28  ;;  %v10906_v25 = vld [vmem:[%s19403_s0 + $0xd9] sm:$0xff] }
  0xf2   :  { %2496 = vrot.lane.b32.xlu1 %v10969_v36, %s12754_s20  ;;  %v2864_v29 = vsel %vm2857_vm4, %v2799_v32, %v13316_v62 }
  0xf3   :  { %1730 = vrot.lane.b32.xlu0 %v10968_v57, %s12751_s15  ;;  %v2929_v46 = vsel %vm2922_vm5, %v2864_v29, %v1715_v45  ;;  %v2735_v45 = vsel %vm2727_vm2, %v2670_v55, %v13298_v61 }
  0xf4   :  { %v2227_v20 = vpop.permute.xlu1 %2226  ;;  %v2994_v17 = vsel %vm2987_vm6, %v2929_v46, %v1971_v12  ;;  %v2800_v21 = vsel %vm2792_vm3, %v2735_v45, %v13318_v48 }
  0xf5   :  { %v1973_v5 = vpop.permute.xlu0 %1972  ;;  %v3059_v39 = vsel %vm3052_vm7, %v2994_v17, %v2227_v20  ;;  %v2865_v61 = vsel %vm2857_vm4, %v2800_v21, %v13350_v3 }
  0xf6   :  { %966 = vrot.lane.b32.xlu1 %v10968_v57, %s12747_s17  ;;  %v2930_v56 = vsel %vm2922_vm5, %v2865_v61, %v1717_v54 }
  0xf7   :  { %712 = vrot.lane.b32.xlu0 %v10905_v9, %s12748_s18  ;;  %v2995_v48 = vsel %vm2987_vm6, %v2930_v56, %v1973_v5 }
  0xf8   :  { %v13422_v8 = vpop.permute.xlu1 %1462 }
  0xf9   :  { %v13424_v50 = vpop.permute.xlu0 %1208 }
  0xfa   :  { %1986 = vrot.lane.b32.xlu1 %v13418_v27, %s12752_s24 }
  0xfb   :  { %1732 = vrot.lane.b32.xlu0 %v10969_v36, %s12751_s15 }
  0xfc   :  { %v2483_v57 = vpop.permute.xlu1 %2482 }
  0xfd   :  { %v2229_v28 = vpop.permute.xlu0 %2228  ;;  %v3124_v9 = vsel %vm3117_vm8, %v3059_v39, %v2483_v57 }
  0xfe   :  { %v3211_v62 = vsel %vm3191_vm9, %v3124_v9, 0  ;;  %1222 = vrot.lane.b32.xlu1 %v13418_v27, %s12749_s27  ;;  %v3060_v29 = vsel %vm3052_vm7, %v2995_v48, %v2229_v28  ;;  %v10970_v28 = vld [vmem:[%s19403_s0 + $0xda] sm:$0xff] }
  0xff   :  { %968 = vrot.lane.b32.xlu0 %v10969_v36, %s12747_s17  ;;  %v13444_v12 = vand.u32 4294901760, %v3211_v62  ;;  %v10907_v9 = vld [vmem:[%s19403_s0 + $0xe1] sm:$0xff] }
 0x100   :  { %v13456_v20 = vpop.permute.xlu1 %1464 }
 0x101   :  { %19772 = vst [vmem:[#allocation18_spill] sm:$0xff] %v13444_v12  ;;  %v13458_v36 = vpop.permute.xlu0 %698  ;;  %v13463_v1 = vsub.f32 %v3211_v62, %v13444_v12  ;;  %11905 = vmatprep.mubr.f32.mxu1 %v13444_v12 }
 0x102   :  { %2242 = vrot.lane.b32.xlu1 %v10906_v25, %s12753_s1 }
 0x103   :  { %1988 = vrot.lane.b32.xlu0 %v13452_v31, %s12752_s24  ;;  %v19415_v32 = vand.u32 4294901760, %v13463_v1 }
 0x104   :  { %v2485_v46 = vpop.permute.xlu1 %2484 }
 0x105   :  { %v1719_v3 = vpop.permute.xlu0 %1718  ;;  %v3125_v17 = vsel %vm3117_vm8, %v3060_v29, %v2485_v46  ;;  %v3518_v39 = vsub.f32 %v13463_v1, %v19415_v32  ;;  %v10971_v46 = vld [vmem:[%s19403_s0 + $0xe2] sm:$0xff] }
 0x106   :  { %v3214_v54 = vsel %vm3191_vm9, %v3125_v17, 0  ;;  %1478 = vrot.lane.b32.xlu1 %v10906_v25, %s12750_s30 }
 0x107   :  { %1224 = vrot.lane.b32.xlu0 %v13452_v31, %s12749_s27  ;;  %v13481_v5 = vand.u32 4294901760, %v3214_v54  ;;  %v3519_v57 = vand.u32 4294901760, %v3518_v39 }
 0x108   :  { %v13489_v55 = vpop.permute.xlu1 %954 }
 0x109   :  { %19773 = vst [vmem:[#allocation19_spill] sm:$0xff] %v13481_v5  ;;  %v13491_v62 = vpop.permute.xlu0 %700  ;;  %v13494_v45 = vsub.f32 %v3214_v54, %v13481_v5  ;;  %11805 = vmatprep.mubr.f32.mxu0 %v3519_v57  ;;  %11906 = vmatmul.mubr.f32.gmra.mxu1 %v13481_v5 }
 0x10a   :  { %2498 = vrot.lane.b32.xlu1 %v10970_v28, %s12754_s20 }
 0x10b   :  { %2244 = vrot.lane.b32.xlu0 %v10907_v9, %s12753_s1  ;;  %v19414_v21 = vand.u32 4294901760, %v13494_v45 }
 0x10c   :  { %v1975_v61 = vpop.permute.xlu1 %1974 }
 0x10d   :  { %v1721_v56 = vpop.permute.xlu0 %1720  ;;  %v3528_v48 = vsub.f32 %v13494_v45, %v19414_v21 }
 0x10e   :  { %1480 = vrot.lane.b32.xlu1 %v10907_v9, %s12750_s30 }
 0x10f   :  { %714 = vrot.lane.b32.xlu0 %v10906_v25, %s12748_s18  ;;  %v3529_v29 = vand.u32 4294901760, %v3528_v48  ;;  %v2671_v25 = vsel %vm2662_vm1, %v12991_v35, %v13352_v7 }
 0x110   :  { %v13508_v17 = vpop.permute.xlu1 %1210  ;;  %v2736_v48 = vsel %vm2727_vm2, %v2671_v25, %v13383_v38 }
 0x111   :  { %v13510_v39 = vpop.permute.xlu0 %956  ;;  %11806 = vmatmul.mubr.f32.gmra.mxu0 %v3529_v29  ;;  %v13524_v29 = vld [vmem:[%s19403_s0 + $0xf0] sm:$0xff]  ;;  %v2801_v21 = vsel %vm2792_vm3, %v2736_v48, %v13402_v60  ;;  %v2672_v48 = vsel %vm2662_vm1, %v13005_v37, %v13385_v59  ;;  %v13558_v37 = vld [vmem:[%s19403_s0 + $0xf8] sm:$0xff] }
 0x112   :  { %2500 = vrot.lane.b32.xlu1 %v10971_v46, %s12754_s20  ;;  %v2866_v35 = vsel %vm2857_vm4, %v2801_v21, %v13422_v8 }
 0x113   :  { %1734 = vrot.lane.b32.xlu0 %v10970_v28, %s12751_s15  ;;  %v2931_v7 = vsel %vm2922_vm5, %v2866_v35, %v1719_v3  ;;  %v2737_v3 = vsel %vm2727_vm2, %v2672_v48, %v13404_v14 }
 0x114   :  { %v2231_v54 = vpop.permute.xlu1 %2230  ;;  %v2996_v38 = vsel %vm2987_vm6, %v2931_v7, %v1975_v61  ;;  %v10908_v61 = vld [vmem:[%s19403_s0 + $0xf1] sm:$0xff]  ;;  %v2802_v59 = vsel %vm2792_vm3, %v2737_v3, %v13424_v50  ;;  %v10909_v3 = vld [vmem:[%s19403_s0 + $0xf9] sm:$0xff] }
 0x115   :  { %v1977_v57 = vpop.permute.xlu0 %1976  ;;  %v2867_v14 = vsel %vm2857_vm4, %v2802_v59, %v13456_v20 }
 0x116   :  { %970 = vrot.lane.b32.xlu1 %v10970_v28, %s12747_s17  ;;  %v3061_v28 = vsel %vm3052_vm7, %v2996_v38, %v2231_v54  ;;  %v2932_v7 = vsel %vm2922_vm5, %v2867_v14, %v1721_v56 }
 0x117   :  { %716 = vrot.lane.b32.xlu0 %v10907_v9, %s12748_s18  ;;  %v2997_v50 = vsel %vm2987_vm6, %v2932_v7, %v1977_v57 }
 0x118   :  { %v13528_v32 = vpop.permute.xlu1 %1466 }
 0x119   :  { %v13530_v52 = vpop.permute.xlu0 %1212 }
 0x11a   :  { %1990 = vrot.lane.b32.xlu1 %v13524_v29, %s12752_s24 }
 0x11b   :  { %1736 = vrot.lane.b32.xlu0 %v10971_v46, %s12751_s15 }
 0x11c   :  { %v2487_v9 = vpop.permute.xlu1 %2486 }
 0x11d   :  { %v2233_v60 = vpop.permute.xlu0 %2232  ;;  %v3126_v25 = vsel %vm3117_vm8, %v3061_v28, %v2487_v9 }
 0x11e   :  { %v3217_v8 = vsel %vm3191_vm9, %v3126_v25, 0  ;;  %1226 = vrot.lane.b32.xlu1 %v13524_v29, %s12749_s27  ;;  %v3062_v28 = vsel %vm3052_vm7, %v2997_v50, %v2233_v60  ;;  %v10972_v60 = vld [vmem:[%s19403_s0 + $0xf2] sm:$0xff] }
 0x11f   :  { %972 = vrot.lane.b32.xlu0 %v10971_v46, %s12747_s17  ;;  %v13550_v21 = vand.u32 4294901760, %v3217_v8 }
 0x120   :  { %v13562_v54 = vpop.permute.xlu1 %1468 }
 0x121   :  { %19774 = vst [vmem:[#allocation20_spill] sm:$0xff] %v13550_v21  ;;  %v13564_v46 = vpop.permute.xlu0 %702  ;;  %v13569_v35 = vsub.f32 %v3217_v8, %v13550_v21  ;;  %11908 = vmatprep.mubr.f32.mxu1 %v13550_v21 }
 0x122   :  { %2246 = vrot.lane.b32.xlu1 %v10908_v61, %s12753_s1 }
 0x123   :  { %1992 = vrot.lane.b32.xlu0 %v13558_v37, %s12752_s24  ;;  %v19417_v38 = vand.u32 4294901760, %v13569_v35 }
 0x124   :  { %v2489_v9 = vpop.permute.xlu1 %2488 }
 0x125   :  { %v1723_v20 = vpop.permute.xlu0 %1722  ;;  %v3127_v25 = vsel %vm3117_vm8, %v3062_v28, %v2489_v9  ;;  %v3538_v48 = vsub.f32 %v13569_v35, %v19417_v38 }
 0x126   :  { %v3220_v56 = vsel %vm3191_vm9, %v3127_v25, 0  ;;  %1482 = vrot.lane.b32.xlu1 %v10908_v61, %s12750_s30 }
 0x127   :  { %1228 = vrot.lane.b32.xlu0 %v13558_v37, %s12749_s27  ;;  %v13587_v57 = vand.u32 4294901760, %v3220_v56  ;;  %v3539_v8 = vand.u32 4294901760, %v3538_v48 }
 0x128   :  { %v13595_v59 = vpop.permute.xlu1 %958 }
 0x129   :  { %19775 = vst [vmem:[#allocation21_spill] sm:$0xff] %v13587_v57  ;;  %v13597_v14 = vpop.permute.xlu0 %704  ;;  %v13600_v7 = vsub.f32 %v3220_v56, %v13587_v57  ;;  %11808 = vmatprep.mubr.f32.mxu0 %v3539_v8  ;;  %11909 = vmatmul.mubr.f32.gmra.mxu1 %v13587_v57  ;;  %v10973_v56 = vld [vmem:[%s19403_s0 + $0xfa] sm:$0xff] }
 0x12a   :  { %2502 = vrot.lane.b32.xlu1 %v10972_v60, %s12754_s20 }
 0x12b   :  { %2248 = vrot.lane.b32.xlu0 %v10909_v3, %s12753_s1  ;;  %v19419_v50 = vand.u32 4294901760, %v13600_v7 }
 0x12c   :  { %v1979_v28 = vpop.permute.xlu1 %1978 }
 0x12d   :  { %v1725_v9 = vpop.permute.xlu0 %1724  ;;  %v3548_v25 = vsub.f32 %v13600_v7, %v19419_v50 }
 0x12e   :  { %1484 = vrot.lane.b32.xlu1 %v10909_v3, %s12750_s30 }
 0x12f   :  { %718 = vrot.lane.b32.xlu0 %v10908_v61, %s12748_s18  ;;  %v3549_v48 = vand.u32 4294901760, %v3548_v25  ;;  %v2673_v61 = vsel %vm2662_vm1, %v13033_v43, %v13458_v36 }
 0x130   :  { %v13614_v8 = vpop.permute.xlu1 %1214  ;;  %v2738_v25 = vsel %vm2727_vm2, %v2673_v61, %v13489_v55 }
 0x131   :  { %v13616_v38 = vpop.permute.xlu0 %960  ;;  %11809 = vmatmul.mubr.f32.gmra.mxu0 %v3549_v48  ;;  %v13630_v48 = vld [vmem:[%s19403_s0 + $0x108] sm:$0xff]  ;;  %v2803_v24 = vsel %vm2792_vm3, %v2738_v25, %v13508_v17  ;;  %v2674_v25 = vsel %vm2662_vm1, %v13051_v49, %v13491_v62  ;;  %v13664_v49 = vld [vmem:[%s19403_s0 + $0x110] sm:$0xff] }
 0x132   :  { %2504 = vrot.lane.b32.xlu1 %v10973_v56, %s12754_s20  ;;  %v2868_v43 = vsel %vm2857_vm4, %v2803_v24, %v13528_v32  ;;  %v2739_v32 = vsel %vm2727_vm2, %v2674_v25, %v13510_v39 }
 0x133   :  { %1738 = vrot.lane.b32.xlu0 %v10972_v60, %s12751_s15  ;;  %v2933_v36 = vsel %vm2922_vm5, %v2868_v43, %v1723_v20  ;;  %v2804_v62 = vsel %vm2792_vm3, %v2739_v32, %v13530_v52  ;;  %v10911_v32 = vld [vmem:[%s19403_s0 + $0x111] sm:$0xff] }
 0x134   :  { %v2235_v26 = vpop.permute.xlu1 %2234  ;;  %v2998_v55 = vsel %vm2987_vm6, %v2933_v36, %v1979_v28  ;;  %v2869_v39 = vsel %vm2857_vm4, %v2804_v62, %v13562_v54 }
 0x135   :  { %v1981_v50 = vpop.permute.xlu0 %1980  ;;  %v2934_v36 = vsel %vm2922_vm5, %v2869_v39, %v1725_v9 }
 0x136   :  { %974 = vrot.lane.b32.xlu1 %v10972_v60, %s12747_s17  ;;  %v3063_v60 = vsel %vm3052_vm7, %v2998_v55, %v2235_v26  ;;  %v10910_v26 = vld [vmem:[%s19403_s0 + $0x109] sm:$0xff]  ;;  %v2999_v52 = vsel %vm2987_vm6, %v2934_v36, %v1981_v50 }
 0x137   :  { %720 = vrot.lane.b32.xlu0 %v10909_v3, %s12748_s18 }
 0x138   :  { %v13634_v51 = vpop.permute.xlu1 %1470 }
 0x139   :  { %v13636_v0 = vpop.permute.xlu0 %1216 }
 0x13a   :  { %1994 = vrot.lane.b32.xlu1 %v13630_v48, %s12752_s24 }
 0x13b   :  { %1740 = vrot.lane.b32.xlu0 %v10973_v56, %s12751_s15 }
 0x13c   :  { %v2491_v3 = vpop.permute.xlu1 %2490 }
 0x13d   :  { %v2237_v17 = vpop.permute.xlu0 %2236  ;;  %v3128_v61 = vsel %vm3117_vm8, %v3063_v60, %v2491_v3 }
 0x13e   :  { %v3223_v24 = vsel %vm3191_vm9, %v3128_v61, 0  ;;  %1230 = vrot.lane.b32.xlu1 %v13630_v48, %s12749_s27  ;;  %v3064_v60 = vsel %vm3052_vm7, %v2999_v52, %v2237_v17  ;;  %v10974_v17 = vld [vmem:[%s19403_s0 + $0x10a] sm:$0xff] }
 0x13f   :  { %976 = vrot.lane.b32.xlu0 %v10973_v56, %s12747_s17  ;;  %v13656_v20 = vand.u32 4294901760, %v3223_v24 }
 0x140   :  { %v13668_v28 = vpop.permute.xlu1 %1472 }
 0x141   :  { %19776 = vst [vmem:[#allocation22_spill] sm:$0xff] %v13656_v20  ;;  %v13670_v56 = vpop.permute.xlu0 %706  ;;  %v13675_v43 = vsub.f32 %v3223_v24, %v13656_v20  ;;  %11911 = vmatprep.mubr.f32.mxu1 %v13656_v20 }
 0x142   :  { %2250 = vrot.lane.b32.xlu1 %v10910_v26, %s12753_s1  ;;  %v2677_v12 = vsel %vm2662_vm1, %v13205_v15, %v13670_v56 }
 0x143   :  { %1996 = vrot.lane.b32.xlu0 %v13664_v49, %s12752_s24  ;;  %v19423_v55 = vand.u32 4294901760, %v13675_v43 }
 0x144   :  { %v2493_v3 = vpop.permute.xlu1 %2492 }
 0x145   :  { %v1727_v54 = vpop.permute.xlu0 %1726  ;;  %v3129_v61 = vsel %vm3117_vm8, %v3064_v60, %v2493_v3  ;;  %v3558_v25 = vsub.f32 %v13675_v43, %v19423_v55 }
 0x146   :  { %v3226_v9 = vsel %vm3191_vm9, %v3129_v61, 0  ;;  %1486 = vrot.lane.b32.xlu1 %v10910_v26, %s12750_s30 }
 0x147   :  { %1232 = vrot.lane.b32.xlu0 %v13664_v49, %s12749_s27  ;;  %v13693_v50 = vand.u32 4294901760, %v3226_v9  ;;  %v3559_v24 = vand.u32 4294901760, %v3558_v25 }
 0x148   :  { %v13701_v62 = vpop.permute.xlu1 %962 }
 0x149   :  { %19777 = vst [vmem:[#allocation23_spill] sm:$0xff] %v13693_v50  ;;  %v13703_v39 = vpop.permute.xlu0 %708  ;;  %v13706_v36 = vsub.f32 %v3226_v9, %v13693_v50  ;;  %11811 = vmatprep.mubr.f32.mxu0 %v3559_v24  ;;  %11912 = vmatmul.mubr.f32.gmra.mxu1 %v13693_v50  ;;  %v10975_v9 = vld [vmem:[%s19403_s0 + $0x112] sm:$0xff] }
 0x14a   :  { %2506 = vrot.lane.b32.xlu1 %v10974_v17, %s12754_s20 }
 0x14b   :  { %2252 = vrot.lane.b32.xlu0 %v10911_v32, %s12753_s1  ;;  %v19425_v52 = vand.u32 4294901760, %v13706_v36 }
 0x14c   :  { %v1983_v60 = vpop.permute.xlu1 %1982 }
 0x14d   :  { %v1729_v3 = vpop.permute.xlu0 %1728  ;;  %v3568_v61 = vsub.f32 %v13706_v36, %v19425_v52 }
 0x14e   :  { %1488 = vrot.lane.b32.xlu1 %v10911_v32, %s12750_s30 }
 0x14f   :  { %722 = vrot.lane.b32.xlu0 %v10910_v26, %s12748_s18  ;;  %v3569_v25 = vand.u32 4294901760, %v3568_v61  ;;  %v2675_v26 = vsel %vm2662_vm1, %v13094_v6, %v13564_v46 }
 0x150   :  { %v13720_v24 = vpop.permute.xlu1 %1218  ;;  %v2740_v61 = vsel %vm2727_vm2, %v2675_v26, %v13595_v59 }
 0x151   :  { %v13722_v55 = vpop.permute.xlu0 %964  ;;  %11812 = vmatmul.mubr.f32.gmra.mxu0 %v3569_v25  ;;  %v13736_v25 = vld [vmem:[%s19403_s0 + $0x120] sm:$0xff]  ;;  %v2805_v50 = vsel %vm2792_vm3, %v2740_v61, %v13614_v8  ;;  %v2676_v61 = vsel %vm2662_vm1, %v13127_v33, %v13597_v14  ;;  %v13770_v33 = vld [vmem:[%s19403_s0 + $0x128] sm:$0xff] }
 0x152   :  { %2508 = vrot.lane.b32.xlu1 %v10975_v9, %s12754_s20  ;;  %v2870_v6 = vsel %vm2857_vm4, %v2805_v50, %v13634_v51 }
 0x153   :  { %1742 = vrot.lane.b32.xlu0 %v10974_v17, %s12751_s15  ;;  %v2935_v46 = vsel %vm2922_vm5, %v2870_v6, %v1727_v54  ;;  %v2741_v54 = vsel %vm2727_vm2, %v2676_v61, %v13616_v38 }
 0x154   :  { %v2239_v44 = vpop.permute.xlu1 %2238  ;;  %v3000_v59 = vsel %vm2987_vm6, %v2935_v46, %v1983_v60  ;;  %v2806_v14 = vsel %vm2792_vm3, %v2741_v54, %v13636_v0  ;;  %v10913_v54 = vld [vmem:[%s19403_s0 + $0x129] sm:$0xff] }
 0x155   :  { %v1985_v52 = vpop.permute.xlu0 %1984  ;;  %v2871_v38 = vsel %vm2857_vm4, %v2806_v14, %v13668_v28 }
 0x156   :  { %978 = vrot.lane.b32.xlu1 %v10974_v17, %s12747_s17  ;;  %v3065_v17 = vsel %vm3052_vm7, %v3000_v59, %v2239_v44  ;;  %v10912_v44 = vld [vmem:[%s19403_s0 + $0x121] sm:$0xff]  ;;  %v2936_v46 = vsel %vm2922_vm5, %v2871_v38, %v1729_v3 }
 0x157   :  { %724 = vrot.lane.b32.xlu0 %v10911_v32, %s12748_s18  ;;  %v3001_v0 = vsel %vm2987_vm6, %v2936_v46, %v1985_v52 }
 0x158   :  { %v13740_v20 = vpop.permute.xlu1 %1474 }
 0x159   :  { %v13742_v57 = vpop.permute.xlu0 %1220 }
 0x15a   :  { %1998 = vrot.lane.b32.xlu1 %v13736_v25, %s12752_s24 }
 0x15b   :  { %1744 = vrot.lane.b32.xlu0 %v10975_v9, %s12751_s15 }
 0x15c   :  { %v2495_v32 = vpop.permute.xlu1 %2494 }
 0x15d   :  { %v2241_v8 = vpop.permute.xlu0 %2240  ;;  %v3130_v26 = vsel %vm3117_vm8, %v3065_v17, %v2495_v32 }
 0x15e   :  { %v3229_v51 = vsel %vm3191_vm9, %v3130_v26, 0  ;;  %1234 = vrot.lane.b32.xlu1 %v13736_v25, %s12749_s27  ;;  %v3066_v17 = vsel %vm3052_vm7, %v3001_v0, %v2241_v8  ;;  %v10976_v8 = vld [vmem:[%s19403_s0 + $0x122] sm:$0xff] }
 0x15f   :  { %980 = vrot.lane.b32.xlu0 %v10975_v9, %s12747_s17  ;;  %v13762_v50 = vand.u32 4294901760, %v3229_v51 }
 0x160   :  { %v13774_v60 = vpop.permute.xlu1 %1476 }
 0x161   :  { %19778 = vst [vmem:[#allocation24_spill] sm:$0xff] %v13762_v50  ;;  %v13776_v9 = vpop.permute.xlu0 %710  ;;  %v13781_v6 = vsub.f32 %v3229_v51, %v13762_v50  ;;  %11914 = vmatprep.mubr.f32.mxu1 %v13762_v50 }
 0x162   :  { %2254 = vrot.lane.b32.xlu1 %v10912_v44, %s12753_s1  ;;  %v2679_v2 = vsel %vm2662_vm1, %v13312_v42, %v13776_v9 }
 0x163   :  { %2000 = vrot.lane.b32.xlu0 %v13770_v33, %s12752_s24  ;;  %v19432_v59 = vand.u32 4294901760, %v13781_v6 }
 0x164   :  { %v2497_v32 = vpop.permute.xlu1 %2496 }
 0x165   :  { %v1731_v28 = vpop.permute.xlu0 %1730  ;;  %v3131_v26 = vsel %vm3117_vm8, %v3066_v17, %v2497_v32  ;;  %v3578_v61 = vsub.f32 %v13781_v6, %v19432_v59 }
 0x166   :  { %v3232_v3 = vsel %vm3191_vm9, %v3131_v26, 0  ;;  %1490 = vrot.lane.b32.xlu1 %v10912_v44, %s12750_s30 }
 0x167   :  { %1236 = vrot.lane.b32.xlu0 %v13770_v33, %s12749_s27  ;;  %v13799_v52 = vand.u32 4294901760, %v3232_v3  ;;  %v3579_v51 = vand.u32 4294901760, %v3578_v61  ;;  %v13826_v61 = vld [vmem:[%s19405_s2] ss:$0 sm:$0xff] }
 0x168   :  { %v13807_v14 = vpop.permute.xlu1 %966 }
 0x169   :  { %19779 = vst [vmem:[#allocation25_spill] sm:$0xff] %v13799_v52  ;;  %v13809_v38 = vpop.permute.xlu0 %712  ;;  %v13812_v46 = vsub.f32 %v3232_v3, %v13799_v52  ;;  %11814 = vmatprep.mubr.f32.mxu0 %v3579_v51  ;;  %11915 = vmatmul.mubr.f32.gmra.mxu1 %v13799_v52  ;;  %v10977_v51 = vld [vmem:[%s19403_s0 + $0x12a] sm:$0xff] }
 0x16a   :  { %2510 = vrot.lane.b32.xlu1 %v10976_v8, %s12754_s20 }
 0x16b   :  { %2256 = vrot.lane.b32.xlu0 %v10913_v54, %s12753_s1  ;;  %v19437_v0 = vand.u32 4294901760, %v13812_v46 }
 0x16c   :  { %v1987_v17 = vpop.permute.xlu1 %1986 }
 0x16d   :  { %v1733_v32 = vpop.permute.xlu0 %1732  ;;  %v3588_v26 = vsub.f32 %v13812_v46, %v19437_v0 }
 0x16e   :  { %1492 = vrot.lane.b32.xlu1 %v10913_v54, %s12750_s30 }
 0x16f   :  { %726 = vrot.lane.b32.xlu0 %v10912_v44, %s12748_s18  ;;  %v3589_v3 = vand.u32 4294901760, %v3588_v26  ;;  %v11898_v44 = vpop.f32.mrf.mxu1 }
 0x170   :  { %v13831_v59 = vpop.permute.xlu1 %1222 }
 0x171   :  { %v13833_v52 = vpop.permute.xlu0 %968  ;;  %v11798_v50 = vpop.f32.mrf.mxu0  ;;  %11815 = vmatmul.mubr.f32.gmra.mxu0 %v3589_v3  ;;  %v13850_v3 = vld [vmem:[%s19403_s0 + $0x138] sm:$0xff] }
 0x172   :  { %v3472_v0 = vadd.f32 %v11798_v50, %v13826_v61  ;;  %2512 = vrot.lane.b32.xlu1 %v10977_v51, %s12754_s20  ;;  %v2742_v50 = vsel %vm2727_vm2, %v2677_v12, %v13701_v62 }
 0x173   :  { %1746 = vrot.lane.b32.xlu0 %v10976_v8, %s12751_s15 }
 0x174   :  { %v2243_v21 = vpop.permute.xlu1 %2242  ;;  %v13838_v26 = vadd.f32 %v11898_v44, %v3472_v0  ;;  %v2807_v0 = vsel %vm2792_vm3, %v2742_v50, %v13720_v24  ;;  %v2678_v50 = vsel %vm2662_vm1, %v13240_v4, %v13703_v39  ;;  %v13884_v4 = vld [vmem:[%s19403_s0 + $0x140] sm:$0xff] }
 0x175   :  { %v1989_v5 = vpop.permute.xlu0 %1988  ;;  %v2872_v15 = vsel %vm2857_vm4, %v2807_v0, %v13740_v20 }
 0x176   :  { %19780 = vst [vmem:[#allocation26_spill] sm:$0xff] %v13838_v26  ;;  %982 = vrot.lane.b32.xlu1 %v10976_v8, %s12747_s17  ;;  %v2937_v56 = vsel %vm2922_vm5, %v2872_v15, %v1731_v28  ;;  %v2743_v28 = vsel %vm2727_vm2, %v2678_v50, %v13722_v55 }
 0x177   :  { %728 = vrot.lane.b32.xlu0 %v10913_v54, %s12748_s18  ;;  %v3002_v12 = vsel %vm2987_vm6, %v2937_v56, %v1987_v17  ;;  %v2808_v39 = vsel %vm2792_vm3, %v2743_v28, %v13742_v57  ;;  %v10915_v28 = vld [vmem:[%s19403_s0 + $0x141] sm:$0xff] }
 0x178   :  { %v13854_v44 = vpop.permute.xlu1 %1478  ;;  %v3067_v62 = vsel %vm3052_vm7, %v3002_v12, %v2243_v21  ;;  %v10914_v21 = vld [vmem:[%s19403_s0 + $0x139] sm:$0xff]  ;;  %v2873_v55 = vsel %vm2857_vm4, %v2808_v39, %v13774_v60 }
 0x179   :  { %v13856_v26 = vpop.permute.xlu0 %1224  ;;  %v2938_v56 = vsel %vm2922_vm5, %v2873_v55, %v1733_v32 }
 0x17a   :  { %2002 = vrot.lane.b32.xlu1 %v13850_v3, %s12752_s24  ;;  %v3003_v57 = vsel %vm2987_vm6, %v2938_v56, %v1989_v5 }
 0x17b   :  { %1748 = vrot.lane.b32.xlu0 %v10977_v51, %s12751_s15 }
 0x17c   :  { %v2499_v8 = vpop.permute.xlu1 %2498 }
 0x17d   :  { %v2245_v24 = vpop.permute.xlu0 %2244  ;;  %v3132_v54 = vsel %vm3117_vm8, %v3067_v62, %v2499_v8 }
 0x17e   :  { %v3235_v20 = vsel %vm3191_vm9, %v3132_v54, 0  ;;  %1238 = vrot.lane.b32.xlu1 %v13850_v3, %s12749_s27  ;;  %v3068_v62 = vsel %vm3052_vm7, %v3003_v57, %v2245_v24  ;;  %v10978_v24 = vld [vmem:[%s19403_s0 + $0x13a] sm:$0xff] }
 0x17f   :  { %984 = vrot.lane.b32.xlu0 %v10977_v51, %s12747_s17  ;;  %v13876_v17 = vand.u32 4294901760, %v3235_v20 }
 0x180   :  { %v13888_v0 = vpop.permute.xlu1 %1480 }
 0x181   :  { %19781 = vst [vmem:[#allocation27_spill] sm:$0xff] %v13876_v17  ;;  %v13890_v51 = vpop.permute.xlu0 %714  ;;  %v13895_v15 = vsub.f32 %v3235_v20, %v13876_v17  ;;  %11917 = vmatprep.mubr.f32.mxu1 %v13876_v17  ;;  %v13946_v17 = vpop.f32.mrf.mxu1 }
 0x182   :  { %2258 = vrot.lane.b32.xlu1 %v10914_v21, %s12753_s1  ;;  %19784 = vst [vmem:[#allocation30_spill] sm:$0xff] %v13946_v17  ;;  %v2681_v53 = vsel %vm2662_vm1, %v13418_v27, %v13890_v51 }
 0x183   :  { %2004 = vrot.lane.b32.xlu0 %v13884_v4, %s12752_s24  ;;  %v19444_v12 = vand.u32 4294901760, %v13895_v15 }
 0x184   :  { %v2501_v8 = vpop.permute.xlu1 %2500 }
 0x185   :  { %v1735_v60 = vpop.permute.xlu0 %1734  ;;  %v3133_v54 = vsel %vm3117_vm8, %v3068_v62, %v2501_v8  ;;  %v3598_v50 = vsub.f32 %v13895_v15, %v19444_v12 }
 0x186   :  { %v3238_v32 = vsel %vm3191_vm9, %v3133_v54, 0  ;;  %1494 = vrot.lane.b32.xlu1 %v10914_v21, %s12750_s30 }
 0x187   :  { %1240 = vrot.lane.b32.xlu0 %v13884_v4, %s12749_s27  ;;  %v13913_v5 = vand.u32 4294901760, %v3238_v32  ;;  %v3599_v20 = vand.u32 4294901760, %v3598_v50  ;;  %v13937_v50 = vpop.f32.mrf.mxu0 }
 0x188   :  { %v13921_v39 = vpop.permute.xlu1 %970  ;;  %19783 = vst [vmem:[#allocation29_spill] sm:$0xff] %v13937_v50 }
 0x189   :  { %19782 = vst [vmem:[#allocation28_spill] sm:$0xff] %v13913_v5  ;;  %v13923_v55 = vpop.permute.xlu0 %716  ;;  %v13926_v56 = vsub.f32 %v3238_v32, %v13913_v5  ;;  %11817 = vmatprep.mubr.f32.mxu0 %v3599_v20  ;;  %11918 = vmatmul.mubr.f32.gmra.mxu1 %v13913_v5  ;;  %v10979_v20 = vld [vmem:[%s19403_s0 + $0x142] sm:$0xff] }
 0x18a   :  { %2514 = vrot.lane.b32.xlu1 %v10978_v24, %s12754_s20 }
 0x18b   :  { %2260 = vrot.lane.b32.xlu0 %v10915_v28, %s12753_s1  ;;  %v19451_v57 = vand.u32 4294901760, %v13926_v56 }
 0x18c   :  { %v1991_v62 = vpop.permute.xlu1 %1990 }
 0x18d   :  { %v1737_v8 = vpop.permute.xlu0 %1736  ;;  %v3608_v54 = vsub.f32 %v13926_v56, %v19451_v57 }
 0x18e   :  { %1496 = vrot.lane.b32.xlu1 %v10915_v28, %s12750_s30 }
 0x18f   :  { %730 = vrot.lane.b32.xlu0 %v10914_v21, %s12748_s18  ;;  %v3609_v32 = vand.u32 4294901760, %v3608_v54  ;;  %v11901_v21 = vpop.f32.mrf.mxu1 }
 0x190   :  { %v13942_v12 = vpop.permute.xlu1 %1226 }
 0x191   :  { %v13944_v5 = vpop.permute.xlu0 %972  ;;  %v11801_v34 = vpop.f32.mrf.mxu0  ;;  %11818 = vmatmul.mubr.f32.gmra.mxu0 %v3609_v32  ;;  %v13963_v32 = vld [vmem:[%s19403_s0 + $0x150] sm:$0xff] }
 0x192   :  { %v3492_v57 = vadd.f32 %v11801_v34, %v13826_v61  ;;  %2516 = vrot.lane.b32.xlu1 %v10979_v20, %s12754_s20  ;;  %v2744_v34 = vsel %vm2727_vm2, %v2679_v2, %v13807_v14 }
 0x193   :  { %1750 = vrot.lane.b32.xlu0 %v10978_v24, %s12751_s15 }
 0x194   :  { %v2247_v54 = vpop.permute.xlu1 %2246  ;;  %v13951_v58 = vadd.f32 %v11901_v21, %v3492_v57  ;;  %v2809_v57 = vsel %vm2792_vm3, %v2744_v34, %v13831_v59  ;;  %v2680_v34 = vsel %vm2662_vm1, %v13346_v18, %v13809_v38  ;;  %v13997_v18 = vld [vmem:[%s19403_s0 + $0x158] sm:$0xff] }
 0x195   :  { %v1993_v50 = vpop.permute.xlu0 %1992  ;;  %v2874_v42 = vsel %vm2857_vm4, %v2809_v57, %v13854_v44 }
 0x196   :  { %19785 = vst [vmem:[#allocation31_spill] sm:$0xff] %v13951_v58  ;;  %986 = vrot.lane.b32.xlu1 %v10978_v24, %s12747_s17  ;;  %v2939_v9 = vsel %vm2922_vm5, %v2874_v42, %v1735_v60  ;;  %v2745_v60 = vsel %vm2727_vm2, %v2680_v34, %v13833_v52 }
 0x197   :  { %732 = vrot.lane.b32.xlu0 %v10915_v28, %s12748_s18  ;;  %v3004_v2 = vsel %vm2987_vm6, %v2939_v9, %v1991_v62  ;;  %v2810_v38 = vsel %vm2792_vm3, %v2745_v60, %v13856_v26  ;;  %v10917_v60 = vld [vmem:[%s19403_s0 + $0x159] sm:$0xff] }
 0x198   :  { %v13967_v21 = vpop.permute.xlu1 %1482  ;;  %v3069_v14 = vsel %vm3052_vm7, %v3004_v2, %v2247_v54  ;;  %v10916_v54 = vld [vmem:[%s19403_s0 + $0x151] sm:$0xff]  ;;  %v2875_v52 = vsel %vm2857_vm4, %v2810_v38, %v13888_v0 }
 0x199   :  { %v13969_v58 = vpop.permute.xlu0 %1228  ;;  %v2940_v9 = vsel %vm2922_vm5, %v2875_v52, %v1737_v8 }
 0x19a   :  { %2006 = vrot.lane.b32.xlu1 %v13963_v32, %s12752_s24  ;;  %v3005_v26 = vsel %vm2987_vm6, %v2940_v9, %v1993_v50 }
 0x19b   :  { %1752 = vrot.lane.b32.xlu0 %v10979_v20, %s12751_s15 }
 0x19c   :  { %v2503_v24 = vpop.permute.xlu1 %2502 }
 0x19d   :  { %v2249_v59 = vpop.permute.xlu0 %2248  ;;  %v3134_v28 = vsel %vm3117_vm8, %v3069_v14, %v2503_v24 }
 0x19e   :  { %v3241_v44 = vsel %vm3191_vm9, %v3134_v28, 0  ;;  %1242 = vrot.lane.b32.xlu1 %v13963_v32, %s12749_s27  ;;  %v3070_v14 = vsel %vm3052_vm7, %v3005_v26, %v2249_v59  ;;  %v10980_v59 = vld [vmem:[%s19403_s0 + $0x152] sm:$0xff] }
 0x19f   :  { %988 = vrot.lane.b32.xlu0 %v10979_v20, %s12747_s17  ;;  %v13989_v62 = vand.u32 4294901760, %v3241_v44 }
 0x1a0   :  { %v14001_v57 = vpop.permute.xlu1 %1484 }
 0x1a1   :  { %19786 = vst [vmem:[#allocation32_spill] sm:$0xff] %v13989_v62  ;;  %v14003_v20 = vpop.permute.xlu0 %718  ;;  %v14008_v42 = vsub.f32 %v3241_v44, %v13989_v62  ;;  %11920 = vmatprep.mubr.f32.mxu1 %v13989_v62 }
 0x1a2   :  { %2262 = vrot.lane.b32.xlu1 %v10916_v54, %s12753_s1 }
 0x1a3   :  { %2008 = vrot.lane.b32.xlu0 %v13997_v18, %s12752_s24  ;;  %v19456_v2 = vand.u32 4294901760, %v14008_v42 }
 0x1a4   :  { %v2505_v24 = vpop.permute.xlu1 %2504 }
 0x1a5   :  { %v1739_v0 = vpop.permute.xlu0 %1738  ;;  %v3135_v28 = vsel %vm3117_vm8, %v3070_v14, %v2505_v24  ;;  %v3618_v34 = vsub.f32 %v14008_v42, %v19456_v2 }
 0x1a6   :  { %v3244_v8 = vsel %vm3191_vm9, %v3135_v28, 0  ;;  %1498 = vrot.lane.b32.xlu1 %v10916_v54, %s12750_s30 }
 0x1a7   :  { %1244 = vrot.lane.b32.xlu0 %v13997_v18, %s12749_s27  ;;  %v14026_v50 = vand.u32 4294901760, %v3244_v8  ;;  %v3619_v44 = vand.u32 4294901760, %v3618_v34  ;;  %v14050_v34 = vpop.f32.mrf.mxu0 }
 0x1a8   :  { %v14034_v38 = vpop.permute.xlu1 %974  ;;  %19788 = vst [vmem:[#allocation34_spill] sm:$0xff] %v14050_v34 }
 0x1a9   :  { %19787 = vst [vmem:[#allocation33_spill] sm:$0xff] %v14026_v50  ;;  %v14036_v52 = vpop.permute.xlu0 %720  ;;  %v14039_v9 = vsub.f32 %v3244_v8, %v14026_v50  ;;  %11820 = vmatprep.mubr.f32.mxu0 %v3619_v44  ;;  %11921 = vmatmul.mubr.f32.gmra.mxu1 %v14026_v50  ;;  %v10981_v44 = vld [vmem:[%s19403_s0 + $0x15a] sm:$0xff]  ;;  %v14059_v50 = vpop.f32.mrf.mxu1 }
 0x1aa   :  { %2518 = vrot.lane.b32.xlu1 %v10980_v59, %s12754_s20  ;;  %19789 = vst [vmem:[#allocation35_spill] sm:$0xff] %v14059_v50 }
 0x1ab   :  { %2264 = vrot.lane.b32.xlu0 %v10917_v60, %s12753_s1  ;;  %v19461_v26 = vand.u32 4294901760, %v14039_v9 }
 0x1ac   :  { %v1995_v14 = vpop.permute.xlu1 %1994 }
 0x1ad   :  { %v1741_v24 = vpop.permute.xlu0 %1740  ;;  %v3628_v28 = vsub.f32 %v14039_v9, %v19461_v26 }
 0x1ae   :  { %1500 = vrot.lane.b32.xlu1 %v10917_v60, %s12750_s30 }
 0x1af   :  { %734 = vrot.lane.b32.xlu0 %v10916_v54, %s12748_s18  ;;  %v3629_v8 = vand.u32 4294901760, %v3628_v28  ;;  %v11904_v54 = vpop.f32.mrf.mxu1 }
 0x1b0   :  { %v14055_v2 = vpop.permute.xlu1 %1230 }
 0x1b1   :  { %v14057_v17 = vpop.permute.xlu0 %976  ;;  %v11804_v62 = vpop.f32.mrf.mxu0  ;;  %11821 = vmatmul.mubr.f32.gmra.mxu0 %v3629_v8  ;;  %v14076_v8 = vld [vmem:[%s19403_s0 + $0x168] sm:$0xff] }
 0x1b2   :  { %v3512_v26 = vadd.f32 %v11804_v62, %v13826_v61  ;;  %2520 = vrot.lane.b32.xlu1 %v10981_v44, %s12754_s20  ;;  %v2746_v62 = vsel %vm2727_vm2, %v2681_v53, %v13921_v39 }
 0x1b3   :  { %1754 = vrot.lane.b32.xlu0 %v10980_v59, %s12751_s15 }
 0x1b4   :  { %v2251_v28 = vpop.permute.xlu1 %2250  ;;  %v14064_v41 = vadd.f32 %v11904_v54, %v3512_v26  ;;  %v2811_v26 = vsel %vm2792_vm3, %v2746_v62, %v13942_v12  ;;  %v2682_v62 = vsel %vm2662_vm1, %v13452_v31, %v13923_v55  ;;  %v14110_v31 = vld [vmem:[%s19403_s0 + $0x170] sm:$0xff] }
 0x1b5   :  { %v1997_v34 = vpop.permute.xlu0 %1996  ;;  %v2876_v27 = vsel %vm2857_vm4, %v2811_v26, %v13967_v21 }
 0x1b6   :  { %19790 = vst [vmem:[#allocation36_spill] sm:$0xff] %v14064_v41  ;;  %990 = vrot.lane.b32.xlu1 %v10980_v59, %s12747_s17  ;;  %v2941_v51 = vsel %vm2922_vm5, %v2876_v27, %v1739_v0  ;;  %v2747_v0 = vsel %vm2727_vm2, %v2682_v62, %v13944_v5 }
 0x1b7   :  { %736 = vrot.lane.b32.xlu0 %v10917_v60, %s12748_s18  ;;  %v3006_v53 = vsel %vm2987_vm6, %v2941_v51, %v1995_v14  ;;  %v2812_v55 = vsel %vm2792_vm3, %v2747_v0, %v13969_v58  ;;  %v10919_v0 = vld [vmem:[%s19403_s0 + $0x171] sm:$0xff] }
 0x1b8   :  { %v14080_v54 = vpop.permute.xlu1 %1486  ;;  %v3071_v39 = vsel %vm3052_vm7, %v3006_v53, %v2251_v28  ;;  %v10918_v28 = vld [vmem:[%s19403_s0 + $0x169] sm:$0xff]  ;;  %v2877_v5 = vsel %vm2857_vm4, %v2812_v55, %v14001_v57 }
 0x1b9   :  { %v14082_v41 = vpop.permute.xlu0 %1232  ;;  %v2942_v51 = vsel %vm2922_vm5, %v2877_v5, %v1741_v24 }
 0x1ba   :  { %2010 = vrot.lane.b32.xlu1 %v14076_v8, %s12752_s24  ;;  %v3007_v58 = vsel %vm2987_vm6, %v2942_v51, %v1997_v34 }
 0x1bb   :  { %1756 = vrot.lane.b32.xlu0 %v10981_v44, %s12751_s15 }
 0x1bc   :  { %v2507_v59 = vpop.permute.xlu1 %2506 }
 0x1bd   :  { %v2253_v12 = vpop.permute.xlu0 %2252  ;;  %v3136_v60 = vsel %vm3117_vm8, %v3071_v39, %v2507_v59 }
 0x1be   :  { %v3247_v21 = vsel %vm3191_vm9, %v3136_v60, 0  ;;  %1246 = vrot.lane.b32.xlu1 %v14076_v8, %s12749_s27  ;;  %v3072_v39 = vsel %vm3052_vm7, %v3007_v58, %v2253_v12  ;;  %v10982_v12 = vld [vmem:[%s19403_s0 + $0x16a] sm:$0xff] }
 0x1bf   :  { %992 = vrot.lane.b32.xlu0 %v10981_v44, %s12747_s17  ;;  %v14102_v14 = vand.u32 4294901760, %v3247_v21 }
 0x1c0   :  { %v14114_v26 = vpop.permute.xlu1 %1488 }
 0x1c1   :  { %19791 = vst [vmem:[#allocation37_spill] sm:$0xff] %v14102_v14  ;;  %v14116_v44 = vpop.permute.xlu0 %722  ;;  %v14121_v27 = vsub.f32 %v3247_v21, %v14102_v14  ;;  %11923 = vmatprep.mubr.f32.mxu1 %v14102_v14 }
 0x1c2   :  { %2266 = vrot.lane.b32.xlu1 %v10918_v28, %s12753_s1 }
 0x1c3   :  { %2012 = vrot.lane.b32.xlu0 %v14110_v31, %s12752_s24  ;;  %v19466_v53 = vand.u32 4294901760, %v14121_v27 }
 0x1c4   :  { %v2509_v59 = vpop.permute.xlu1 %2508 }
 0x1c5   :  { %v1743_v57 = vpop.permute.xlu0 %1742  ;;  %v3137_v60 = vsel %vm3117_vm8, %v3072_v39, %v2509_v59  ;;  %v3638_v62 = vsub.f32 %v14121_v27, %v19466_v53 }
 0x1c6   :  { %v3250_v24 = vsel %vm3191_vm9, %v3137_v60, 0  ;;  %1502 = vrot.lane.b32.xlu1 %v10918_v28, %s12750_s30 }
 0x1c7   :  { %1248 = vrot.lane.b32.xlu0 %v14110_v31, %s12749_s27  ;;  %v14139_v34 = vand.u32 4294901760, %v3250_v24  ;;  %v3639_v21 = vand.u32 4294901760, %v3638_v62  ;;  %v14163_v62 = vpop.f32.mrf.mxu0 }
 0x1c8   :  { %v14147_v55 = vpop.permute.xlu1 %978  ;;  %19794 = vst [vmem:[#allocation40_spill] sm:$0xff] %v14163_v62 }
 0x1c9   :  { %19792 = vst [vmem:[#allocation38_spill] sm:$0xff] %v14139_v34  ;;  %v14149_v5 = vpop.permute.xlu0 %724  ;;  %v14152_v51 = vsub.f32 %v3250_v24, %v14139_v34  ;;  %11823 = vmatprep.mubr.f32.mxu0 %v3639_v21  ;;  %11924 = vmatmul.mubr.f32.gmra.mxu1 %v14139_v34  ;;  %v10983_v21 = vld [vmem:[%s19403_s0 + $0x172] sm:$0xff]  ;;  %v14172_v34 = vpop.f32.mrf.mxu1 }
 0x1ca   :  { %2522 = vrot.lane.b32.xlu1 %v10982_v12, %s12754_s20  ;;  %19795 = vst [vmem:[#allocation41_spill] sm:$0xff] %v14172_v34 }
 0x1cb   :  { %19793 = vst [vmem:[#allocation39_spill] sm:$0xff] %v14152_v51  ;;  %2268 = vrot.lane.b32.xlu0 %v10919_v0, %s12753_s1  ;;  %v19471_v58 = vand.u32 4294901760, %v14152_v51 }
 0x1cc   :  { %v1999_v39 = vpop.permute.xlu1 %1998 }
 0x1cd   :  { %v1745_v59 = vpop.permute.xlu0 %1744  ;;  %v3648_v60 = vsub.f32 %v14152_v51, %v19471_v58  ;;  %v2683_v51 = vsel %vm2662_vm1, %v13524_v29, %v14003_v20 }
 0x1ce   :  { %1504 = vrot.lane.b32.xlu1 %v10919_v0, %s12750_s30 }
 0x1cf   :  { %738 = vrot.lane.b32.xlu0 %v10918_v28, %s12748_s18  ;;  %v3649_v24 = vand.u32 4294901760, %v3648_v60  ;;  %v11907_v28 = vpop.f32.mrf.mxu1 }
 0x1d0   :  { %v14168_v53 = vpop.permute.xlu1 %1234 }
 0x1d1   :  { %v14170_v50 = vpop.permute.xlu0 %980  ;;  %v11807_v14 = vpop.f32.mrf.mxu0  ;;  %11824 = vmatmul.mubr.f32.gmra.mxu0 %v3649_v24  ;;  %v10856_v24 = vld [vmem:[%s19403_s0 + $0x180] sm:$0xff] }
 0x1d2   :  { %v3532_v58 = vadd.f32 %v11807_v14, %v13826_v61  ;;  %2524 = vrot.lane.b32.xlu1 %v10983_v21, %s12754_s20  ;;  %v2748_v14 = vsel %vm2727_vm2, %v2683_v51, %v14034_v38 }
 0x1d3   :  { %1758 = vrot.lane.b32.xlu0 %v10982_v12, %s12751_s15  ;;  %v2813_v34 = vsel %vm2792_vm3, %v2748_v14, %v14055_v2  ;;  %v2684_v14 = vsel %vm2662_vm1, %v13558_v37, %v14036_v52 }
 0x1d4   :  { %v2255_v60 = vpop.permute.xlu1 %2254  ;;  %v14177_v30 = vadd.f32 %v11907_v28, %v3532_v58  ;;  %v2878_v29 = vsel %vm2857_vm4, %v2813_v34, %v14080_v54 }
 0x1d5   :  { %v2001_v62 = vpop.permute.xlu0 %2000  ;;  %v2943_v20 = vsel %vm2922_vm5, %v2878_v29, %v1743_v57  ;;  %v2749_v57 = vsel %vm2727_vm2, %v2684_v14, %v14057_v17 }
 0x1d6   :  { %19796 = vst [vmem:[#allocation42_spill] sm:$0xff] %v14177_v30  ;;  %994 = vrot.lane.b32.xlu1 %v10982_v12, %s12747_s17  ;;  %v3008_v38 = vsel %vm2987_vm6, %v2943_v20, %v1999_v39  ;;  %v10920_v39 = vld [vmem:[%s19403_s0 + $0x181] sm:$0xff]  ;;  %v2814_v37 = vsel %vm2792_vm3, %v2749_v57, %v14082_v41 }
 0x1d7   :  { %740 = vrot.lane.b32.xlu0 %v10919_v0, %s12748_s18  ;;  %v3073_v12 = vsel %vm3052_vm7, %v3008_v38, %v2255_v60  ;;  %v10857_v60 = vld [vmem:[%s19403_s0 + $0x188] sm:$0xff]  ;;  %v2879_v17 = vsel %vm2857_vm4, %v2814_v37, %v14114_v26 }
 0x1d8   :  { %v14191_v58 = vpop.permute.xlu1 %1490  ;;  %v2944_v29 = vsel %vm2922_vm5, %v2879_v17, %v1745_v59 }
 0x1d9   :  { %v14193_v28 = vpop.permute.xlu0 %1236  ;;  %v3009_v41 = vsel %vm2987_vm6, %v2944_v29, %v2001_v62 }
 0x1da   :  { %2014 = vrot.lane.b32.xlu1 %v10856_v24, %s12752_s24 }
 0x1db   :  { %1760 = vrot.lane.b32.xlu0 %v10983_v21, %s12751_s15 }
 0x1dc   :  { %v2511_v0 = vpop.permute.xlu1 %2510 }
 0x1dd   :  { %v2257_v51 = vpop.permute.xlu0 %2256  ;;  %v3138_v2 = vsel %vm3117_vm8, %v3073_v12, %v2511_v0 }
 0x1de   :  { %v3253_v54 = vsel %vm3191_vm9, %v3138_v2, 0  ;;  %1250 = vrot.lane.b32.xlu1 %v10856_v24, %s12749_s27  ;;  %v3074_v38 = vsel %vm3052_vm7, %v3009_v41, %v2257_v51  ;;  %v10984_v51 = vld [vmem:[%s19403_s0 + $0x182] sm:$0xff] }
 0x1df   :  { %996 = vrot.lane.b32.xlu0 %v10983_v21, %s12747_s17  ;;  %v14211_v34 = vand.u32 4294901760, %v3253_v54 }
 0x1e0   :  { %v14221_v52 = vpop.permute.xlu1 %1492 }
 0x1e1   :  { %19797 = vst [vmem:[#allocation43_spill] sm:$0xff] %v14211_v34  ;;  %v14223_v24 = vpop.permute.xlu0 %726  ;;  %v14228_v21 = vsub.f32 %v3253_v54, %v14211_v34  ;;  %11926 = vmatprep.mubr.f32.mxu1 %v14211_v34  ;;  %v10921_v54 = vld [vmem:[%s19403_s0 + $0x189] sm:$0xff] }
 0x1e2   :  { %2270 = vrot.lane.b32.xlu1 %v10920_v39, %s12753_s1 }
 0x1e3   :  { %19798 = vst [vmem:[#allocation44_spill] sm:$0xff] %v14228_v21  ;;  %2016 = vrot.lane.b32.xlu0 %v10857_v60, %s12752_s24  ;;  %v19476_v20 = vand.u32 4294901760, %v14228_v21 }
 0x1e4   :  { %v2513_v12 = vpop.permute.xlu1 %2512 }
 0x1e5   :  { %v1747_v0 = vpop.permute.xlu0 %1746  ;;  %v3139_v26 = vsel %vm3117_vm8, %v3074_v38, %v2513_v12  ;;  %v3658_v2 = vsub.f32 %v14228_v21, %v19476_v20  ;;  %v14271_v12 = vpop.f32.mrf.mxu0 }
 0x1e6   :  { %v3256_v59 = vsel %vm3191_vm9, %v3139_v26, 0  ;;  %1506 = vrot.lane.b32.xlu1 %v10920_v39, %s12750_s30  ;;  %v132_v39 = vld [vmem:[%s19403_s0 + $0x1b1] sm:$0xff]  ;;  %19801 = vst [vmem:[#allocation47_spill] sm:$0xff] %v14271_v12  ;;  %v14280_v20 = vpop.f32.mrf.mxu1 }
 0x1e7   :  { %1252 = vrot.lane.b32.xlu0 %v10857_v60, %s12749_s27  ;;  %v14244_v14 = vand.u32 4294901760, %v3256_v59  ;;  %v3659_v62 = vand.u32 4294901760, %v3658_v2  ;;  %v10985_v2 = vld [vmem:[%s19403_s0 + $0x18a] sm:$0xff]  ;;  %19802 = vst [vmem:[#allocation48_spill] sm:$0xff] %v14280_v20 }
 0x1e8   :  { %v14252_v57 = vpop.permute.xlu1 %982 }
 0x1e9   :  { %19799 = vst [vmem:[#allocation45_spill] sm:$0xff] %v14244_v14  ;;  %v14254_v37 = vpop.permute.xlu0 %728  ;;  %v14257_v17 = vsub.f32 %v3256_v59, %v14244_v14  ;;  %11826 = vmatprep.mubr.f32.mxu0 %v3659_v62  ;;  %11927 = vmatmul.mubr.f32.gmra.mxu1 %v14244_v14 }
 0x1ea   :  { %2526 = vrot.lane.b32.xlu1 %v10984_v51, %s12754_s20 }
 0x1eb   :  { %19800 = vst [vmem:[#allocation46_spill] sm:$0xff] %v14257_v17  ;;  %2272 = vrot.lane.b32.xlu0 %v10921_v54, %s12753_s1  ;;  %v19477_v60 = vand.u32 4294901760, %v14257_v17 }
 0x1ec   :  { %v2003_v29 = vpop.permute.xlu1 %2002 }
 0x1ed   :  { %v1749_v41 = vpop.permute.xlu0 %1748  ;;  %v3668_v38 = vsub.f32 %v14257_v17, %v19477_v60 }
 0x1ee   :  { %1508 = vrot.lane.b32.xlu1 %v10921_v54, %s12750_s30  ;;  %v11910_v54 = vpop.f32.mrf.mxu1 }
 0x1ef   :  { %742 = vrot.lane.b32.xlu0 %v132_v39, %s12748_s18  ;;  %v3669_v26 = vand.u32 4294901760, %v3668_v38  ;;  %v196_v39 = vld [vmem:[%s19403_s0 + $0x1b2] sm:$0xff] }
 0x1f0   :  { %v14276_v59 = vpop.permute.xlu1 %1238  ;;  %v133_v38 = vld [vmem:[%s19403_s0 + $0x1b9] sm:$0xff] }
 0x1f1   :  { %v14278_v62 = vpop.permute.xlu0 %984  ;;  %v11810_v30 = vpop.f32.mrf.mxu0  ;;  %11827 = vmatmul.mubr.f32.gmra.mxu0 %v3669_v26  ;;  %v10858_v26 = vld [vmem:[%s19403_s0 + $0x198] sm:$0xff] }
 0x1f2   :  { %v3552_v60 = vadd.f32 %v11810_v30, %v13826_v61  ;;  %2528 = vrot.lane.b32.xlu1 %v10985_v2, %s12754_s20  ;;  %v2685_v30 = vsel %vm2662_vm1, %v13630_v48, %v14116_v44 }
 0x1f3   :  { %1762 = vrot.lane.b32.xlu0 %v10984_v51, %s12751_s15  ;;  %v2750_v51 = vsel %vm2727_vm2, %v2685_v30, %v14147_v55 }
 0x1f4   :  { %v2259_v12 = vpop.permute.xlu1 %2258  ;;  %v14291_v20 = vadd.f32 %v11910_v54, %v3552_v60  ;;  %v2815_v34 = vsel %vm2792_vm3, %v2750_v51, %v14168_v53  ;;  %v197_v53 = vld [vmem:[%s19403_s0 + $0x1ba] sm:$0xff] }
 0x1f5   :  { %v2005_v14 = vpop.permute.xlu0 %2004  ;;  %v2880_v48 = vsel %vm2857_vm4, %v2815_v34, %v14191_v58 }
 0x1f6   :  { %19803 = vst [vmem:[#allocation49_spill] sm:$0xff] %v14291_v20  ;;  %998 = vrot.lane.b32.xlu1 %v196_v39, %s12747_s17  ;;  %v2945_v44 = vsel %vm2922_vm5, %v2880_v48, %v1747_v0  ;;  %v14318_v39 = vld [vmem:[%s19403_s0 + $0x1c8] sm:$0xff] }
 0x1f7   :  { %744 = vrot.lane.b32.xlu0 %v133_v38, %s12748_s18  ;;  %v3010_v55 = vsel %vm2987_vm6, %v2945_v44, %v2003_v29 }
 0x1f8   :  { %v14305_v60 = vpop.permute.xlu1 %1494  ;;  %v3075_v38 = vsel %vm3052_vm7, %v3010_v55, %v2259_v12  ;;  %v10922_v12 = vld [vmem:[%s19403_s0 + $0x199] sm:$0xff] }
 0x1f9   :  { %v14307_v54 = vpop.permute.xlu0 %1240 }
 0x1fa   :  { %2018 = vrot.lane.b32.xlu1 %v10858_v26, %s12752_s24 }
 0x1fb   :  { %1764 = vrot.lane.b32.xlu0 %v10985_v2, %s12751_s15  ;;  %v2686_v2 = vsel %vm2662_vm1, %v13664_v49, %v14149_v5  ;;  %v10859_v49 = vld [vmem:[%s19403_s0 + $0x1a0] sm:$0xff] }
 0x1fc   :  { %v2515_v58 = vpop.permute.xlu1 %2514  ;;  %v2751_v30 = vsel %vm2727_vm2, %v2686_v2, %v14170_v50 }
 0x1fd   :  { %v2261_v34 = vpop.permute.xlu0 %2260  ;;  %v3140_v0 = vsel %vm3117_vm8, %v3075_v38, %v2515_v58  ;;  %v2816_v5 = vsel %vm2792_vm3, %v2751_v30, %v14193_v28 }
 0x1fe   :  { %v3259_v29 = vsel %vm3191_vm9, %v3140_v0, 0  ;;  %1254 = vrot.lane.b32.xlu1 %v14318_v39, %s12749_s27  ;;  %v2881_v50 = vsel %vm2857_vm4, %v2816_v5, %v14221_v52  ;;  %v14364_v52 = vld [vmem:[%s19403_s0 + $0x1d0] sm:$0xff] }
 0x1ff   :  { %1000 = vrot.lane.b32.xlu0 %v197_v53, %s12747_s17  ;;  %v14334_v51 = vand.u32 4294901760, %v3259_v29  ;;  %v2946_v55 = vsel %vm2922_vm5, %v2881_v50, %v1749_v41  ;;  %v10732_v53 = vld [vmem:[%s19403_s0 + $0x1c9] sm:$0xff] }
 0x200   :  { %v14344_v26 = vpop.permute.xlu1 %1496  ;;  %v3011_v28 = vsel %vm2987_vm6, %v2946_v55, %v2005_v14 }
 0x201   :  { %19804 = vst [vmem:[#allocation50_spill] sm:$0xff] %v14334_v51  ;;  %v14346_v48 = vpop.permute.xlu0 %730  ;;  %v14351_v44 = vsub.f32 %v3259_v29, %v14334_v51  ;;  %11929 = vmatprep.mubr.f32.mxu1 %v14334_v51  ;;  %v3076_v58 = vsel %vm3052_vm7, %v3011_v28, %v2261_v34  ;;  %v10986_v34 = vld [vmem:[%s19403_s0 + $0x19a] sm:$0xff]  ;;  %v10733_v28 = vld [vmem:[%s19403_s0 + $0x1d1] sm:$0xff] }
 0x202   :  { %2274 = vrot.lane.b32.xlu1 %v10922_v12, %s12753_s1 }
 0x203   :  { %19805 = vst [vmem:[#allocation51_spill] sm:$0xff] %v14351_v44  ;;  %2020 = vrot.lane.b32.xlu0 %v10859_v49, %s12752_s24  ;;  %v19482_v38 = vand.u32 4294901760, %v14351_v44  ;;  %v10923_v49 = vld [vmem:[%s19403_s0 + $0x1a1] sm:$0xff] }
 0x204   :  { %v2517_v41 = vpop.permute.xlu1 %2516 }
 0x205   :  { %v1751_v0 = vpop.permute.xlu0 %1750  ;;  %v3141_v2 = vsel %vm3117_vm8, %v3076_v58, %v2517_v41  ;;  %v3678_v14 = vsub.f32 %v14351_v44, %v19482_v38  ;;  %v2687_v44 = vsel %vm2662_vm1, %v13736_v25, %v14223_v24 }
 0x206   :  { %v3262_v29 = vsel %vm3191_vm9, %v3141_v2, 0  ;;  %1510 = vrot.lane.b32.xlu1 %v10732_v53, %s12750_s30 }
 0x207   :  { %1256 = vrot.lane.b32.xlu0 %v14364_v52, %s12749_s27  ;;  %v14376_v30 = vand.u32 4294901760, %v3262_v29  ;;  %v3679_v12 = vand.u32 4294901760, %v3678_v14 }
 0x208   :  { %v14384_v5 = vpop.permute.xlu1 %986 }
 0x209   :  { %19806 = vst [vmem:[#allocation52_spill] sm:$0xff] %v14376_v30  ;;  %v14386_v50 = vpop.permute.xlu0 %732  ;;  %v14389_v55 = vsub.f32 %v3262_v29, %v14376_v30  ;;  %11829 = vmatprep.mubr.f32.mxu0 %v3679_v12  ;;  %11930 = vmatmul.mubr.f32.gmra.mxu1 %v14376_v30  ;;  %v14403_v29 = vpop.f32.mrf.mxu0 }
 0x20a   :  { %2530 = vrot.lane.b32.xlu1 %v10986_v34, %s12754_s20  ;;  %19808 = vst [vmem:[#allocation54_spill] sm:$0xff] %v14403_v29  ;;  %v10987_v34 = vld [vmem:[%s19403_s0 + $0x1a2] sm:$0xff] }
 0x20b   :  { %19807 = vst [vmem:[#allocation53_spill] sm:$0xff] %v14389_v55  ;;  %2276 = vrot.lane.b32.xlu0 %v10923_v49, %s12753_s1  ;;  %v19483_v58 = vand.u32 4294901760, %v14389_v55  ;;  %v10796_v49 = vld [vmem:[%s19403_s0 + $0x1ca] sm:$0xff] }
 0x20c   :  { %v2007_v41 = vpop.permute.xlu1 %2006 }
 0x20d   :  { %v1753_v2 = vpop.permute.xlu0 %1752  ;;  %v3688_v14 = vsub.f32 %v14389_v55, %v19483_v58  ;;  %v14415_v58 = vpop.f32.mrf.mxu1 }
 0x20e   :  { %1512 = vrot.lane.b32.xlu1 %v10733_v28, %s12750_s30  ;;  %19809 = vst [vmem:[#allocation55_spill] sm:$0xff] %v14415_v58 }
 0x20f   :  { %746 = vrot.lane.b32.xlu0 %v10732_v53, %s12748_s18  ;;  %v3689_v12 = vand.u32 4294901760, %v3688_v14  ;;  %v11913_v14 = vpop.f32.mrf.mxu1 }
 0x210   :  { %v14411_v38 = vpop.permute.xlu1 %1242 }
 0x211   :  { %v14413_v20 = vpop.permute.xlu0 %988  ;;  %v11813_v30 = vpop.f32.mrf.mxu0  ;;  %11830 = vmatmul.mubr.f32.gmra.mxu0 %v3689_v12  ;;  %v14432_v12 = vld [vmem:[%s19403_s0 + $0x1e0] sm:$0xff] }
 0x212   :  { %v3572_v53 = vadd.f32 %v11813_v30, %v13826_v61  ;;  %2532 = vrot.lane.b32.xlu1 %v10987_v34, %s12754_s20  ;;  %v2752_v30 = vsel %vm2727_vm2, %v2687_v44, %v14252_v57  ;;  %v10797_v34 = vld [vmem:[%s19403_s0 + $0x1d2] sm:$0xff] }
 0x213   :  { %1766 = vrot.lane.b32.xlu0 %v10796_v49, %s12751_s15 }
 0x214   :  { %v2263_v29 = vpop.permute.xlu1 %2262  ;;  %v14420_v55 = vadd.f32 %v11913_v14, %v3572_v53  ;;  %v2817_v53 = vsel %vm2792_vm3, %v2752_v30, %v14276_v59 }
 0x215   :  { %v2009_v51 = vpop.permute.xlu0 %2008 }
 0x216   :  { %19810 = vst [vmem:[#allocation56_spill] sm:$0xff] %v14420_v55  ;;  %1002 = vrot.lane.b32.xlu1 %v10796_v49, %s12747_s17  ;;  %v2688_v55 = vsel %vm2662_vm1, %v13770_v33, %v14254_v37  ;;  %v14469_v33 = vld [vmem:[%s19403_s0 + $0x1e8] sm:$0xff] }
 0x217   :  { %748 = vrot.lane.b32.xlu0 %v10733_v28, %s12748_s18  ;;  %v2882_v28 = vsel %vm2857_vm4, %v2817_v53, %v14305_v60 }
 0x218   :  { %v14439_v25 = vpop.permute.xlu1 %1498  ;;  %v2947_v57 = vsel %vm2922_vm5, %v2882_v28, %v1751_v0  ;;  %v2753_v0 = vsel %vm2727_vm2, %v2688_v55, %v14278_v62 }
 0x219   :  { %v14441_v24 = vpop.permute.xlu0 %1244  ;;  %v3012_v44 = vsel %vm2987_vm6, %v2947_v57, %v2007_v41  ;;  %v2818_v37 = vsel %vm2792_vm3, %v2753_v0, %v14307_v54  ;;  %v10925_v0 = vld [vmem:[%s19403_s0 + $0x1e9] sm:$0xff] }
 0x21a   :  { %2022 = vrot.lane.b32.xlu1 %v14432_v12, %s12752_s24  ;;  %v3077_v49 = vsel %vm3052_vm7, %v3012_v44, %v2263_v29  ;;  %v10924_v29 = vld [vmem:[%s19403_s0 + $0x1e1] sm:$0xff]  ;;  %v2883_v62 = vsel %vm2857_vm4, %v2818_v37, %v14344_v26 }
 0x21b   :  { %1768 = vrot.lane.b32.xlu0 %v10797_v34, %s12751_s15  ;;  %v2948_v28 = vsel %vm2922_vm5, %v2883_v62, %v1753_v2 }
 0x21c   :  { %v2519_v14 = vpop.permute.xlu1 %2518  ;;  %v3013_v54 = vsel %vm2987_vm6, %v2948_v28, %v2009_v51 }
 0x21d   :  { %v2265_v59 = vpop.permute.xlu0 %2264  ;;  %v3142_v30 = vsel %vm3117_vm8, %v3077_v49, %v2519_v14 }
 0x21e   :  { %v3265_v60 = vsel %vm3191_vm9, %v3142_v30, 0  ;;  %1258 = vrot.lane.b32.xlu1 %v14432_v12, %s12749_s27  ;;  %v3078_v44 = vsel %vm3052_vm7, %v3013_v54, %v2265_v59  ;;  %v10988_v59 = vld [vmem:[%s19403_s0 + $0x1e2] sm:$0xff] }
 0x21f   :  { %1004 = vrot.lane.b32.xlu0 %v10797_v34, %s12747_s17  ;;  %v14461_v41 = vand.u32 4294901760, %v3265_v60 }
 0x220   :  { %v14473_v53 = vpop.permute.xlu1 %1500 }
 0x221   :  { %19811 = vst [vmem:[#allocation57_spill] sm:$0xff] %v14461_v41  ;;  %v14475_v34 = vpop.permute.xlu0 %734  ;;  %v14480_v55 = vsub.f32 %v3265_v60, %v14461_v41  ;;  %11932 = vmatprep.mubr.f32.mxu1 %v14461_v41 }
 0x222   :  { %2278 = vrot.lane.b32.xlu1 %v10924_v29, %s12753_s1 }
 0x223   :  { %19812 = vst [vmem:[#allocation58_spill] sm:$0xff] %v14480_v55  ;;  %2024 = vrot.lane.b32.xlu0 %v14469_v33, %s12752_s24  ;;  %v19492_v57 = vand.u32 4294901760, %v14480_v55 }
 0x224   :  { %v2521_v49 = vpop.permute.xlu1 %2520 }
 0x225   :  { %v1755_v26 = vpop.permute.xlu0 %1754  ;;  %v3143_v14 = vsel %vm3117_vm8, %v3078_v44, %v2521_v49  ;;  %v3698_v30 = vsub.f32 %v14480_v55, %v19492_v57  ;;  %v2689_v55 = vsel %vm2662_vm1, %v13850_v3, %v14346_v48 }
 0x226   :  { %v3268_v2 = vsel %vm3191_vm9, %v3143_v14, 0  ;;  %1514 = vrot.lane.b32.xlu1 %v10924_v29, %s12750_s30 }
 0x227   :  { %1260 = vrot.lane.b32.xlu0 %v14469_v33, %s12749_s27  ;;  %v14498_v51 = vand.u32 4294901760, %v3268_v2  ;;  %v3699_v60 = vand.u32 4294901760, %v3698_v30  ;;  %v14522_v30 = vpop.f32.mrf.mxu0 }
 0x228   :  { %v14506_v37 = vpop.permute.xlu1 %990  ;;  %19815 = vst [vmem:[#allocation61_spill] sm:$0xff] %v14522_v30 }
 0x229   :  { %19813 = vst [vmem:[#allocation59_spill] sm:$0xff] %v14498_v51  ;;  %v14508_v62 = vpop.permute.xlu0 %736  ;;  %v14511_v28 = vsub.f32 %v3268_v2, %v14498_v51  ;;  %11832 = vmatprep.mubr.f32.mxu0 %v3699_v60  ;;  %11933 = vmatmul.mubr.f32.gmra.mxu1 %v14498_v51  ;;  %v10989_v60 = vld [vmem:[%s19403_s0 + $0x1ea] sm:$0xff]  ;;  %v14531_v51 = vpop.f32.mrf.mxu1 }
 0x22a   :  { %2534 = vrot.lane.b32.xlu1 %v10988_v59, %s12754_s20  ;;  %19816 = vst [vmem:[#allocation62_spill] sm:$0xff] %v14531_v51 }
 0x22b   :  { %19814 = vst [vmem:[#allocation60_spill] sm:$0xff] %v14511_v28  ;;  %2280 = vrot.lane.b32.xlu0 %v10925_v0, %s12753_s1  ;;  %v19497_v54 = vand.u32 4294901760, %v14511_v28 }
 0x22c   :  { %v2011_v44 = vpop.permute.xlu1 %2010 }
 0x22d   :  { %v1757_v49 = vpop.permute.xlu0 %1756  ;;  %v3708_v14 = vsub.f32 %v14511_v28, %v19497_v54 }
 0x22e   :  { %1516 = vrot.lane.b32.xlu1 %v10925_v0, %s12750_s30 }
 0x22f   :  { %750 = vrot.lane.b32.xlu0 %v10924_v29, %s12748_s18  ;;  %v3709_v2 = vand.u32 4294901760, %v3708_v14  ;;  %v11916_v29 = vpop.f32.mrf.mxu1 }
 0x230   :  { %v14527_v57 = vpop.permute.xlu1 %1246 }
 0x231   :  { %v14529_v58 = vpop.permute.xlu0 %992  ;;  %v11816_v41 = vpop.f32.mrf.mxu0  ;;  %11833 = vmatmul.mubr.f32.gmra.mxu0 %v3709_v2 }
 0x232   :  { %v3592_v54 = vadd.f32 %v11816_v41, %v13826_v61  ;;  %2536 = vrot.lane.b32.xlu1 %v10989_v60, %s12754_s20  ;;  %v2754_v61 = vsel %vm2727_vm2, %v2689_v55, %v14384_v5  ;;  %v14548_v41 = vld [vmem:[%s19403_s0 + $0x1f8] sm:$0xff]  ;;  %v14644_v51 = vpop.f32.mrf.mxu1 }
 0x233   :  { %1770 = vrot.lane.b32.xlu0 %v10988_v59, %s12751_s15  ;;  %19823 = vst [vmem:[#allocation69_spill] sm:$0xff] %v14644_v51  ;;  %v14666_v51 = vld [vmem:[%s19403_s0 + $0x210] sm:$0xff] }
 0x234   :  { %v2267_v14 = vpop.permute.xlu1 %2266  ;;  %v14536_v28 = vadd.f32 %v11916_v29, %v3592_v54  ;;  %v2819_v54 = vsel %vm2792_vm3, %v2754_v61, %v14411_v38  ;;  %v2690_v61 = vsel %vm2662_vm1, %v13884_v4, %v14386_v50  ;;  %v14582_v4 = vld [vmem:[%s19403_s0 + $0x200] sm:$0xff] }
 0x235   :  { %v2013_v30 = vpop.permute.xlu0 %2012  ;;  %v2884_v3 = vsel %vm2857_vm4, %v2819_v54, %v14439_v25 }
 0x236   :  { %19817 = vst [vmem:[#allocation63_spill] sm:$0xff] %v14536_v28  ;;  %1006 = vrot.lane.b32.xlu1 %v10988_v59, %s12747_s17  ;;  %v2949_v48 = vsel %vm2922_vm5, %v2884_v3, %v1755_v26  ;;  %v2755_v26 = vsel %vm2727_vm2, %v2690_v61, %v14413_v20 }
 0x237   :  { %752 = vrot.lane.b32.xlu0 %v10925_v0, %s12748_s18  ;;  %v3014_v5 = vsel %vm2987_vm6, %v2949_v48, %v2011_v44  ;;  %v2820_v50 = vsel %vm2792_vm3, %v2755_v26, %v14441_v24  ;;  %v10927_v26 = vld [vmem:[%s19403_s0 + $0x201] sm:$0xff] }
 0x238   :  { %v14552_v2 = vpop.permute.xlu1 %1502  ;;  %v3079_v55 = vsel %vm3052_vm7, %v3014_v5, %v2267_v14  ;;  %v10926_v14 = vld [vmem:[%s19403_s0 + $0x1f9] sm:$0xff]  ;;  %v2885_v20 = vsel %vm2857_vm4, %v2820_v50, %v14473_v53 }
 0x239   :  { %v14554_v29 = vpop.permute.xlu0 %1248  ;;  %v2950_v48 = vsel %vm2922_vm5, %v2885_v20, %v1757_v49 }
 0x23a   :  { %2026 = vrot.lane.b32.xlu1 %v14548_v41, %s12752_s24  ;;  %v3015_v24 = vsel %vm2987_vm6, %v2950_v48, %v2013_v30 }
 0x23b   :  { %1772 = vrot.lane.b32.xlu0 %v10989_v60, %s12751_s15 }
 0x23c   :  { %v2523_v59 = vpop.permute.xlu1 %2522 }
 0x23d   :  { %v2269_v38 = vpop.permute.xlu0 %2268  ;;  %v3144_v0 = vsel %vm3117_vm8, %v3079_v55, %v2523_v59 }
 0x23e   :  { %v3271_v25 = vsel %vm3191_vm9, %v3144_v0, 0  ;;  %1262 = vrot.lane.b32.xlu1 %v14548_v41, %s12749_s27  ;;  %v3080_v55 = vsel %vm3052_vm7, %v3015_v24, %v2269_v38  ;;  %v10990_v38 = vld [vmem:[%s19403_s0 + $0x1fa] sm:$0xff] }
 0x23f   :  { %1008 = vrot.lane.b32.xlu0 %v10989_v60, %s12747_s17  ;;  %v14574_v44 = vand.u32 4294901760, %v3271_v25 }
 0x240   :  { %v14586_v54 = vpop.permute.xlu1 %1504 }
 0x241   :  { %19818 = vst [vmem:[#allocation64_spill] sm:$0xff] %v14574_v44  ;;  %v14588_v60 = vpop.permute.xlu0 %738  ;;  %v14593_v3 = vsub.f32 %v3271_v25, %v14574_v44  ;;  %11935 = vmatprep.mubr.f32.mxu1 %v14574_v44 }
 0x242   :  { %2282 = vrot.lane.b32.xlu1 %v10926_v14, %s12753_s1 }
 0x243   :  { %19819 = vst [vmem:[#allocation65_spill] sm:$0xff] %v14593_v3  ;;  %2028 = vrot.lane.b32.xlu0 %v14582_v4, %s12752_s24  ;;  %v19502_v5 = vand.u32 4294901760, %v14593_v3 }
 0x244   :  { %v2525_v59 = vpop.permute.xlu1 %2524 }
 0x245   :  { %v1759_v53 = vpop.permute.xlu0 %1758  ;;  %v3145_v0 = vsel %vm3117_vm8, %v3080_v55, %v2525_v59  ;;  %v3718_v61 = vsub.f32 %v14593_v3, %v19502_v5  ;;  %v2693_v3 = vsel %vm2662_vm1, %v14076_v8, %v14588_v60 }
 0x246   :  { %v3274_v49 = vsel %vm3191_vm9, %v3145_v0, 0  ;;  %1518 = vrot.lane.b32.xlu1 %v10926_v14, %s12750_s30 }
 0x247   :  { %1264 = vrot.lane.b32.xlu0 %v14582_v4, %s12749_s27  ;;  %v14611_v30 = vand.u32 4294901760, %v3274_v49  ;;  %v3719_v25 = vand.u32 4294901760, %v3718_v61  ;;  %v14635_v61 = vpop.f32.mrf.mxu0 }
 0x248   :  { %v14619_v50 = vpop.permute.xlu1 %994  ;;  %19822 = vst [vmem:[#allocation68_spill] sm:$0xff] %v14635_v61 }
 0x249   :  { %19820 = vst [vmem:[#allocation66_spill] sm:$0xff] %v14611_v30  ;;  %v14621_v20 = vpop.permute.xlu0 %740  ;;  %v14624_v48 = vsub.f32 %v3274_v49, %v14611_v30  ;;  %11835 = vmatprep.mubr.f32.mxu0 %v3719_v25  ;;  %11936 = vmatmul.mubr.f32.gmra.mxu1 %v14611_v30  ;;  %v10991_v25 = vld [vmem:[%s19403_s0 + $0x202] sm:$0xff] }
 0x24a   :  { %2538 = vrot.lane.b32.xlu1 %v10990_v38, %s12754_s20 }
 0x24b   :  { %19821 = vst [vmem:[#allocation67_spill] sm:$0xff] %v14624_v48  ;;  %2284 = vrot.lane.b32.xlu0 %v10927_v26, %s12753_s1  ;;  %v19505_v24 = vand.u32 4294901760, %v14624_v48 }
 0x24c   :  { %v2015_v55 = vpop.permute.xlu1 %2014 }
 0x24d   :  { %v1761_v59 = vpop.permute.xlu0 %1760  ;;  %v3728_v0 = vsub.f32 %v14624_v48, %v19505_v24  ;;  %v14649_v24 = vld [vmem:[%s19405_s2] ss:$0 sm:$0xff] }
 0x24e   :  { %1520 = vrot.lane.b32.xlu1 %v10927_v26, %s12750_s30 }
 0x24f   :  { %754 = vrot.lane.b32.xlu0 %v10926_v14, %s12748_s18  ;;  %v3729_v49 = vand.u32 4294901760, %v3728_v0  ;;  %v11919_v0 = vpop.f32.mrf.mxu1 }
 0x250   :  { %v14640_v5 = vpop.permute.xlu1 %1250 }
 0x251   :  { %v14642_v28 = vpop.permute.xlu0 %996  ;;  %v11819_v30 = vpop.f32.mrf.mxu0  ;;  %11836 = vmatmul.mubr.f32.gmra.mxu0 %v3729_v49  ;;  %v2691_v49 = vsel %vm2662_vm1, %v13963_v32, %v14475_v34 }
 0x252   :  { %v3612_v14 = vadd.f32 %v14649_v24, %v11819_v30  ;;  %2540 = vrot.lane.b32.xlu1 %v10991_v25, %s12754_s20  ;;  %v2756_v30 = vsel %vm2727_vm2, %v2691_v49, %v14506_v37 }
 0x253   :  { %1774 = vrot.lane.b32.xlu0 %v10990_v38, %s12751_s15 }
 0x254   :  { %v2271_v61 = vpop.permute.xlu1 %2270  ;;  %v14654_v48 = vadd.f32 %v11919_v0, %v3612_v14  ;;  %v2821_v14 = vsel %vm2792_vm3, %v2756_v30, %v14527_v57  ;;  %v2692_v30 = vsel %vm2662_vm1, %v13997_v18, %v14508_v62  ;;  %v14700_v18 = vld [vmem:[%s19403_s0 + $0x218] sm:$0xff] }
 0x255   :  { %v2017_v44 = vpop.permute.xlu0 %2016  ;;  %v2886_v32 = vsel %vm2857_vm4, %v2821_v14, %v14552_v2 }
 0x256   :  { %19824 = vst [vmem:[#allocation70_spill] sm:$0xff] %v14654_v48  ;;  %1010 = vrot.lane.b32.xlu1 %v10990_v38, %s12747_s17  ;;  %v2951_v34 = vsel %vm2922_vm5, %v2886_v32, %v1759_v53  ;;  %v2757_v53 = vsel %vm2727_vm2, %v2692_v30, %v14529_v58 }
 0x257   :  { %756 = vrot.lane.b32.xlu0 %v10927_v26, %s12748_s18  ;;  %v3016_v37 = vsel %vm2987_vm6, %v2951_v34, %v2015_v55  ;;  %v2822_v62 = vsel %vm2792_vm3, %v2757_v53, %v14554_v29  ;;  %v10929_v53 = vld [vmem:[%s19403_s0 + $0x219] sm:$0xff] }
 0x258   :  { %v14670_v0 = vpop.permute.xlu1 %1506  ;;  %v3081_v38 = vsel %vm3052_vm7, %v3016_v37, %v2271_v61  ;;  %v10928_v61 = vld [vmem:[%s19403_s0 + $0x211] sm:$0xff]  ;;  %v2887_v58 = vsel %vm2857_vm4, %v2822_v62, %v14586_v54 }
 0x259   :  { %v14672_v48 = vpop.permute.xlu0 %1252  ;;  %v2952_v34 = vsel %vm2922_vm5, %v2887_v58, %v1761_v59 }
 0x25a   :  { %2030 = vrot.lane.b32.xlu1 %v14666_v51, %s12752_s24  ;;  %v3017_v29 = vsel %vm2987_vm6, %v2952_v34, %v2017_v44 }
 0x25b   :  { %1776 = vrot.lane.b32.xlu0 %v10991_v25, %s12751_s15 }
 0x25c   :  { %v2527_v26 = vpop.permute.xlu1 %2526 }
 0x25d   :  { %v2273_v57 = vpop.permute.xlu0 %2272  ;;  %v3146_v49 = vsel %vm3117_vm8, %v3081_v38, %v2527_v26 }
 0x25e   :  { %v3277_v2 = vsel %vm3191_vm9, %v3146_v49, 0  ;;  %1266 = vrot.lane.b32.xlu1 %v14666_v51, %s12749_s27  ;;  %v3082_v38 = vsel %vm3052_vm7, %v3017_v29, %v2273_v57  ;;  %v10992_v57 = vld [vmem:[%s19403_s0 + $0x212] sm:$0xff] }
 0x25f   :  { %1012 = vrot.lane.b32.xlu0 %v10991_v25, %s12747_s17  ;;  %v14692_v55 = vand.u32 4294901760, %v3277_v2 }
 0x260   :  { %v14704_v14 = vpop.permute.xlu1 %1508 }
 0x261   :  { %19825 = vst [vmem:[#allocation71_spill] sm:$0xff] %v14692_v55  ;;  %v14706_v25 = vpop.permute.xlu0 %742  ;;  %v14711_v32 = vsub.f32 %v3277_v2, %v14692_v55  ;;  %11938 = vmatprep.mubr.f32.mxu1 %v14692_v55  ;;  %v14762_v55 = vpop.f32.mrf.mxu1 }
 0x262   :  { %2286 = vrot.lane.b32.xlu1 %v10928_v61, %s12753_s1  ;;  %19830 = vst [vmem:[#allocation76_spill] sm:$0xff] %v14762_v55 }
 0x263   :  { %19826 = vst [vmem:[#allocation72_spill] sm:$0xff] %v14711_v32  ;;  %2032 = vrot.lane.b32.xlu0 %v14700_v18, %s12752_s24  ;;  %v19510_v37 = vand.u32 4294901760, %v14711_v32 }
 0x264   :  { %v2529_v26 = vpop.permute.xlu1 %2528 }
 0x265   :  { %v1763_v54 = vpop.permute.xlu0 %1762  ;;  %v3147_v49 = vsel %vm3117_vm8, %v3082_v38, %v2529_v26  ;;  %v3738_v30 = vsub.f32 %v14711_v32, %v19510_v37 }
 0x266   :  { %v3280_v59 = vsel %vm3191_vm9, %v3147_v49, 0  ;;  %1522 = vrot.lane.b32.xlu1 %v10928_v61, %s12750_s30 }
 0x267   :  { %1268 = vrot.lane.b32.xlu0 %v14700_v18, %s12749_s27  ;;  %v14729_v44 = vand.u32 4294901760, %v3280_v59  ;;  %v3739_v2 = vand.u32 4294901760, %v3738_v30  ;;  %v14753_v30 = vpop.f32.mrf.mxu0 }
 0x268   :  { %v14737_v62 = vpop.permute.xlu1 %998  ;;  %19829 = vst [vmem:[#allocation75_spill] sm:$0xff] %v14753_v30 }
 0x269   :  { %19827 = vst [vmem:[#allocation73_spill] sm:$0xff] %v14729_v44  ;;  %v14739_v58 = vpop.permute.xlu0 %744  ;;  %v14742_v34 = vsub.f32 %v3280_v59, %v14729_v44  ;;  %11838 = vmatprep.mubr.f32.mxu0 %v3739_v2  ;;  %11939 = vmatmul.mubr.f32.gmra.mxu1 %v14729_v44  ;;  %v10993_v2 = vld [vmem:[%s19403_s0 + $0x21a] sm:$0xff] }
 0x26a   :  { %2542 = vrot.lane.b32.xlu1 %v10992_v57, %s12754_s20 }
 0x26b   :  { %19828 = vst [vmem:[#allocation74_spill] sm:$0xff] %v14742_v34  ;;  %2288 = vrot.lane.b32.xlu0 %v10929_v53, %s12753_s1  ;;  %v19517_v29 = vand.u32 4294901760, %v14742_v34 }
 0x26c   :  { %v2019_v38 = vpop.permute.xlu1 %2018 }
 0x26d   :  { %v1765_v26 = vpop.permute.xlu0 %1764  ;;  %v3748_v49 = vsub.f32 %v14742_v34, %v19517_v29 }
 0x26e   :  { %1524 = vrot.lane.b32.xlu1 %v10929_v53, %s12750_s30 }
 0x26f   :  { %758 = vrot.lane.b32.xlu0 %v10928_v61, %s12748_s18  ;;  %v3749_v59 = vand.u32 4294901760, %v3748_v49  ;;  %v11922_v61 = vpop.f32.mrf.mxu1 }
 0x270   :  { %v14758_v37 = vpop.permute.xlu1 %1254 }
 0x271   :  { %v14760_v44 = vpop.permute.xlu0 %1000  ;;  %v11822_v32 = vpop.f32.mrf.mxu0  ;;  %11839 = vmatmul.mubr.f32.gmra.mxu0 %v3749_v59  ;;  %v14779_v59 = vld [vmem:[%s19403_s0 + $0x228] sm:$0xff] }
 0x272   :  { %v3632_v29 = vadd.f32 %v14649_v24, %v11822_v32  ;;  %2544 = vrot.lane.b32.xlu1 %v10993_v2, %s12754_s20  ;;  %v2758_v32 = vsel %vm2727_vm2, %v2693_v3, %v14619_v50 }
 0x273   :  { %1778 = vrot.lane.b32.xlu0 %v10992_v57, %s12751_s15 }
 0x274   :  { %v2275_v49 = vpop.permute.xlu1 %2274  ;;  %v14767_v34 = vadd.f32 %v11922_v61, %v3632_v29  ;;  %v2823_v29 = vsel %vm2792_vm3, %v2758_v32, %v14640_v5  ;;  %v2694_v32 = vsel %vm2662_vm1, %v14110_v31, %v14621_v20  ;;  %v14813_v31 = vld [vmem:[%s19403_s0 + $0x230] sm:$0xff] }
 0x275   :  { %v2021_v30 = vpop.permute.xlu0 %2020  ;;  %v2888_v8 = vsel %vm2857_vm4, %v2823_v29, %v14670_v0 }
 0x276   :  { %19831 = vst [vmem:[#allocation77_spill] sm:$0xff] %v14767_v34  ;;  %1014 = vrot.lane.b32.xlu1 %v10992_v57, %s12747_s17  ;;  %v2953_v60 = vsel %vm2922_vm5, %v2888_v8, %v1763_v54  ;;  %v2759_v54 = vsel %vm2727_vm2, %v2694_v32, %v14642_v28 }
 0x277   :  { %760 = vrot.lane.b32.xlu0 %v10929_v53, %s12748_s18  ;;  %v3018_v3 = vsel %vm2987_vm6, %v2953_v60, %v2019_v38  ;;  %v2824_v20 = vsel %vm2792_vm3, %v2759_v54, %v14672_v48  ;;  %v10931_v54 = vld [vmem:[%s19403_s0 + $0x231] sm:$0xff] }
 0x278   :  { %v14783_v61 = vpop.permute.xlu1 %1510  ;;  %v3083_v50 = vsel %vm3052_vm7, %v3018_v3, %v2275_v49  ;;  %v10930_v49 = vld [vmem:[%s19403_s0 + $0x229] sm:$0xff]  ;;  %v2889_v28 = vsel %vm2857_vm4, %v2824_v20, %v14704_v14 }
 0x279   :  { %v14785_v34 = vpop.permute.xlu0 %1256  ;;  %v2954_v60 = vsel %vm2922_vm5, %v2889_v28, %v1765_v26 }
 0x27a   :  { %2034 = vrot.lane.b32.xlu1 %v14779_v59, %s12752_s24  ;;  %v3019_v48 = vsel %vm2987_vm6, %v2954_v60, %v2021_v30 }
 0x27b   :  { %1780 = vrot.lane.b32.xlu0 %v10993_v2, %s12751_s15 }
 0x27c   :  { %v2531_v57 = vpop.permute.xlu1 %2530 }
 0x27d   :  { %v2277_v5 = vpop.permute.xlu0 %2276  ;;  %v3148_v53 = vsel %vm3117_vm8, %v3083_v50, %v2531_v57 }
 0x27e   :  { %v3283_v0 = vsel %vm3191_vm9, %v3148_v53, 0  ;;  %1270 = vrot.lane.b32.xlu1 %v14779_v59, %s12749_s27  ;;  %v3084_v50 = vsel %vm3052_vm7, %v3019_v48, %v2277_v5  ;;  %v10994_v5 = vld [vmem:[%s19403_s0 + $0x22a] sm:$0xff] }
 0x27f   :  { %1016 = vrot.lane.b32.xlu0 %v10993_v2, %s12747_s17  ;;  %v14805_v38 = vand.u32 4294901760, %v3283_v0 }
 0x280   :  { %v14817_v29 = vpop.permute.xlu1 %1512 }
 0x281   :  { %19832 = vst [vmem:[#allocation78_spill] sm:$0xff] %v14805_v38  ;;  %v14819_v2 = vpop.permute.xlu0 %746  ;;  %v14824_v8 = vsub.f32 %v3283_v0, %v14805_v38  ;;  %11941 = vmatprep.mubr.f32.mxu1 %v14805_v38 }
 0x282   :  { %2290 = vrot.lane.b32.xlu1 %v10930_v49, %s12753_s1  ;;  %v2697_v21 = vsel %vm2662_vm1, %v14318_v39, %v14819_v2 }
 0x283   :  { %19833 = vst [vmem:[#allocation79_spill] sm:$0xff] %v14824_v8  ;;  %2036 = vrot.lane.b32.xlu0 %v14813_v31, %s12752_s24  ;;  %v19522_v3 = vand.u32 4294901760, %v14824_v8 }
 0x284   :  { %v2533_v57 = vpop.permute.xlu1 %2532 }
 0x285   :  { %v1767_v14 = vpop.permute.xlu0 %1766  ;;  %v3149_v53 = vsel %vm3117_vm8, %v3084_v50, %v2533_v57  ;;  %v3758_v32 = vsub.f32 %v14824_v8, %v19522_v3 }
 0x286   :  { %v3286_v26 = vsel %vm3191_vm9, %v3149_v53, 0  ;;  %1526 = vrot.lane.b32.xlu1 %v10930_v49, %s12750_s30 }
 0x287   :  { %1272 = vrot.lane.b32.xlu0 %v14813_v31, %s12749_s27  ;;  %v14842_v30 = vand.u32 4294901760, %v3286_v26  ;;  %v3759_v0 = vand.u32 4294901760, %v3758_v32  ;;  %v14866_v32 = vpop.f32.mrf.mxu0 }
 0x288   :  { %v14850_v20 = vpop.permute.xlu1 %1002  ;;  %19836 = vst [vmem:[#allocation82_spill] sm:$0xff] %v14866_v32 }
 0x289   :  { %19834 = vst [vmem:[#allocation80_spill] sm:$0xff] %v14842_v30  ;;  %v14852_v28 = vpop.permute.xlu0 %748  ;;  %v14855_v60 = vsub.f32 %v3286_v26, %v14842_v30  ;;  %11841 = vmatprep.mubr.f32.mxu0 %v3759_v0  ;;  %11942 = vmatmul.mubr.f32.gmra.mxu1 %v14842_v30  ;;  %v10995_v0 = vld [vmem:[%s19403_s0 + $0x232] sm:$0xff]  ;;  %v14875_v30 = vpop.f32.mrf.mxu1 }
 0x28a   :  { %2546 = vrot.lane.b32.xlu1 %v10994_v5, %s12754_s20  ;;  %19837 = vst [vmem:[#allocation83_spill] sm:$0xff] %v14875_v30 }
 0x28b   :  { %19835 = vst [vmem:[#allocation81_spill] sm:$0xff] %v14855_v60  ;;  %2292 = vrot.lane.b32.xlu0 %v10931_v54, %s12753_s1  ;;  %v19527_v48 = vand.u32 4294901760, %v14855_v60 }
 0x28c   :  { %v2023_v50 = vpop.permute.xlu1 %2022 }
 0x28d   :  { %v1769_v57 = vpop.permute.xlu0 %1768  ;;  %v3768_v53 = vsub.f32 %v14855_v60, %v19527_v48 }
 0x28e   :  { %1528 = vrot.lane.b32.xlu1 %v10931_v54, %s12750_s30 }
 0x28f   :  { %762 = vrot.lane.b32.xlu0 %v10930_v49, %s12748_s18  ;;  %v3769_v26 = vand.u32 4294901760, %v3768_v53  ;;  %v68_v49 = vld [vmem:[%s19403_s0 + $0x1b0] sm:$0xff]  ;;  %v11925_v53 = vpop.f32.mrf.mxu1 }
 0x290   :  { %v14871_v3 = vpop.permute.xlu1 %1258  ;;  %v2695_v30 = vsel %vm2662_vm1, %v68_v49, %v14706_v25 }
 0x291   :  { %v14873_v55 = vpop.permute.xlu0 %1004  ;;  %v11825_v38 = vpop.f32.mrf.mxu0  ;;  %11842 = vmatmul.mubr.f32.gmra.mxu0 %v3769_v26  ;;  %v14894_v26 = vld [vmem:[%s19403_s0 + $0x240] sm:$0xff] }
 0x292   :  { %v3652_v48 = vadd.f32 %v14649_v24, %v11825_v38  ;;  %2548 = vrot.lane.b32.xlu1 %v10995_v0, %s12754_s20  ;;  %v2760_v38 = vsel %vm2727_vm2, %v2695_v30, %v14737_v62  ;;  %v69_v62 = vld [vmem:[%s19403_s0 + $0x1b8] sm:$0xff] }
 0x293   :  { %1782 = vrot.lane.b32.xlu0 %v10994_v5, %s12751_s15  ;;  %v2825_v17 = vsel %vm2792_vm3, %v2760_v38, %v14758_v37 }
 0x294   :  { %v2279_v32 = vpop.permute.xlu1 %2278  ;;  %v14883_v8 = vadd.f32 %v11925_v53, %v3652_v48  ;;  %v2890_v25 = vsel %vm2857_vm4, %v2825_v17, %v14783_v61  ;;  %v2696_v17 = vsel %vm2662_vm1, %v69_v62, %v14739_v58  ;;  %v14930_v58 = vld [vmem:[%s19403_s0 + $0x248] sm:$0xff] }
 0x295   :  { %v2025_v60 = vpop.permute.xlu0 %2024 }
 0x296   :  { %19838 = vst [vmem:[#allocation84_spill] sm:$0xff] %v14883_v8  ;;  %1018 = vrot.lane.b32.xlu1 %v10994_v5, %s12747_s17  ;;  %v2955_v5 = vsel %vm2922_vm5, %v2890_v25, %v1767_v14  ;;  %v2761_v14 = vsel %vm2727_vm2, %v2696_v17, %v14760_v44 }
 0x297   :  { %764 = vrot.lane.b32.xlu0 %v10931_v54, %s12748_s18  ;;  %v3020_v37 = vsel %vm2987_vm6, %v2955_v5, %v2023_v50  ;;  %v2826_v25 = vsel %vm2792_vm3, %v2761_v14, %v14785_v34 }
 0x298   :  { %v14898_v48 = vpop.permute.xlu1 %1514  ;;  %v3085_v30 = vsel %vm3052_vm7, %v3020_v37, %v2279_v32  ;;  %v10932_v32 = vld [vmem:[%s19403_s0 + $0x241] sm:$0xff]  ;;  %v2891_v44 = vsel %vm2857_vm4, %v2826_v25, %v14817_v29  ;;  %v10933_v25 = vld [vmem:[%s19403_s0 + $0x249] sm:$0xff] }
 0x299   :  { %v14900_v53 = vpop.permute.xlu0 %1260  ;;  %v2956_v37 = vsel %vm2922_vm5, %v2891_v44, %v1769_v57 }
 0x29a   :  { %2038 = vrot.lane.b32.xlu1 %v14894_v26, %s12752_s24  ;;  %v3021_v34 = vsel %vm2987_vm6, %v2956_v37, %v2025_v60 }
 0x29b   :  { %1784 = vrot.lane.b32.xlu0 %v10995_v0, %s12751_s15 }
 0x29c   :  { %v2535_v54 = vpop.permute.xlu1 %2534 }
 0x29d   :  { %v2281_v49 = vpop.permute.xlu0 %2280  ;;  %v3150_v38 = vsel %vm3117_vm8, %v3085_v30, %v2535_v54 }
 0x29e   :  { %v3289_v61 = vsel %vm3191_vm9, %v3150_v38, 0  ;;  %1274 = vrot.lane.b32.xlu1 %v14894_v26, %s12749_s27  ;;  %v3086_v54 = vsel %vm3052_vm7, %v3021_v34, %v2281_v49  ;;  %v10996_v49 = vld [vmem:[%s19403_s0 + $0x242] sm:$0xff] }
 0x29f   :  { %1020 = vrot.lane.b32.xlu0 %v10995_v0, %s12747_s17  ;;  %v14922_v50 = vand.u32 4294901760, %v3289_v61 }
 0x2a0   :  { %v14934_v5 = vpop.permute.xlu1 %1516 }
 0x2a1   :  { %19839 = vst [vmem:[#allocation85_spill] sm:$0xff] %v14922_v50  ;;  %v14936_v0 = vpop.permute.xlu0 %750  ;;  %v14941_v62 = vsub.f32 %v3289_v61, %v14922_v50  ;;  %11944 = vmatprep.mubr.f32.mxu1 %v14922_v50  ;;  %v14992_v50 = vpop.f32.mrf.mxu1 }
 0x2a2   :  { %2294 = vrot.lane.b32.xlu1 %v10932_v32, %s12753_s1  ;;  %19844 = vst [vmem:[#allocation90_spill] sm:$0xff] %v14992_v50 }
 0x2a3   :  { %19840 = vst [vmem:[#allocation86_spill] sm:$0xff] %v14941_v62  ;;  %2040 = vrot.lane.b32.xlu0 %v14930_v58, %s12752_s24  ;;  %v19534_v30 = vand.u32 4294901760, %v14941_v62 }
 0x2a4   :  { %v2537_v38 = vpop.permute.xlu1 %2536 }
 0x2a5   :  { %v1771_v29 = vpop.permute.xlu0 %1770  ;;  %v3151_v17 = vsel %vm3117_vm8, %v3086_v54, %v2537_v38  ;;  %v3778_v61 = vsub.f32 %v14941_v62, %v19534_v30  ;;  %v10997_v30 = vld [vmem:[%s19403_s0 + $0x24a] sm:$0xff] }
 0x2a6   :  { %v3292_v57 = vsel %vm3191_vm9, %v3151_v17, 0  ;;  %1530 = vrot.lane.b32.xlu1 %v10932_v32, %s12750_s30 }
 0x2a7   :  { %1276 = vrot.lane.b32.xlu0 %v14930_v58, %s12749_s27  ;;  %v14959_v60 = vand.u32 4294901760, %v3292_v57  ;;  %v3779_v14 = vand.u32 4294901760, %v3778_v61 }
 0x2a8   :  { %v14967_v44 = vpop.permute.xlu1 %1006 }
 0x2a9   :  { %19841 = vst [vmem:[#allocation87_spill] sm:$0xff] %v14959_v60  ;;  %v14969_v37 = vpop.permute.xlu0 %752  ;;  %v14972_v34 = vsub.f32 %v3292_v57, %v14959_v60  ;;  %11844 = vmatprep.mubr.f32.mxu0 %v3779_v14  ;;  %11945 = vmatmul.mubr.f32.gmra.mxu1 %v14959_v60  ;;  %v14983_v57 = vpop.f32.mrf.mxu0 }
 0x2aa   :  { %2550 = vrot.lane.b32.xlu1 %v10996_v49, %s12754_s20  ;;  %19843 = vst [vmem:[#allocation89_spill] sm:$0xff] %v14983_v57 }
 0x2ab   :  { %19842 = vst [vmem:[#allocation88_spill] sm:$0xff] %v14972_v34  ;;  %2296 = vrot.lane.b32.xlu0 %v10933_v25, %s12753_s1  ;;  %v19541_v54 = vand.u32 4294901760, %v14972_v34 }
 0x2ac   :  { %v2027_v38 = vpop.permute.xlu1 %2026 }
 0x2ad   :  { %v1773_v17 = vpop.permute.xlu0 %1772  ;;  %v3788_v61 = vsub.f32 %v14972_v34, %v19541_v54 }
 0x2ae   :  { %1532 = vrot.lane.b32.xlu1 %v10933_v25, %s12750_s30 }
 0x2af   :  { %766 = vrot.lane.b32.xlu0 %v10932_v32, %s12748_s18  ;;  %v3789_v14 = vand.u32 4294901760, %v3788_v61  ;;  %v11928_v32 = vpop.f32.mrf.mxu1 }
 0x2b0   :  { %v14988_v8 = vpop.permute.xlu1 %1262 }
 0x2b1   :  { %v14990_v60 = vpop.permute.xlu0 %1008  ;;  %v11828_v62 = vpop.f32.mrf.mxu0  ;;  %11845 = vmatmul.mubr.f32.gmra.mxu0 %v3789_v14  ;;  %v15009_v14 = vld [vmem:[%s19403_s0 + $0x258] sm:$0xff] }
 0x2b2   :  { %v3672_v54 = vadd.f32 %v14649_v24, %v11828_v62  ;;  %2552 = vrot.lane.b32.xlu1 %v10997_v30, %s12754_s20  ;;  %v2762_v62 = vsel %vm2727_vm2, %v2697_v21, %v14850_v20 }
 0x2b3   :  { %1786 = vrot.lane.b32.xlu0 %v10996_v49, %s12751_s15 }
 0x2b4   :  { %v2283_v61 = vpop.permute.xlu1 %2282  ;;  %v14997_v34 = vadd.f32 %v11928_v32, %v3672_v54  ;;  %v2827_v54 = vsel %vm2792_vm3, %v2762_v62, %v14871_v3  ;;  %v2698_v62 = vsel %vm2662_vm1, %v14364_v52, %v14852_v28  ;;  %v15043_v52 = vld [vmem:[%s19403_s0 + $0x260] sm:$0xff] }
 0x2b5   :  { %v2029_v57 = vpop.permute.xlu0 %2028  ;;  %v2892_v39 = vsel %vm2857_vm4, %v2827_v54, %v14898_v48 }
 0x2b6   :  { %19845 = vst [vmem:[#allocation91_spill] sm:$0xff] %v14997_v34  ;;  %1022 = vrot.lane.b32.xlu1 %v10996_v49, %s12747_s17  ;;  %v2957_v2 = vsel %vm2922_vm5, %v2892_v39, %v1771_v29  ;;  %v2763_v29 = vsel %vm2727_vm2, %v2698_v62, %v14873_v55 }
 0x2b7   :  { %768 = vrot.lane.b32.xlu0 %v10933_v25, %s12748_s18  ;;  %v3022_v21 = vsel %vm2987_vm6, %v2957_v2, %v2027_v38  ;;  %v2828_v28 = vsel %vm2792_vm3, %v2763_v29, %v14900_v53  ;;  %v10935_v29 = vld [vmem:[%s19403_s0 + $0x261] sm:$0xff] }
 0x2b8   :  { %v15013_v32 = vpop.permute.xlu1 %1518  ;;  %v3087_v20 = vsel %vm3052_vm7, %v3022_v21, %v2283_v61  ;;  %v10934_v61 = vld [vmem:[%s19403_s0 + $0x259] sm:$0xff]  ;;  %v2893_v55 = vsel %vm2857_vm4, %v2828_v28, %v14934_v5 }
 0x2b9   :  { %v15015_v50 = vpop.permute.xlu0 %1264  ;;  %v2958_v2 = vsel %vm2922_vm5, %v2893_v55, %v1773_v17 }
 0x2ba   :  { %2042 = vrot.lane.b32.xlu1 %v15009_v14, %s12752_s24  ;;  %v3023_v53 = vsel %vm2987_vm6, %v2958_v2, %v2029_v57 }
 0x2bb   :  { %1788 = vrot.lane.b32.xlu0 %v10997_v30, %s12751_s15 }
 0x2bc   :  { %v2539_v49 = vpop.permute.xlu1 %2538 }
 0x2bd   :  { %v2285_v3 = vpop.permute.xlu0 %2284  ;;  %v3152_v25 = vsel %vm3117_vm8, %v3087_v20, %v2539_v49 }
 0x2be   :  { %v3295_v48 = vsel %vm3191_vm9, %v3152_v25, 0  ;;  %1278 = vrot.lane.b32.xlu1 %v15009_v14, %s12749_s27  ;;  %v3088_v20 = vsel %vm3052_vm7, %v3023_v53, %v2285_v3  ;;  %v10998_v3 = vld [vmem:[%s19403_s0 + $0x25a] sm:$0xff] }
 0x2bf   :  { %1024 = vrot.lane.b32.xlu0 %v10997_v30, %s12747_s17  ;;  %v15035_v38 = vand.u32 4294901760, %v3295_v48 }
 0x2c0   :  { %v15047_v54 = vpop.permute.xlu1 %1520 }
 0x2c1   :  { %19846 = vst [vmem:[#allocation92_spill] sm:$0xff] %v15035_v38  ;;  %v15049_v30 = vpop.permute.xlu0 %754  ;;  %v15054_v39 = vsub.f32 %v3295_v48, %v15035_v38  ;;  %11947 = vmatprep.mubr.f32.mxu1 %v15035_v38 }
 0x2c2   :  { %2298 = vrot.lane.b32.xlu1 %v10934_v61, %s12753_s1 }
 0x2c3   :  { %19847 = vst [vmem:[#allocation93_spill] sm:$0xff] %v15054_v39  ;;  %2044 = vrot.lane.b32.xlu0 %v15043_v52, %s12752_s24  ;;  %v19546_v21 = vand.u32 4294901760, %v15054_v39 }
 0x2c4   :  { %v2541_v49 = vpop.permute.xlu1 %2540 }
 0x2c5   :  { %v1775_v5 = vpop.permute.xlu0 %1774  ;;  %v3153_v25 = vsel %vm3117_vm8, %v3088_v20, %v2541_v49  ;;  %v3798_v62 = vsub.f32 %v15054_v39, %v19546_v21  ;;  %v2699_v39 = vsel %vm2662_vm1, %v14432_v12, %v14936_v0 }
 0x2c6   :  { %v3298_v17 = vsel %vm3191_vm9, %v3153_v25, 0  ;;  %1534 = vrot.lane.b32.xlu1 %v10934_v61, %s12750_s30 }
 0x2c7   :  { %1280 = vrot.lane.b32.xlu0 %v15043_v52, %s12749_s27  ;;  %v15072_v57 = vand.u32 4294901760, %v3298_v17  ;;  %v3799_v48 = vand.u32 4294901760, %v3798_v62  ;;  %v15096_v62 = vpop.f32.mrf.mxu0 }
 0x2c8   :  { %v15080_v28 = vpop.permute.xlu1 %1010  ;;  %19850 = vst [vmem:[#allocation96_spill] sm:$0xff] %v15096_v62 }
 0x2c9   :  { %19848 = vst [vmem:[#allocation94_spill] sm:$0xff] %v15072_v57  ;;  %v15082_v55 = vpop.permute.xlu0 %756  ;;  %v15085_v2 = vsub.f32 %v3298_v17, %v15072_v57  ;;  %11847 = vmatprep.mubr.f32.mxu0 %v3799_v48  ;;  %11948 = vmatmul.mubr.f32.gmra.mxu1 %v15072_v57  ;;  %v10999_v48 = vld [vmem:[%s19403_s0 + $0x262] sm:$0xff]  ;;  %v15105_v57 = vpop.f32.mrf.mxu1 }
 0x2ca   :  { %2554 = vrot.lane.b32.xlu1 %v10998_v3, %s12754_s20  ;;  %19851 = vst [vmem:[#allocation97_spill] sm:$0xff] %v15105_v57 }
 0x2cb   :  { %19849 = vst [vmem:[#allocation95_spill] sm:$0xff] %v15085_v2  ;;  %2300 = vrot.lane.b32.xlu0 %v10935_v29, %s12753_s1  ;;  %v19551_v53 = vand.u32 4294901760, %v15085_v2 }
 0x2cc   :  { %v2031_v20 = vpop.permute.xlu1 %2030 }
 0x2cd   :  { %v1777_v49 = vpop.permute.xlu0 %1776  ;;  %v3808_v25 = vsub.f32 %v15085_v2, %v19551_v53 }
 0x2ce   :  { %1536 = vrot.lane.b32.xlu1 %v10935_v29, %s12750_s30 }
 0x2cf   :  { %770 = vrot.lane.b32.xlu0 %v10934_v61, %s12748_s18  ;;  %v3809_v17 = vand.u32 4294901760, %v3808_v25  ;;  %v11931_v61 = vpop.f32.mrf.mxu1 }
 0x2d0   :  { %v15101_v21 = vpop.permute.xlu1 %1266 }
 0x2d1   :  { %v15103_v34 = vpop.permute.xlu0 %1012  ;;  %v11831_v38 = vpop.f32.mrf.mxu0  ;;  %11848 = vmatmul.mubr.f32.gmra.mxu0 %v3809_v17  ;;  %v15122_v17 = vld [vmem:[%s19403_s0 + $0x270] sm:$0xff] }
 0x2d2   :  { %v3692_v53 = vadd.f32 %v14649_v24, %v11831_v38  ;;  %2556 = vrot.lane.b32.xlu1 %v10999_v48, %s12754_s20  ;;  %v2764_v38 = vsel %vm2727_vm2, %v2699_v39, %v14967_v44 }
 0x2d3   :  { %1790 = vrot.lane.b32.xlu0 %v10998_v3, %s12751_s15 }
 0x2d4   :  { %v2287_v25 = vpop.permute.xlu1 %2286  ;;  %v15110_v2 = vadd.f32 %v11931_v61, %v3692_v53  ;;  %v2829_v53 = vsel %vm2792_vm3, %v2764_v38, %v14988_v8  ;;  %v2700_v38 = vsel %vm2662_vm1, %v14469_v33, %v14969_v37  ;;  %v15156_v33 = vld [vmem:[%s19403_s0 + $0x278] sm:$0xff] }
 0x2d5   :  { %v2033_v62 = vpop.permute.xlu0 %2032  ;;  %v2894_v12 = vsel %vm2857_vm4, %v2829_v53, %v15013_v32 }
 0x2d6   :  { %19852 = vst [vmem:[#allocation98_spill] sm:$0xff] %v15110_v2  ;;  %1026 = vrot.lane.b32.xlu1 %v10998_v3, %s12747_s17  ;;  %v2959_v0 = vsel %vm2922_vm5, %v2894_v12, %v1775_v5  ;;  %v2765_v5 = vsel %vm2727_vm2, %v2700_v38, %v14990_v60 }
 0x2d7   :  { %772 = vrot.lane.b32.xlu0 %v10935_v29, %s12748_s18  ;;  %v3024_v44 = vsel %vm2987_vm6, %v2959_v0, %v2031_v20  ;;  %v2830_v37 = vsel %vm2792_vm3, %v2765_v5, %v15015_v50  ;;  %v10937_v5 = vld [vmem:[%s19403_s0 + $0x279] sm:$0xff] }
 0x2d8   :  { %v15126_v61 = vpop.permute.xlu1 %1522  ;;  %v3089_v39 = vsel %vm3052_vm7, %v3024_v44, %v2287_v25  ;;  %v10936_v25 = vld [vmem:[%s19403_s0 + $0x271] sm:$0xff]  ;;  %v2895_v60 = vsel %vm2857_vm4, %v2830_v37, %v15047_v54 }
 0x2d9   :  { %v15128_v57 = vpop.permute.xlu0 %1268  ;;  %v2960_v0 = vsel %vm2922_vm5, %v2895_v60, %v1777_v49 }
 0x2da   :  { %2046 = vrot.lane.b32.xlu1 %v15122_v17, %s12752_s24  ;;  %v3025_v50 = vsel %vm2987_vm6, %v2960_v0, %v2033_v62 }
 0x2db   :  { %1792 = vrot.lane.b32.xlu0 %v10999_v48, %s12751_s15 }
 0x2dc   :  { %v2543_v3 = vpop.permute.xlu1 %2542 }
 0x2dd   :  { %v2289_v8 = vpop.permute.xlu0 %2288  ;;  %v3154_v29 = vsel %vm3117_vm8, %v3089_v39, %v2543_v3 }
 0x2de   :  { %v3301_v32 = vsel %vm3191_vm9, %v3154_v29, 0  ;;  %1282 = vrot.lane.b32.xlu1 %v15122_v17, %s12749_s27  ;;  %v3090_v39 = vsel %vm3052_vm7, %v3025_v50, %v2289_v8  ;;  %v11000_v8 = vld [vmem:[%s19403_s0 + $0x272] sm:$0xff] }
 0x2df   :  { %1028 = vrot.lane.b32.xlu0 %v10999_v48, %s12747_s17  ;;  %v15148_v20 = vand.u32 4294901760, %v3301_v32 }
 0x2e0   :  { %v15160_v53 = vpop.permute.xlu1 %1524 }
 0x2e1   :  { %19853 = vst [vmem:[#allocation99_spill] sm:$0xff] %v15148_v20  ;;  %v15162_v48 = vpop.permute.xlu0 %758  ;;  %v15167_v12 = vsub.f32 %v3301_v32, %v15148_v20  ;;  %11950 = vmatprep.mubr.f32.mxu1 %v15148_v20 }
 0x2e2   :  { %2302 = vrot.lane.b32.xlu1 %v10936_v25, %s12753_s1 }
 0x2e3   :  { %19854 = vst [vmem:[#allocation100_spill] sm:$0xff] %v15167_v12  ;;  %2048 = vrot.lane.b32.xlu0 %v15156_v33, %s12752_s24  ;;  %v19556_v44 = vand.u32 4294901760, %v15167_v12 }
 0x2e4   :  { %v2545_v3 = vpop.permute.xlu1 %2544 }
 0x2e5   :  { %v1779_v54 = vpop.permute.xlu0 %1778  ;;  %v3155_v29 = vsel %vm3117_vm8, %v3090_v39, %v2545_v3  ;;  %v3818_v38 = vsub.f32 %v15167_v12, %v19556_v44  ;;  %v2701_v12 = vsel %vm2662_vm1, %v14548_v41, %v15049_v30 }
 0x2e6   :  { %v3304_v49 = vsel %vm3191_vm9, %v3155_v29, 0  ;;  %1538 = vrot.lane.b32.xlu1 %v10936_v25, %s12750_s30 }
 0x2e7   :  { %1284 = vrot.lane.b32.xlu0 %v15156_v33, %s12749_s27  ;;  %v15185_v62 = vand.u32 4294901760, %v3304_v49  ;;  %v3819_v32 = vand.u32 4294901760, %v3818_v38  ;;  %v15209_v38 = vpop.f32.mrf.mxu0 }
 0x2e8   :  { %v15193_v37 = vpop.permute.xlu1 %1014  ;;  %19857 = vst [vmem:[#allocation103_spill] sm:$0xff] %v15209_v38 }
 0x2e9   :  { %19855 = vst [vmem:[#allocation101_spill] sm:$0xff] %v15185_v62  ;;  %v15195_v60 = vpop.permute.xlu0 %760  ;;  %v15198_v0 = vsub.f32 %v3304_v49, %v15185_v62  ;;  %11850 = vmatprep.mubr.f32.mxu0 %v3819_v32  ;;  %11951 = vmatmul.mubr.f32.gmra.mxu1 %v15185_v62  ;;  %v11001_v32 = vld [vmem:[%s19403_s0 + $0x27a] sm:$0xff]  ;;  %v15218_v62 = vpop.f32.mrf.mxu1 }
 0x2ea   :  { %2558 = vrot.lane.b32.xlu1 %v11000_v8, %s12754_s20  ;;  %19858 = vst [vmem:[#allocation104_spill] sm:$0xff] %v15218_v62 }
 0x2eb   :  { %19856 = vst [vmem:[#allocation102_spill] sm:$0xff] %v15198_v0  ;;  %2304 = vrot.lane.b32.xlu0 %v10937_v5, %s12753_s1  ;;  %v19561_v50 = vand.u32 4294901760, %v15198_v0 }
 0x2ec   :  { %v2035_v39 = vpop.permute.xlu1 %2034 }
 0x2ed   :  { %v1781_v3 = vpop.permute.xlu0 %1780  ;;  %v3828_v29 = vsub.f32 %v15198_v0, %v19561_v50 }
 0x2ee   :  { %1540 = vrot.lane.b32.xlu1 %v10937_v5, %s12750_s30 }
 0x2ef   :  { %774 = vrot.lane.b32.xlu0 %v10936_v25, %s12748_s18  ;;  %v3829_v49 = vand.u32 4294901760, %v3828_v29  ;;  %v11934_v25 = vpop.f32.mrf.mxu1 }
 0x2f0   :  { %v15214_v44 = vpop.permute.xlu1 %1270 }
 0x2f1   :  { %v15216_v2 = vpop.permute.xlu0 %1016  ;;  %v11834_v20 = vpop.f32.mrf.mxu0  ;;  %11851 = vmatmul.mubr.f32.gmra.mxu0 %v3829_v49  ;;  %v15235_v49 = vld [vmem:[%s19403_s0 + $0x288] sm:$0xff] }
 0x2f2   :  { %v3712_v50 = vadd.f32 %v14649_v24, %v11834_v20  ;;  %2560 = vrot.lane.b32.xlu1 %v11001_v32, %s12754_s20  ;;  %v2766_v20 = vsel %vm2727_vm2, %v2701_v12, %v15080_v28 }
 0x2f3   :  { %1794 = vrot.lane.b32.xlu0 %v11000_v8, %s12751_s15 }
 0x2f4   :  { %v2291_v29 = vpop.permute.xlu1 %2290  ;;  %v15223_v0 = vadd.f32 %v11934_v25, %v3712_v50  ;;  %v2831_v50 = vsel %vm2792_vm3, %v2766_v20, %v15101_v21  ;;  %v2702_v20 = vsel %vm2662_vm1, %v14582_v4, %v15082_v55  ;;  %v15269_v4 = vld [vmem:[%s19403_s0 + $0x290] sm:$0xff] }
 0x2f5   :  { %v2037_v38 = vpop.permute.xlu0 %2036  ;;  %v2896_v41 = vsel %vm2857_vm4, %v2831_v50, %v15126_v61 }
 0x2f6   :  { %19859 = vst [vmem:[#allocation105_spill] sm:$0xff] %v15223_v0  ;;  %1030 = vrot.lane.b32.xlu1 %v11000_v8, %s12747_s17  ;;  %v2961_v30 = vsel %vm2922_vm5, %v2896_v41, %v1779_v54  ;;  %v2767_v54 = vsel %vm2727_vm2, %v2702_v20, %v15103_v34 }
 0x2f7   :  { %776 = vrot.lane.b32.xlu0 %v10937_v5, %s12748_s18  ;;  %v3026_v28 = vsel %vm2987_vm6, %v2961_v30, %v2035_v39  ;;  %v2832_v55 = vsel %vm2792_vm3, %v2767_v54, %v15128_v57  ;;  %v10939_v54 = vld [vmem:[%s19403_s0 + $0x291] sm:$0xff] }
 0x2f8   :  { %v15239_v25 = vpop.permute.xlu1 %1526  ;;  %v3091_v12 = vsel %vm3052_vm7, %v3026_v28, %v2291_v29  ;;  %v10938_v29 = vld [vmem:[%s19403_s0 + $0x289] sm:$0xff]  ;;  %v2897_v34 = vsel %vm2857_vm4, %v2832_v55, %v15160_v53 }
 0x2f9   :  { %v15241_v62 = vpop.permute.xlu0 %1272  ;;  %v2962_v30 = vsel %vm2922_vm5, %v2897_v34, %v1781_v3 }
 0x2fa   :  { %2050 = vrot.lane.b32.xlu1 %v15235_v49, %s12752_s24  ;;  %v3027_v57 = vsel %vm2987_vm6, %v2962_v30, %v2037_v38 }
 0x2fb   :  { %1796 = vrot.lane.b32.xlu0 %v11001_v32, %s12751_s15 }
 0x2fc   :  { %v2547_v8 = vpop.permute.xlu1 %2546 }
 0x2fd   :  { %v2293_v21 = vpop.permute.xlu0 %2292  ;;  %v3156_v5 = vsel %vm3117_vm8, %v3091_v12, %v2547_v8 }
 0x2fe   :  { %v3307_v61 = vsel %vm3191_vm9, %v3156_v5, 0  ;;  %1286 = vrot.lane.b32.xlu1 %v15235_v49, %s12749_s27  ;;  %v3092_v12 = vsel %vm3052_vm7, %v3027_v57, %v2293_v21  ;;  %v11002_v21 = vld [vmem:[%s19403_s0 + $0x28a] sm:$0xff] }
 0x2ff   :  { %1032 = vrot.lane.b32.xlu0 %v11001_v32, %s12747_s17  ;;  %v15261_v39 = vand.u32 4294901760, %v3307_v61 }
 0x300   :  { %v15273_v50 = vpop.permute.xlu1 %1528 }
 0x301   :  { %19860 = vst [vmem:[#allocation106_spill] sm:$0xff] %v15261_v39  ;;  %v15275_v32 = vpop.permute.xlu0 %762  ;;  %v15280_v41 = vsub.f32 %v3307_v61, %v15261_v39  ;;  %11953 = vmatprep.mubr.f32.mxu1 %v15261_v39 }
 0x302   :  { %2306 = vrot.lane.b32.xlu1 %v10938_v29, %s12753_s1 }
 0x303   :  { %19861 = vst [vmem:[#allocation107_spill] sm:$0xff] %v15280_v41  ;;  %2052 = vrot.lane.b32.xlu0 %v15269_v4, %s12752_s24  ;;  %v19566_v28 = vand.u32 4294901760, %v15280_v41 }
 0x304   :  { %v2549_v8 = vpop.permute.xlu1 %2548 }
 0x305   :  { %v1783_v53 = vpop.permute.xlu0 %1782  ;;  %v3157_v5 = vsel %vm3117_vm8, %v3092_v12, %v2549_v8  ;;  %v3838_v20 = vsub.f32 %v15280_v41, %v19566_v28  ;;  %v2703_v41 = vsel %vm2662_vm1, %v14666_v51, %v15162_v48 }
 0x306   :  { %v3310_v3 = vsel %vm3191_vm9, %v3157_v5, 0  ;;  %1542 = vrot.lane.b32.xlu1 %v10938_v29, %s12750_s30 }
 0x307   :  { %1288 = vrot.lane.b32.xlu0 %v15269_v4, %s12749_s27  ;;  %v15298_v38 = vand.u32 4294901760, %v3310_v3  ;;  %v3839_v61 = vand.u32 4294901760, %v3838_v20  ;;  %v15322_v20 = vpop.f32.mrf.mxu0 }
 0x308   :  { %v15306_v55 = vpop.permute.xlu1 %1018  ;;  %19864 = vst [vmem:[#allocation110_spill] sm:$0xff] %v15322_v20 }
 0x309   :  { %19862 = vst [vmem:[#allocation108_spill] sm:$0xff] %v15298_v38  ;;  %v15308_v34 = vpop.permute.xlu0 %764  ;;  %v15311_v30 = vsub.f32 %v3310_v3, %v15298_v38  ;;  %11853 = vmatprep.mubr.f32.mxu0 %v3839_v61  ;;  %11954 = vmatmul.mubr.f32.gmra.mxu1 %v15298_v38  ;;  %v11003_v61 = vld [vmem:[%s19403_s0 + $0x292] sm:$0xff]  ;;  %v15331_v38 = vpop.f32.mrf.mxu1 }
 0x30a   :  { %2562 = vrot.lane.b32.xlu1 %v11002_v21, %s12754_s20  ;;  %19865 = vst [vmem:[#allocation111_spill] sm:$0xff] %v15331_v38 }
 0x30b   :  { %19863 = vst [vmem:[#allocation109_spill] sm:$0xff] %v15311_v30  ;;  %2308 = vrot.lane.b32.xlu0 %v10939_v54, %s12753_s1  ;;  %v19571_v57 = vand.u32 4294901760, %v15311_v30 }
 0x30c   :  { %v2039_v12 = vpop.permute.xlu1 %2038 }
 0x30d   :  { %v1785_v8 = vpop.permute.xlu0 %1784  ;;  %v3848_v5 = vsub.f32 %v15311_v30, %v19571_v57 }
 0x30e   :  { %1544 = vrot.lane.b32.xlu1 %v10939_v54, %s12750_s30 }
 0x30f   :  { %778 = vrot.lane.b32.xlu0 %v10938_v29, %s12748_s18  ;;  %v3849_v3 = vand.u32 4294901760, %v3848_v5  ;;  %v11937_v29 = vpop.f32.mrf.mxu1 }
 0x310   :  { %v15327_v28 = vpop.permute.xlu1 %1274 }
 0x311   :  { %v15329_v0 = vpop.permute.xlu0 %1020  ;;  %v11837_v39 = vpop.f32.mrf.mxu0  ;;  %11854 = vmatmul.mubr.f32.gmra.mxu0 %v3849_v3 }
 0x312   :  { %v3732_v57 = vadd.f32 %v14649_v24, %v11837_v39  ;;  %2564 = vrot.lane.b32.xlu1 %v11003_v61, %s12754_s20  ;;  %v2768_v24 = vsel %vm2727_vm2, %v2703_v41, %v15193_v37  ;;  %v15348_v39 = vld [vmem:[%s19403_s0 + $0x2a0] sm:$0xff] }
 0x313   :  { %1798 = vrot.lane.b32.xlu0 %v11002_v21, %s12751_s15 }
 0x314   :  { %v2295_v5 = vpop.permute.xlu1 %2294  ;;  %v15336_v30 = vadd.f32 %v11937_v29, %v3732_v57  ;;  %v2833_v57 = vsel %vm2792_vm3, %v2768_v24, %v15214_v44  ;;  %v2704_v24 = vsel %vm2662_vm1, %v14700_v18, %v15195_v60  ;;  %v15382_v18 = vld [vmem:[%s19403_s0 + $0x2a8] sm:$0xff] }
 0x315   :  { %v2041_v20 = vpop.permute.xlu0 %2040  ;;  %v2898_v51 = vsel %vm2857_vm4, %v2833_v57, %v15239_v25 }
 0x316   :  { %19866 = vst [vmem:[#allocation112_spill] sm:$0xff] %v15336_v30  ;;  %1034 = vrot.lane.b32.xlu1 %v11002_v21, %s12747_s17  ;;  %v2963_v48 = vsel %vm2922_vm5, %v2898_v51, %v1783_v53  ;;  %v2769_v53 = vsel %vm2727_vm2, %v2704_v24, %v15216_v2  ;;  %v15444_v30 = vpop.f32.mrf.mxu1 }
 0x317   :  { %780 = vrot.lane.b32.xlu0 %v10939_v54, %s12748_s18  ;;  %v3028_v37 = vsel %vm2987_vm6, %v2963_v48, %v2039_v12  ;;  %v2834_v60 = vsel %vm2792_vm3, %v2769_v53, %v15241_v62  ;;  %v10941_v53 = vld [vmem:[%s19403_s0 + $0x2a9] sm:$0xff]  ;;  %19872 = vst [vmem:[#allocation118_spill] sm:$0xff] %v15444_v30  ;;  %v15466_v30 = vld [vmem:[%s19403_s0 + $0x2b8] sm:$0xff] }
 0x318   :  { %v15352_v3 = vpop.permute.xlu1 %1530  ;;  %v3093_v41 = vsel %vm3052_vm7, %v3028_v37, %v2295_v5  ;;  %v10940_v5 = vld [vmem:[%s19403_s0 + $0x2a1] sm:$0xff]  ;;  %v2899_v2 = vsel %vm2857_vm4, %v2834_v60, %v15273_v50 }
 0x319   :  { %v15354_v29 = vpop.permute.xlu0 %1276  ;;  %v2964_v48 = vsel %vm2922_vm5, %v2899_v2, %v1785_v8 }
 0x31a   :  { %2054 = vrot.lane.b32.xlu1 %v15348_v39, %s12752_s24  ;;  %v3029_v62 = vsel %vm2987_vm6, %v2964_v48, %v2041_v20 }
 0x31b   :  { %1800 = vrot.lane.b32.xlu0 %v11003_v61, %s12751_s15 }
 0x31c   :  { %v2551_v21 = vpop.permute.xlu1 %2550 }
 0x31d   :  { %v2297_v44 = vpop.permute.xlu0 %2296  ;;  %v3158_v54 = vsel %vm3117_vm8, %v3093_v41, %v2551_v21 }
 0x31e   :  { %v3313_v25 = vsel %vm3191_vm9, %v3158_v54, 0  ;;  %1290 = vrot.lane.b32.xlu1 %v15348_v39, %s12749_s27  ;;  %v3094_v41 = vsel %vm3052_vm7, %v3029_v62, %v2297_v44  ;;  %v11004_v44 = vld [vmem:[%s19403_s0 + $0x2a2] sm:$0xff] }
 0x31f   :  { %1036 = vrot.lane.b32.xlu0 %v11003_v61, %s12747_s17  ;;  %v15374_v12 = vand.u32 4294901760, %v3313_v25 }
 0x320   :  { %v15386_v57 = vpop.permute.xlu1 %1532 }
 0x321   :  { %19867 = vst [vmem:[#allocation113_spill] sm:$0xff] %v15374_v12  ;;  %v15388_v61 = vpop.permute.xlu0 %766  ;;  %v15393_v51 = vsub.f32 %v3313_v25, %v15374_v12  ;;  %11956 = vmatprep.mubr.f32.mxu1 %v15374_v12 }
 0x322   :  { %2310 = vrot.lane.b32.xlu1 %v10940_v5, %s12753_s1 }
 0x323   :  { %19868 = vst [vmem:[#allocation114_spill] sm:$0xff] %v15393_v51  ;;  %2056 = vrot.lane.b32.xlu0 %v15382_v18, %s12752_s24  ;;  %v19576_v37 = vand.u32 4294901760, %v15393_v51 }
 0x324   :  { %v2553_v21 = vpop.permute.xlu1 %2552 }
 0x325   :  { %v1787_v50 = vpop.permute.xlu0 %1786  ;;  %v3159_v54 = vsel %vm3117_vm8, %v3094_v41, %v2553_v21  ;;  %v3858_v24 = vsub.f32 %v15393_v51, %v19576_v37  ;;  %v2707_v51 = vsel %vm2662_vm1, %v14894_v26, %v15388_v61 }
 0x326   :  { %v3316_v8 = vsel %vm3191_vm9, %v3159_v54, 0  ;;  %1546 = vrot.lane.b32.xlu1 %v10940_v5, %s12750_s30 }
 0x327   :  { %1292 = vrot.lane.b32.xlu0 %v15382_v18, %s12749_s27  ;;  %v15411_v20 = vand.u32 4294901760, %v3316_v8  ;;  %v3859_v25 = vand.u32 4294901760, %v3858_v24  ;;  %v15435_v24 = vpop.f32.mrf.mxu0 }
 0x328   :  { %v15419_v60 = vpop.permute.xlu1 %1022  ;;  %19871 = vst [vmem:[#allocation117_spill] sm:$0xff] %v15435_v24 }
 0x329   :  { %19869 = vst [vmem:[#allocation115_spill] sm:$0xff] %v15411_v20  ;;  %v15421_v2 = vpop.permute.xlu0 %768  ;;  %v15424_v48 = vsub.f32 %v3316_v8, %v15411_v20  ;;  %11856 = vmatprep.mubr.f32.mxu0 %v3859_v25  ;;  %11957 = vmatmul.mubr.f32.gmra.mxu1 %v15411_v20  ;;  %v11005_v25 = vld [vmem:[%s19403_s0 + $0x2aa] sm:$0xff] }
 0x32a   :  { %2566 = vrot.lane.b32.xlu1 %v11004_v44, %s12754_s20 }
 0x32b   :  { %19870 = vst [vmem:[#allocation116_spill] sm:$0xff] %v15424_v48  ;;  %2312 = vrot.lane.b32.xlu0 %v10941_v53, %s12753_s1  ;;  %v19579_v62 = vand.u32 4294901760, %v15424_v48 }
 0x32c   :  { %v2043_v41 = vpop.permute.xlu1 %2042 }
 0x32d   :  { %v1789_v21 = vpop.permute.xlu0 %1788  ;;  %v3868_v54 = vsub.f32 %v15424_v48, %v19579_v62  ;;  %v15449_v62 = vld [vmem:[%s19405_s2] ss:$0 sm:$0xff] }
 0x32e   :  { %1548 = vrot.lane.b32.xlu1 %v10941_v53, %s12750_s30 }
 0x32f   :  { %782 = vrot.lane.b32.xlu0 %v10940_v5, %s12748_s18  ;;  %v3869_v8 = vand.u32 4294901760, %v3868_v54  ;;  %v11940_v54 = vpop.f32.mrf.mxu1 }
 0x330   :  { %v15440_v37 = vpop.permute.xlu1 %1278 }
 0x331   :  { %v15442_v38 = vpop.permute.xlu0 %1024  ;;  %v11840_v20 = vpop.f32.mrf.mxu0  ;;  %11857 = vmatmul.mubr.f32.gmra.mxu0 %v3869_v8  ;;  %v2705_v8 = vsel %vm2662_vm1, %v14779_v59, %v15275_v32 }
 0x332   :  { %v3752_v5 = vadd.f32 %v15449_v62, %v11840_v20  ;;  %2568 = vrot.lane.b32.xlu1 %v11005_v25, %s12754_s20  ;;  %v2770_v20 = vsel %vm2727_vm2, %v2705_v8, %v15306_v55 }
 0x333   :  { %1802 = vrot.lane.b32.xlu0 %v11004_v44, %s12751_s15 }
 0x334   :  { %v2299_v24 = vpop.permute.xlu1 %2298  ;;  %v15454_v48 = vadd.f32 %v11940_v54, %v3752_v5  ;;  %v2835_v5 = vsel %vm2792_vm3, %v2770_v20, %v15327_v28  ;;  %v2706_v20 = vsel %vm2662_vm1, %v14813_v31, %v15308_v34  ;;  %v15500_v31 = vld [vmem:[%s19403_s0 + $0x2c0] sm:$0xff] }
 0x335   :  { %v2045_v12 = vpop.permute.xlu0 %2044  ;;  %v2900_v59 = vsel %vm2857_vm4, %v2835_v5, %v15352_v3 }
 0x336   :  { %19873 = vst [vmem:[#allocation119_spill] sm:$0xff] %v15454_v48  ;;  %1038 = vrot.lane.b32.xlu1 %v11004_v44, %s12747_s17  ;;  %v2965_v32 = vsel %vm2922_vm5, %v2900_v59, %v1787_v50  ;;  %v2771_v50 = vsel %vm2727_vm2, %v2706_v20, %v15329_v0 }
 0x337   :  { %784 = vrot.lane.b32.xlu0 %v10941_v53, %s12748_s18  ;;  %v3030_v55 = vsel %vm2987_vm6, %v2965_v32, %v2043_v41  ;;  %v2836_v34 = vsel %vm2792_vm3, %v2771_v50, %v15354_v29  ;;  %v10943_v50 = vld [vmem:[%s19403_s0 + $0x2c1] sm:$0xff] }
 0x338   :  { %v15470_v54 = vpop.permute.xlu1 %1534  ;;  %v3095_v44 = vsel %vm3052_vm7, %v3030_v55, %v2299_v24  ;;  %v10942_v24 = vld [vmem:[%s19403_s0 + $0x2b9] sm:$0xff]  ;;  %v2901_v0 = vsel %vm2857_vm4, %v2836_v34, %v15386_v57 }
 0x339   :  { %v15472_v48 = vpop.permute.xlu0 %1280  ;;  %v2966_v32 = vsel %vm2922_vm5, %v2901_v0, %v1789_v21 }
 0x33a   :  { %2058 = vrot.lane.b32.xlu1 %v15466_v30, %s12752_s24  ;;  %v3031_v29 = vsel %vm2987_vm6, %v2966_v32, %v2045_v12 }
 0x33b   :  { %1804 = vrot.lane.b32.xlu0 %v11005_v25, %s12751_s15 }
 0x33c   :  { %v2555_v53 = vpop.permute.xlu1 %2554 }
 0x33d   :  { %v2301_v28 = vpop.permute.xlu0 %2300  ;;  %v3160_v8 = vsel %vm3117_vm8, %v3095_v44, %v2555_v53 }
 0x33e   :  { %v3319_v3 = vsel %vm3191_vm9, %v3160_v8, 0  ;;  %1294 = vrot.lane.b32.xlu1 %v15466_v30, %s12749_s27  ;;  %v3096_v44 = vsel %vm3052_vm7, %v3031_v29, %v2301_v28  ;;  %v11006_v28 = vld [vmem:[%s19403_s0 + $0x2ba] sm:$0xff] }
 0x33f   :  { %1040 = vrot.lane.b32.xlu0 %v11005_v25, %s12747_s17  ;;  %v15492_v41 = vand.u32 4294901760, %v3319_v3 }
 0x340   :  { %v15504_v5 = vpop.permute.xlu1 %1536 }
 0x341   :  { %19874 = vst [vmem:[#allocation120_spill] sm:$0xff] %v15492_v41  ;;  %v15506_v25 = vpop.permute.xlu0 %770  ;;  %v15511_v59 = vsub.f32 %v3319_v3, %v15492_v41  ;;  %11959 = vmatprep.mubr.f32.mxu1 %v15492_v41  ;;  %v15562_v41 = vpop.f32.mrf.mxu1 }
 0x342   :  { %2314 = vrot.lane.b32.xlu1 %v10942_v24, %s12753_s1  ;;  %19879 = vst [vmem:[#allocation125_spill] sm:$0xff] %v15562_v41 }
 0x343   :  { %19875 = vst [vmem:[#allocation121_spill] sm:$0xff] %v15511_v59  ;;  %2060 = vrot.lane.b32.xlu0 %v15500_v31, %s12752_s24  ;;  %v19584_v55 = vand.u32 4294901760, %v15511_v59 }
 0x344   :  { %v2557_v53 = vpop.permute.xlu1 %2556 }
 0x345   :  { %v1791_v57 = vpop.permute.xlu0 %1790  ;;  %v3161_v8 = vsel %vm3117_vm8, %v3096_v44, %v2557_v53  ;;  %v3878_v20 = vsub.f32 %v15511_v59, %v19584_v55 }
 0x346   :  { %v3322_v21 = vsel %vm3191_vm9, %v3161_v8, 0  ;;  %1550 = vrot.lane.b32.xlu1 %v10942_v24, %s12750_s30 }
 0x347   :  { %1296 = vrot.lane.b32.xlu0 %v15500_v31, %s12749_s27  ;;  %v15529_v12 = vand.u32 4294901760, %v3322_v21  ;;  %v3879_v3 = vand.u32 4294901760, %v3878_v20  ;;  %v15553_v20 = vpop.f32.mrf.mxu0 }
 0x348   :  { %v15537_v34 = vpop.permute.xlu1 %1026  ;;  %19878 = vst [vmem:[#allocation124_spill] sm:$0xff] %v15553_v20 }
 0x349   :  { %19876 = vst [vmem:[#allocation122_spill] sm:$0xff] %v15529_v12  ;;  %v15539_v0 = vpop.permute.xlu0 %772  ;;  %v15542_v32 = vsub.f32 %v3322_v21, %v15529_v12  ;;  %11859 = vmatprep.mubr.f32.mxu0 %v3879_v3  ;;  %11960 = vmatmul.mubr.f32.gmra.mxu1 %v15529_v12  ;;  %v11007_v3 = vld [vmem:[%s19403_s0 + $0x2c2] sm:$0xff] }
 0x34a   :  { %2570 = vrot.lane.b32.xlu1 %v11006_v28, %s12754_s20 }
 0x34b   :  { %19877 = vst [vmem:[#allocation123_spill] sm:$0xff] %v15542_v32  ;;  %2316 = vrot.lane.b32.xlu0 %v10943_v50, %s12753_s1  ;;  %v19591_v29 = vand.u32 4294901760, %v15542_v32 }
 0x34c   :  { %v2047_v44 = vpop.permute.xlu1 %2046 }
 0x34d   :  { %v1793_v53 = vpop.permute.xlu0 %1792  ;;  %v3888_v8 = vsub.f32 %v15542_v32, %v19591_v29 }
 0x34e   :  { %1552 = vrot.lane.b32.xlu1 %v10943_v50, %s12750_s30 }
 0x34f   :  { %786 = vrot.lane.b32.xlu0 %v10942_v24, %s12748_s18  ;;  %v3889_v21 = vand.u32 4294901760, %v3888_v8  ;;  %v11943_v24 = vpop.f32.mrf.mxu1 }
 0x350   :  { %v15558_v55 = vpop.permute.xlu1 %1282 }
 0x351   :  { %v15560_v12 = vpop.permute.xlu0 %1028  ;;  %v11843_v59 = vpop.f32.mrf.mxu0  ;;  %11860 = vmatmul.mubr.f32.gmra.mxu0 %v3889_v21  ;;  %v15579_v21 = vld [vmem:[%s19403_s0 + $0x2d0] sm:$0xff] }
 0x352   :  { %v3772_v29 = vadd.f32 %v15449_v62, %v11843_v59  ;;  %2572 = vrot.lane.b32.xlu1 %v11007_v3, %s12754_s20  ;;  %v2772_v59 = vsel %vm2727_vm2, %v2707_v51, %v15419_v60 }
 0x353   :  { %1806 = vrot.lane.b32.xlu0 %v11006_v28, %s12751_s15 }
 0x354   :  { %v2303_v8 = vpop.permute.xlu1 %2302  ;;  %v15567_v32 = vadd.f32 %v11943_v24, %v3772_v29  ;;  %v2837_v29 = vsel %vm2792_vm3, %v2772_v59, %v15440_v37  ;;  %v2708_v59 = vsel %vm2662_vm1, %v14930_v58, %v15421_v2  ;;  %v15613_v58 = vld [vmem:[%s19403_s0 + $0x2d8] sm:$0xff] }
 0x355   :  { %v2049_v20 = vpop.permute.xlu0 %2048  ;;  %v2902_v26 = vsel %vm2857_vm4, %v2837_v29, %v15470_v54 }
 0x356   :  { %19880 = vst [vmem:[#allocation126_spill] sm:$0xff] %v15567_v32  ;;  %1042 = vrot.lane.b32.xlu1 %v11006_v28, %s12747_s17  ;;  %v2967_v61 = vsel %vm2922_vm5, %v2902_v26, %v1791_v57  ;;  %v2773_v57 = vsel %vm2727_vm2, %v2708_v59, %v15442_v38 }
 0x357   :  { %788 = vrot.lane.b32.xlu0 %v10943_v50, %s12748_s18  ;;  %v3032_v51 = vsel %vm2987_vm6, %v2967_v61, %v2047_v44  ;;  %v2838_v2 = vsel %vm2792_vm3, %v2773_v57, %v15472_v48  ;;  %v10945_v57 = vld [vmem:[%s19403_s0 + $0x2d9] sm:$0xff] }
 0x358   :  { %v15583_v24 = vpop.permute.xlu1 %1538  ;;  %v3097_v60 = vsel %vm3052_vm7, %v3032_v51, %v2303_v8  ;;  %v10944_v8 = vld [vmem:[%s19403_s0 + $0x2d1] sm:$0xff]  ;;  %v2903_v38 = vsel %vm2857_vm4, %v2838_v2, %v15504_v5 }
 0x359   :  { %v15585_v41 = vpop.permute.xlu0 %1284  ;;  %v2968_v61 = vsel %vm2922_vm5, %v2903_v38, %v1793_v53 }
 0x35a   :  { %2062 = vrot.lane.b32.xlu1 %v15579_v21, %s12752_s24  ;;  %v3033_v48 = vsel %vm2987_vm6, %v2968_v61, %v2049_v20 }
 0x35b   :  { %1808 = vrot.lane.b32.xlu0 %v11007_v3, %s12751_s15 }
 0x35c   :  { %v2559_v28 = vpop.permute.xlu1 %2558 }
 0x35d   :  { %v2305_v37 = vpop.permute.xlu0 %2304  ;;  %v3162_v50 = vsel %vm3117_vm8, %v3097_v60, %v2559_v28 }
 0x35e   :  { %v3325_v54 = vsel %vm3191_vm9, %v3162_v50, 0  ;;  %1298 = vrot.lane.b32.xlu1 %v15579_v21, %s12749_s27  ;;  %v3098_v60 = vsel %vm3052_vm7, %v3033_v48, %v2305_v37  ;;  %v11008_v37 = vld [vmem:[%s19403_s0 + $0x2d2] sm:$0xff] }
 0x35f   :  { %1044 = vrot.lane.b32.xlu0 %v11007_v3, %s12747_s17  ;;  %v15605_v44 = vand.u32 4294901760, %v3325_v54 }
 0x360   :  { %v15617_v29 = vpop.permute.xlu1 %1540 }
 0x361   :  { %19881 = vst [vmem:[#allocation127_spill] sm:$0xff] %v15605_v44  ;;  %v15619_v3 = vpop.permute.xlu0 %774  ;;  %v15624_v26 = vsub.f32 %v3325_v54, %v15605_v44  ;;  %11962 = vmatprep.mubr.f32.mxu1 %v15605_v44 }
 0x362   :  { %2318 = vrot.lane.b32.xlu1 %v10944_v8, %s12753_s1 }
 0x363   :  { %19882 = vst [vmem:[#allocation128_spill] sm:$0xff] %v15624_v26  ;;  %2064 = vrot.lane.b32.xlu0 %v15613_v58, %s12752_s24  ;;  %v19596_v51 = vand.u32 4294901760, %v15624_v26 }
 0x364   :  { %v2561_v28 = vpop.permute.xlu1 %2560 }
 0x365   :  { %v1795_v5 = vpop.permute.xlu0 %1794  ;;  %v3163_v50 = vsel %vm3117_vm8, %v3098_v60, %v2561_v28  ;;  %v3898_v59 = vsub.f32 %v15624_v26, %v19596_v51  ;;  %v2709_v26 = vsel %vm2662_vm1, %v15009_v14, %v15506_v25 }
 0x366   :  { %v3328_v53 = vsel %vm3191_vm9, %v3163_v50, 0  ;;  %1554 = vrot.lane.b32.xlu1 %v10944_v8, %s12750_s30 }
 0x367   :  { %1300 = vrot.lane.b32.xlu0 %v15613_v58, %s12749_s27  ;;  %v15642_v20 = vand.u32 4294901760, %v3328_v53  ;;  %v3899_v54 = vand.u32 4294901760, %v3898_v59  ;;  %v15666_v59 = vpop.f32.mrf.mxu0 }
 0x368   :  { %v15650_v2 = vpop.permute.xlu1 %1030  ;;  %19885 = vst [vmem:[#allocation131_spill] sm:$0xff] %v15666_v59 }
 0x369   :  { %19883 = vst [vmem:[#allocation129_spill] sm:$0xff] %v15642_v20  ;;  %v15652_v38 = vpop.permute.xlu0 %776  ;;  %v15655_v61 = vsub.f32 %v3328_v53, %v15642_v20  ;;  %11862 = vmatprep.mubr.f32.mxu0 %v3899_v54  ;;  %11963 = vmatmul.mubr.f32.gmra.mxu1 %v15642_v20  ;;  %v11009_v54 = vld [vmem:[%s19403_s0 + $0x2da] sm:$0xff]  ;;  %v15675_v20 = vpop.f32.mrf.mxu1 }
 0x36a   :  { %2574 = vrot.lane.b32.xlu1 %v11008_v37, %s12754_s20  ;;  %19886 = vst [vmem:[#allocation132_spill] sm:$0xff] %v15675_v20 }
 0x36b   :  { %19884 = vst [vmem:[#allocation130_spill] sm:$0xff] %v15655_v61  ;;  %2320 = vrot.lane.b32.xlu0 %v10945_v57, %s12753_s1  ;;  %v19601_v48 = vand.u32 4294901760, %v15655_v61 }
 0x36c   :  { %v2051_v60 = vpop.permute.xlu1 %2050 }
 0x36d   :  { %v1797_v28 = vpop.permute.xlu0 %1796  ;;  %v3908_v50 = vsub.f32 %v15655_v61, %v19601_v48 }
 0x36e   :  { %1556 = vrot.lane.b32.xlu1 %v10945_v57, %s12750_s30 }
 0x36f   :  { %790 = vrot.lane.b32.xlu0 %v10944_v8, %s12748_s18  ;;  %v3909_v53 = vand.u32 4294901760, %v3908_v50  ;;  %v11946_v8 = vpop.f32.mrf.mxu1 }
 0x370   :  { %v15671_v51 = vpop.permute.xlu1 %1286 }
 0x371   :  { %v15673_v32 = vpop.permute.xlu0 %1032  ;;  %v11846_v44 = vpop.f32.mrf.mxu0  ;;  %11863 = vmatmul.mubr.f32.gmra.mxu0 %v3909_v53  ;;  %v15692_v53 = vld [vmem:[%s19403_s0 + $0x2e8] sm:$0xff] }
 0x372   :  { %v3792_v48 = vadd.f32 %v15449_v62, %v11846_v44  ;;  %2576 = vrot.lane.b32.xlu1 %v11009_v54, %s12754_s20  ;;  %v2774_v44 = vsel %vm2727_vm2, %v2709_v26, %v15537_v34 }
 0x373   :  { %1810 = vrot.lane.b32.xlu0 %v11008_v37, %s12751_s15 }
 0x374   :  { %v2307_v50 = vpop.permute.xlu1 %2306  ;;  %v15680_v61 = vadd.f32 %v11946_v8, %v3792_v48  ;;  %v2839_v48 = vsel %vm2792_vm3, %v2774_v44, %v15558_v55  ;;  %v2710_v44 = vsel %vm2662_vm1, %v15043_v52, %v15539_v0  ;;  %v15726_v52 = vld [vmem:[%s19403_s0 + $0x2f0] sm:$0xff] }
 0x375   :  { %v2053_v59 = vpop.permute.xlu0 %2052  ;;  %v2904_v14 = vsel %vm2857_vm4, %v2839_v48, %v15583_v24 }
 0x376   :  { %19887 = vst [vmem:[#allocation133_spill] sm:$0xff] %v15680_v61  ;;  %1046 = vrot.lane.b32.xlu1 %v11008_v37, %s12747_s17  ;;  %v2969_v25 = vsel %vm2922_vm5, %v2904_v14, %v1795_v5  ;;  %v2775_v5 = vsel %vm2727_vm2, %v2710_v44, %v15560_v12 }
 0x377   :  { %792 = vrot.lane.b32.xlu0 %v10945_v57, %s12748_s18  ;;  %v3034_v34 = vsel %vm2987_vm6, %v2969_v25, %v2051_v60  ;;  %v2840_v0 = vsel %vm2792_vm3, %v2775_v5, %v15585_v41  ;;  %v10947_v5 = vld [vmem:[%s19403_s0 + $0x2f1] sm:$0xff] }
 0x378   :  { %v15696_v8 = vpop.permute.xlu1 %1542  ;;  %v3099_v26 = vsel %vm3052_vm7, %v3034_v34, %v2307_v50  ;;  %v10946_v50 = vld [vmem:[%s19403_s0 + $0x2e9] sm:$0xff]  ;;  %v2905_v12 = vsel %vm2857_vm4, %v2840_v0, %v15617_v29 }
 0x379   :  { %v15698_v20 = vpop.permute.xlu0 %1288  ;;  %v2970_v25 = vsel %vm2922_vm5, %v2905_v12, %v1797_v28 }
 0x37a   :  { %2066 = vrot.lane.b32.xlu1 %v15692_v53, %s12752_s24  ;;  %v3035_v41 = vsel %vm2987_vm6, %v2970_v25, %v2053_v59 }
 0x37b   :  { %1812 = vrot.lane.b32.xlu0 %v11009_v54, %s12751_s15 }
 0x37c   :  { %v2563_v37 = vpop.permute.xlu1 %2562 }
 0x37d   :  { %v2309_v55 = vpop.permute.xlu0 %2308  ;;  %v3164_v57 = vsel %vm3117_vm8, %v3099_v26, %v2563_v37 }
 0x37e   :  { %v3331_v24 = vsel %vm3191_vm9, %v3164_v57, 0  ;;  %1302 = vrot.lane.b32.xlu1 %v15692_v53, %s12749_s27  ;;  %v3100_v26 = vsel %vm3052_vm7, %v3035_v41, %v2309_v55  ;;  %v11010_v55 = vld [vmem:[%s19403_s0 + $0x2ea] sm:$0xff] }
 0x37f   :  { %1048 = vrot.lane.b32.xlu0 %v11009_v54, %s12747_s17  ;;  %v15718_v60 = vand.u32 4294901760, %v3331_v24 }
 0x380   :  { %v15730_v48 = vpop.permute.xlu1 %1544 }
 0x381   :  { %19888 = vst [vmem:[#allocation134_spill] sm:$0xff] %v15718_v60  ;;  %v15732_v54 = vpop.permute.xlu0 %778  ;;  %v15737_v14 = vsub.f32 %v3331_v24, %v15718_v60  ;;  %11965 = vmatprep.mubr.f32.mxu1 %v15718_v60 }
 0x382   :  { %2322 = vrot.lane.b32.xlu1 %v10946_v50, %s12753_s1 }
 0x383   :  { %19889 = vst [vmem:[#allocation135_spill] sm:$0xff] %v15737_v14  ;;  %2068 = vrot.lane.b32.xlu0 %v15726_v52, %s12752_s24  ;;  %v19606_v34 = vand.u32 4294901760, %v15737_v14 }
 0x384   :  { %v2565_v37 = vpop.permute.xlu1 %2564 }
 0x385   :  { %v1799_v29 = vpop.permute.xlu0 %1798  ;;  %v3165_v57 = vsel %vm3117_vm8, %v3100_v26, %v2565_v37  ;;  %v3918_v44 = vsub.f32 %v15737_v14, %v19606_v34  ;;  %v2711_v14 = vsel %vm2662_vm1, %v15122_v17, %v15619_v3 }
 0x386   :  { %v3334_v28 = vsel %vm3191_vm9, %v3165_v57, 0  ;;  %1558 = vrot.lane.b32.xlu1 %v10946_v50, %s12750_s30 }
 0x387   :  { %1304 = vrot.lane.b32.xlu0 %v15726_v52, %s12749_s27  ;;  %v15755_v59 = vand.u32 4294901760, %v3334_v28  ;;  %v3919_v24 = vand.u32 4294901760, %v3918_v44  ;;  %v15779_v44 = vpop.f32.mrf.mxu0 }
 0x388   :  { %v15763_v0 = vpop.permute.xlu1 %1034  ;;  %19892 = vst [vmem:[#allocation138_spill] sm:$0xff] %v15779_v44 }
 0x389   :  { %19890 = vst [vmem:[#allocation136_spill] sm:$0xff] %v15755_v59  ;;  %v15765_v12 = vpop.permute.xlu0 %780  ;;  %v15768_v25 = vsub.f32 %v3334_v28, %v15755_v59  ;;  %11865 = vmatprep.mubr.f32.mxu0 %v3919_v24  ;;  %11966 = vmatmul.mubr.f32.gmra.mxu1 %v15755_v59  ;;  %v11011_v24 = vld [vmem:[%s19403_s0 + $0x2f2] sm:$0xff]  ;;  %v15788_v59 = vpop.f32.mrf.mxu1 }
 0x38a   :  { %2578 = vrot.lane.b32.xlu1 %v11010_v55, %s12754_s20  ;;  %19893 = vst [vmem:[#allocation139_spill] sm:$0xff] %v15788_v59 }
 0x38b   :  { %19891 = vst [vmem:[#allocation137_spill] sm:$0xff] %v15768_v25  ;;  %2324 = vrot.lane.b32.xlu0 %v10947_v5, %s12753_s1  ;;  %v19611_v41 = vand.u32 4294901760, %v15768_v25 }
 0x38c   :  { %v2055_v26 = vpop.permute.xlu1 %2054 }
 0x38d   :  { %v1801_v37 = vpop.permute.xlu0 %1800  ;;  %v3928_v57 = vsub.f32 %v15768_v25, %v19611_v41 }
 0x38e   :  { %1560 = vrot.lane.b32.xlu1 %v10947_v5, %s12750_s30 }
 0x38f   :  { %794 = vrot.lane.b32.xlu0 %v10946_v50, %s12748_s18  ;;  %v3929_v28 = vand.u32 4294901760, %v3928_v57  ;;  %v11949_v50 = vpop.f32.mrf.mxu1 }
 0x390   :  { %v15784_v34 = vpop.permute.xlu1 %1290 }
 0x391   :  { %v15786_v61 = vpop.permute.xlu0 %1036  ;;  %v11849_v60 = vpop.f32.mrf.mxu0  ;;  %11866 = vmatmul.mubr.f32.gmra.mxu0 %v3929_v28  ;;  %v15805_v28 = vld [vmem:[%s19403_s0 + $0x300] sm:$0xff] }
 0x392   :  { %v3812_v41 = vadd.f32 %v15449_v62, %v11849_v60  ;;  %2580 = vrot.lane.b32.xlu1 %v11011_v24, %s12754_s20  ;;  %v2776_v60 = vsel %vm2727_vm2, %v2711_v14, %v15650_v2 }
 0x393   :  { %1814 = vrot.lane.b32.xlu0 %v11010_v55, %s12751_s15 }
 0x394   :  { %v2311_v57 = vpop.permute.xlu1 %2310  ;;  %v15793_v25 = vadd.f32 %v11949_v50, %v3812_v41  ;;  %v2841_v41 = vsel %vm2792_vm3, %v2776_v60, %v15671_v51  ;;  %v2712_v60 = vsel %vm2662_vm1, %v15156_v33, %v15652_v38  ;;  %v15839_v33 = vld [vmem:[%s19403_s0 + $0x308] sm:$0xff] }
 0x395   :  { %v2057_v44 = vpop.permute.xlu0 %2056  ;;  %v2906_v17 = vsel %vm2857_vm4, %v2841_v41, %v15696_v8 }
 0x396   :  { %19894 = vst [vmem:[#allocation140_spill] sm:$0xff] %v15793_v25  ;;  %1050 = vrot.lane.b32.xlu1 %v11010_v55, %s12747_s17  ;;  %v2971_v3 = vsel %vm2922_vm5, %v2906_v17, %v1799_v29  ;;  %v2777_v29 = vsel %vm2727_vm2, %v2712_v60, %v15673_v32 }
 0x397   :  { %796 = vrot.lane.b32.xlu0 %v10947_v5, %s12748_s18  ;;  %v3036_v2 = vsel %vm2987_vm6, %v2971_v3, %v2055_v26  ;;  %v2842_v38 = vsel %vm2792_vm3, %v2777_v29, %v15698_v20  ;;  %v10949_v29 = vld [vmem:[%s19403_s0 + $0x309] sm:$0xff] }
 0x398   :  { %v15809_v50 = vpop.permute.xlu1 %1546  ;;  %v3101_v14 = vsel %vm3052_vm7, %v3036_v2, %v2311_v57  ;;  %v10948_v57 = vld [vmem:[%s19403_s0 + $0x301] sm:$0xff]  ;;  %v2907_v32 = vsel %vm2857_vm4, %v2842_v38, %v15730_v48 }
 0x399   :  { %v15811_v59 = vpop.permute.xlu0 %1292  ;;  %v2972_v3 = vsel %vm2922_vm5, %v2907_v32, %v1801_v37 }
 0x39a   :  { %2070 = vrot.lane.b32.xlu1 %v15805_v28, %s12752_s24  ;;  %v3037_v20 = vsel %vm2987_vm6, %v2972_v3, %v2057_v44 }
 0x39b   :  { %1816 = vrot.lane.b32.xlu0 %v11011_v24, %s12751_s15 }
 0x39c   :  { %v2567_v55 = vpop.permute.xlu1 %2566 }
 0x39d   :  { %v2313_v51 = vpop.permute.xlu0 %2312  ;;  %v3166_v5 = vsel %vm3117_vm8, %v3101_v14, %v2567_v55 }
 0x39e   :  { %v3337_v8 = vsel %vm3191_vm9, %v3166_v5, 0  ;;  %1306 = vrot.lane.b32.xlu1 %v15805_v28, %s12749_s27  ;;  %v3102_v14 = vsel %vm3052_vm7, %v3037_v20, %v2313_v51  ;;  %v11012_v51 = vld [vmem:[%s19403_s0 + $0x302] sm:$0xff] }
 0x39f   :  { %1052 = vrot.lane.b32.xlu0 %v11011_v24, %s12747_s17  ;;  %v15831_v26 = vand.u32 4294901760, %v3337_v8 }
 0x3a0   :  { %v15843_v41 = vpop.permute.xlu1 %1548 }
 0x3a1   :  { %19895 = vst [vmem:[#allocation141_spill] sm:$0xff] %v15831_v26  ;;  %v15845_v24 = vpop.permute.xlu0 %782  ;;  %v15850_v17 = vsub.f32 %v3337_v8, %v15831_v26  ;;  %11968 = vmatprep.mubr.f32.mxu1 %v15831_v26 }
 0x3a2   :  { %2326 = vrot.lane.b32.xlu1 %v10948_v57, %s12753_s1 }
 0x3a3   :  { %19896 = vst [vmem:[#allocation142_spill] sm:$0xff] %v15850_v17  ;;  %2072 = vrot.lane.b32.xlu0 %v15839_v33, %s12752_s24  ;;  %v19616_v2 = vand.u32 4294901760, %v15850_v17 }
 0x3a4   :  { %v2569_v55 = vpop.permute.xlu1 %2568 }
 0x3a5   :  { %v1803_v48 = vpop.permute.xlu0 %1802  ;;  %v3167_v5 = vsel %vm3117_vm8, %v3102_v14, %v2569_v55  ;;  %v3938_v60 = vsub.f32 %v15850_v17, %v19616_v2  ;;  %v2713_v17 = vsel %vm2662_vm1, %v15235_v49, %v15732_v54 }
 0x3a6   :  { %v3340_v37 = vsel %vm3191_vm9, %v3167_v5, 0  ;;  %1562 = vrot.lane.b32.xlu1 %v10948_v57, %s12750_s30 }
 0x3a7   :  { %1308 = vrot.lane.b32.xlu0 %v15839_v33, %s12749_s27  ;;  %v15868_v44 = vand.u32 4294901760, %v3340_v37  ;;  %v3939_v8 = vand.u32 4294901760, %v3938_v60  ;;  %v15892_v60 = vpop.f32.mrf.mxu0 }
 0x3a8   :  { %v15876_v38 = vpop.permute.xlu1 %1038  ;;  %19899 = vst [vmem:[#allocation145_spill] sm:$0xff] %v15892_v60 }
 0x3a9   :  { %19897 = vst [vmem:[#allocation143_spill] sm:$0xff] %v15868_v44  ;;  %v15878_v32 = vpop.permute.xlu0 %784  ;;  %v15881_v3 = vsub.f32 %v3340_v37, %v15868_v44  ;;  %11868 = vmatprep.mubr.f32.mxu0 %v3939_v8  ;;  %11969 = vmatmul.mubr.f32.gmra.mxu1 %v15868_v44  ;;  %v11013_v8 = vld [vmem:[%s19403_s0 + $0x30a] sm:$0xff]  ;;  %v15901_v44 = vpop.f32.mrf.mxu1 }
 0x3aa   :  { %2582 = vrot.lane.b32.xlu1 %v11012_v51, %s12754_s20  ;;  %19900 = vst [vmem:[#allocation146_spill] sm:$0xff] %v15901_v44 }
 0x3ab   :  { %19898 = vst [vmem:[#allocation144_spill] sm:$0xff] %v15881_v3  ;;  %2328 = vrot.lane.b32.xlu0 %v10949_v29, %s12753_s1  ;;  %v19621_v20 = vand.u32 4294901760, %v15881_v3 }
 0x3ac   :  { %v2059_v14 = vpop.permute.xlu1 %2058 }
 0x3ad   :  { %v1805_v55 = vpop.permute.xlu0 %1804  ;;  %v3948_v5 = vsub.f32 %v15881_v3, %v19621_v20 }
 0x3ae   :  { %1564 = vrot.lane.b32.xlu1 %v10949_v29, %s12750_s30 }
 0x3af   :  { %798 = vrot.lane.b32.xlu0 %v10948_v57, %s12748_s18  ;;  %v3949_v37 = vand.u32 4294901760, %v3948_v5  ;;  %v11952_v57 = vpop.f32.mrf.mxu1 }
 0x3b0   :  { %v15897_v2 = vpop.permute.xlu1 %1294 }
 0x3b1   :  { %v15899_v25 = vpop.permute.xlu0 %1040  ;;  %v11852_v26 = vpop.f32.mrf.mxu0  ;;  %11869 = vmatmul.mubr.f32.gmra.mxu0 %v3949_v37  ;;  %v15918_v37 = vld [vmem:[%s19403_s0 + $0x318] sm:$0xff] }
 0x3b2   :  { %v3832_v20 = vadd.f32 %v15449_v62, %v11852_v26  ;;  %2584 = vrot.lane.b32.xlu1 %v11013_v8, %s12754_s20  ;;  %v2778_v26 = vsel %vm2727_vm2, %v2713_v17, %v15763_v0 }
 0x3b3   :  { %1818 = vrot.lane.b32.xlu0 %v11012_v51, %s12751_s15 }
 0x3b4   :  { %v2315_v5 = vpop.permute.xlu1 %2314  ;;  %v15906_v3 = vadd.f32 %v11952_v57, %v3832_v20  ;;  %v2843_v20 = vsel %vm2792_vm3, %v2778_v26, %v15784_v34  ;;  %v2714_v26 = vsel %vm2662_vm1, %v15269_v4, %v15765_v12  ;;  %v15952_v4 = vld [vmem:[%s19403_s0 + $0x320] sm:$0xff] }
 0x3b5   :  { %v2061_v60 = vpop.permute.xlu0 %2060  ;;  %v2908_v49 = vsel %vm2857_vm4, %v2843_v20, %v15809_v50 }
 0x3b6   :  { %19901 = vst [vmem:[#allocation147_spill] sm:$0xff] %v15906_v3  ;;  %1054 = vrot.lane.b32.xlu1 %v11012_v51, %s12747_s17  ;;  %v2973_v54 = vsel %vm2922_vm5, %v2908_v49, %v1803_v48  ;;  %v2779_v48 = vsel %vm2727_vm2, %v2714_v26, %v15786_v61 }
 0x3b7   :  { %800 = vrot.lane.b32.xlu0 %v10949_v29, %s12748_s18  ;;  %v3038_v0 = vsel %vm2987_vm6, %v2973_v54, %v2059_v14  ;;  %v2844_v12 = vsel %vm2792_vm3, %v2779_v48, %v15811_v59  ;;  %v10951_v48 = vld [vmem:[%s19403_s0 + $0x321] sm:$0xff] }
 0x3b8   :  { %v15922_v57 = vpop.permute.xlu1 %1550  ;;  %v3103_v17 = vsel %vm3052_vm7, %v3038_v0, %v2315_v5  ;;  %v10950_v5 = vld [vmem:[%s19403_s0 + $0x319] sm:$0xff]  ;;  %v2909_v61 = vsel %vm2857_vm4, %v2844_v12, %v15843_v41 }
 0x3b9   :  { %v15924_v44 = vpop.permute.xlu0 %1296  ;;  %v2974_v54 = vsel %vm2922_vm5, %v2909_v61, %v1805_v55 }
 0x3ba   :  { %2074 = vrot.lane.b32.xlu1 %v15918_v37, %s12752_s24  ;;  %v3039_v59 = vsel %vm2987_vm6, %v2974_v54, %v2061_v60 }
 0x3bb   :  { %1820 = vrot.lane.b32.xlu0 %v11013_v8, %s12751_s15 }
 0x3bc   :  { %v2571_v51 = vpop.permute.xlu1 %2570 }
 0x3bd   :  { %v2317_v34 = vpop.permute.xlu0 %2316  ;;  %v3168_v29 = vsel %vm3117_vm8, %v3103_v17, %v2571_v51 }
 0x3be   :  { %v3343_v50 = vsel %vm3191_vm9, %v3168_v29, 0  ;;  %1310 = vrot.lane.b32.xlu1 %v15918_v37, %s12749_s27  ;;  %v3104_v17 = vsel %vm3052_vm7, %v3039_v59, %v2317_v34  ;;  %v11014_v34 = vld [vmem:[%s19403_s0 + $0x31a] sm:$0xff] }
 0x3bf   :  { %1056 = vrot.lane.b32.xlu0 %v11013_v8, %s12747_s17  ;;  %v15944_v14 = vand.u32 4294901760, %v3343_v50 }
 0x3c0   :  { %v15956_v20 = vpop.permute.xlu1 %1552 }
 0x3c1   :  { %19902 = vst [vmem:[#allocation148_spill] sm:$0xff] %v15944_v14  ;;  %v15958_v8 = vpop.permute.xlu0 %786  ;;  %v15963_v49 = vsub.f32 %v3343_v50, %v15944_v14  ;;  %11971 = vmatprep.mubr.f32.mxu1 %v15944_v14 }
 0x3c2   :  { %2330 = vrot.lane.b32.xlu1 %v10950_v5, %s12753_s1 }
 0x3c3   :  { %19903 = vst [vmem:[#allocation149_spill] sm:$0xff] %v15963_v49  ;;  %2076 = vrot.lane.b32.xlu0 %v15952_v4, %s12752_s24  ;;  %v19626_v0 = vand.u32 4294901760, %v15963_v49 }
 0x3c4   :  { %v2573_v51 = vpop.permute.xlu1 %2572 }
 0x3c5   :  { %v1807_v41 = vpop.permute.xlu0 %1806  ;;  %v3169_v29 = vsel %vm3117_vm8, %v3104_v17, %v2573_v51  ;;  %v3958_v26 = vsub.f32 %v15963_v49, %v19626_v0  ;;  %v2715_v49 = vsel %vm2662_vm1, %v15348_v39, %v15845_v24 }
 0x3c6   :  { %v3346_v55 = vsel %vm3191_vm9, %v3169_v29, 0  ;;  %1566 = vrot.lane.b32.xlu1 %v10950_v5, %s12750_s30 }
 0x3c7   :  { %1312 = vrot.lane.b32.xlu0 %v15952_v4, %s12749_s27  ;;  %v15981_v60 = vand.u32 4294901760, %v3346_v55  ;;  %v3959_v50 = vand.u32 4294901760, %v3958_v26  ;;  %v16005_v26 = vpop.f32.mrf.mxu0 }
 0x3c8   :  { %v15989_v12 = vpop.permute.xlu1 %1042  ;;  %19906 = vst [vmem:[#allocation152_spill] sm:$0xff] %v16005_v26 }
 0x3c9   :  { %19904 = vst [vmem:[#allocation150_spill] sm:$0xff] %v15981_v60  ;;  %v15991_v61 = vpop.permute.xlu0 %788  ;;  %v15994_v54 = vsub.f32 %v3346_v55, %v15981_v60  ;;  %11871 = vmatprep.mubr.f32.mxu0 %v3959_v50  ;;  %11972 = vmatmul.mubr.f32.gmra.mxu1 %v15981_v60  ;;  %v11015_v50 = vld [vmem:[%s19403_s0 + $0x322] sm:$0xff]  ;;  %v16014_v60 = vpop.f32.mrf.mxu1 }
 0x3ca   :  { %2586 = vrot.lane.b32.xlu1 %v11014_v34, %s12754_s20  ;;  %19907 = vst [vmem:[#allocation153_spill] sm:$0xff] %v16014_v60 }
 0x3cb   :  { %19905 = vst [vmem:[#allocation151_spill] sm:$0xff] %v15994_v54  ;;  %2332 = vrot.lane.b32.xlu0 %v10951_v48, %s12753_s1  ;;  %v19631_v59 = vand.u32 4294901760, %v15994_v54 }
 0x3cc   :  { %v2063_v17 = vpop.permute.xlu1 %2062 }
 0x3cd   :  { %v1809_v51 = vpop.permute.xlu0 %1808  ;;  %v3968_v29 = vsub.f32 %v15994_v54, %v19631_v59 }
 0x3ce   :  { %1568 = vrot.lane.b32.xlu1 %v10951_v48, %s12750_s30 }
 0x3cf   :  { %802 = vrot.lane.b32.xlu0 %v10950_v5, %s12748_s18  ;;  %v3969_v55 = vand.u32 4294901760, %v3968_v29  ;;  %v11955_v5 = vpop.f32.mrf.mxu1 }
 0x3d0   :  { %v16010_v0 = vpop.permute.xlu1 %1298 }
 0x3d1   :  { %v16012_v3 = vpop.permute.xlu0 %1044  ;;  %v11855_v14 = vpop.f32.mrf.mxu0  ;;  %11872 = vmatmul.mubr.f32.gmra.mxu0 %v3969_v55  ;;  %v10888_v55 = vld [vmem:[%s19403_s0 + $0x330] sm:$0xff] }
 0x3d2   :  { %v3852_v59 = vadd.f32 %v15449_v62, %v11855_v14  ;;  %2588 = vrot.lane.b32.xlu1 %v11015_v50, %s12754_s20  ;;  %v2780_v14 = vsel %vm2727_vm2, %v2715_v49, %v15876_v38 }
 0x3d3   :  { %1822 = vrot.lane.b32.xlu0 %v11014_v34, %s12751_s15  ;;  %v2845_v60 = vsel %vm2792_vm3, %v2780_v14, %v15897_v2  ;;  %v2716_v14 = vsel %vm2662_vm1, %v15382_v18, %v15878_v32 }
 0x3d4   :  { %v2319_v29 = vpop.permute.xlu1 %2318  ;;  %v16019_v54 = vadd.f32 %v11955_v5, %v3852_v59  ;;  %v2910_v39 = vsel %vm2857_vm4, %v2845_v60, %v15922_v57 }
 0x3d5   :  { %v2065_v26 = vpop.permute.xlu0 %2064  ;;  %v2975_v24 = vsel %vm2922_vm5, %v2910_v39, %v1807_v41  ;;  %v2781_v41 = vsel %vm2727_vm2, %v2716_v14, %v15899_v25 }
 0x3d6   :  { %19908 = vst [vmem:[#allocation154_spill] sm:$0xff] %v16019_v54  ;;  %1058 = vrot.lane.b32.xlu1 %v11014_v34, %s12747_s17  ;;  %v3040_v38 = vsel %vm2987_vm6, %v2975_v24, %v2063_v17  ;;  %v10952_v17 = vld [vmem:[%s19403_s0 + $0x331] sm:$0xff]  ;;  %v2846_v18 = vsel %vm2792_vm3, %v2781_v41, %v15924_v44 }
 0x3d7   :  { %804 = vrot.lane.b32.xlu0 %v10951_v48, %s12748_s18  ;;  %v3105_v49 = vsel %vm3052_vm7, %v3040_v38, %v2319_v29  ;;  %v10889_v29 = vld [vmem:[%s19403_s0 + $0x338] sm:$0xff]  ;;  %v2911_v25 = vsel %vm2857_vm4, %v2846_v18, %v15956_v20 }
 0x3d8   :  { %v16033_v59 = vpop.permute.xlu1 %1554  ;;  %v2976_v39 = vsel %vm2922_vm5, %v2911_v25, %v1809_v51 }
 0x3d9   :  { %v16035_v5 = vpop.permute.xlu0 %1300  ;;  %v3041_v44 = vsel %vm2987_vm6, %v2976_v39, %v2065_v26 }
 0x3da   :  { %2078 = vrot.lane.b32.xlu1 %v10888_v55, %s12752_s24 }
 0x3db   :  { %1824 = vrot.lane.b32.xlu0 %v11015_v50, %s12751_s15 }
 0x3dc   :  { %v2575_v34 = vpop.permute.xlu1 %2574 }
 0x3dd   :  { %v2321_v48 = vpop.permute.xlu0 %2320  ;;  %v3170_v2 = vsel %vm3117_vm8, %v3105_v49, %v2575_v34 }
 0x3de   :  { %v3349_v57 = vsel %vm3191_vm9, %v3170_v2, 0  ;;  %1314 = vrot.lane.b32.xlu1 %v10888_v55, %s12749_s27  ;;  %v3106_v38 = vsel %vm3052_vm7, %v3041_v44, %v2321_v48  ;;  %v11016_v48 = vld [vmem:[%s19403_s0 + $0x332] sm:$0xff] }
 0x3df   :  { %1060 = vrot.lane.b32.xlu0 %v11015_v50, %s12747_s17  ;;  %v16053_v60 = vand.u32 4294901760, %v3349_v57  ;;  %s12763_s17 = smov 80  }
 0x3e0   :  { %v16063_v32 = vpop.permute.xlu1 %1556 }
 0x3e1   :  { %19909 = vst [vmem:[#allocation155_spill] sm:$0xff] %v16053_v60  ;;  %v16065_v55 = vpop.permute.xlu0 %790  ;;  %v16070_v50 = vsub.f32 %v3349_v57, %v16053_v60  ;;  %11974 = vmatprep.mubr.f32.mxu1 %v16053_v60  ;;  %v10953_v57 = vld [vmem:[%s19403_s0 + $0x339] sm:$0xff] }
 0x3e2   :  { %2334 = vrot.lane.b32.xlu1 %v10952_v17, %s12753_s1 }
 0x3e3   :  { %2080 = vrot.lane.b32.xlu0 %v10889_v29, %s12752_s24  ;;  %v19636_v24 = vand.u32 4294901760, %v16070_v50 }
 0x3e4   :  { %v2577_v49 = vpop.permute.xlu1 %2576 }
 0x3e5   :  { %v1811_v34 = vpop.permute.xlu0 %1810  ;;  %v3171_v20 = vsel %vm3117_vm8, %v3106_v38, %v2577_v49  ;;  %v3978_v2 = vsub.f32 %v16070_v50, %v19636_v24  ;;  %v16110_v38 = vpop.f32.mrf.mxu0 }
 0x3e6   :  { %v3352_v51 = vsel %vm3191_vm9, %v3171_v20, 0  ;;  %1570 = vrot.lane.b32.xlu1 %v10952_v17, %s12750_s30  ;;  %19911 = vst [vmem:[#allocation157_spill] sm:$0xff] %v16110_v38  ;;  %v10827_v20 = vld [vmem:[%s19403_s0 + $0x33a] sm:$0xff] }
 0x3e7   :  { %1316 = vrot.lane.b32.xlu0 %v10889_v29, %s12749_s27  ;;  %v16086_v14 = vand.u32 4294901760, %v3352_v51  ;;  %v3979_v26 = vand.u32 4294901760, %v3978_v2 }
 0x3e8   :  { %v16094_v41 = vpop.permute.xlu1 %1046 }
 0x3e9   :  { %19910 = vst [vmem:[#allocation156_spill] sm:$0xff] %v16086_v14  ;;  %v16096_v18 = vpop.permute.xlu0 %792  ;;  %v16099_v25 = vsub.f32 %v3352_v51, %v16086_v14  ;;  %11874 = vmatprep.mubr.f32.mxu0 %v3979_v26  ;;  %11975 = vmatmul.mubr.f32.gmra.mxu1 %v16086_v14  ;;  %v16119_v26 = vpop.f32.mrf.mxu1 }
 0x3ea   :  { %2590 = vrot.lane.b32.xlu1 %v11016_v48, %s12754_s20  ;;  %19912 = vst [vmem:[#allocation158_spill] sm:$0xff] %v16119_v26 }
 0x3eb   :  { %2336 = vrot.lane.b32.xlu0 %v10953_v57, %s12753_s1  ;;  %v19637_v17 = vand.u32 4294901760, %v16099_v25 }
 0x3ec   :  { %v2067_v29 = vpop.permute.xlu1 %2066 }
 0x3ed   :  { %v1813_v39 = vpop.permute.xlu0 %1812  ;;  %v3988_v44 = vsub.f32 %v16099_v25, %v19637_v17 }
 0x3ee   :  { %1826 = vrot.lane.b32.xlu1 %v11016_v48, %s12751_s15  ;;  %v11958_v48 = vpop.f32.mrf.mxu1 }
 0x3ef   :  { %1572 = vrot.lane.b32.xlu0 %v10953_v57, %s12750_s30  ;;  %v3989_v49 = vand.u32 4294901760, %v3988_v44  ;;  %v10891_v57 = vld [vmem:[%s19403_s0 + $0x350] sm:$0xff]  ;;  %v10890_v44 = vld [vmem:[%s19403_s0 + $0x348] sm:$0xff]  ;;  %s12761_s30 = smov 56  }
 0x3f0   :  { %v16115_v2 = vpop.permute.xlu1 %1302 }
 0x3f1   :  { %v16117_v51 = vpop.permute.xlu0 %1048  ;;  %v11858_v24 = vpop.f32.mrf.mxu0  ;;  %11875 = vmatmul.mubr.f32.gmra.mxu0 %v3989_v49  ;;  %v10955_v49 = vld [vmem:[%s19403_s0 + $0x351] sm:$0xff] }
 0x3f2   :  { %v3872_v17 = vadd.f32 %v15449_v62, %v11858_v24  ;;  %1828 = vrot.lane.b32.xlu1 %v10827_v20, %s12751_s15  ;;  %v2717_v62 = vsel %vm2662_vm1, %v15466_v30, %v15958_v8 }
 0x3f3   :  { %2592 = vrot.lane.b32.xlu0 %v10827_v20, %s12754_s20  ;;  %v2782_v24 = vsel %vm2727_vm2, %v2717_v62, %v15989_v12 }
 0x3f4   :  { %v2323_v38 = vpop.permute.xlu1 %2322  ;;  %v16130_v26 = vadd.f32 %v11958_v48, %v3872_v17  ;;  %v10954_v17 = vld [vmem:[%s19403_s0 + $0x349] sm:$0xff]  ;;  %v2847_v20 = vsel %vm2792_vm3, %v2782_v24, %v16010_v0 }
 0x3f5   :  { %v2069_v54 = vpop.permute.xlu0 %2068  ;;  %v2912_v8 = vsel %vm2857_vm4, %v2847_v20, %v16033_v59  ;;  %v11018_v0 = vld [vmem:[%s19403_s0 + $0x34a] sm:$0xff] }
 0x3f6   :  { %19913 = vst [vmem:[#allocation159_spill] sm:$0xff] %v16130_v26  ;;  %2084 = vrot.lane.b32.xlu1 %v10891_v57, %s12752_s24  ;;  %v2977_v12 = vsel %vm2922_vm5, %v2912_v8, %v1811_v34 }
 0x3f7   :  { %2082 = vrot.lane.b32.xlu0 %v10890_v44, %s12752_s24  ;;  %v3042_v57 = vsel %vm2987_vm6, %v2977_v12, %v2067_v29  ;;  %v11019_v44 = vld [vmem:[%s19403_s0 + $0x352] sm:$0xff] }
 0x3f8   :  { %v16147_v48 = vpop.permute.xlu1 %1558  ;;  %v3107_v62 = vsel %vm3052_vm7, %v3042_v57, %v2323_v38 }
 0x3f9   :  { %v16149_v30 = vpop.permute.xlu0 %1304 }
 0x3fa   :  { %2340 = vrot.lane.b32.xlu1 %v10955_v49, %s12753_s1  ;;  %v2718_v49 = vsel %vm2662_vm1, %v15500_v31, %v15991_v61 }
 0x3fb   :  { %2338 = vrot.lane.b32.xlu0 %v10954_v17, %s12753_s1  ;;  %v2783_v17 = vsel %vm2727_vm2, %v2718_v49, %v16012_v3  ;;  %s12760_s1 = smov 48  }
 0x3fc   :  { %v2579_v24 = vpop.permute.xlu1 %2578  ;;  %v2848_v38 = vsel %vm2792_vm3, %v2783_v17, %v16035_v5 }
 0x3fd   :  { %v2325_v59 = vpop.permute.xlu0 %2324  ;;  %v3172_v34 = vsel %vm3117_vm8, %v3107_v62, %v2579_v24  ;;  %v2913_v31 = vsel %vm2857_vm4, %v2848_v38, %v16063_v32 }
 0x3fe   :  { %v3355_v29 = vsel %vm3191_vm9, %v3172_v34, 0  ;;  %2596 = vrot.lane.b32.xlu1 %v11019_v44, %s12754_s20  ;;  %v2978_v57 = vsel %vm2922_vm5, %v2913_v31, %v1813_v39 }
 0x3ff   :  { %2594 = vrot.lane.b32.xlu0 %v11018_v0, %s12754_s20  ;;  %v16173_v20 = vand.u32 4294901760, %v3355_v29  ;;  %v3043_v3 = vsel %vm2987_vm6, %v2978_v57, %v2069_v54 }
 0x400   :  { %v1561_v8 = vpop.permute.xlu1 %1560  ;;  %v3108_v0 = vsel %vm3052_vm7, %v3043_v3, %v2325_v59  ;;  %v16208_v3 = vpop.f32.mrf.mxu0 }
 0x401   :  { %19914 = vst [vmem:[#allocation160_spill] sm:$0xff] %v16173_v20  ;;  %v16177_v12 = vpop.permute.xlu0 %794  ;;  %v16182_v61 = vsub.f32 %v3355_v29, %v16173_v20  ;;  %11977 = vmatprep.mubr.f32.mxu1 %v16173_v20  ;;  %19916 = vst [vmem:[#allocation162_spill] sm:$0xff] %v16208_v3 }
 0x403   :  { %v19638_v44 = vand.u32 4294901760, %v16182_v61 }
 0x404   :  { %v2581_v5 = vpop.permute.xlu1 %2580 }
 0x405   :  { %v1815_v62 = vpop.permute.xlu0 %1814  ;;  %v3173_v24 = vsel %vm3117_vm8, %v3108_v0, %v2581_v5  ;;  %v3998_v32 = vsub.f32 %v16182_v61, %v19638_v44 }
 0x406   :  { %v3358_v34 = vsel %vm3191_vm9, %v3173_v24, 0 }
 0x407   :  { %v16194_v49 = vand.u32 4294901760, %v3358_v34  ;;  %v3999_v29 = vand.u32 4294901760, %v3998_v32  ;;  %v16214_v32 = vpop.f32.mrf.mxu1 }
 0x408   :  { %v16196_v39 = vpop.permute.xlu1 %1050  ;;  %19917 = vst [vmem:[#allocation163_spill] sm:$0xff] %v16214_v32 }
 0x409   :  { %19915 = vst [vmem:[#allocation161_spill] sm:$0xff] %v16194_v49  ;;  %v16198_v54 = vpop.permute.xlu0 %796  ;;  %v16201_v17 = vsub.f32 %v3358_v34, %v16194_v49  ;;  %11877 = vmatprep.mubr.f32.mxu0 %v3999_v29  ;;  %11978 = vmatmul.mubr.f32.gmra.mxu1 %v16194_v49  ;;  %v16219_v29 = vld [vmem:[%s19405_s2] ss:$0 sm:$0xff]  ;;  %v11961_v26 = vpop.f32.mrf.mxu1 }
 0x40b   :  { %v19639_v59 = vand.u32 4294901760, %v16201_v17 }
 0x40c   :  { %v2071_v38 = vpop.permute.xlu1 %2070 }
 0x40d   :  { %v1817_v31 = vpop.permute.xlu0 %1816  ;;  %v4008_v57 = vsub.f32 %v16201_v17, %v19639_v59 }
 0x40f   :  { %v4009_v0 = vand.u32 4294901760, %v4008_v57  ;;  %v2719_v57 = vsel %vm2662_vm1, %v15579_v21, %v16065_v55 }
 0x410   :  { %v16210_v5 = vpop.permute.xlu1 %1306  ;;  %v2784_v32 = vsel %vm2727_vm2, %v2719_v57, %v16094_v41  ;;  %v2720_v41 = vsel %vm2662_vm1, %v15613_v58, %v16096_v18 }
 0x411   :  { %v16212_v24 = vpop.permute.xlu0 %1052  ;;  %v11861_v34 = vpop.f32.mrf.mxu0  ;;  %11878 = vmatmul.mubr.f32.gmra.mxu0 %v4009_v0  ;;  %v2849_v0 = vsel %vm2792_vm3, %v2784_v32, %v16115_v2  ;;  %v2785_v32 = vsel %vm2727_vm2, %v2720_v41, %v16117_v51 }
 0x412   :  { %v3892_v44 = vadd.f32 %v16219_v29, %v11861_v34  ;;  %v2914_v34 = vsel %vm2857_vm4, %v2849_v0, %v16147_v48 }
 0x413   :  { %v2979_v60 = vsel %vm2922_vm5, %v2914_v34, %v1815_v62 }
 0x414   :  { %v2327_v59 = vpop.permute.xlu1 %2326  ;;  %v16222_v3 = vadd.f32 %v11961_v26, %v3892_v44  ;;  %v3044_v26 = vsel %vm2987_vm6, %v2979_v60, %v2071_v38  ;;  %v2850_v60 = vsel %vm2792_vm3, %v2785_v32, %v16149_v30 }
 0x415   :  { %v2073_v49 = vpop.permute.xlu0 %2072  ;;  %v3109_v44 = vsel %vm3052_vm7, %v3044_v26, %v2327_v59  ;;  %v2915_v38 = vsel %vm2857_vm4, %v2850_v60, %v1561_v8 }
 0x416   :  { %19918 = vst [vmem:[#allocation164_spill] sm:$0xff] %v16222_v3  ;;  %v2980_v58 = vsel %vm2922_vm5, %v2915_v38, %v1817_v31  ;;  %v16279_v38 = vpop.f32.mrf.mxu0 }
 0x417   :  { %v3045_v18 = vsel %vm2987_vm6, %v2980_v58, %v2073_v49  ;;  %19922 = vst [vmem:[#allocation168_spill] sm:$0xff] %v16279_v38 }
 0x418   :  { %v1563_v20 = vpop.permute.xlu1 %1562 }
 0x419   :  { %v16231_v14 = vpop.permute.xlu0 %1308 }
 0x41c   :  { %v2583_v3 = vpop.permute.xlu1 %2582 }
 0x41d   :  { %v2329_v21 = vpop.permute.xlu0 %2328  ;;  %v3174_v55 = vsel %vm3117_vm8, %v3109_v44, %v2583_v3 }
 0x41e   :  { %v3361_v2 = vsel %vm3191_vm9, %v3174_v55, 0  ;;  %v3110_v57 = vsel %vm3052_vm7, %v3045_v18, %v2329_v21 }
 0x41f   :  { %v16245_v48 = vand.u32 4294901760, %v3361_v2 }
 0x420   :  { %v1565_v62 = vpop.permute.xlu1 %1564 }
 0x421   :  { %19919 = vst [vmem:[#allocation165_spill] sm:$0xff] %v16245_v48  ;;  %v16249_v59 = vpop.permute.xlu0 %798  ;;  %v16253_v3 = vsub.f32 %v3361_v2, %v16245_v48  ;;  %11980 = vmatprep.mubr.f32.mxu1 %v16245_v48 }
 0x423   :  { %v19648_v51 = vand.u32 4294901760, %v16253_v3 }
 0x424   :  { %v2585_v0 = vpop.permute.xlu1 %2584 }
 0x425   :  { %v1819_v30 = vpop.permute.xlu0 %1818  ;;  %v3175_v34 = vsel %vm3117_vm8, %v3110_v57, %v2585_v0  ;;  %v4018_v8 = vsub.f32 %v16253_v3, %v19648_v51  ;;  %v16285_v0 = vpop.f32.mrf.mxu1 }
 0x426   :  { %v3364_v26 = vsel %vm3191_vm9, %v3175_v34, 0  ;;  %19923 = vst [vmem:[#allocation169_spill] sm:$0xff] %v16285_v0 }
 0x427   :  { %v16265_v44 = vand.u32 4294901760, %v3364_v26  ;;  %v4019_v55 = vand.u32 4294901760, %v4018_v8 }
 0x428   :  { %v16267_v31 = vpop.permute.xlu1 %1054 }
 0x429   :  { %19920 = vst [vmem:[#allocation166_spill] sm:$0xff] %v16265_v44  ;;  %v16269_v49 = vpop.permute.xlu0 %800  ;;  %v16272_v41 = vsub.f32 %v3364_v26, %v16265_v44  ;;  %11880 = vmatprep.mubr.f32.mxu0 %v4019_v55  ;;  %11981 = vmatmul.mubr.f32.gmra.mxu1 %v16265_v44  ;;  %v11964_v26 = vpop.f32.mrf.mxu1 }
 0x42b   :  { %19921 = vst [vmem:[#allocation167_spill] sm:$0xff] %v16272_v41  ;;  %v19651_v21 = vand.u32 4294901760, %v16272_v41 }
 0x42c   :  { %v2075_v2 = vpop.permute.xlu1 %2074 }
 0x42d   :  { %v1821_v32 = vpop.permute.xlu0 %1820  ;;  %v4028_v60 = vsub.f32 %v16272_v41, %v19651_v21  ;;  %v2721_v21 = vsel %vm2662_vm1, %v15692_v53, %v16177_v12  ;;  %v2722_v12 = vsel %vm2662_vm1, %v15726_v52, %v16198_v54 }
 0x42f   :  { %v4029_v58 = vand.u32 4294901760, %v4028_v60  ;;  %v2786_v60 = vsel %vm2727_vm2, %v2721_v21, %v16196_v39 }
 0x430   :  { %v16281_v18 = vpop.permute.xlu1 %1310  ;;  %v2851_v38 = vsel %vm2792_vm3, %v2786_v60, %v16210_v5  ;;  %v2787_v5 = vsel %vm2727_vm2, %v2722_v12, %v16212_v24 }
 0x431   :  { %v16283_v57 = vpop.permute.xlu0 %1056  ;;  %v11864_v34 = vpop.f32.mrf.mxu0  ;;  %11881 = vmatmul.mubr.f32.gmra.mxu0 %v4029_v58  ;;  %v2916_v58 = vsel %vm2857_vm4, %v2851_v38, %v1563_v20 }
 0x432   :  { %v3912_v8 = vadd.f32 %v16219_v29, %v11864_v34  ;;  %v2981_v34 = vsel %vm2922_vm5, %v2916_v58, %v1819_v30  ;;  %v2852_v30 = vsel %vm2792_vm3, %v2787_v5, %v16231_v14 }
 0x433   :  { %v2917_v38 = vsel %vm2857_vm4, %v2852_v30, %v1565_v62  ;;  %v16340_v30 = vpop.f32.mrf.mxu0 }
 0x434   :  { %v2331_v55 = vpop.permute.xlu1 %2330  ;;  %v16288_v44 = vadd.f32 %v11964_v26, %v3912_v8  ;;  %v3046_v8 = vsel %vm2987_vm6, %v2981_v34, %v2075_v2  ;;  %v2982_v52 = vsel %vm2922_vm5, %v2917_v38, %v1821_v32  ;;  %19927 = vst [vmem:[#allocation173_spill] sm:$0xff] %v16340_v30 }
 0x435   :  { %v2077_v51 = vpop.permute.xlu0 %2076  ;;  %v3111_v26 = vsel %vm3052_vm7, %v3046_v8, %v2331_v55 }
 0x436   :  { %19924 = vst [vmem:[#allocation170_spill] sm:$0xff] %v16288_v44  ;;  %v3047_v54 = vsel %vm2987_vm6, %v2982_v52, %v2077_v51 }
 0x438   :  { %v1567_v0 = vpop.permute.xlu1 %1566 }
 0x439   :  { %v16297_v48 = vpop.permute.xlu0 %1312 }
 0x43c   :  { %v2587_v44 = vpop.permute.xlu1 %2586 }
 0x43d   :  { %v2333_v41 = vpop.permute.xlu0 %2332  ;;  %v3176_v53 = vsel %vm3117_vm8, %v3111_v26, %v2587_v44 }
 0x43e   :  { %v3367_v39 = vsel %vm3191_vm9, %v3176_v53, 0  ;;  %v3112_v55 = vsel %vm3052_vm7, %v3047_v54, %v2333_v41 }
 0x43f   :  { %v16310_v20 = vand.u32 4294901760, %v3367_v39 }
 0x440   :  { %v1569_v21 = vpop.permute.xlu1 %1568 }
 0x441   :  { %19925 = vst [vmem:[#allocation171_spill] sm:$0xff] %v16310_v20  ;;  %v16314_v2 = vpop.permute.xlu0 %802  ;;  %v16318_v44 = vsub.f32 %v3367_v39, %v16310_v20  ;;  %11983 = vmatprep.mubr.f32.mxu1 %v16310_v20 }
 0x443   :  { %v19656_v24 = vand.u32 4294901760, %v16318_v44 }
 0x444   :  { %v2589_v60 = vpop.permute.xlu1 %2588 }
 0x445   :  { %v1823_v14 = vpop.permute.xlu0 %1822  ;;  %v3177_v58 = vsel %vm3117_vm8, %v3112_v55, %v2589_v60  ;;  %v4038_v62 = vsub.f32 %v16318_v44, %v19656_v24  ;;  %v16342_v55 = vpop.f32.mrf.mxu1 }
 0x446   :  { %v3370_v34 = vsel %vm3191_vm9, %v3177_v58, 0  ;;  %19928 = vst [vmem:[#allocation174_spill] sm:$0xff] %v16342_v55 }
 0x447   :  { %v16330_v8 = vand.u32 4294901760, %v3370_v34  ;;  %v4039_v26 = vand.u32 4294901760, %v4038_v62 }
 0x448   :  { %v1059_v32 = vpop.permute.xlu1 %1058 }
 0x449   :  { %19926 = vst [vmem:[#allocation172_spill] sm:$0xff] %v16330_v8  ;;  %v805_v53 = vpop.permute.xlu0 %804  ;;  %v16333_v51 = vsub.f32 %v3370_v34, %v16330_v8  ;;  %11883 = vmatprep.mubr.f32.mxu0 %v4039_v26  ;;  %11984 = vmatmul.mubr.f32.gmra.mxu1 %v16330_v8  ;;  %v11967_v62 = vpop.f32.mrf.mxu1 }
 0x44b   :  { %v19657_v41 = vand.u32 4294901760, %v16333_v51 }
 0x44c   :  { %v2079_v12 = vpop.permute.xlu1 %2078 }
 0x44d   :  { %v1825_v39 = vpop.permute.xlu0 %1824  ;;  %v4048_v5 = vsub.f32 %v16333_v51, %v19657_v41  ;;  %v2723_v41 = vsel %vm2662_vm1, %v15805_v28, %v16249_v59  ;;  %v2724_v59 = vsel %vm2662_vm1, %v15839_v33, %v16269_v49 }
 0x44f   :  { %v4049_v38 = vand.u32 4294901760, %v4048_v5  ;;  %v2788_v5 = vsel %vm2727_vm2, %v2723_v41, %v16267_v31 }
 0x450   :  { %v1315_v52 = vpop.permute.xlu1 %1314  ;;  %v2853_v30 = vsel %vm2792_vm3, %v2788_v5, %v16281_v18  ;;  %v2789_v18 = vsel %vm2727_vm2, %v2724_v59, %v16283_v57  ;;  %v2726_v59 = vsel %vm2662_vm1, %v15952_v4, %v805_v53 }
 0x451   :  { %v1061_v54 = vpop.permute.xlu0 %1060  ;;  %v11867_v60 = vpop.f32.mrf.mxu0  ;;  %11884 = vmatmul.mubr.f32.gmra.mxu0 %v4049_v38  ;;  %v2918_v38 = vsel %vm2857_vm4, %v2853_v30, %v1567_v0 }
 0x452   :  { %v3932_v58 = vadd.f32 %v16219_v29, %v11867_v60  ;;  %v2983_v60 = vsel %vm2922_vm5, %v2918_v38, %v1823_v14  ;;  %v2854_v14 = vsel %vm2792_vm3, %v2789_v18, %v16297_v48  ;;  %v2791_v18 = vsel %vm2727_vm2, %v2726_v59, %v1061_v54 }
 0x453   :  { %v3048_v20 = vsel %vm2987_vm6, %v2983_v60, %v2079_v12  ;;  %v2919_v12 = vsel %vm2857_vm4, %v2854_v14, %v1569_v21 }
 0x454   :  { %v2335_v34 = vpop.permute.xlu1 %2334  ;;  %v16345_v24 = vadd.f32 %v11967_v62, %v3932_v58  ;;  %v2984_v33 = vsel %vm2922_vm5, %v2919_v12, %v1825_v39 }
 0x455   :  { %v2081_v26 = vpop.permute.xlu0 %2080  ;;  %v3113_v58 = vsel %vm3052_vm7, %v3048_v20, %v2335_v34 }
 0x456   :  { %19929 = vst [vmem:[#allocation175_spill] sm:$0xff] %v16345_v24  ;;  %v3049_v49 = vsel %vm2987_vm6, %v2984_v33, %v2081_v26 }
 0x458   :  { %v1571_v55 = vpop.permute.xlu1 %1570 }
 0x459   :  { %v1317_v8 = vpop.permute.xlu0 %1316 }
 0x45a   :  { %v2856_v33 = vsel %vm2792_vm3, %v2791_v18, %v1317_v8 }
 0x45c   :  { %v2591_v62 = vpop.permute.xlu1 %2590 }
 0x45d   :  { %v2337_v24 = vpop.permute.xlu0 %2336  ;;  %v3178_v28 = vsel %vm3117_vm8, %v3113_v58, %v2591_v62 }
 0x45e   :  { %v3373_v31 = vsel %vm3191_vm9, %v3178_v28, 0  ;;  %v3114_v34 = vsel %vm3052_vm7, %v3049_v49, %v2337_v24  ;;  %v2725_v24 = vsel %vm2662_vm1, %v15918_v37, %v16314_v2  ;;  %vm7692_vm1 = vcmask 523264  }
 0x45f   :  { %v16365_v0 = vand.u32 4294901760, %v3373_v31 }
 0x460   :  { %v1827_v41 = vpop.permute.xlu1 %1826 }
 0x461   :  { %v1573_v20 = vpop.permute.xlu0 %1572  ;;  %v16371_v30 = vsub.f32 %v3373_v31, %v16365_v0  ;;  %11986 = vmatprep.mubr.f32.mxu1 %v16365_v0  ;;  %v2790_v31 = vsel %vm2727_vm2, %v2725_v24, %v1059_v32  ;;  %v16406_v32 = vpop.f32.mrf.mxu0 }
 0x462   :  { %v2855_v12 = vsel %vm2792_vm3, %v2790_v31, %v1315_v52  ;;  %19930 = vst [vmem:[#allocation176_spill] sm:$0xff] %v16406_v32  ;;  %vm7725_vm3 = vcmask 588800  }
 0x463   :  { %v4057_v57 = vand.u32 4294901760, %v16371_v30 }
 0x464   :  { %v1829_v5 = vpop.permute.xlu1 %1828 }
 0x465   :  { %v2593_v38 = vpop.permute.xlu0 %2592  ;;  %v4058_v21 = vsub.f32 %v16371_v30, %v4057_v57 }
 0x466   :  { %v3179_v48 = vsel %vm3117_vm8, %v3114_v34, %v2593_v38  ;;  %v2920_v38 = vsel %vm2857_vm4, %v2855_v12, %v1571_v55 }
 0x467   :  { %v3376_v60 = vsel %vm3191_vm9, %v3179_v48, 0  ;;  %v4059_v62 = vand.u32 4294901760, %v4058_v21  ;;  %v2921_v48 = vsel %vm2857_vm4, %v2856_v33, %v1573_v20  ;;  %v2985_v4 = vsel %vm2922_vm5, %v2920_v38, %v1827_v41 }
 0x468   :  { %v16383_v58 = vand.u32 4294901760, %v3376_v60  ;;  %v2085_v39 = vpop.permute.xlu1 %2084  ;;  %v2986_v2 = vsel %vm2922_vm5, %v2921_v48, %v1829_v5  ;;  %vm9072_vm4 = vcmask 125952   ;;  %vm9119_vm5 = vcmask 1041409  }
 0x469   :  { %v2083_v28 = vpop.permute.xlu0 %2082  ;;  %11886 = vmatprep.mubr.f32.mxu0 %v4059_v62  ;;  %v3051_v53 = vsel %vm2987_vm6, %v2986_v2, %v2085_v39  ;;  %v19933_v2 = vand.u32 4294901760, %v13168_v63 }
 0x46a   :  { %v16386_v26 = vsub.f32 %v3376_v60, %v16383_v58  ;;  %11987 = vmatmul.mubr.f32.gmra.mxu1 %v16383_v58  ;;  %v3050_v8 = vsel %vm2987_vm6, %v2985_v4, %v2083_v28  ;;  %v16412_v60 = vpop.f32.mrf.mxu1  ;;  %vm9229_vm6 = vcmask 654336  }
 0x46b   :  { %19931 = vst [vmem:[#allocation177_spill] sm:$0xff] %v16412_v60 }
 0x46c   :  { %v4067_v14 = vand.u32 4294901760, %v16386_v26  ;;  %v2341_v49 = vpop.permute.xlu1 %2340  ;;  %v11970_v59 = vpop.f32.mrf.mxu1 }
 0x46d   :  { %v2339_v34 = vpop.permute.xlu0 %2338  ;;  %v3116_v54 = vsel %vm3052_vm7, %v3051_v53, %v2341_v49  ;;  %v19934_v53 = vand.u32 4294901760, %v13251_v47 }
 0x46e   :  { %v4068_v37 = vsub.f32 %v16386_v26, %v4067_v14  ;;  %v3115_v55 = vsel %vm3052_vm7, %v3050_v8, %v2339_v34  ;;  %v19932_v34 = vand.u32 4294901760, %v13137_v40  ;;  %vm9231_vm7 = vcmask 785408  }
 0x470   :  { %v4069_v52 = vand.u32 4294901760, %v4068_v37  ;;  %v2597_v20 = vpop.permute.xlu1 %2596 }
 0x471   :  { %v2595_v21 = vpop.permute.xlu0 %2594  ;;  %v3181_v62 = vsel %vm3117_vm8, %v3116_v54, %v2597_v20  ;;  %v11870_v5 = vpop.f32.mrf.mxu0  ;;  %v19935_v54 = vand.u32 4294901760, %v13282_v23  ;;  %v19937_v20 = vand.u32 4294901760, %v13388_v10 }
 0x472   :  { %v3180_v41 = vsel %vm3117_vm8, %v3115_v55, %v2595_v21  ;;  %11887 = vmatmul.mubr.f32.gmra.mxu0 %v4069_v52  ;;  %v3382_v24 = vsel %vm3191_vm9, %v3181_v62, 0  ;;  %v3952_v28 = vadd.f32 %v16219_v29, %v11870_v5  ;;  %v19936_v55 = vand.u32 4294901760, %v13357_v11 }
 0x473   :  { %v3379_v39 = vsel %vm3191_vm9, %v3180_v41, 0  ;;  %v16419_v31 = vand.u32 4294901760, %v3382_v24  ;;  %v19947_v21 = vand.u32 4294901760, %v13812_v46  ;;  %v19948_v62 = vand.u32 4294901760, %v13895_v15 }
 0x474   :  { %v16421_v18 = vand.u32 4294901760, %v3379_v39  ;;  %v16423_v12 = vadd.f32 %v11970_v59, %v3952_v28  ;;  %v19949_v41 = vand.u32 4294901760, %v13926_v56  ;;  %v19951_v5 = vand.u32 4294901760, %v14039_v9 }
 0x475   :  { %v16426_v33 = vsub.f32 %v3382_v24, %v16419_v31  ;;  %vm10156_vm9 = vcmask 1041408  }
 0x476   :  { %v16429_v49 = vsub.f32 %v3379_v39, %v16421_v18  ;;  %11989 = vmatprep.mubr.f32.mxu1 %v16421_v18 }
 0x477   :  { %11990 = vmatmul.mubr.f32.gmra.mxu1 %v16419_v31  ;;  %v4087_v48 = vand.u32 4294901760, %v16426_v33 }
 0x478   :  { %12096 = vmatprep.mubr.f32.mxu1 %v19932_v34  ;;  %v4077_v38 = vand.u32 4294901760, %v16429_v49 }
 0x479   :  { %v4088_v4 = vsub.f32 %v16426_v33, %v4087_v48 }
 0x47a   :  { %v4078_v37 = vsub.f32 %v16429_v49, %v4077_v38 }
 0x47b   :  { %12097 = vmatmul.mubr.f32.vlgmr.msra.gmra.mxu1 %v19933_v2  ;;  %v4089_v52 = vand.u32 4294901760, %v4088_v4 }
 0x47c   :  { %12099 = vmatprep.mubr.f32.mxu1 %v19934_v53  ;;  %v4079_v8 = vand.u32 4294901760, %v4078_v37  ;;  %12293 = vmatpush3.msra.mxu1 %v12883_v13  ;;  %v19938_v13 = vand.u32 4294901760, %v13463_v1  ;;  %v19969_v53 = vld [vmem:[#allocation67_spill] sm:$0xff] }
 0x47d   :  { %12294 = vmatprep.subr.mxu1 %v12891_v16 }
 0x47e   :  { %11889 = vmatprep.mubr.f32.mxu0 %v4079_v8  ;;  %12295 = vmatpush3.msra.mxu1 %v12891_v16  ;;  %v19939_v16 = vand.u32 4294901760, %v13494_v45  ;;  %v19970_v8 = vand.u32 4294901760, %v19969_v53 }
 0x47f   :  { %11890 = vmatmul.mubr.f32.gmra.mxu0 %v4089_v52  ;;  %12100 = vmatmul.mubr.f32.gmra.mxu1 %v19935_v54  ;;  %v19972_v54 = vld [vmem:[#allocation72_spill] sm:$0xff] }
 0x480   :  { %11996 = vmatprep.mubr.f32.mxu0 %v13137_v40  ;;  %12102 = vmatprep.mubr.f32.mxu1 %v19936_v55  ;;  %v19940_v40 = vand.u32 4294901760, %v13569_v35  ;;  %v19973_v55 = vand.u32 4294901760, %v19972_v54 }
 0x483   :  { %11997 = vmatmul.mubr.f32.vlgmr.msra.gmra.mxu0 %v13168_v63  ;;  %12103 = vmatmul.mubr.f32.gmra.mxu1 %v19937_v20  ;;  %v19942_v63 = vand.u32 4294901760, %v13675_v43 }
 0x484   :  { %12193 = vmatpush3.msra.mxu0 %v12906_v19  ;;  %11999 = vmatprep.mubr.f32.mxu0 %v13251_v47  ;;  %v19941_v19 = vand.u32 4294901760, %v13600_v7  ;;  %v16479_v47 = vpop.f32.mrf.mxu0 }
 0x485   :  { %12105 = vmatprep.mubr.f32.mxu1 %v19938_v13  ;;  %12194 = vmatprep.subr.mxu0 %v12916_v22  ;;  %19944 = vst [vmem:[#allocation178_spill] sm:$0xff] %v16479_v47 }
 0x486   :  { %12195 = vmatpush3.msra.mxu0 %v12916_v22  ;;  %v19943_v22 = vand.u32 4294901760, %v13706_v36 }
 0x487   :  { %12000 = vmatmul.mubr.f32.gmra.mxu0 %v13282_v23  ;;  %12106 = vmatmul.mubr.f32.gmra.mxu1 %v19939_v16  ;;  %v19945_v23 = vand.u32 4294901760, %v13781_v6 }
 0x488   :  { %12002 = vmatprep.mubr.f32.mxu0 %v13357_v11  ;;  %12108 = vmatprep.mubr.f32.mxu1 %v19940_v40  ;;  %v16484_v11 = vpop.f32.mrf.mxu1  ;;  %v19975_v40 = vld [vmem:[#allocation74_spill] sm:$0xff] }
 0x489   :  { %19946 = vst [vmem:[#allocation179_spill] sm:$0xff] %v16484_v11 }
 0x48b   :  { %12003 = vmatmul.mubr.f32.gmra.mxu0 %v13388_v10  ;;  %12109 = vmatmul.mubr.f32.gmra.mxu1 %v19941_v19  ;;  %v19976_v19 = vand.u32 4294901760, %v19975_v40 }
 0x48c   :  { %12005 = vmatprep.mubr.f32.mxu0 %v13463_v1  ;;  %12111 = vmatprep.mubr.f32.mxu1 %v19942_v63 }
 0x48f   :  { %12006 = vmatmul.mubr.f32.gmra.mxu0 %v13494_v45  ;;  %12112 = vmatmul.mubr.f32.gmra.mxu1 %v19943_v22  ;;  %v11973_v45 = vpop.f32.mrf.mxu1  ;;  %v19977_v22 = vld [vmem:[#allocation79_spill] sm:$0xff] }
 0x490   :  { %12008 = vmatprep.mubr.f32.mxu0 %v13569_v35  ;;  %12114 = vmatprep.mubr.f32.mxu1 %v19945_v23  ;;  %v19978_v23 = vand.u32 4294901760, %v19977_v22 }
 0x491   :  { %v11873_v10 = vpop.f32.mrf.mxu0  ;;  %v16539_v20 = vpop.f32.mrf.mxu1 }
 0x492   :  { %v3972_v1 = vadd.f32 %v16219_v29, %v11873_v10 }
 0x493   :  { %12009 = vmatmul.mubr.f32.gmra.mxu0 %v13600_v7  ;;  %12115 = vmatmul.mubr.f32.gmra.mxu1 %v19947_v21  ;;  %v19950_v7 = vand.u32 4294901760, %v14008_v42  ;;  %v16534_v52 = vpop.f32.mrf.mxu0 }
 0x494   :  { %12011 = vmatprep.mubr.f32.mxu0 %v13675_v43  ;;  %12117 = vmatprep.mubr.f32.mxu1 %v19948_v62  ;;  %v16493_v35 = vadd.f32 %v11973_v45, %v3972_v1  ;;  %v19952_v43 = vand.u32 4294901760, %v14121_v27  ;;  %v19979_v1 = vld [vmem:[#allocation81_spill] sm:$0xff]  ;;  %v19981_v45 = vld [vmem:[#allocation86_spill] sm:$0xff] }
 0x495   :  { %v19980_v21 = vand.u32 4294901760, %v19979_v1  ;;  %v19982_v62 = vand.u32 4294901760, %v19981_v45 }
 0x497   :  { %12012 = vmatmul.mubr.f32.gmra.mxu0 %v13706_v36  ;;  %12118 = vmatmul.mubr.f32.gmra.mxu1 %v19949_v41  ;;  %v19953_v36 = vld [vmem:[#allocation39_spill] sm:$0xff]  ;;  %v19983_v41 = vld [vmem:[#allocation88_spill] sm:$0xff] }
 0x498   :  { %12014 = vmatprep.mubr.f32.mxu0 %v13781_v6  ;;  %12120 = vmatprep.mubr.f32.mxu1 %v19950_v7  ;;  %v19954_v24 = vand.u32 4294901760, %v19953_v36  ;;  %v19955_v6 = vld [vmem:[#allocation44_spill] sm:$0xff]  ;;  %19971 = vst [vmem:[#allocation39_spill] sm:$0xff] %v16534_v52  ;;  %v19984_v7 = vand.u32 4294901760, %v19983_v41 }
 0x499   :  { %v19956_v39 = vand.u32 4294901760, %v19955_v6  ;;  %19974 = vst [vmem:[#allocation44_spill] sm:$0xff] %v16539_v20 }
 0x49b   :  { %12015 = vmatmul.mubr.f32.gmra.mxu0 %v13812_v46  ;;  %12121 = vmatmul.mubr.f32.gmra.mxu1 %v19951_v5  ;;  %v19957_v46 = vld [vmem:[#allocation46_spill] sm:$0xff]  ;;  %v19985_v5 = vld [vmem:[#allocation93_spill] sm:$0xff] }
 0x49c   :  { %12017 = vmatprep.mubr.f32.mxu0 %v13895_v15  ;;  %12123 = vmatprep.mubr.f32.mxu1 %v19952_v43  ;;  %v19958_v28 = vand.u32 4294901760, %v19957_v46  ;;  %v19959_v15 = vld [vmem:[#allocation51_spill] sm:$0xff]  ;;  %v19986_v43 = vand.u32 4294901760, %v19985_v5 }
 0x49d   :  { %v19960_v59 = vand.u32 4294901760, %v19959_v15 }
 0x49f   :  { %12018 = vmatmul.mubr.f32.gmra.mxu0 %v13926_v56  ;;  %12124 = vmatmul.mubr.f32.gmra.mxu1 %v19954_v24  ;;  %v19961_v56 = vld [vmem:[#allocation53_spill] sm:$0xff] }
 0x4a0   :  { %12020 = vmatprep.mubr.f32.mxu0 %v14008_v42  ;;  %12126 = vmatprep.mubr.f32.mxu1 %v19956_v39  ;;  %v19962_v34 = vand.u32 4294901760, %v19961_v56  ;;  %v19963_v42 = vld [vmem:[#allocation58_spill] sm:$0xff] }
 0x4a1   :  { %v19964_v37 = vand.u32 4294901760, %v19963_v42 }
 0x4a3   :  { %12021 = vmatmul.mubr.f32.gmra.mxu0 %v14039_v9  ;;  %12127 = vmatmul.mubr.f32.gmra.mxu1 %v19958_v28  ;;  %v19965_v9 = vld [vmem:[#allocation60_spill] sm:$0xff] }
 0x4a4   :  { %12023 = vmatprep.mubr.f32.mxu0 %v14121_v27  ;;  %12129 = vmatprep.mubr.f32.mxu1 %v19960_v59  ;;  %v19966_v4 = vand.u32 4294901760, %v19965_v9  ;;  %v19967_v27 = vld [vmem:[#allocation65_spill] sm:$0xff] }
 0x4a5   :  { %v19968_v2 = vand.u32 4294901760, %v19967_v27 }
 0x4a7   :  { %12024 = vmatmul.mubr.f32.gmra.mxu0 %v19953_v36  ;;  %12130 = vmatmul.mubr.f32.gmra.mxu1 %v19962_v34  ;;  %v19987_v36 = vld [vmem:[#allocation95_spill] sm:$0xff] }
 0x4a8   :  { %12026 = vmatprep.mubr.f32.mxu0 %v19955_v6  ;;  %12132 = vmatprep.mubr.f32.mxu1 %v19964_v37  ;;  %v19988_v24 = vand.u32 4294901760, %v19987_v36  ;;  %v19989_v6 = vld [vmem:[#allocation100_spill] sm:$0xff] }
 0x4a9   :  { %v11976_v63 = vpop.f32.mrf.mxu1  ;;  %v19990_v39 = vand.u32 4294901760, %v19989_v6 }
 0x4ab   :  { %12027 = vmatmul.mubr.f32.gmra.mxu0 %v19957_v46  ;;  %12133 = vmatmul.mubr.f32.gmra.mxu1 %v19966_v4  ;;  %v19991_v46 = vld [vmem:[#allocation102_spill] sm:$0xff] }
 0x4ac   :  { %12029 = vmatprep.mubr.f32.mxu0 %v19959_v15  ;;  %12135 = vmatprep.mubr.f32.mxu1 %v19968_v2  ;;  %v19992_v28 = vand.u32 4294901760, %v19991_v46  ;;  %v19993_v15 = vld [vmem:[#allocation107_spill] sm:$0xff] }
 0x4ad   :  { %v19994_v59 = vand.u32 4294901760, %v19993_v15 }
 0x4af   :  { %12030 = vmatmul.mubr.f32.gmra.mxu0 %v19961_v56  ;;  %12136 = vmatmul.mubr.f32.gmra.mxu1 %v19970_v8  ;;  %v19995_v56 = vld [vmem:[#allocation109_spill] sm:$0xff] }
 0x4b0   :  { %12032 = vmatprep.mubr.f32.mxu0 %v19963_v42  ;;  %12138 = vmatprep.mubr.f32.mxu1 %v19973_v55  ;;  %v19996_v34 = vand.u32 4294901760, %v19995_v56  ;;  %v19997_v42 = vld [vmem:[#allocation114_spill] sm:$0xff]  ;;  %v20006_v55 = vld [vmem:[#allocation128_spill] sm:$0xff] }
 0x4b1   :  { %v11876_v13 = vpop.f32.mrf.mxu0  ;;  %v19998_v37 = vand.u32 4294901760, %v19997_v42 }
 0x4b2   :  { %v3992_v16 = vadd.f32 %v16219_v29, %v11876_v13  ;;  %v20007_v13 = vand.u32 4294901760, %v20006_v55 }
 0x4b3   :  { %12033 = vmatmul.mubr.f32.gmra.mxu0 %v19965_v9  ;;  %12139 = vmatmul.mubr.f32.gmra.mxu1 %v19976_v19  ;;  %v19999_v9 = vld [vmem:[#allocation116_spill] sm:$0xff] }
 0x4b4   :  { %12035 = vmatprep.mubr.f32.mxu0 %v19967_v27  ;;  %12141 = vmatprep.mubr.f32.mxu1 %v19978_v23  ;;  %v16548_v10 = vadd.f32 %v11976_v63, %v3992_v16  ;;  %v20000_v4 = vand.u32 4294901760, %v19999_v9  ;;  %v20001_v27 = vld [vmem:[#allocation121_spill] sm:$0xff]  ;;  %v16594_v16 = vpop.f32.mrf.mxu1  ;;  %v20009_v63 = vld [vmem:[#allocation130_spill] sm:$0xff] }
 0x4b5   :  { %v20002_v2 = vand.u32 4294901760, %v20001_v27  ;;  %20008 = vst [vmem:[#allocation51_spill] sm:$0xff] %v16594_v16 }
 0x4b7   :  { %12036 = vmatmul.mubr.f32.gmra.mxu0 %v19969_v53  ;;  %12142 = vmatmul.mubr.f32.gmra.mxu1 %v19980_v21  ;;  %v20003_v53 = vld [vmem:[#allocation123_spill] sm:$0xff] }
 0x4b8   :  { %12038 = vmatprep.mubr.f32.mxu0 %v19972_v54  ;;  %12144 = vmatprep.mubr.f32.mxu1 %v19982_v62  ;;  %v20004_v8 = vand.u32 4294901760, %v20003_v53  ;;  %v16589_v54 = vpop.f32.mrf.mxu0  ;;  %v20013_v62 = vld [vmem:[#allocation137_spill] sm:$0xff] }
 0x4b9   :  { %20005 = vst [vmem:[#allocation46_spill] sm:$0xff] %v16589_v54 }
 0x4bb   :  { %12039 = vmatmul.mubr.f32.gmra.mxu0 %v19975_v40  ;;  %12145 = vmatmul.mubr.f32.gmra.mxu1 %v19984_v7  ;;  %v20015_v7 = vld [vmem:[#allocation142_spill] sm:$0xff] }
 0x4bc   :  { %12041 = vmatprep.mubr.f32.mxu0 %v19977_v22  ;;  %12147 = vmatprep.mubr.f32.mxu1 %v19986_v43  ;;  %v20010_v22 = vand.u32 4294901760, %v20009_v63  ;;  %v20017_v43 = vld [vmem:[#allocation144_spill] sm:$0xff] }
 0x4bf   :  { %12042 = vmatmul.mubr.f32.gmra.mxu0 %v19979_v1  ;;  %12148 = vmatmul.mubr.f32.gmra.mxu1 %v19988_v24  ;;  %v20011_v1 = vld [vmem:[#allocation135_spill] sm:$0xff]  ;;  %v20019_v24 = vld [vmem:[#allocation149_spill] sm:$0xff] }
 0x4c0   :  { %12044 = vmatprep.mubr.f32.mxu0 %v19981_v45  ;;  %12150 = vmatprep.mubr.f32.mxu1 %v19990_v39  ;;  %v20012_v21 = vand.u32 4294901760, %v20011_v1  ;;  %v20021_v39 = vld [vmem:[#allocation151_spill] sm:$0xff] }
 0x4c3   :  { %12045 = vmatmul.mubr.f32.gmra.mxu0 %v19983_v41  ;;  %12151 = vmatmul.mubr.f32.gmra.mxu1 %v19992_v28  ;;  %v20014_v41 = vand.u32 4294901760, %v20013_v62  ;;  %v20023_v28 = vand.u32 4294901760, %v16070_v50 }
 0x4c4   :  { %12047 = vmatprep.mubr.f32.mxu0 %v19985_v5  ;;  %12153 = vmatprep.mubr.f32.mxu1 %v19994_v59  ;;  %v20016_v5 = vand.u32 4294901760, %v20015_v7  ;;  %v20025_v59 = vand.u32 4294901760, %v16182_v61 }
 0x4c7   :  { %12048 = vmatmul.mubr.f32.gmra.mxu0 %v19987_v36  ;;  %12154 = vmatmul.mubr.f32.gmra.mxu1 %v19996_v34  ;;  %v20018_v36 = vand.u32 4294901760, %v20017_v43  ;;  %v20027_v34 = vand.u32 4294901760, %v16253_v3 }
 0x4c8   :  { %12050 = vmatprep.mubr.f32.mxu0 %v19989_v6  ;;  %12156 = vmatprep.mubr.f32.mxu1 %v19998_v37  ;;  %v20020_v6 = vand.u32 4294901760, %v20019_v24 }
 0x4c9   :  { %v11979_v23 = vpop.f32.mrf.mxu1 }
 0x4cb   :  { %12051 = vmatmul.mubr.f32.gmra.mxu0 %v19991_v46  ;;  %12157 = vmatmul.mubr.f32.gmra.mxu1 %v20000_v4  ;;  %v20022_v46 = vand.u32 4294901760, %v20021_v39  ;;  %v20031_v4 = vand.u32 4294901760, %v16333_v51 }
 0x4cc   :  { %12053 = vmatprep.mubr.f32.mxu0 %v19993_v15  ;;  %12159 = vmatprep.mubr.f32.mxu1 %v20002_v2  ;;  %v20024_v15 = vand.u32 4294901760, %v16099_v25  ;;  %v20044_v2 = vld [vmem:[#allocation22_spill] sm:$0xff] }
 0x4cf   :  { %12054 = vmatmul.mubr.f32.gmra.mxu0 %v19995_v56  ;;  %12160 = vmatmul.mubr.f32.gmra.mxu1 %v20004_v8  ;;  %v20026_v56 = vand.u32 4294901760, %v16201_v17 }
 0x4d0   :  { %12056 = vmatprep.mubr.f32.mxu0 %v19997_v42  ;;  %12162 = vmatprep.mubr.f32.mxu1 %v20007_v13  ;;  %v20028_v42 = vld [vmem:[#allocation167_spill] sm:$0xff] }
 0x4d1   :  { %v11879_v40 = vpop.f32.mrf.mxu0  ;;  %v20029_v37 = vand.u32 4294901760, %v20028_v42 }
 0x4d2   :  { %v4012_v19 = vadd.f32 %v16219_v29, %v11879_v40 }
 0x4d3   :  { %12057 = vmatmul.mubr.f32.gmra.mxu0 %v19999_v9  ;;  %12163 = vmatmul.mubr.f32.gmra.mxu1 %v20010_v22  ;;  %v20030_v9 = vand.u32 4294901760, %v16318_v44 }
 0x4d4   :  { %12059 = vmatprep.mubr.f32.mxu0 %v20001_v27  ;;  %12165 = vmatprep.mubr.f32.mxu1 %v20012_v21  ;;  %v16603_v45 = vadd.f32 %v11979_v23, %v4012_v19  ;;  %v16644_v27 = vpop.f32.mrf.mxu0  ;;  %v20050_v23 = vld [vmem:[#allocation27_spill] sm:$0xff]  ;;  %v20051_v21 = vld [vmem:[#allocation28_spill] sm:$0xff] }
 0x4d5   :  { %20032 = vst [vmem:[#allocation53_spill] sm:$0xff] %v16644_v27 }
 0x4d7   :  { %12060 = vmatmul.mubr.f32.gmra.mxu0 %v20003_v53  ;;  %12166 = vmatmul.mubr.f32.gmra.mxu1 %v20014_v41  ;;  %v20045_v53 = vld [vmem:[#allocation23_spill] sm:$0xff]  ;;  %v20053_v41 = vld [vmem:[#allocation33_spill] sm:$0xff] }
 0x4d8   :  { %12062 = vmatprep.mubr.f32.mxu0 %v20006_v55  ;;  %12168 = vmatprep.mubr.f32.mxu1 %v20016_v5  ;;  %v20047_v55 = vld [vmem:[#allocation24_spill] sm:$0xff]  ;;  %v20055_v5 = vld [vmem:[#allocation38_spill] sm:$0xff] }
 0x4db   :  { %12063 = vmatmul.mubr.f32.gmra.mxu0 %v20009_v63  ;;  %12169 = vmatmul.mubr.f32.gmra.mxu1 %v20018_v36  ;;  %v20049_v63 = vld [vmem:[#allocation25_spill] sm:$0xff] }
 0x4dc   :  { %12065 = vmatprep.mubr.f32.mxu0 %v20011_v1  ;;  %12171 = vmatprep.mubr.f32.mxu1 %v20020_v6  ;;  %v20057_v36 = vld [vmem:[#allocation45_spill] sm:$0xff]  ;;  %v20059_v6 = vld [vmem:[#allocation52_spill] sm:$0xff] }
 0x4df   :  { %12066 = vmatmul.mubr.f32.gmra.mxu0 %v20013_v62  ;;  %12172 = vmatmul.mubr.f32.gmra.mxu1 %v20022_v46  ;;  %v20052_v62 = vld [vmem:[#allocation32_spill] sm:$0xff]  ;;  %v20061_v46 = vld [vmem:[#allocation59_spill] sm:$0xff] }
 0x4e0   :  { %12068 = vmatprep.mubr.f32.mxu0 %v20015_v7  ;;  %12174 = vmatprep.mubr.f32.mxu1 %v20023_v28  ;;  %v20054_v7 = vld [vmem:[#allocation37_spill] sm:$0xff]  ;;  %v20062_v28 = vld [vmem:[#allocation64_spill] sm:$0xff] }
 0x4e3   :  { %12069 = vmatmul.mubr.f32.gmra.mxu0 %v20017_v43  ;;  %12175 = vmatmul.mubr.f32.gmra.mxu1 %v20024_v15  ;;  %v20056_v43 = vld [vmem:[#allocation43_spill] sm:$0xff] }
 0x4e4   :  { %12071 = vmatprep.mubr.f32.mxu0 %v20019_v24  ;;  %12177 = vmatprep.mubr.f32.mxu1 %v20025_v59  ;;  %v20058_v24 = vld [vmem:[#allocation50_spill] sm:$0xff] }
 0x4e5   :  { %v20064_v59 = vld [vmem:[#allocation66_spill] sm:$0xff] }
 0x4e7   :  { %12072 = vmatmul.mubr.f32.gmra.mxu0 %v20021_v39  ;;  %12178 = vmatmul.mubr.f32.gmra.mxu1 %v20026_v56  ;;  %v20060_v39 = vld [vmem:[#allocation57_spill] sm:$0xff] }
 0x4e8   :  { %12074 = vmatprep.mubr.f32.mxu0 %v16070_v50  ;;  %12180 = vmatprep.mubr.f32.mxu1 %v20027_v34  ;;  %v16649_v50 = vpop.f32.mrf.mxu1  ;;  %v20066_v34 = vld [vmem:[#allocation71_spill] sm:$0xff] }
 0x4e9   :  { %20033 = vst [vmem:[#allocation58_spill] sm:$0xff] %v16649_v50 }
 0x4eb   :  { %12075 = vmatmul.mubr.f32.gmra.mxu0 %v16099_v25  ;;  %12181 = vmatmul.mubr.f32.gmra.mxu1 %v20029_v37 }
 0x4ec   :  { %12077 = vmatprep.mubr.f32.mxu0 %v16182_v61  ;;  %12183 = vmatprep.mubr.f32.mxu1 %v20030_v9 }
 0x4ef   :  { %12078 = vmatmul.mubr.f32.gmra.mxu0 %v16201_v17  ;;  %12184 = vmatmul.mubr.f32.gmra.mxu1 %v20031_v4  ;;  %v11982_v17 = vpop.f32.mrf.mxu1  ;;  %v20067_v4 = vld [vmem:[#allocation73_spill] sm:$0xff] }
 0x4f0   :  { %12080 = vmatprep.mubr.f32.mxu0 %v16253_v3  ;;  %12186 = vmatprep.mubr.f32.mxu1 %v4057_v57  ;;  %v20034_v57 = vld [vmem:[#allocation12_spill] sm:$0xff] }
 0x4f1   :  { %v11882_v25 = vpop.f32.mrf.mxu0  ;;  %v16691_v13 = vpop.f32.mrf.mxu1 }
 0x4f2   :  { %v4032_v61 = vadd.f32 %v16219_v29, %v11882_v25  ;;  %20048 = vst [vmem:[#allocation65_spill] sm:$0xff] %v16691_v13  ;;  %v20123_v13 = vld [vmem:[#allocation166_spill] sm:$0xff] }
 0x4f3   :  { %12081 = vmatmul.mubr.f32.gmra.mxu0 %v20028_v42  ;;  %12187 = vmatmul.mubr.f32.gmra.mxu1 %v4067_v14  ;;  %v20035_v14 = vld [vmem:[#allocation13_spill] sm:$0xff]  ;;  %v16687_v8 = vpop.f32.mrf.mxu0 }
 0x4f4   :  { %12083 = vmatprep.mubr.f32.mxu0 %v16318_v44  ;;  %12189 = vmatprep.mubr.f32.mxu1 %v4077_v38  ;;  %v16658_v3 = vadd.f32 %v11982_v17, %v4032_v61  ;;  %v20036_v44 = vld [vmem:[#allocation14_spill] sm:$0xff]  ;;  %v20037_v38 = vld [vmem:[#allocation15_spill] sm:$0xff]  ;;  %20046 = vst [vmem:[#allocation60_spill] sm:$0xff] %v16687_v8  ;;  %v20126_v8 = vld [vmem:[#allocation172_spill] sm:$0xff] }
 0x4f5   :  { %v20068_v61 = vld [vmem:[#allocation78_spill] sm:$0xff] }
 0x4f7   :  { %12084 = vmatmul.mubr.f32.gmra.mxu0 %v16333_v51  ;;  %12190 = vmatmul.mubr.f32.gmra.mxu1 %v4087_v48  ;;  %v20038_v51 = vld [vmem:[#allocation16_spill] sm:$0xff]  ;;  %v20043_v48 = vld [vmem:[#allocation21_spill] sm:$0xff] }
 0x4f8   :  { %12086 = vmatprep.mubr.f32.mxu0 %v16371_v30  ;;  %12296 = vmatprep.mubr.f32.mxu1 %v20034_v57  ;;  %v20039_v30 = vld [vmem:[#allocation17_spill] sm:$0xff] }
 0x4fb   :  { %12087 = vmatmul.mubr.f32.gmra.mxu0 %v16386_v26  ;;  %12297 = vmatmul.mubr.f32.vlgmr.msra.gmra.mxu1 %v20035_v14  ;;  %v20040_v26 = vld [vmem:[#allocation18_spill] sm:$0xff] }
 0x4fc   :  { %12089 = vmatprep.mubr.f32.mxu0 %v16429_v49  ;;  %12299 = vmatprep.mubr.f32.mxu1 %v20036_v44  ;;  %v20041_v49 = vld [vmem:[#allocation19_spill] sm:$0xff] }
 0x4ff   :  { %12090 = vmatmul.mubr.f32.gmra.mxu0 %v16426_v33  ;;  %12300 = vmatmul.mubr.f32.gmra.mxu1 %v20037_v38  ;;  %v20042_v33 = vld [vmem:[#allocation20_spill] sm:$0xff] }
 0x500   :  { %12196 = vmatprep.mubr.f32.mxu0 %v20034_v57  ;;  %12302 = vmatprep.mubr.f32.mxu1 %v20038_v51 }
 0x503   :  { %12197 = vmatmul.mubr.f32.vlgmr.msra.gmra.mxu0 %v20035_v14  ;;  %12303 = vmatmul.mubr.f32.gmra.mxu1 %v20039_v30 }
 0x504   :  { %12199 = vmatprep.mubr.f32.mxu0 %v20036_v44  ;;  %12305 = vmatprep.mubr.f32.mxu1 %v20040_v26 }
 0x507   :  { %12200 = vmatmul.mubr.f32.gmra.mxu0 %v20037_v38  ;;  %12306 = vmatmul.mubr.f32.gmra.mxu1 %v20041_v49  ;;  %v20069_v38 = vld [vmem:[#allocation80_spill] sm:$0xff] }
 0x508   :  { %12202 = vmatprep.mubr.f32.mxu0 %v20038_v51  ;;  %12308 = vmatprep.mubr.f32.mxu1 %v20042_v33 }
 0x509   :  { %v11985_v22 = vpop.f32.mrf.mxu1 }
 0x50b   :  { %12203 = vmatmul.mubr.f32.gmra.mxu0 %v20039_v30  ;;  %12309 = vmatmul.mubr.f32.gmra.mxu1 %v20043_v48  ;;  %v16724_v15 = vpop.f32.mrf.mxu1  ;;  %v20071_v30 = vld [vmem:[#allocation85_spill] sm:$0xff] }
 0x50c   :  { %12205 = vmatprep.mubr.f32.mxu0 %v20040_v26  ;;  %12311 = vmatprep.mubr.f32.mxu1 %v20044_v2  ;;  %20063 = vst [vmem:[#allocation67_spill] sm:$0xff] %v16724_v15 }
 0x50f   :  { %12206 = vmatmul.mubr.f32.gmra.mxu0 %v20041_v49  ;;  %12312 = vmatmul.mubr.f32.gmra.mxu1 %v20045_v53 }
 0x510   :  { %12208 = vmatprep.mubr.f32.mxu0 %v20042_v33  ;;  %12314 = vmatprep.mubr.f32.mxu1 %v20047_v55  ;;  %v20072_v33 = vld [vmem:[#allocation87_spill] sm:$0xff] }
 0x511   :  { %v11885_v40 = vpop.f32.mrf.mxu0 }
 0x512   :  { %v4052_v19 = vadd.f32 %v16219_v29, %v11885_v40 }
 0x513   :  { %12209 = vmatmul.mubr.f32.gmra.mxu0 %v20043_v48  ;;  %12315 = vmatmul.mubr.f32.gmra.mxu1 %v20049_v63  ;;  %v16728_v56 = vpop.f32.mrf.mxu0  ;;  %v20073_v48 = vld [vmem:[#allocation92_spill] sm:$0xff] }
 0x514   :  { %12211 = vmatprep.mubr.f32.mxu0 %v20044_v2  ;;  %12317 = vmatprep.mubr.f32.mxu1 %v20050_v23  ;;  %v16698_v1 = vadd.f32 %v11985_v22, %v4052_v19  ;;  %20065 = vst [vmem:[#allocation72_spill] sm:$0xff] %v16728_v56 }
 0x517   :  { %12212 = vmatmul.mubr.f32.gmra.mxu0 %v20045_v53  ;;  %12318 = vmatmul.mubr.f32.gmra.mxu1 %v20051_v21  ;;  %v20074_v53 = vld [vmem:[#allocation29_spill] sm:$0xff] }
 0x518   :  { %12214 = vmatprep.mubr.f32.mxu0 %v20047_v55  ;;  %12320 = vmatprep.mubr.f32.mxu1 %v20052_v62  ;;  %v3462_v55 = vadd.f32 %v16219_v29, %v20074_v53 }
 0x51b   :  { %12215 = vmatmul.mubr.f32.gmra.mxu0 %v20049_v63  ;;  %12321 = vmatmul.mubr.f32.gmra.mxu1 %v20053_v41  ;;  %v20075_v63 = vld [vmem:[#allocation94_spill] sm:$0xff] }
 0x51c   :  { %12217 = vmatprep.mubr.f32.mxu0 %v20050_v23  ;;  %12323 = vmatprep.mubr.f32.mxu1 %v20054_v7  ;;  %v20076_v23 = vld [vmem:[#allocation99_spill] sm:$0xff] }
 0x51f   :  { %12218 = vmatmul.mubr.f32.gmra.mxu0 %v20051_v21  ;;  %12324 = vmatmul.mubr.f32.gmra.mxu1 %v20055_v5 }
 0x520   :  { %12220 = vmatprep.mubr.f32.mxu0 %v20052_v62  ;;  %12326 = vmatprep.mubr.f32.mxu1 %v20056_v43 }
 0x523   :  { %12221 = vmatmul.mubr.f32.gmra.mxu0 %v20053_v41  ;;  %12327 = vmatmul.mubr.f32.gmra.mxu1 %v20057_v36 }
 0x524   :  { %12223 = vmatprep.mubr.f32.mxu0 %v20054_v7  ;;  %12329 = vmatprep.mubr.f32.mxu1 %v20058_v24 }
 0x527   :  { %12224 = vmatmul.mubr.f32.gmra.mxu0 %v20055_v5  ;;  %12330 = vmatmul.mubr.f32.gmra.mxu1 %v20059_v6 }
 0x528   :  { %12226 = vmatprep.mubr.f32.mxu0 %v20056_v43  ;;  %12332 = vmatprep.mubr.f32.mxu1 %v20060_v39 }
 0x52a   :  { %v11988_v42 = vpop.f32.mrf.mxu1 }
 0x52b   :  { %12227 = vmatmul.mubr.f32.gmra.mxu0 %v20057_v36  ;;  %12333 = vmatmul.mubr.f32.gmra.mxu1 %v20061_v46  ;;  %v20077_v36 = vld [vmem:[#allocation101_spill] sm:$0xff] }
 0x52c   :  { %12229 = vmatprep.mubr.f32.mxu0 %v20058_v24  ;;  %12335 = vmatprep.mubr.f32.mxu1 %v20062_v28  ;;  %v4532_v17 = vpop.f32.mrf.mxu1  ;;  %v20078_v24 = vld [vmem:[#allocation30_spill] sm:$0xff] }
 0x52f   :  { %12230 = vmatmul.mubr.f32.gmra.mxu0 %v20059_v6  ;;  %12336 = vmatmul.mubr.f32.gmra.mxu1 %v20064_v59  ;;  %v4173_v6 = vadd.f32 %v20078_v24, %v3462_v55  ;;  %v20089_v24 = vld [vmem:[#allocation41_spill] sm:$0xff] }
 0x530   :  { %12232 = vmatprep.mubr.f32.mxu0 %v20060_v39  ;;  %12338 = vmatprep.mubr.f32.mxu1 %v20066_v34  ;;  %v20079_v39 = vld [vmem:[#allocation34_spill] sm:$0xff] }
 0x532   :  { %v11888_v37 = vpop.f32.mrf.mxu0 }
 0x533   :  { %v4072_v9 = vadd.f32 %v16219_v29, %v11888_v37  ;;  %12233 = vmatmul.mubr.f32.gmra.mxu0 %v20061_v46  ;;  %12339 = vmatmul.mubr.f32.gmra.mxu1 %v20067_v4  ;;  %v3482_v46 = vadd.f32 %v16219_v29, %v20079_v39 }
 0x534   :  { %v4061_v25 = vpop.f32.mrf.mxu0  ;;  %12235 = vmatprep.mubr.f32.mxu0 %v20062_v28  ;;  %12341 = vmatprep.mubr.f32.mxu1 %v20068_v61  ;;  %v20080_v28 = vld [vmem:[#allocation26_spill] sm:$0xff] }
 0x535   :  { %v4062_v57 = vadd.f32 %v16219_v29, %v4061_v25  ;;  %v16738_v14 = vadd.f32 %v11988_v42, %v4072_v9 }
 0x537   :  { %v11991_v44 = vpop.f32.mrf.mxu1  ;;  %12236 = vmatmul.mubr.f32.gmra.mxu0 %v20064_v59  ;;  %12342 = vmatmul.mubr.f32.gmra.mxu1 %v20069_v38  ;;  %v16742_v51 = vadd.f32 %v4532_v17, %v4062_v57 }
 0x538   :  { %12238 = vmatprep.mubr.f32.mxu0 %v20066_v34  ;;  %12344 = vmatprep.mubr.f32.mxu1 %v20071_v30  ;;  %v20081_v34 = vld [vmem:[#allocation106_spill] sm:$0xff] }
 0x539   :  { %20070 = vst [vmem:[#allocation74_spill] sm:$0xff] %v16742_v51  ;;  %v4544_v26 = vpop.f32.mrf.mxu1 }
 0x53b   :  { %v12098_v49 = vpop.f32.mrf.mxu1  ;;  %12239 = vmatmul.mubr.f32.gmra.mxu0 %v20067_v4  ;;  %12345 = vmatmul.mubr.f32.gmra.mxu1 %v20072_v33 }
 0x53c   :  { %12241 = vmatprep.mubr.f32.mxu0 %v20068_v61  ;;  %12347 = vmatprep.mubr.f32.mxu1 %v20073_v48  ;;  %v20083_v61 = vld [vmem:[#allocation40_spill] sm:$0xff] }
 0x53d   :  { %v5142_v2 = vpop.f32.mrf.mxu1  ;;  %v3502_v17 = vadd.f32 %v16219_v29, %v20083_v61  ;;  %v20093_v61 = vld [vmem:[#allocation54_spill] sm:$0xff] }
 0x53f   :  { %v11891_v40 = vpop.f32.mrf.mxu0  ;;  %v12101_v19 = vpop.f32.mrf.mxu1  ;;  %12242 = vmatmul.mubr.f32.gmra.mxu0 %v20069_v38  ;;  %12348 = vmatmul.mubr.f32.gmra.mxu1 %v20075_v63  ;;  %v20084_v38 = vld [vmem:[#allocation108_spill] sm:$0xff] }
 0x540   :  { %v4092_v22 = vadd.f32 %v16219_v29, %v11891_v40  ;;  %12244 = vmatprep.mubr.f32.mxu0 %v20071_v30  ;;  %12350 = vmatprep.mubr.f32.mxu1 %v20076_v23  ;;  %v20085_v30 = vld [vmem:[#allocation31_spill] sm:$0xff] }
 0x541   :  { %v4081_v21 = vpop.f32.mrf.mxu0  ;;  %v5158_v62 = vpop.f32.mrf.mxu1 }
 0x542   :  { %v4082_v41 = vadd.f32 %v16219_v29, %v4081_v21  ;;  %v16758_v7 = vadd.f32 %v11991_v44, %v4092_v22 }
 0x543   :  { %v11998_v5 = vpop.f32.mrf.mxu0  ;;  %v12104_v43 = vpop.f32.mrf.mxu1  ;;  %12245 = vmatmul.mubr.f32.gmra.mxu0 %v20072_v33  ;;  %12351 = vmatmul.mubr.f32.gmra.mxu1 %v20077_v36 }
 0x544   :  { %v4634_v59 = vadd.f32 %v11998_v5, %v20080_v28  ;;  %12247 = vmatprep.mubr.f32.mxu0 %v20073_v48  ;;  %12353 = vmatprep.mubr.f32.mxu1 %v20081_v34  ;;  %v16768_v42 = vadd.f32 %v4544_v26, %v4082_v41  ;;  %v20086_v26 = vld [vmem:[#allocation113_spill] sm:$0xff]  ;;  %v20087_v48 = vld [vmem:[#allocation35_spill] sm:$0xff]  ;;  %v20092_v28 = vld [vmem:[#allocation120_spill] sm:$0xff] }
 0x545   :  { %v4626_v37 = vpop.f32.mrf.mxu0  ;;  %v5174_v9 = vpop.f32.mrf.mxu1  ;;  %v4185_v53 = vadd.f32 %v20087_v48, %v3482_v46  ;;  %v20091_v46 = vld [vmem:[#allocation36_spill] sm:$0xff] }
 0x546   :  { %20082 = vst [vmem:[#allocation79_spill] sm:$0xff] %v16768_v42  ;;  %v4627_v4 = vadd.f32 %v4626_v37, %v4173_v6  ;;  %v16770_v25 = vadd.f32 %v12098_v49, %v4634_v59  ;;  %v20090_v6 = vld [vmem:[#allocation47_spill] sm:$0xff] }
 0x547   :  { %v12001_v57 = vpop.f32.mrf.mxu0  ;;  %v12107_v44 = vpop.f32.mrf.mxu1  ;;  %12248 = vmatmul.mubr.f32.gmra.mxu0 %v20075_v63  ;;  %12354 = vmatmul.mubr.f32.gmra.mxu1 %v20084_v38  ;;  %v20088_v63 = vld [vmem:[#allocation115_spill] sm:$0xff]  ;;  %v3522_v39 = vadd.f32 %v16219_v29, %v20090_v6  ;;  %v20098_v6 = vld [vmem:[#allocation61_spill] sm:$0xff] }
 0x548   :  { %v4648_v33 = vadd.f32 %v12001_v57, %v20085_v30  ;;  %12250 = vmatprep.mubr.f32.mxu0 %v20076_v23  ;;  %12356 = vmatprep.mubr.f32.mxu1 %v20086_v26  ;;  %v16780_v55 = vadd.f32 %v5142_v2, %v4627_v4  ;;  %v4197_v23 = vadd.f32 %v20089_v24, %v3502_v17  ;;  %v20110_v42 = vld [vmem:[#allocation75_spill] sm:$0xff] }
 0x549   :  { %v4640_v49 = vpop.f32.mrf.mxu0  ;;  %v5190_v40 = vpop.f32.mrf.mxu1  ;;  %v3542_v17 = vadd.f32 %v16219_v29, %v20093_v61  ;;  %v20102_v61 = vld [vmem:[#allocation134_spill] sm:$0xff] }
 0x54a   :  { %v4641_v22 = vadd.f32 %v4640_v49, %v4185_v53  ;;  %v16782_v21 = vadd.f32 %v12101_v19, %v4648_v33  ;;  %v20094_v33 = vld [vmem:[#allocation122_spill] sm:$0xff]  ;;  %v20097_v53 = vld [vmem:[#allocation48_spill] sm:$0xff] }
 0x54b   :  { %v12004_v41 = vpop.f32.mrf.mxu0  ;;  %v16784_v5 = vpop.f32.mrf.mxu1  ;;  %12251 = vmatmul.mubr.f32.gmra.mxu0 %v20077_v36  ;;  %12357 = vmatmul.mubr.f32.gmra.mxu1 %v20088_v63  ;;  %v4209_v49 = vadd.f32 %v20097_v53, %v3522_v39  ;;  %v20100_v39 = vld [vmem:[#allocation55_spill] sm:$0xff] }
 0x54c   :  { %v4662_v2 = vadd.f32 %v12004_v41, %v20091_v46  ;;  %12253 = vmatprep.mubr.f32.mxu0 %v20081_v34  ;;  %12359 = vmatprep.mubr.f32.mxu1 %v20092_v28  ;;  %v16794_v19 = vadd.f32 %v5158_v62, %v4641_v22  ;;  %v20095_v34 = vld [vmem:[#allocation42_spill] sm:$0xff]  ;;  %v20096_v62 = vld [vmem:[#allocation127_spill] sm:$0xff] }
 0x54d   :  { %v4654_v59 = vpop.f32.mrf.mxu0  ;;  %v16796_v37 = vpop.f32.mrf.mxu1 }
 0x54e   :  { %v4655_v4 = vadd.f32 %v4654_v59, %v4197_v23  ;;  %v16798_v36 = vadd.f32 %v12104_v43, %v4662_v2  ;;  %v20101_v59 = vld [vmem:[#allocation49_spill] sm:$0xff] }
 0x54f   :  { %v12007_v57 = vpop.f32.mrf.mxu0  ;;  %v16802_v30 = vpop.f32.mrf.mxu1  ;;  %12254 = vmatmul.mubr.f32.gmra.mxu0 %v20084_v38  ;;  %12360 = vmatmul.mubr.f32.gmra.mxu1 %v20094_v33  ;;  %v16818_v38 = vadd.f32 %v16219_v29, %v20098_v6 }
 0x550   :  { %v4676_v48 = vadd.f32 %v12007_v57, %v20095_v34  ;;  %12256 = vmatprep.mubr.f32.mxu0 %v20086_v26  ;;  %12362 = vmatprep.mubr.f32.mxu1 %v20096_v62  ;;  %v16810_v43 = vadd.f32 %v5174_v9, %v4655_v4  ;;  %v20099_v26 = vld [vmem:[#allocation129_spill] sm:$0xff]  ;;  %v4221_v9 = vadd.f32 %v20100_v39, %v3542_v17  ;;  %v19662_v34 = vmov 0.0   ;;  %v20103_v17 = vld [vmem:[#allocation68_spill] sm:$0xff] }
 0x551   :  { %v4668_v22 = vpop.f32.mrf.mxu0  ;;  %v16812_v41 = vpop.f32.mrf.mxu1  ;;  %6859 = vst.msk [vmem:[#allocation3] sm:$0xff] %vm3117_vm8, %v19662_v34  ;;  %6862 = vst.msk [vmem:[#allocation3 + $0x10] sm:$0xff] %vm3117_vm8, %v19662_v34 }
 0x552   :  { %v4669_v24 = vadd.f32 %v4668_v22, %v4209_v49  ;;  %v16814_v23 = vadd.f32 %v12107_v44, %v4676_v48  ;;  %6861 = vst.msk [vmem:[#allocation3 + $0x8] sm:$0x3] %vm6860_vm10, %v19662_v34  ;;  %6863 = vst.msk [vmem:[#allocation3 + $0x18] sm:$0x3] %vm6860_vm10, %v19662_v34  ;;  %v20104_v22 = vld [vmem:[#allocation136_spill] sm:$0xff] }
 0x553   :  { %v12010_v46 = vpop.f32.mrf.mxu0  ;;  %v16820_v2 = vpop.f32.mrf.mxu1  ;;  %12257 = vmatmul.mubr.f32.gmra.mxu0 %v20088_v63  ;;  %12363 = vmatmul.mubr.f32.gmra.mxu1 %v20099_v26  ;;  %6864 = vst.msk [vmem:[#allocation3 + $0x20] sm:$0xff] %vm3117_vm8, %v19662_v34  ;;  %6866 = vst.msk [vmem:[#allocation3 + $0x30] sm:$0xff] %vm3117_vm8, %v19662_v34 }
 0x554   :  { %v4690_v4 = vadd.f32 %v12010_v46, %v20101_v59  ;;  %12259 = vmatprep.mubr.f32.mxu0 %v20092_v28  ;;  %12365 = vmatprep.mubr.f32.mxu1 %v20102_v61  ;;  %v16828_v44 = vadd.f32 %v5190_v40, %v4669_v24  ;;  %6865 = vst.msk [vmem:[#allocation3 + $0x28] sm:$0x3] %vm6860_vm10, %v19662_v34  ;;  %6867 = vst.msk [vmem:[#allocation3 + $0x38] sm:$0x3] %vm6860_vm10, %v19662_v34  ;;  %v16918_v28 = vld [vmem:[%s19405_s2] ss:$0 sm:$0xff] }
 0x555   :  { %v4682_v29 = vpop.f32.mrf.mxu0  ;;  %v16830_v57 = vpop.f32.mrf.mxu1  ;;  %6868 = vst.msk [vmem:[#allocation3 + $0x40] sm:$0xff] %vm3117_vm8, %v19662_v34  ;;  %6870 = vst.msk [vmem:[#allocation3 + $0x50] sm:$0xff] %vm3117_vm8, %v19662_v34  ;;  %v3582_v48 = vadd.f32 %v16918_v28, %v20103_v17  ;;  %v20105_v24 = vld [vmem:[#allocation56_spill] sm:$0xff]  ;;  %v20107_v46 = vld [vmem:[#allocation62_spill] sm:$0xff] }
 0x556   :  { %6869 = vst.msk [vmem:[#allocation3 + $0x48] sm:$0x3] %vm6860_vm10, %v19662_v34  ;;  %6871 = vst.msk [vmem:[#allocation3 + $0x58] sm:$0x3] %vm6860_vm10, %v19662_v34  ;;  %v4683_v40 = vadd.f32 %v4682_v29, %v4221_v9  ;;  %v16913_v63 = vadd.f32 %v16784_v5, %v4690_v4  ;;  %v20106_v5 = vld [vmem:[#allocation141_spill] sm:$0xff]  ;;  %v4233_v39 = vadd.f32 %v20107_v46, %v16818_v38  ;;  %v20111_v46 = vld [vmem:[#allocation63_spill] sm:$0xff] }
 0x557   :  { %6872 = vst.msk [vmem:[#allocation3 + $0x60] sm:$0xff] %vm3117_vm8, %v19662_v34  ;;  %6874 = vst.msk [vmem:[#allocation3 + $0x70] sm:$0xff] %vm3117_vm8, %v19662_v34  ;;  %v12013_v53 = vpop.f32.mrf.mxu0  ;;  %v12119_v49 = vpop.f32.mrf.mxu1  ;;  %12260 = vmatmul.mubr.f32.gmra.mxu0 %v20094_v33  ;;  %12366 = vmatmul.mubr.f32.gmra.mxu1 %v20104_v22  ;;  %v3602_v38 = vadd.f32 %v16918_v28, %v20110_v42 }
 0x558   :  { %6873 = vst.msk [vmem:[#allocation3 + $0x68] sm:$0x3] %vm6860_vm10, %v19662_v34  ;;  %6875 = vst.msk [vmem:[#allocation3 + $0x78] sm:$0x3] %vm6860_vm10, %v19662_v34  ;;  %v4704_v6 = vadd.f32 %v12013_v53, %v20105_v24  ;;  %12262 = vmatprep.mubr.f32.mxu0 %v20096_v62  ;;  %12368 = vmatprep.mubr.f32.mxu1 %v20106_v5  ;;  %v16930_v9 = vadd.f32 %v16796_v37, %v4683_v40  ;;  %v20108_v53 = vld [vmem:[#allocation143_spill] sm:$0xff]  ;;  %v20109_v62 = vld [vmem:[#allocation69_spill] sm:$0xff] }
 0x559   :  { %6876 = vst.msk [vmem:[#allocation3 + $0x80] sm:$0xff] %vm3117_vm8, %v19662_v34  ;;  %6878 = vst.msk [vmem:[#allocation3 + $0x90] sm:$0xff] %vm3117_vm8, %v19662_v34  ;;  %v4696_v59 = vpop.f32.mrf.mxu0  ;;  %v5254_v4 = vpop.f32.mrf.mxu1  ;;  %v4245_v24 = vadd.f32 %v20109_v62, %v3582_v48  ;;  %v20112_v40 = vld [vmem:[#allocation148_spill] sm:$0xff] }
 0x55a   :  { %6877 = vst.msk [vmem:[#allocation3 + $0x88] sm:$0x3] %vm6860_vm10, %v19662_v34  ;;  %6879 = vst.msk [vmem:[#allocation3 + $0x98] sm:$0x3] %vm6860_vm10, %v19662_v34  ;;  %v4697_v29 = vadd.f32 %v4696_v59, %v4233_v39  ;;  %v16933_v17 = vadd.f32 %v16802_v30, %v4704_v6  ;;  %v6933_v6 = vld [vmem:[#allocation3 + $0x1] sm:$0xff] }
 0x55b   :  { %6880 = vst.msk [vmem:[#allocation3 + $0xa0] sm:$0xff] %vm3117_vm8, %v19662_v34  ;;  %6882 = vst.msk [vmem:[#allocation3 + $0xb0] sm:$0xff] %vm3117_vm8, %v19662_v34  ;;  %v12016_v33 = vpop.f32.mrf.mxu0  ;;  %12263 = vmatmul.mubr.f32.gmra.mxu0 %v20099_v26  ;;  %12369 = vmatmul.mubr.f32.gmra.mxu1 %v20108_v53 }
 0x55c   :  { %6881 = vst.msk [vmem:[#allocation3 + $0xa8] sm:$0x3] %vm6860_vm10, %v19662_v34  ;;  %6883 = vst.msk [vmem:[#allocation3 + $0xb8] sm:$0x3] %vm6860_vm10, %v19662_v34  ;;  %v4718_v37 = vadd.f32 %v12016_v33, %v20111_v46  ;;  %12265 = vmatprep.mubr.f32.mxu0 %v20102_v61  ;;  %12371 = vmatprep.mubr.f32.mxu1 %v20112_v40  ;;  %v16944_v30 = vadd.f32 %v16812_v41, %v4697_v29  ;;  %v20113_v61 = vld [vmem:[#allocation150_spill] sm:$0xff]  ;;  %v20115_v41 = vld [vmem:[#allocation155_spill] sm:$0xff] }
 0x55d   :  { %6884 = vst.msk [vmem:[#allocation3 + $0xc0] sm:$0xff] %vm3117_vm8, %v19662_v34  ;;  %6886 = vst.msk [vmem:[#allocation3 + $0xd0] sm:$0xff] %vm3117_vm8, %v19662_v34  ;;  %v4710_v39 = vpop.f32.mrf.mxu0  ;;  %7078 = vrot.lane.b32.xlu0 %v6933_v6, %s12754_s20  ;;  %v20114_v33 = vld [vmem:[#allocation70_spill] sm:$0xff]  ;;  %v20116_v29 = vld [vmem:[#allocation76_spill] sm:$0xff] }
 0x55e   :  { %6885 = vst.msk [vmem:[#allocation3 + $0xc8] sm:$0x3] %vm6860_vm10, %v19662_v34  ;;  %6887 = vst.msk [vmem:[#allocation3 + $0xd8] sm:$0x3] %vm6860_vm10, %v19662_v34  ;;  %v4711_v26 = vadd.f32 %v4710_v39, %v4245_v24  ;;  %v16950_v48 = vadd.f32 %v16820_v2, %v4718_v37  ;;  %v4257_v51 = vadd.f32 %v20116_v29, %v3602_v38  ;;  %v6949_v24 = vld [vmem:[#allocation3 + $0x2] sm:$0xff]  ;;  %v20118_v38 = vld [vmem:[#allocation77_spill] sm:$0xff] }
 0x55f   :  { %6888 = vst.msk [vmem:[#allocation3 + $0xe0] sm:$0xff] %vm3117_vm8, %v19662_v34  ;;  %6890 = vst.msk [vmem:[#allocation3 + $0xf0] sm:$0xff] %vm3117_vm8, %v19662_v34  ;;  %v12019_v42 = vpop.f32.mrf.mxu0  ;;  %12266 = vmatmul.mubr.f32.gmra.mxu0 %v20104_v22  ;;  %12372 = vmatmul.mubr.f32.gmra.mxu1 %v20113_v61 }
 0x560   :  { %6889 = vst.msk [vmem:[#allocation3 + $0xe8] sm:$0x3] %vm6860_vm10, %v19662_v34  ;;  %6891 = vst.msk [vmem:[#allocation3 + $0xf8] sm:$0x3] %vm6860_vm10, %v19662_v34  ;;  %v4732_v46 = vadd.f32 %v12019_v42, %v20114_v33  ;;  %12268 = vmatprep.mubr.f32.mxu0 %v20106_v5  ;;  %12374 = vmatprep.mubr.f32.mxu1 %v20115_v41  ;;  %v16959_v6 = vadd.f32 %v16830_v57, %v4711_v26  ;;  %v20117_v5 = vld [vmem:[#allocation156_spill] sm:$0xff] }
 0x561   :  { %6892 = vst.msk [vmem:[#allocation3 + $0x100] sm:$0xff] %vm3117_vm8, %v19662_v34  ;;  %6894 = vst.msk [vmem:[#allocation3 + $0x110] sm:$0xff] %vm3117_vm8, %v19662_v34  ;;  %v4724_v2 = vpop.f32.mrf.mxu0  ;;  %7142 = vrot.lane.b32.xlu0 %v6949_v24, %s12756_s19  ;;  %v20119_v57 = vld [vmem:[#allocation160_spill] sm:$0xff] }
 0x562   :  { %6893 = vst.msk [vmem:[#allocation3 + $0x108] sm:$0x3] %vm6860_vm10, %v19662_v34  ;;  %6895 = vst.msk [vmem:[#allocation3 + $0x118] sm:$0x3] %vm6860_vm10, %v19662_v34  ;;  %v4725_v22 = vadd.f32 %v4724_v2, %v4257_v51  ;;  %v16964_v39 = vadd.f32 %v12119_v49, %v4732_v46  ;;  %v20121_v2 = vld [vmem:[#allocation84_spill] sm:$0xff] }
 0x563   :  { %6896 = vst.msk [vmem:[#allocation3 + $0x120] sm:$0xff] %vm3117_vm8, %v19662_v34  ;;  %6898 = vst.msk [vmem:[#allocation3 + $0x130] sm:$0xff] %vm3117_vm8, %v19662_v34  ;;  %v12022_v42 = vpop.f32.mrf.mxu0  ;;  %12269 = vmatmul.mubr.f32.gmra.mxu0 %v20108_v53  ;;  %12375 = vmatmul.mubr.f32.gmra.mxu1 %v20117_v5  ;;  %v20120_v53 = vld [vmem:[#allocation161_spill] sm:$0xff] }
 0x564   :  { %6897 = vst.msk [vmem:[#allocation3 + $0x128] sm:$0x3] %vm6860_vm10, %v19662_v34  ;;  %6899 = vst.msk [vmem:[#allocation3 + $0x138] sm:$0x3] %vm6860_vm10, %v19662_v34  ;;  %v12122_v34 = vpop.f32.mrf.mxu1  ;;  %v4746_v29 = vadd.f32 %v12022_v42, %v20118_v38  ;;  %12271 = vmatprep.mubr.f32.mxu0 %v20112_v40  ;;  %12377 = vmatprep.mubr.f32.mxu1 %v20119_v57  ;;  %v16971_v26 = vadd.f32 %v5254_v4, %v4725_v22  ;;  %v20122_v40 = vld [vmem:[#allocation165_spill] sm:$0xff]  ;;  %vm12766_vm10 = vmmov 0  }
 0x565   :  { %v16973_v15 = vpop.f32.mrf.mxu0 }
 0x566   :  { %v16946_v59 = vpop.f32.mrf.mxu1  ;;  %v16977_v51 = vadd.f32 %v12122_v34, %v4746_v29 }
 0x567   :  { %v12025_v49 = vpop.f32.mrf.mxu0  ;;  %12272 = vmatmul.mubr.f32.gmra.mxu0 %v20113_v61  ;;  %12378 = vmatmul.mubr.f32.gmra.mxu1 %v20120_v53  ;;  %v20124_v61 = vld [vmem:[#allocation91_spill] sm:$0xff] }
 0x568   :  { %v12125_v62 = vpop.f32.mrf.mxu1  ;;  %v4760_v42 = vadd.f32 %v12025_v49, %v20121_v2  ;;  %12274 = vmatprep.mubr.f32.mxu0 %v20115_v41  ;;  %12380 = vmatprep.mubr.f32.mxu1 %v20122_v40  ;;  %v20125_v49 = vld [vmem:[#allocation171_spill] sm:$0xff] }
 0x569   :  { %v16984_v4 = vpop.f32.mrf.mxu0 }
 0x56a   :  { %v16961_v37 = vpop.f32.mrf.mxu1  ;;  %v16988_v38 = vadd.f32 %v12125_v62, %v4760_v42 }
 0x56b   :  { %v12028_v34 = vpop.f32.mrf.mxu0  ;;  %12275 = vmatmul.mubr.f32.gmra.mxu0 %v20117_v5  ;;  %12381 = vmatmul.mubr.f32.gmra.mxu1 %v20123_v13  ;;  %v20127_v5 = vld [vmem:[#allocation98_spill] sm:$0xff] }
 0x56c   :  { %v12128_v33 = vpop.f32.mrf.mxu1  ;;  %v4774_v56 = vadd.f32 %v12028_v34, %v20124_v61  ;;  %12277 = vmatprep.mubr.f32.mxu0 %v20119_v57  ;;  %12383 = vmatprep.mubr.f32.mxu1 %v20125_v49 }
 0x56d   :  { %v16995_v41 = vpop.f32.mrf.mxu0 }
 0x56e   :  { %v16975_v24 = vpop.f32.mrf.mxu1  ;;  %v16999_v50 = vadd.f32 %v12128_v33, %v4774_v56 }
 0x56f   :  { %v12031_v62 = vpop.f32.mrf.mxu0  ;;  %12278 = vmatmul.mubr.f32.gmra.mxu0 %v20120_v53  ;;  %12384 = vmatmul.mubr.f32.gmra.mxu1 %v20126_v8  ;;  %v20128_v53 = vld [vmem:[#allocation105_spill] sm:$0xff] }
 0x570   :  { %v12131_v46 = vpop.f32.mrf.mxu1  ;;  %v4788_v16 = vadd.f32 %v12031_v62, %v20127_v5  ;;  %12280 = vmatprep.mubr.f32.mxu0 %v20122_v40  ;;  %12386 = vmatprep.mubr.f32.mxu1 %v16365_v0 }
 0x571   :  { %v17006_v57 = vpop.f32.mrf.mxu0 }
 0x572   :  { %v16986_v22 = vpop.f32.mrf.mxu1  ;;  %v17010_v61 = vadd.f32 %v12131_v46, %v4788_v16 }
 0x573   :  { %v12034_v56 = vpop.f32.mrf.mxu0  ;;  %12281 = vmatmul.mubr.f32.gmra.mxu0 %v20123_v13  ;;  %12387 = vmatmul.mubr.f32.gmra.mxu1 %v16383_v58  ;;  %v20130_v13 = vld [vmem:[#allocation112_spill] sm:$0xff] }
 0x574   :  { %v12134_v29 = vpop.f32.mrf.mxu1  ;;  %v4802_v27 = vadd.f32 %v12034_v56, %v20128_v53  ;;  %12283 = vmatprep.mubr.f32.mxu0 %v20125_v49  ;;  %12389 = vmatprep.mubr.f32.mxu1 %v16421_v18 }
 0x575   :  { %v17017_v40 = vpop.f32.mrf.mxu0 }
 0x576   :  { %v16997_v2 = vpop.f32.mrf.mxu1  ;;  %v17021_v5 = vadd.f32 %v12134_v29, %v4802_v27  ;;  %v20133_v27 = vld [vmem:[#allocation119_spill] sm:$0xff] }
 0x577   :  { %v12037_v16 = vpop.f32.mrf.mxu0  ;;  %12284 = vmatmul.mubr.f32.gmra.mxu0 %v20126_v8  ;;  %12390 = vmatmul.mubr.f32.gmra.mxu1 %v16419_v31 }
 0x578   :  { %v12137_v42 = vpop.f32.mrf.mxu1  ;;  %v4816_v20 = vadd.f32 %v12037_v16, %v20130_v13  ;;  %12286 = vmatprep.mubr.f32.mxu0 %v16365_v0 }
 0x579   :  { %v17027_v56 = vpop.f32.mrf.mxu0 }
 0x57a   :  { %v17008_v34 = vpop.f32.mrf.mxu1  ;;  %v17031_v53 = vadd.f32 %v12137_v42, %v4816_v20  ;;  %v20136_v20 = vld [vmem:[#allocation126_spill] sm:$0xff] }
 0x57b   :  { %v12040_v54 = vpop.f32.mrf.mxu0  ;;  %12287 = vmatmul.mubr.f32.gmra.mxu0 %v16383_v58 }
 0x57c   :  { %v12140_v33 = vpop.f32.mrf.mxu1  ;;  %20132 = vst [vmem:[#allocation88_spill] sm:$0xff] %v17031_v53  ;;  %v4830_v29 = vadd.f32 %v12040_v54, %v20133_v27  ;;  %12289 = vmatprep.mubr.f32.mxu0 %v16421_v18  ;;  %v20139_v27 = vld [vmem:[#allocation133_spill] sm:$0xff] }
 0x57d   :  { %v17036_v8 = vpop.f32.mrf.mxu0 }
 0x57e   :  { %v17019_v62 = vpop.f32.mrf.mxu1  ;;  %v17040_v16 = vadd.f32 %v12140_v33, %v4830_v29 }
 0x57f   :  { %20129 = vst [vmem:[#allocation81_spill] sm:$0xff] %v17019_v62  ;;  %v12043_v0 = vpop.f32.mrf.mxu0  ;;  %12290 = vmatmul.mubr.f32.gmra.mxu0 %v16419_v31 }
 0x580   :  { %v12143_v46 = vpop.f32.mrf.mxu1  ;;  %20135 = vst [vmem:[#allocation95_spill] sm:$0xff] %v17040_v16  ;;  %v4844_v42 = vadd.f32 %v12043_v0, %v20136_v20  ;;  %v20142_v16 = vld [vmem:[#allocation140_spill] sm:$0xff] }
 0x581   :  { %v17044_v60 = vpop.f32.mrf.mxu0 }
 0x582   :  { %v17029_v49 = vpop.f32.mrf.mxu1  ;;  %v17048_v58 = vadd.f32 %v12143_v46, %v4844_v42 }
 0x583   :  { %20131 = vst [vmem:[#allocation86_spill] sm:$0xff] %v17029_v49  ;;  %v12046_v54 = vpop.f32.mrf.mxu0 }
 0x584   :  { %v12146_v11 = vpop.f32.mrf.mxu1  ;;  %20138 = vst [vmem:[#allocation102_spill] sm:$0xff] %v17048_v58  ;;  %v4858_v32 = vadd.f32 %v12046_v54, %v20139_v27  ;;  %v20146_v58 = vld [vmem:[#allocation147_spill] sm:$0xff] }
 0x585   :  { %v17051_v49 = vpop.f32.mrf.mxu0 }
 0x586   :  { %v17038_v52 = vpop.f32.mrf.mxu1  ;;  %v17055_v29 = vadd.f32 %v12146_v11, %v4858_v32 }
 0x587   :  { %20134 = vst [vmem:[#allocation93_spill] sm:$0xff] %v17038_v52  ;;  %v12049_v52 = vpop.f32.mrf.mxu0 }
 0x588   :  { %v12149_v13 = vpop.f32.mrf.mxu1  ;;  %20141 = vst [vmem:[#allocation109_spill] sm:$0xff] %v17055_v29  ;;  %v4872_v0 = vadd.f32 %v12049_v52, %v20142_v16  ;;  %v20150_v29 = vld [vmem:[#allocation154_spill] sm:$0xff] }
 0x589   :  { %v17058_v20 = vpop.f32.mrf.mxu0 }
 0x58a   :  { %v17046_v47 = vpop.f32.mrf.mxu1  ;;  %20143 = vst [vmem:[#allocation114_spill] sm:$0xff] %v17058_v20  ;;  %v17062_v46 = vadd.f32 %v12149_v13, %v4872_v0 }
 0x58b   :  { %20137 = vst [vmem:[#allocation100_spill] sm:$0xff] %v17046_v47  ;;  %v12052_v42 = vpop.f32.mrf.mxu0 }
 0x58c   :  { %v12152_v18 = vpop.f32.mrf.mxu1  ;;  %20145 = vst [vmem:[#allocation121_spill] sm:$0xff] %v17062_v46  ;;  %v4886_v54 = vadd.f32 %v12052_v42, %v20146_v58  ;;  %v20154_v46 = vld [vmem:[#allocation159_spill] sm:$0xff] }
 0x58d   :  { %v17065_v27 = vpop.f32.mrf.mxu0 }
 0x58e   :  { %v17053_v33 = vpop.f32.mrf.mxu1  ;;  %20147 = vst [vmem:[#allocation123_spill] sm:$0xff] %v17065_v27  ;;  %v17069_v32 = vadd.f32 %v12152_v18, %v4886_v54 }
 0x58f   :  { %20140 = vst [vmem:[#allocation107_spill] sm:$0xff] %v17053_v33  ;;  %v12055_v11 = vpop.f32.mrf.mxu0 }
 0x590   :  { %v12155_v31 = vpop.f32.mrf.mxu1  ;;  %20149 = vst [vmem:[#allocation130_spill] sm:$0xff] %v17069_v32  ;;  %v4900_v52 = vadd.f32 %v12055_v11, %v20150_v29  ;;  %v20158_v32 = vld [vmem:[#allocation164_spill] sm:$0xff] }
 0x591   :  { %v17072_v16 = vpop.f32.mrf.mxu0 }
 0x592   :  { %v17060_v62 = vpop.f32.mrf.mxu1  ;;  %20151 = vst [vmem:[#allocation135_spill] sm:$0xff] %v17072_v16  ;;  %v17076_v13 = vadd.f32 %v12155_v31, %v4900_v52 }
 0x593   :  { %20144 = vst [vmem:[#allocation116_spill] sm:$0xff] %v17060_v62  ;;  %v12058_v0 = vpop.f32.mrf.mxu0 }
 0x594   :  { %v12158_v47 = vpop.f32.mrf.mxu1  ;;  %20153 = vst [vmem:[#allocation142_spill] sm:$0xff] %v17076_v13  ;;  %v4914_v58 = vadd.f32 %v12058_v0, %v20154_v46  ;;  %v20162_v13 = vld [vmem:[#allocation170_spill] sm:$0xff] }
 0x595   :  { %v17079_v42 = vpop.f32.mrf.mxu0 }
 0x596   :  { %v17067_v53 = vpop.f32.mrf.mxu1  ;;  %20155 = vst [vmem:[#allocation144_spill] sm:$0xff] %v17079_v42  ;;  %v17083_v18 = vadd.f32 %v12158_v47, %v4914_v58 }
 0x597   :  { %20148 = vst [vmem:[#allocation128_spill] sm:$0xff] %v17067_v53  ;;  %v12061_v54 = vpop.f32.mrf.mxu0 }
 0x598   :  { %v12161_v33 = vpop.f32.mrf.mxu1  ;;  %20157 = vst [vmem:[#allocation151_spill] sm:$0xff] %v17083_v18  ;;  %v4928_v29 = vadd.f32 %v12061_v54, %v20158_v32  ;;  %v20165_v18 = vld [vmem:[#allocation175_spill] sm:$0xff] }
 0x599   :  { %v17086_v11 = vpop.f32.mrf.mxu0 }
 0x59a   :  { %v17074_v20 = vpop.f32.mrf.mxu1  ;;  %20159 = vst [vmem:[#allocation167_spill] sm:$0xff] %v17086_v11  ;;  %v17090_v31 = vadd.f32 %v12161_v33, %v4928_v29 }
 0x59b   :  { %20152 = vst [vmem:[#allocation137_spill] sm:$0xff] %v17074_v20  ;;  %v12064_v52 = vpop.f32.mrf.mxu0 }
 0x59c   :  { %v12164_v62 = vpop.f32.mrf.mxu1  ;;  %20161 = vst [vmem:[#allocation13_spill] sm:$0xff] %v17090_v31  ;;  %v4942_v46 = vadd.f32 %v12064_v52, %v20162_v13 }
 0x59d   :  { %v17093_v0 = vpop.f32.mrf.mxu0 }
 0x59e   :  { %v17081_v27 = vpop.f32.mrf.mxu1  ;;  %v17097_v47 = vadd.f32 %v12164_v62, %v4942_v46 }
 0x59f   :  { %20156 = vst [vmem:[#allocation149_spill] sm:$0xff] %v17081_v27  ;;  %v12067_v58 = vpop.f32.mrf.mxu0 }
 0x5a0   :  { %v12167_v53 = vpop.f32.mrf.mxu1  ;;  %20164 = vst [vmem:[#allocation15_spill] sm:$0xff] %v17097_v47  ;;  %v4956_v32 = vadd.f32 %v12067_v58, %v20165_v18 }
 0x5a1   :  { %v17100_v54 = vpop.f32.mrf.mxu0 }
 0x5a2   :  { %v17088_v16 = vpop.f32.mrf.mxu1  ;;  %v17104_v33 = vadd.f32 %v12167_v53, %v4956_v32 }
 0x5a3   :  { %20160 = vst [vmem:[#allocation12_spill] sm:$0xff] %v17088_v16  ;;  %v12070_v29 = vpop.f32.mrf.mxu0 }
 0x5a4   :  { %v12170_v20 = vpop.f32.mrf.mxu1  ;;  %20167 = vst [vmem:[#allocation17_spill] sm:$0xff] %v17104_v33  ;;  %v4970_v13 = vadd.f32 %v12070_v29, %v16423_v12 }
 0x5a5   :  { %v17107_v52 = vpop.f32.mrf.mxu0 }
 0x5a6   :  { %v17095_v42 = vpop.f32.mrf.mxu1  ;;  %v17111_v62 = vadd.f32 %v12170_v20, %v4970_v13 }
 0x5a7   :  { %20163 = vst [vmem:[#allocation14_spill] sm:$0xff] %v17095_v42  ;;  %v12073_v46 = vpop.f32.mrf.mxu0 }
 0x5a8   :  { %v12173_v27 = vpop.f32.mrf.mxu1  ;;  %20169 = vst [vmem:[#allocation19_spill] sm:$0xff] %v17111_v62  ;;  %v4984_v18 = vadd.f32 %v12073_v46, %v16493_v35 }
 0x5a9   :  { %v17114_v58 = vpop.f32.mrf.mxu0 }
 0x5aa   :  { %v17102_v11 = vpop.f32.mrf.mxu1  ;;  %v17118_v53 = vadd.f32 %v12173_v27, %v4984_v18 }
 0x5ab   :  { %20166 = vst [vmem:[#allocation16_spill] sm:$0xff] %v17102_v11  ;;  %v12076_v32 = vpop.f32.mrf.mxu0 }
 0x5ac   :  { %v12176_v16 = vpop.f32.mrf.mxu1  ;;  %20171 = vst [vmem:[#allocation21_spill] sm:$0xff] %v17118_v53  ;;  %v4998_v12 = vadd.f32 %v12076_v32, %v16548_v10 }
 0x5ad   :  { %v17121_v29 = vpop.f32.mrf.mxu0 }
 0x5ae   :  { %v17109_v31 = vpop.f32.mrf.mxu1  ;;  %v17125_v20 = vadd.f32 %v12176_v16, %v4998_v12 }
 0x5af   :  { %20168 = vst [vmem:[#allocation18_spill] sm:$0xff] %v17109_v31  ;;  %v12079_v13 = vpop.f32.mrf.mxu0 }
 0x5b0   :  { %v12179_v42 = vpop.f32.mrf.mxu1  ;;  %20173 = vst [vmem:[#allocation23_spill] sm:$0xff] %v17125_v20  ;;  %v5012_v35 = vadd.f32 %v12079_v13, %v16603_v45 }
 0x5b1   :  { %v17128_v46 = vpop.f32.mrf.mxu0 }
 0x5b2   :  { %v17116_v47 = vpop.f32.mrf.mxu1  ;;  %v17132_v27 = vadd.f32 %v12179_v42, %v5012_v35 }
 0x5b3   :  { %20170 = vst [vmem:[#allocation20_spill] sm:$0xff] %v17116_v47  ;;  %v12082_v18 = vpop.f32.mrf.mxu0 }
 0x5b4   :  { %v12182_v11 = vpop.f32.mrf.mxu1  ;;  %20175 = vst [vmem:[#allocation25_spill] sm:$0xff] %v17132_v27  ;;  %v5026_v10 = vadd.f32 %v12082_v18, %v16658_v3 }
 0x5b5   :  { %v17135_v32 = vpop.f32.mrf.mxu0 }
 0x5b6   :  { %v17123_v33 = vpop.f32.mrf.mxu1  ;;  %20176 = vst [vmem:[#allocation27_spill] sm:$0xff] %v17135_v32  ;;  %v17139_v16 = vadd.f32 %v12182_v11, %v5026_v10 }
 0x5b7   :  { %20172 = vst [vmem:[#allocation22_spill] sm:$0xff] %v17123_v33  ;;  %v12085_v12 = vpop.f32.mrf.mxu0 }
 0x5b8   :  { %v12185_v31 = vpop.f32.mrf.mxu1  ;;  %20178 = vst [vmem:[#allocation32_spill] sm:$0xff] %v17139_v16  ;;  %v5040_v45 = vadd.f32 %v12085_v12, %v16698_v1 }
 0x5b9   :  { %v17142_v13 = vpop.f32.mrf.mxu0 }
 0x5ba   :  { %v17130_v62 = vpop.f32.mrf.mxu1  ;;  %20179 = vst [vmem:[#allocation33_spill] sm:$0xff] %v17142_v13  ;;  %v17146_v42 = vadd.f32 %v12185_v31, %v5040_v45 }
 0x5bb   :  { %20174 = vst [vmem:[#allocation24_spill] sm:$0xff] %v17130_v62  ;;  %v12088_v35 = vpop.f32.mrf.mxu0 }
 0x5bc   :  { %v12188_v47 = vpop.f32.mrf.mxu1  ;;  %20181 = vst [vmem:[#allocation38_spill] sm:$0xff] %v17146_v42  ;;  %v5054_v3 = vadd.f32 %v12088_v35, %v16738_v14 }
 0x5bd   :  { %v17149_v18 = vpop.f32.mrf.mxu0 }
 0x5be   :  { %v17137_v53 = vpop.f32.mrf.mxu1  ;;  %20182 = vst [vmem:[#allocation43_spill] sm:$0xff] %v17149_v18 }
 0x5bf   :  { %20177 = vst [vmem:[#allocation28_spill] sm:$0xff] %v17137_v53  ;;  %v17151_v53 = vadd.f32 %v12188_v47, %v5054_v3  ;;  %v12091_v11 = vpop.f32.mrf.mxu0 }
 0x5c0   :  { %v12191_v33 = vpop.f32.mrf.mxu1  ;;  %v5068_v16 = vadd.f32 %v12091_v11, %v16758_v7 }
 0x5c1   :  { %20183 = vst [vmem:[#allocation45_spill] sm:$0xff] %v17151_v53  ;;  %v17154_v1 = vpop.f32.mrf.mxu0 }
 0x5c2   :  { %v17144_v20 = vpop.f32.mrf.mxu1  ;;  %20184 = vst [vmem:[#allocation50_spill] sm:$0xff] %v17154_v1  ;;  %v17156_v13 = vadd.f32 %v12191_v33, %v5068_v16 }
 0x5c3   :  { %20180 = vst [vmem:[#allocation37_spill] sm:$0xff] %v17144_v20  ;;  %v12198_v31 = vpop.f32.mrf.mxu0 }
 0x5c4   :  { %v12298_v62 = vpop.f32.mrf.mxu1  ;;  %20185 = vst [vmem:[#allocation52_spill] sm:$0xff] %v17156_v13  ;;  %v5730_v20 = vadd.f32 %v12198_v31, %v16770_v25 }
 0x5c5   :  { %v5723_v42 = vpop.f32.mrf.mxu0 }
 0x5c6   :  { %v6174_v27 = vpop.f32.mrf.mxu1  ;;  %v6181_v35 = vadd.f32 %v12298_v62, %v5730_v20  ;;  %v5724_v18 = vadd.f32 %v5723_v42, %v16780_v55 }
 0x5c7   :  { %v12201_v47 = vpop.f32.mrf.mxu0 }
 0x5c8   :  { %v12301_v10 = vpop.f32.mrf.mxu1  ;;  %v6557_v53 = vmax.f32 %v6181_v35, 0.0  ;;  %v6175_v32 = vadd.f32 %v6174_v27, %v5724_v18  ;;  %v5742_v7 = vadd.f32 %v12201_v47, %v16782_v21 }
 0x5c9   :  { %v5735_v11 = vpop.f32.mrf.mxu0 }
 0x5ca   :  { %v6186_v12 = vpop.f32.mrf.mxu1  ;;  %6621 = vst.msk [vmem:[#allocation2 + $0x8] sm:$0xff] %vm3117_vm8, %v6557_v53  ;;  %v6556_v33 = vmax.f32 %v6175_v32, 0.0  ;;  %v6193_v16 = vadd.f32 %v12301_v10, %v5742_v7  ;;  %v5736_v13 = vadd.f32 %v5735_v11, %v16794_v19 }
 0x5cb   :  { %v12204_v25 = vpop.f32.mrf.mxu0 }
 0x5cc   :  { %v12304_v45 = vpop.f32.mrf.mxu1  ;;  %6620 = vst.msk [vmem:[#allocation2] sm:$0xff] %vm3117_vm8, %v6556_v33  ;;  %v6559_v62 = vmax.f32 %v6193_v16, 0.0  ;;  %v6187_v55 = vadd.f32 %v6186_v12, %v5736_v13  ;;  %v5754_v20 = vadd.f32 %v12204_v25, %v16798_v36 }
 0x5cd   :  { %v5747_v42 = vpop.f32.mrf.mxu0 }
 0x5ce   :  { %v6198_v14 = vpop.f32.mrf.mxu1  ;;  %6623 = vst.msk [vmem:[#allocation2 + $0x18] sm:$0xff] %vm3117_vm8, %v6559_v62  ;;  %v6558_v21 = vmax.f32 %v6187_v55, 0.0  ;;  %v6205_v18 = vadd.f32 %v12304_v45, %v5754_v20  ;;  %v5748_v53 = vadd.f32 %v5747_v42, %v16810_v43 }
 0x5cf   :  { %v12207_v32 = vpop.f32.mrf.mxu0 }
 0x5d0   :  { %v12307_v3 = vpop.f32.mrf.mxu1  ;;  %6622 = vst.msk [vmem:[#allocation2 + $0x10] sm:$0xff] %vm3117_vm8, %v6558_v21  ;;  %v6561_v19 = vmax.f32 %v6205_v18, 0.0  ;;  %v6199_v35 = vadd.f32 %v6198_v14, %v5748_v53  ;;  %v5766_v47 = vadd.f32 %v12207_v32, %v16814_v23 }
 0x5d1   :  { %v5759_v7 = vpop.f32.mrf.mxu0 }
 0x5d2   :  { %v6210_v1 = vpop.f32.mrf.mxu1  ;;  %6625 = vst.msk [vmem:[#allocation2 + $0x28] sm:$0xff] %vm3117_vm8, %v6561_v19  ;;  %v6560_v36 = vmax.f32 %v6199_v35, 0.0  ;;  %v6217_v12 = vadd.f32 %v12307_v3, %v5766_v47  ;;  %v5760_v11 = vadd.f32 %v5759_v7, %v16828_v44  ;;  %v20186_v47 = vld [vmem:[#allocation82_spill] sm:$0xff] }
 0x5d3   :  { %v12210_v33 = vpop.f32.mrf.mxu0  ;;  %v6684_v16 = vld [vmem:[#allocation2] ss:$2 sm:$0xff]  ;;  %v6748_v43 = vld [vmem:[#allocation2 + $0x1] ss:$2 sm:$0xff]  ;;  %v3622_v7 = vadd.f32 %v16918_v28, %v20186_v47 }
 0x5d4   :  { %v12310_v31 = vpop.f32.mrf.mxu1  ;;  %6624 = vst.msk [vmem:[#allocation2 + $0x20] sm:$0xff] %vm3117_vm8, %v6560_v36  ;;  %v6563_v25 = vmax.f32 %v6217_v12, 0.0  ;;  %v6211_v62 = vadd.f32 %v6210_v1, %v5760_v11  ;;  %v5778_v14 = vadd.f32 %v12210_v33, %v16913_v63  ;;  %v6811_v21 = vmax.f32 %v6684_v16, %v6748_v43 }
 0x5d5   :  { %v5771_v55 = vpop.f32.mrf.mxu0 }
 0x5d6   :  { %v6222_v27 = vpop.f32.mrf.mxu1  ;;  %6627 = vst.msk [vmem:[#allocation2 + $0x38] sm:$0xff] %vm3117_vm8, %v6563_v25  ;;  %v6562_v20 = vmax.f32 %v6211_v62, 0.0  ;;  %v6229_v42 = vadd.f32 %v12310_v31, %v5778_v14  ;;  %v5772_v3 = vadd.f32 %v5771_v55, %v16930_v9  ;;  %v20187_v55 = vld [vmem:[#allocation89_spill] sm:$0xff] }
 0x5d7   :  { %v6686_v44 = vld [vmem:[#allocation2 + $0x10] ss:$2 sm:$0xff]  ;;  %v6750_v18 = vld [vmem:[#allocation2 + $0x11] ss:$2 sm:$0xff]  ;;  %v12213_v53 = vpop.f32.mrf.mxu0 }
 0x5d8   :  { %v12313_v10 = vpop.f32.mrf.mxu1  ;;  %v6812_v19 = vmax.f32 %v6686_v44, %v6750_v18  ;;  %6626 = vst.msk [vmem:[#allocation2 + $0x30] sm:$0xff] %vm3117_vm8, %v6562_v20  ;;  %v6565_v35 = vmax.f32 %v6229_v42, 0.0  ;;  %v6223_v1 = vadd.f32 %v6222_v27, %v5772_v3  ;;  %v5790_v63 = vadd.f32 %v12213_v53, %v16933_v17  ;;  %v20188_v42 = vld [vmem:[#allocation83_spill] sm:$0xff] }
 0x5d9   :  { %v5783_v36 = vpop.f32.mrf.mxu0  ;;  %v3642_v20 = vadd.f32 %v16918_v28, %v20187_v55  ;;  %v4269_v3 = vadd.f32 %v20188_v42, %v3622_v7 }
 0x5da   :  { %v6234_v13 = vpop.f32.mrf.mxu1  ;;  %v6843_v31 = vmax.f32 %v6811_v21, %v6812_v19  ;;  %6629 = vst.msk [vmem:[#allocation2 + $0x48] sm:$0xff] %vm3117_vm8, %v6565_v35  ;;  %v6564_v9 = vmax.f32 %v6223_v1, 0.0  ;;  %v6241_v11 = vadd.f32 %v12313_v10, %v5790_v63  ;;  %v5784_v33 = vadd.f32 %v5783_v36, %v16944_v30 }
 0x5db   :  { %v12216_v16 = vpop.f32.mrf.mxu0  ;;  %v6688_v25 = vld [vmem:[#allocation2 + $0x20] ss:$2 sm:$0xff]  ;;  %v6752_v62 = vld [vmem:[#allocation2 + $0x21] ss:$2 sm:$0xff]  ;;  %v4739_v53 = vadd.f32 %v16973_v15, %v4269_v3 }
 0x5dc   :  { %v12316_v45 = vpop.f32.mrf.mxu1  ;;  %6628 = vst.msk [vmem:[#allocation2 + $0x40] sm:$0xff] %vm3117_vm8, %v6564_v9  ;;  %v6567_v27 = vmax.f32 %v6241_v11, 0.0  ;;  %v6235_v17 = vadd.f32 %v6234_v13, %v5784_v33  ;;  %v5802_v14 = vadd.f32 %v12216_v16, %v16950_v48  ;;  %6901 = vst.msk [vmem:[#allocation3 + $0x11] sm:$0xff] %vm3117_vm8, %v6843_v31  ;;  %v6813_v13 = vmax.f32 %v6688_v25, %v6752_v62  ;;  %v20189_v31 = vld [vmem:[#allocation96_spill] sm:$0xff]  ;;  %v20190_v9 = vld [vmem:[#allocation90_spill] sm:$0xff] }
 0x5dd   :  { %v5795_v10 = vpop.f32.mrf.mxu0 }
 0x5de   :  { %v6246_v23 = vpop.f32.mrf.mxu1  ;;  %6631 = vst.msk [vmem:[#allocation2 + $0x58] sm:$0xff] %vm3117_vm8, %v6567_v27  ;;  %v6566_v30 = vmax.f32 %v6235_v17, 0.0  ;;  %v6253_v44 = vadd.f32 %v12316_v45, %v5802_v14  ;;  %v5796_v18 = vadd.f32 %v5795_v10, %v16959_v6  ;;  %v3662_v45 = vadd.f32 %v16918_v28, %v20189_v31 }
 0x5df   :  { %v6690_v19 = vld [vmem:[#allocation2 + $0x30] ss:$2 sm:$0xff]  ;;  %v6754_v48 = vld [vmem:[#allocation2 + $0x31] ss:$2 sm:$0xff]  ;;  %v12219_v35 = vpop.f32.mrf.mxu0  ;;  %v4281_v6 = vadd.f32 %v20190_v9, %v3642_v20 }
 0x5e0   :  { %v12319_v32 = vpop.f32.mrf.mxu1  ;;  %v6814_v63 = vmax.f32 %v6690_v19, %v6754_v48  ;;  %6630 = vst.msk [vmem:[#allocation2 + $0x50] sm:$0xff] %vm3117_vm8, %v6566_v30  ;;  %v6569_v47 = vmax.f32 %v6253_v44, 0.0  ;;  %v6247_v7 = vadd.f32 %v6246_v23, %v5796_v18  ;;  %v5814_v36 = vadd.f32 %v12219_v35, %v16964_v39  ;;  %v20192_v30 = vld [vmem:[#allocation110_spill] sm:$0xff]  ;;  %v20193_v18 = vld [vmem:[#allocation97_spill] sm:$0xff] }
 0x5e1   :  { %v5807_v11 = vpop.f32.mrf.mxu0  ;;  %v4753_v27 = vadd.f32 %v16984_v4, %v4281_v6  ;;  %v5271_v4 = vadd.f32 %v16946_v59, %v4739_v53  ;;  %v3702_v44 = vadd.f32 %v16918_v28, %v20192_v30  ;;  %v20200_v30 = vld [vmem:[#allocation118_spill] sm:$0xff] }
 0x5e2   :  { %v6258_v12 = vpop.f32.mrf.mxu1  ;;  %v6844_v33 = vmax.f32 %v6813_v13, %v6814_v63  ;;  %6633 = vst.msk [vmem:[#allocation2 + $0x68] sm:$0xff] %vm3117_vm8, %v6569_v47  ;;  %v6568_v16 = vmax.f32 %v6247_v7, 0.0  ;;  %v6265_v25 = vadd.f32 %v12319_v32, %v5814_v36  ;;  %v5808_v62 = vadd.f32 %v5807_v11, %v16971_v26  ;;  %v20191_v32 = vld [vmem:[#allocation103_spill] sm:$0xff]  ;;  %v20195_v63 = vld [vmem:[#allocation124_spill] sm:$0xff] }
 0x5e3   :  { %v12222_v23 = vpop.f32.mrf.mxu0  ;;  %v6965_v39 = vld [vmem:[#allocation3 + $0x10] sm:$0xff]  ;;  %v6692_v14 = vld [vmem:[#allocation2 + $0x40] ss:$2 sm:$0xff]  ;;  %v6756_v55 = vld [vmem:[#allocation2 + $0x41] ss:$2 sm:$0xff]  ;;  %v3682_v10 = vadd.f32 %v16918_v28, %v20191_v32  ;;  %v4293_v13 = vadd.f32 %v20193_v18, %v3662_v45  ;;  %v3742_v47 = vadd.f32 %v16918_v28, %v20195_v63  ;;  %v5287_v11 = vadd.f32 %v16961_v37, %v4753_v27 }
 0x5e4   :  { %v12322_v43 = vpop.f32.mrf.mxu1  ;;  %6632 = vst.msk [vmem:[#allocation2 + $0x60] sm:$0xff] %vm3117_vm8, %v6568_v16  ;;  %6902 = vst.msk [vmem:[#allocation3 + $0x21] sm:$0xff] %vm3117_vm8, %v6844_v33  ;;  %v6571_v20 = vmax.f32 %v6265_v25, 0.0  ;;  %v6259_v42 = vadd.f32 %v6258_v12, %v5808_v62  ;;  %v5826_v3 = vadd.f32 %v12222_v23, %v16977_v51  ;;  %7206 = vrot.lane.b32.xlu0 %v6965_v39, %s12757_s21  ;;  %v6934_v26 = vld [vmem:[#allocation3 + $0x11] sm:$0xff] }
 0x5e5   :  { %7080 = vrot.lane.b32.xlu1 %v6934_v26, %s12754_s20  ;;  %v5819_v19 = vpop.f32.mrf.mxu0  ;;  %v20194_v51 = vld [vmem:[#allocation117_spill] sm:$0xff]  ;;  %v4767_v7 = vadd.f32 %v16995_v41, %v4293_v13  ;;  %v6815_v36 = vmax.f32 %v6692_v14, %v6756_v55  ;;  %v20196_v41 = vld [vmem:[#allocation131_spill] sm:$0xff]  ;;  %v20197_v39 = vld [vmem:[#allocation138_spill] sm:$0xff] }
 0x5e6   :  { %v6270_v21 = vpop.f32.mrf.mxu1  ;;  %v3722_v48 = vadd.f32 %v16918_v28, %v20194_v51  ;;  %6635 = vst.msk [vmem:[#allocation2 + $0x78] sm:$0xff] %vm3117_vm8, %v6571_v20  ;;  %v6570_v35 = vmax.f32 %v6259_v42, 0.0  ;;  %v6277_v59 = vadd.f32 %v12322_v43, %v5826_v3  ;;  %v5820_v53 = vadd.f32 %v5819_v19, %v5271_v4  ;;  %v17229_v62 = vld [vmem:[#allocation3 + $0x12] sm:$0xff]  ;;  %v20198_v55 = vld [vmem:[#allocation104_spill] sm:$0xff]  ;;  %v20199_v4 = vld [vmem:[#allocation111_spill] sm:$0xff] }
 0x5e7   :  { %v6694_v31 = vld [vmem:[#allocation2 + $0x50] ss:$2 sm:$0xff]  ;;  %v6758_v45 = vld [vmem:[#allocation2 + $0x51] ss:$2 sm:$0xff]  ;;  %v12225_v9 = vpop.f32.mrf.mxu0  ;;  %v3762_v23 = vadd.f32 %v16918_v28, %v20196_v41  ;;  %v3782_v14 = vadd.f32 %v16918_v28, %v20197_v39  ;;  %v4305_v37 = vadd.f32 %v20198_v55, %v3682_v10  ;;  %v4317_v32 = vadd.f32 %v20199_v4, %v3702_v44 }
 0x5e8   :  { %v17190_v1 = vpop.f32.mrf.mxu1  ;;  %v6816_v33 = vmax.f32 %v6694_v31, %v6758_v45  ;;  %6634 = vst.msk [vmem:[#allocation2 + $0x70] sm:$0xff] %vm3117_vm8, %v6570_v35  ;;  %v6573_v16 = vmax.f32 %v6277_v59, 0.0  ;;  %v6271_v25 = vadd.f32 %v6270_v21, %v5820_v53  ;;  %v5838_v43 = vadd.f32 %v12225_v9, %v16988_v38  ;;  %7270 = vrot.lane.b32.xlu0 %v6934_v26, %s12758_s22  ;;  %v20201_v10 = vld [vmem:[#allocation125_spill] sm:$0xff]  ;;  %v20203_v31 = vld [vmem:[#allocation152_spill] sm:$0xff]  ;;  %v20207_v4 = vld [vmem:[#allocation146_spill] sm:$0xff] }
 0x5e9   :  { %7144 = vrot.lane.b32.xlu1 %v17229_v62, %s12756_s19  ;;  %v5831_v27 = vpop.f32.mrf.mxu0  ;;  %v4781_v26 = vadd.f32 %v17006_v57, %v4305_v37  ;;  %v4329_v18 = vadd.f32 %v20200_v30, %v3722_v48  ;;  %v17246_v13 = vadd.f32 %v20201_v10, %v3742_v47  ;;  %v5303_v63 = vadd.f32 %v16975_v24, %v4767_v7  ;;  %v20202_v47 = vld [vmem:[#allocation145_spill] sm:$0xff]  ;;  %v20209_v10 = vld [vmem:[#allocation158_spill] sm:$0xff] }
 0x5ea   :  { %v17197_v15 = vpop.f32.mrf.mxu1  ;;  %v6845_v38 = vmax.f32 %v6815_v36, %v6816_v33  ;;  %6637 = vst.msk [vmem:[#allocation2 + $0x88] sm:$0xff] %vm3117_vm8, %v6573_v16  ;;  %v6572_v20 = vmax.f32 %v6271_v25, 0.0  ;;  %v6289_v42 = vadd.f32 %v17190_v1, %v5838_v43  ;;  %v5832_v3 = vadd.f32 %v5831_v27, %v5287_v11  ;;  %v20204_v9 = vld [vmem:[#allocation157_spill] sm:$0xff]  ;;  %v20205_v33 = vld [vmem:[#allocation132_spill] sm:$0xff]  ;;  %v20206_v25 = vld [vmem:[#allocation139_spill] sm:$0xff] }
 0x5eb   :  { %v12228_v19 = vpop.f32.mrf.mxu0  ;;  %v17250_v35 = vld [vmem:[#allocation3 + $0x21] sm:$0xff]  ;;  %v3802_v36 = vadd.f32 %v16918_v28, %v20202_v47  ;;  %v3822_v45 = vadd.f32 %v16918_v28, %v20203_v31  ;;  %v3842_v11 = vadd.f32 %v16918_v28, %v20204_v9  ;;  %v17273_v43 = vadd.f32 %v20206_v25, %v3782_v14  ;;  %v20208_v30 = vld [vmem:[#allocation153_spill] sm:$0xff] }
 0x5ec   :  { %v17202_v17 = vpop.f32.mrf.mxu1  ;;  %v6696_v59 = vld [vmem:[#allocation2 + $0x60] ss:$2 sm:$0xff]  ;;  %v6760_v53 = vld [vmem:[#allocation2 + $0x61] ss:$2 sm:$0xff]  ;;  %6903 = vst.msk [vmem:[#allocation3 + $0x31] sm:$0xff] %vm3117_vm8, %v6845_v38  ;;  %6636 = vst.msk [vmem:[#allocation2 + $0x80] sm:$0xff] %vm3117_vm8, %v6572_v20  ;;  %v6283_v57 = vadd.f32 %v17197_v15, %v5832_v3  ;;  %v5850_v44 = vadd.f32 %v12228_v19, %v16999_v50  ;;  %7272 = vrot.lane.b32.xlu0 %v17250_v35, %s12758_s22  ;;  %v4353_v15 = vadd.f32 %v20205_v33, %v3762_v23 }
 0x5ed   :  { %v6575_v1 = vmax.f32 %v6289_v42, 0.0  ;;  %v17258_v48 = vld [vmem:[#allocation3 + $0x20] sm:$0xff]  ;;  %v5843_v50 = vpop.f32.mrf.mxu0  ;;  %v4795_v39 = vadd.f32 %v17017_v40, %v4317_v32  ;;  %v4809_v55 = vadd.f32 %v17027_v56, %v4329_v18  ;;  %v6817_v23 = vmax.f32 %v6696_v59, %v6760_v53 }
 0x5ee   :  { %v17215_v12 = vpop.f32.mrf.mxu1  ;;  %7208 = vrot.lane.b32.xlu1 %v17258_v48, %s12757_s21  ;;  %v6574_v24 = vmax.f32 %v6283_v57, 0.0  ;;  %v6301_v7 = vadd.f32 %v17202_v17, %v5850_v44  ;;  %v5844_v41 = vadd.f32 %v5843_v50, %v5303_v63  ;;  %v5319_v42 = vadd.f32 %v16986_v22, %v4781_v26  ;;  %v7717_v14 = vld [vmem:[%s19406_s3 + $0x40] sm:$0xff]  ;;  %v20210_v44 = vld [vmem:[#allocation162_spill] sm:$0xff] }
 0x5ef   :  { %6639 = vst.msk [vmem:[#allocation2 + $0x98] sm:$0xff] %vm3117_vm8, %v6575_v1  ;;  %v6698_v37 = vld [vmem:[#allocation2 + $0x70] ss:$2 sm:$0xff]  ;;  %v6762_v27 = vld [vmem:[#allocation2 + $0x71] ss:$2 sm:$0xff]  ;;  %v12231_v38 = vpop.f32.mrf.mxu0  ;;  %v17289_v32 = vadd.f32 %v20207_v4, %v3802_v36  ;;  %v17292_v18 = vadd.f32 %v20208_v30, %v3822_v45  ;;  %v17295_v22 = vadd.f32 %v20209_v10, %v3842_v11  ;;  %v17301_v59 = vand.u32 4294901760, %v7717_v14 }
 0x5f0   :  { %v17223_v6 = vpop.f32.mrf.mxu1  ;;  %v6818_v3 = vmax.f32 %v6698_v37, %v6762_v27  ;;  %6638 = vst.msk [vmem:[#allocation2 + $0x90] sm:$0xff] %vm3117_vm8, %v6574_v24  ;;  %v6577_v17 = vmax.f32 %v6301_v7, 0.0  ;;  %v6295_v40 = vadd.f32 %v17215_v12, %v5844_v41  ;;  %v5862_v56 = vadd.f32 %v12231_v38, %v17010_v61  ;;  %v7716_v61 = vld [vmem:[%s19406_s3 + $0x38] sm:$0xff] }
 0x5f1   :  { %v5855_v26 = vpop.f32.mrf.mxu0  ;;  %v17310_v63 = vadd.f32 %v16918_v28, %v20210_v44  ;;  %v5335_v45 = vadd.f32 %v16997_v2, %v4795_v39  ;;  %v17318_v9 = vsub.f32 %v7717_v14, %v17301_v59  ;;  %v17320_v11 = vand.u32 4294901760, %v7716_v61  ;;  %12392 = vmatprep.subr.mxu0 %v17301_v59  ;;  %v17360_v14 = vld [vmem:[#allocation3 + $0x22] sm:$0xff] }
 0x5f2   :  { %v17238_v21 = vpop.f32.mrf.mxu1  ;;  %7082 = vrot.lane.b32.xlu1 %v17250_v35, %s12754_s20  ;;  %v6846_v12 = vmax.f32 %v6817_v23, %v6818_v3  ;;  %6641 = vst.msk [vmem:[#allocation2 + $0xa8] sm:$0xff] %vm3117_vm8, %v6577_v17  ;;  %v6576_v53 = vmax.f32 %v6295_v40, 0.0  ;;  %v6313_v1 = vadd.f32 %v17223_v6, %v5862_v56  ;;  %v5856_v57 = vadd.f32 %v5855_v26, %v5319_v42  ;;  %v7713_v44 = vld [vmem:[%s19406_s3 + $0x20] sm:$0xff] }
 0x5f3   :  { %v12234_v47 = vpop.f32.mrf.mxu0  ;;  %v17314_v31 = vld [vmem:[#allocation3 + $0x31] sm:$0xff]  ;;  %v6700_v6 = vld [vmem:[#allocation2 + $0x80] ss:$2 sm:$0xff]  ;;  %v6764_v33 = vld [vmem:[#allocation2 + $0x81] ss:$2 sm:$0xff]  ;;  %v5351_v2 = vadd.f32 %v17008_v34, %v4809_v55  ;;  %12393 = vmatpush3.msra.mxu0 %v17301_v59  ;;  %v4823_v24 = vadd.f32 %v17036_v8, %v17246_v13  ;;  %v4837_v7 = vadd.f32 %v17044_v60, %v4353_v15  ;;  %v17342_v39 = vsub.f32 %v7716_v61, %v17320_v11 }
 0x5f4   :  { %v17248_v51 = vpop.f32.mrf.mxu1  ;;  %6904 = vst.msk [vmem:[#allocation3 + $0x41] sm:$0xff] %vm3117_vm8, %v6846_v12  ;;  %6640 = vst.msk [vmem:[#allocation2 + $0xa0] sm:$0xff] %vm3117_vm8, %v6576_v53  ;;  %v6579_v28 = vmax.f32 %v6313_v1, 0.0  ;;  %v6307_v50 = vadd.f32 %v17238_v21, %v5856_v57  ;;  %v5874_v25 = vadd.f32 %v12234_v47, %v17021_v5  ;;  %7084 = vrot.lane.b32.xlu0 %v17314_v31, %s12754_s20  ;;  %v17339_v5 = vand.u32 4294901760, %v17318_v9  ;;  %v7715_v34 = vld [vmem:[%s19406_s3 + $0x30] sm:$0xff]  ;;  %v7714_v15 = vld [vmem:[%s19406_s3 + $0x28] sm:$0xff] }
 0x5f5   :  { %v5867_v41 = vpop.f32.mrf.mxu0  ;;  %12394 = vmatprep.subr.mxu0 %v17320_v11  ;;  %v17350_v13 = vand.u32 4294901760, %v7715_v34  ;;  %v4851_v55 = vadd.f32 %v17051_v49, %v17273_v43  ;;  %v6819_v23 = vmax.f32 %v6700_v6, %v6764_v33  ;;  %v17365_v3 = vand.u32 4294901760, %v17342_v39  ;;  %v20211_v43 = vld [vmem:[#allocation88_spill] sm:$0xff]  ;;  %v7712_v47 = vld [vmem:[%s19406_s3 + $0x18] sm:$0xff] }
 0x5f6   :  { %v17270_v16 = vpop.f32.mrf.mxu1  ;;  %7334 = vrot.lane.b32.xlu1 %v17229_v62, %s12759_s26  ;;  %6643 = vst.msk [vmem:[#allocation2 + $0xb8] sm:$0xff] %vm3117_vm8, %v6579_v28  ;;  %v6578_v60 = vmax.f32 %v6307_v50, 0.0  ;;  %v6325_v8 = vadd.f32 %v17248_v51, %v5874_v25  ;;  %v5868_v62 = vadd.f32 %v5867_v41, %v5335_v45  ;;  %12395 = vmatpush3.msra.mxu0 %v17320_v11  ;;  %v17395_v33 = vld [vmem:[#allocation3 + $0x32] sm:$0xff] }
 0x5f7   :  { %v6702_v37 = vld [vmem:[#allocation2 + $0x90] ss:$2 sm:$0xff]  ;;  %v6766_v27 = vld [vmem:[#allocation2 + $0x91] ss:$2 sm:$0xff]  ;;  %v12237_v38 = vpop.f32.mrf.mxu0  ;;  %v8026_v51 = vsub.f32 %v17318_v9, %v17339_v5  ;;  %12396 = vmatprep.subr.mxu0 %v17350_v13  ;;  %v8033_v26 = vsub.f32 %v17342_v39, %v17365_v3  ;;  %v17380_v61 = vsub.f32 %v7715_v34, %v17350_v13 }
 0x5f8   :  { %v17279_v20 = vpop.f32.mrf.mxu1  ;;  %v6820_v17 = vmax.f32 %v6702_v37, %v6766_v27  ;;  %6642 = vst.msk [vmem:[#allocation2 + $0xb0] sm:$0xff] %vm3117_vm8, %v6578_v60  ;;  %v6581_v40 = vmax.f32 %v6325_v8, 0.0  ;;  %v6319_v49 = vadd.f32 %v17270_v16, %v5868_v62  ;;  %v5886_v56 = vadd.f32 %v12237_v38, %v20211_v43  ;;  %7336 = vrot.lane.b32.xlu0 %v17360_v14, %s12759_s26  ;;  %v20212_v28 = vld [vmem:[#allocation81_spill] sm:$0xff]  ;;  %v20213_v25 = vld [vmem:[#allocation86_spill] sm:$0xff] }
 0x5f9   :  { %v5879_v4 = vpop.f32.mrf.mxu0  ;;  %v8027_v10 = vand.u32 4294901760, %v8026_v51  ;;  %v17382_v16 = vand.u32 4294901760, %v7714_v15  ;;  %12397 = vmatpush3.msra.mxu0 %v17350_v13  ;;  %v5367_v50 = vadd.f32 %v20212_v28, %v4823_v24  ;;  %v5383_v41 = vadd.f32 %v20213_v25, %v4837_v7  ;;  %v20215_v7 = vld [vmem:[#allocation93_spill] sm:$0xff]  ;;  %v20217_v25 = vld [vmem:[#allocation102_spill] sm:$0xff] }
 0x5fa   :  { %v17299_v19 = vpop.f32.mrf.mxu1  ;;  %7146 = vrot.lane.b32.xlu1 %v17360_v14, %s12756_s19  ;;  %v6847_v12 = vmax.f32 %v6819_v23, %v6820_v17  ;;  %6645 = vst.msk [vmem:[#allocation2 + $0xc8] sm:$0xff] %vm3117_vm8, %v6581_v40  ;;  %v6580_v53 = vmax.f32 %v6319_v49, 0.0  ;;  %v6337_v1 = vadd.f32 %v17279_v20, %v5886_v56  ;;  %v5880_v57 = vadd.f32 %v5879_v4, %v5351_v2  ;;  %v20214_v23 = vld [vmem:[#allocation95_spill] sm:$0xff]  ;;  %v20216_v40 = vld [vmem:[#allocation114_spill] sm:$0xff] }
 0x5fb   :  { %v12240_v45 = vpop.f32.mrf.mxu0  ;;  %12434 = vmatprep.subr.mxu1 %v8027_v10  ;;  %v8034_v20 = vand.u32 4294901760, %v8033_v26  ;;  %v17400_v2 = vsub.f32 %v7714_v15, %v17382_v16  ;;  %12398 = vmatprep.subr.mxu0 %v17382_v16  ;;  %v6704_v34 = vld [vmem:[#allocation2 + $0xa0] ss:$2 sm:$0xff]  ;;  %v6768_v60 = vld [vmem:[#allocation2 + $0xa1] ss:$2 sm:$0xff]  ;;  %v17410_v37 = vadd.f32 %v20215_v7, %v4851_v55  ;;  %v7711_v15 = vld [vmem:[%s19406_s3 + $0x10] sm:$0xff]  ;;  %v4865_v49 = vadd.f32 %v20216_v40, %v17289_v32 }
 0x5fc   :  { %v17312_v36 = vpop.f32.mrf.mxu1  ;;  %6905 = vst.msk [vmem:[#allocation3 + $0x51] sm:$0xff] %vm3117_vm8, %v6847_v12  ;;  %6644 = vst.msk [vmem:[#allocation2 + $0xc0] sm:$0xff] %vm3117_vm8, %v6580_v53  ;;  %v6583_v8 = vmax.f32 %v6337_v1, 0.0  ;;  %v6331_v62 = vadd.f32 %v17299_v19, %v5880_v57  ;;  %v5898_v24 = vadd.f32 %v12240_v45, %v20214_v23  ;;  %7148 = vrot.lane.b32.xlu0 %v17395_v33, %s12756_s19  ;;  %12435 = vmatpush3.msra.mxu1 %v8027_v10  ;;  %v7015_v1 = vld [vmem:[#allocation3 + $0x30] sm:$0xff] }
 0x5fd   :  { %v5891_v27 = vpop.f32.mrf.mxu0  ;;  %12436 = vmatprep.subr.mxu1 %v8034_v20  ;;  %v17420_v19 = vand.u32 4294901760, %v17380_v61  ;;  %v17423_v51 = vand.u32 4294901760, %v17400_v2  ;;  %v17425_v55 = vand.u32 4294901760, %v7713_v44  ;;  %v17427_v17 = vand.u32 4294901760, %v7712_v47  ;;  %12399 = vmatpush3.msra.mxu0 %v17382_v16 }
 0x5fe   :  { %v17336_v21 = vpop.f32.mrf.mxu1  ;;  %7398 = vrot.lane.b32.xlu1 %v17258_v48, %s12760_s1  ;;  %6647 = vst.msk [vmem:[#allocation2 + $0xd8] sm:$0xff] %vm3117_vm8, %v6583_v8  ;;  %v6582_v48 = vmax.f32 %v6331_v62, 0.0  ;;  %v6349_v43 = vadd.f32 %v17312_v36, %v5898_v24  ;;  %v5892_v56 = vadd.f32 %v5891_v27, %v5367_v50  ;;  %12437 = vmatpush3.msra.mxu1 %v8034_v20  ;;  %v17440_v45 = vand.u32 4294901760, %v7711_v15 }
 0x5ff   :  { %v6821_v4 = vmax.f32 %v6704_v34, %v6768_v60  ;;  %v6706_v10 = vld [vmem:[#allocation2 + $0xb0] ss:$2 sm:$0xff]  ;;  %v6770_v26 = vld [vmem:[#allocation2 + $0xb1] ss:$2 sm:$0xff]  ;;  %v12243_v12 = vpop.f32.mrf.mxu0  ;;  %v8040_v57 = vsub.f32 %v17380_v61, %v17420_v19  ;;  %v8047_v32 = vsub.f32 %v17400_v2, %v17423_v51  ;;  %12400 = vmatprep.subr.mxu0 %v17425_v55  ;;  %v17452_v23 = vsub.f32 %v7713_v44, %v17425_v55 }
 0x600   :  { %v17358_v42 = vpop.f32.mrf.mxu1  ;;  %v6822_v36 = vmax.f32 %v6706_v10, %v6770_v26  ;;  %6646 = vst.msk [vmem:[#allocation2 + $0xd0] sm:$0xff] %vm3117_vm8, %v6582_v48  ;;  %v6585_v28 = vmax.f32 %v6349_v43, 0.0  ;;  %v6343_v50 = vadd.f32 %v17336_v21, %v5892_v56  ;;  %v5910_v20 = vadd.f32 %v12243_v12, %v20217_v25  ;;  %7400 = vrot.lane.b32.xlu0 %v7015_v1, %s12760_s1  ;;  %v17460_v48 = vld [vmem:[#allocation3 + $0x40] sm:$0xff]  ;;  %v7710_v43 = vld [vmem:[%s19406_s3 + $0x8] sm:$0xff] }
 0x601   :  { %12401 = vmatpush3.msra.mxu0 %v17425_v55  ;;  %v5903_v34 = vpop.f32.mrf.mxu0  ;;  %v8041_v8 = vand.u32 4294901760, %v8040_v57  ;;  %v8048_v62 = vand.u32 4294901760, %v8047_v32  ;;  %v17455_v24 = vsub.f32 %v7712_v47, %v17427_v17  ;;  %v20218_v44 = vld [vmem:[#allocation123_spill] sm:$0xff]  ;;  %v20219_v12 = vld [vmem:[#allocation100_spill] sm:$0xff] }
 0x602   :  { %v17375_v30 = vpop.f32.mrf.mxu1  ;;  %7210 = vrot.lane.b32.xlu1 %v7015_v1, %s12757_s21  ;;  %12402 = vmatprep.subr.mxu0 %v17427_v17  ;;  %v6848_v21 = vmax.f32 %v6821_v4, %v6822_v36  ;;  %6649 = vst.msk [vmem:[#allocation2 + $0xe8] sm:$0xff] %vm3117_vm8, %v6585_v28  ;;  %v6584_v7 = vmax.f32 %v6343_v50, 0.0  ;;  %v6361_v27 = vadd.f32 %v17358_v42, %v5910_v20  ;;  %v7709_v57 = vld [vmem:[%s19406_s3] sm:$0xff]  ;;  %v20221_v36 = vld [vmem:[#allocation109_spill] sm:$0xff]  ;;  %s12764_s3 = smov 96  }
 0x603   :  { %v5904_v40 = vadd.f32 %v5903_v34, %v5383_v41  ;;  %12403 = vmatpush3.msra.mxu0 %v17427_v17  ;;  %v17468_v47 = vadd.f32 %v20218_v44, %v17292_v18  ;;  %v6708_v56 = vld [vmem:[#allocation2 + $0xc0] ss:$2 sm:$0xff]  ;;  %v6772_v4 = vld [vmem:[#allocation2 + $0xc1] ss:$2 sm:$0xff]  ;;  %v12246_v10 = vpop.f32.mrf.mxu0  ;;  %v5415_v42 = vadd.f32 %v20219_v12, %v4865_v49  ;;  %12438 = vmatprep.subr.mxu1 %v8041_v8  ;;  %v17474_v41 = vand.u32 4294901760, %v17452_v23 }
 0x604   :  { %v17393_v6 = vpop.f32.mrf.mxu1  ;;  %v17477_v1 = vsub.f32 %v7711_v15, %v17440_v45  ;;  %12404 = vmatprep.subr.mxu0 %v17440_v45  ;;  %6906 = vst.msk [vmem:[#allocation3 + $0x61] sm:$0xff] %vm3117_vm8, %v6848_v21  ;;  %v6823_v18 = vmax.f32 %v6708_v56, %v6772_v4  ;;  %6648 = vst.msk [vmem:[#allocation2 + $0xe0] sm:$0xff] %vm3117_vm8, %v6584_v7  ;;  %v6587_v32 = vmax.f32 %v6361_v27, 0.0  ;;  %7212 = vrot.lane.b32.xlu0 %v17460_v48, %s12757_s21 }
 0x605   :  { %20220 = vst [vmem:[#allocation57_spill] sm:$0xff] %v17474_v41  ;;  %v6355_v49 = vadd.f32 %v17375_v30, %v5904_v40  ;;  %v5922_v28 = vadd.f32 %v12246_v10, %v20221_v36  ;;  %12439 = vmatpush3.msra.mxu1 %v8041_v8  ;;  %v5915_v15 = vpop.f32.mrf.mxu0  ;;  %v8054_v25 = vsub.f32 %v17452_v23, %v17474_v41  ;;  %v17496_v20 = vand.u32 4294901760, %v17455_v24 }
 0x606   :  { %v17417_v38 = vpop.f32.mrf.mxu1  ;;  %7462 = vrot.lane.b32.xlu1 %v17250_v35, %s12761_s30  ;;  %12440 = vmatprep.subr.mxu1 %v8048_v62  ;;  %v17499_v30 = vand.u32 4294901760, %v17477_v1  ;;  %v17501_v34 = vand.u32 4294901760, %v7710_v43  ;;  %6651 = vst.msk [vmem:[#allocation2 + $0xf8] sm:$0xff] %vm3117_vm8, %v6587_v32  ;;  %v5916_v21 = vadd.f32 %v5915_v15, %v17410_v37  ;;  %v17506_v7 = vand.u32 4294901760, %v7709_v57 }
 0x607   :  { %20222 = vst [vmem:[#allocation59_spill] sm:$0xff] %v17496_v20  ;;  %v6586_v8 = vmax.f32 %v6355_v49, 0.0  ;;  %v6373_v35 = vadd.f32 %v17393_v6, %v5922_v28  ;;  %12441 = vmatpush3.msra.mxu1 %v8048_v62  ;;  %12405 = vmatpush3.msra.mxu0 %v17440_v45  ;;  %v6710_v27 = vld [vmem:[#allocation2 + $0xd0] ss:$2 sm:$0xff]  ;;  %v6774_v40 = vld [vmem:[#allocation2 + $0xd1] ss:$2 sm:$0xff]  ;;  %v12249_v44 = vpop.f32.mrf.mxu0  ;;  %v8061_v10 = vsub.f32 %v17455_v24, %v17496_v20 }
 0x608   :  { %v17434_v53 = vpop.f32.mrf.mxu1  ;;  %20223 = vst [vmem:[#allocation64_spill] sm:$0xff] %v17499_v30  ;;  %v8055_v4 = vand.u32 4294901760, %v8054_v25  ;;  %v8068_v12 = vsub.f32 %v17477_v1, %v17499_v30  ;;  %v17516_v6 = vsub.f32 %v7710_v43, %v17501_v34  ;;  %12406 = vmatprep.subr.mxu0 %v17501_v34  ;;  %v6824_v37 = vmax.f32 %v6710_v27, %v6774_v40  ;;  %v20224_v49 = vld [vmem:[#allocation121_spill] sm:$0xff] }
 0x609   :  { %6650 = vst.msk [vmem:[#allocation2 + $0xf0] sm:$0xff] %vm3117_vm8, %v6586_v8  ;;  %v6589_v62 = vmax.f32 %v6373_v35, 0.0  ;;  %v6367_v32 = vadd.f32 %v17417_v38, %v5916_v21  ;;  %v5934_v36 = vadd.f32 %v12249_v44, %v20224_v49  ;;  %7464 = vrot.lane.b32.xlu0 %v17314_v31, %s12761_s30  ;;  %12407 = vmatpush3.msra.mxu0 %v17501_v34  ;;  %v5927_v43 = vpop.f32.mrf.mxu0  ;;  %v8062_v15 = vand.u32 4294901760, %v8061_v10  ;;  %v17542_v49 = vld [vmem:[#allocation3 + $0x41] sm:$0xff] }
 0x60a   :  { %v17449_v60 = vpop.f32.mrf.mxu1  ;;  %7274 = vrot.lane.b32.xlu1 %v17314_v31, %s12758_s22  ;;  %12442 = vmatprep.subr.mxu1 %v8055_v4  ;;  %v8069_v25 = vand.u32 4294901760, %v8068_v12  ;;  %v17530_v8 = vand.u32 4294901760, %v17516_v6  ;;  %v17533_v38 = vsub.f32 %v7709_v57, %v17506_v7  ;;  %v6849_v35 = vmax.f32 %v6823_v18, %v6824_v37  ;;  %v20226_v31 = vld [vmem:[#allocation135_spill] sm:$0xff]  ;;  %v20228_v37 = vld [vmem:[#allocation130_spill] sm:$0xff] }
 0x60b   :  { %6653 = vst.msk [vmem:[#allocation2 + $0x108] sm:$0xff] %vm3117_vm8, %v6589_v62  ;;  %v6588_v21 = vmax.f32 %v6367_v32, 0.0  ;;  %v6385_v27 = vadd.f32 %v17434_v53, %v5934_v36  ;;  %v5928_v40 = vadd.f32 %v5927_v43, %v5415_v42  ;;  %12443 = vmatpush3.msra.mxu1 %v8055_v4  ;;  %12408 = vmatprep.subr.mxu0 %v17506_v7  ;;  %v12252_v10 = vpop.f32.mrf.mxu0  ;;  %v6712_v53 = vld [vmem:[#allocation2 + $0xe0] ss:$2 sm:$0xff]  ;;  %v6776_v42 = vld [vmem:[#allocation2 + $0xe1] ss:$2 sm:$0xff] }
 0x60c   :  { %v17470_v26 = vpop.f32.mrf.mxu1  ;;  %20225 = vst [vmem:[#allocation66_spill] sm:$0xff] %v17530_v8  ;;  %v4893_v44 = vadd.f32 %v20226_v31, %v17295_v22  ;;  %12444 = vmatprep.subr.mxu1 %v8062_v15  ;;  %v8075_v57 = vsub.f32 %v17516_v6, %v17530_v8  ;;  %v17547_v18 = vand.u32 4294901760, %v17533_v38  ;;  %12409 = vmatpush3.msra.mxu0 %v17506_v7  ;;  %6907 = vst.msk [vmem:[#allocation3 + $0x71] sm:$0xff] %vm3117_vm8, %v6849_v35  ;;  %v20229_v32 = vld [vmem:[#allocation107_spill] sm:$0xff]  ;;  %v20230_v35 = vld [vmem:[#allocation168_spill] sm:$0xff] }
 0x60d   :  { %6652 = vst.msk [vmem:[#allocation2 + $0x100] sm:$0xff] %vm3117_vm8, %v6588_v21  ;;  %v6591_v22 = vmax.f32 %v6385_v27, 0.0  ;;  %v6379_v4 = vadd.f32 %v17449_v60, %v5928_v40  ;;  %v5946_v62 = vadd.f32 %v12252_v10, %v20228_v37  ;;  %7086 = vrot.lane.b32.xlu0 %v17542_v49, %s12754_s20  ;;  %v5431_v36 = vadd.f32 %v20229_v32, %v17468_v47  ;;  %v17561_v43 = vld [vmem:[%s19405_s2] ss:$0 sm:$0xff]  ;;  %v5939_v40 = vpop.f32.mrf.mxu0 }
 0x60e   :  { %v17491_v50 = vpop.f32.mrf.mxu1  ;;  %20227 = vst [vmem:[#allocation71_spill] sm:$0xff] %v17547_v18  ;;  %12445 = vmatpush3.msra.mxu1 %v8062_v15  ;;  %v3882_v21 = vadd.f32 %v17561_v43, %v20230_v35  ;;  %v20231_v27 = vld [vmem:[#allocation163_spill] sm:$0xff]  ;;  %7526 = vrot.lane.b32.xlu1 %v17360_v14, %s12762_s28  ;;  %v8076_v47 = vand.u32 4294901760, %v8075_v57  ;;  %v8082_v15 = vsub.f32 %v17533_v38, %v17547_v18  ;;  %v20233_v57 = vld [vmem:[#allocation116_spill] sm:$0xff] }
 0x60f   :  { %v4413_v60 = vadd.f32 %v20231_v27, %v17310_v63  ;;  %12446 = vmatprep.subr.mxu1 %v8069_v25  ;;  %6655 = vst.msk [vmem:[#allocation2 + $0x118] sm:$0xff] %vm3117_vm8, %v6591_v22  ;;  %v6590_v10 = vmax.f32 %v6379_v4, 0.0  ;;  %v6397_v37 = vadd.f32 %v17470_v26, %v5946_v62  ;;  %v5940_v32 = vadd.f32 %v5939_v40, %v5431_v36  ;;  %v20232_v63 = vld [vmem:[#allocation144_spill] sm:$0xff]  ;;  %v12255_v30 = vpop.f32.mrf.mxu0  ;;  %v20234_v4 = vld [vmem:[#allocation142_spill] sm:$0xff]  ;;  %v20236_v36 = vld [vmem:[#allocation169_spill] sm:$0xff] }
 0x610   :  { %v17509_v56 = vpop.f32.mrf.mxu1  ;;  %12447 = vmatpush3.msra.mxu1 %v8069_v25  ;;  %12476 = vmatprep.subr.mxu0 %v17318_v9  ;;  %v6825_v14 = vmax.f32 %v6712_v53, %v6776_v42  ;;  %v6714_v27 = vld [vmem:[#allocation2 + $0xf0] ss:$2 sm:$0xff]  ;;  %v6778_v8 = vld [vmem:[#allocation2 + $0xf1] ss:$2 sm:$0xff]  ;;  %v5447_v41 = vadd.f32 %v20233_v57, %v4893_v44  ;;  %v8083_v18 = vand.u32 4294901760, %v8082_v15  ;;  %v5958_v62 = vadd.f32 %v12255_v30, %v20234_v4  ;;  %v20239_v57 = vld [vmem:[#allocation128_spill] sm:$0xff] }
 0x611   :  { %v4907_v35 = vadd.f32 %v20232_v63, %v4413_v60  ;;  %12448 = vmatprep.subr.mxu1 %v8076_v47  ;;  %v6826_v22 = vmax.f32 %v6714_v27, %v6778_v8  ;;  %6654 = vst.msk [vmem:[#allocation2 + $0x110] sm:$0xff] %vm3117_vm8, %v6590_v10  ;;  %v6593_v26 = vmax.f32 %v6397_v37, 0.0  ;;  %v6391_v25 = vadd.f32 %v17491_v50, %v5940_v32  ;;  %v20235_v53 = vld [vmem:[#allocation173_spill] sm:$0xff]  ;;  %v5951_v8 = vpop.f32.mrf.mxu0  ;;  %v20241_v4 = vld [vmem:[#allocation174_spill] sm:$0xff] }
 0x612   :  { %v17527_v28 = vpop.f32.mrf.mxu1  ;;  %7338 = vrot.lane.b32.xlu0 %v17395_v33, %s12759_s26  ;;  %12449 = vmatpush3.msra.mxu1 %v8076_v47  ;;  %v3902_v42 = vadd.f32 %v17561_v43, %v20235_v53  ;;  %v4425_v60 = vadd.f32 %v20236_v36, %v3882_v21  ;;  %v6409_v30 = vadd.f32 %v17509_v56, %v5958_v62  ;;  %v20237_v47 = vld [vmem:[#allocation167_spill] sm:$0xff]  ;;  %v17597_v21 = vld [vmem:[#allocation3 + $0x51] sm:$0xff] }
 0x613   :  { %7276 = vrot.lane.b32.xlu1 %v17542_v49, %s12758_s22  ;;  %12450 = vmatprep.subr.mxu1 %v8083_v18  ;;  %v6850_v40 = vmax.f32 %v6825_v14, %v6826_v22  ;;  %6657 = vst.msk [vmem:[#allocation2 + $0x128] sm:$0xff] %vm3117_vm8, %v6593_v26  ;;  %v6592_v50 = vmax.f32 %v6391_v25, 0.0  ;;  %v5952_v15 = vadd.f32 %v5951_v8, %v5447_v41  ;;  %v12258_v37 = vpop.f32.mrf.mxu0  ;;  %v20238_v41 = vld [vmem:[#allocation151_spill] sm:$0xff]  ;;  %v20240_v26 = vld [vmem:[#allocation176_spill] sm:$0xff] }
 0x614   :  { %v17540_v12 = vpop.f32.mrf.mxu1  ;;  %12451 = vmatpush3.msra.mxu1 %v8083_v18  ;;  %v4921_v10 = vadd.f32 %v20237_v47, %v4425_v60  ;;  %v6716_v63 = vld [vmem:[#allocation2 + $0x100] ss:$2 sm:$0xff]  ;;  %v6780_v14 = vld [vmem:[#allocation2 + $0x101] ss:$2 sm:$0xff]  ;;  %v6595_v27 = vmax.f32 %v6409_v30, 0.0  ;;  %v5970_v18 = vadd.f32 %v12258_v37, %v20238_v41  ;;  %v5463_v22 = vadd.f32 %v20239_v57, %v4907_v35 }
 0x615   :  { %12518 = vmatprep.subr.mxu1 %v17301_v59  ;;  %6908 = vst.msk [vmem:[#allocation3 + $0x81] sm:$0xff] %vm3117_vm8, %v6850_v40  ;;  %6656 = vst.msk [vmem:[#allocation2 + $0x120] sm:$0xff] %vm3117_vm8, %v6592_v50  ;;  %v6403_v56 = vadd.f32 %v17527_v28, %v5952_v15  ;;  %v3922_v25 = vadd.f32 %v17561_v43, %v20240_v26  ;;  %v4437_v62 = vadd.f32 %v20241_v4, %v3902_v42  ;;  %v5963_v53 = vpop.f32.mrf.mxu0  ;;  %v17617_v42 = vld [vmem:[#allocation3 + $0x42] sm:$0xff]  ;;  %v20242_v37 = vld [vmem:[#allocation137_spill] sm:$0xff] }
 0x616   :  { %v17569_v31 = vpop.f32.mrf.mxu1  ;;  %7088 = vrot.lane.b32.xlu0 %v17597_v21, %s12754_s20  ;;  %6659 = vst.msk [vmem:[#allocation2 + $0x138] sm:$0xff] %vm3117_vm8, %v6595_v27  ;;  %v6421_v60 = vadd.f32 %v17540_v12, %v5970_v18  ;;  %v5964_v8 = vadd.f32 %v5963_v53, %v5463_v22  ;;  %v6827_v50 = vmax.f32 %v6716_v63, %v6780_v14  ;;  %v20243_v12 = vld [vmem:[#allocation13_spill] sm:$0xff] }
 0x617   :  { %7528 = vrot.lane.b32.xlu1 %v17395_v33, %s12762_s28  ;;  %v6594_v28 = vmax.f32 %v6403_v56, 0.0  ;;  %v4935_v40 = vadd.f32 %v17093_v0, %v4437_v62  ;;  %v12261_v15 = vpop.f32.mrf.mxu0  ;;  %v5479_v33 = vadd.f32 %v20242_v37, %v4921_v10  ;;  %v20244_v0 = vld [vmem:[#allocation178_spill] sm:$0xff]  ;;  %v20245_v14 = vld [vmem:[#allocation177_spill] sm:$0xff] }
 0x618   :  { %v17577_v20 = vpop.f32.mrf.mxu1  ;;  %v6718_v35 = vld [vmem:[#allocation2 + $0x110] ss:$2 sm:$0xff]  ;;  %v6782_v30 = vld [vmem:[#allocation2 + $0x111] ss:$2 sm:$0xff]  ;;  %v6597_v27 = vmax.f32 %v6421_v60, 0.0  ;;  %v6415_v56 = vadd.f32 %v17569_v31, %v5964_v8  ;;  %v5982_v18 = vadd.f32 %v12261_v15, %v20243_v12  ;;  %v3942_v63 = vadd.f32 %v17561_v43, %v20244_v0 }
 0x619   :  { %v6828_v41 = vmax.f32 %v6718_v35, %v6782_v30  ;;  %6658 = vst.msk [vmem:[#allocation2 + $0x130] sm:$0xff] %vm3117_vm8, %v6594_v28  ;;  %v4449_v57 = vadd.f32 %v20245_v14, %v3922_v25  ;;  %v5975_v10 = vpop.f32.mrf.mxu0  ;;  %v17635_v8 = vld [vmem:[#allocation3 + $0x52] sm:$0xff]  ;;  %v20246_v15 = vld [vmem:[#allocation15_spill] sm:$0xff] }
 0x61a   :  { %v17590_v44 = vpop.f32.mrf.mxu1  ;;  %7340 = vrot.lane.b32.xlu0 %v17617_v42, %s12759_s26  ;;  %6661 = vst.msk [vmem:[#allocation2 + $0x148] sm:$0xff] %vm3117_vm8, %v6597_v27  ;;  %v6596_v4 = vmax.f32 %v6415_v56, 0.0  ;;  %v6433_v31 = vadd.f32 %v17577_v20, %v5982_v18  ;;  %v5976_v62 = vadd.f32 %v5975_v10, %v5479_v33  ;;  %v20248_v33 = vld [vmem:[#allocation39_spill] sm:$0xff] }
 0x61b   :  { %7150 = vrot.lane.b32.xlu1 %v17617_v42, %s12756_s19  ;;  %v6851_v26 = vmax.f32 %v6827_v50, %v6828_v41  ;;  %v4949_v53 = vadd.f32 %v17100_v54, %v4449_v57  ;;  %v12264_v28 = vpop.f32.mrf.mxu0  ;;  %v20247_v54 = vld [vmem:[#allocation149_spill] sm:$0xff]  ;;  %v3962_v41 = vadd.f32 %v17561_v43, %v20248_v33  ;;  %v20249_v27 = vld [vmem:[#allocation179_spill] sm:$0xff] }
 0x61c   :  { %v17595_v32 = vpop.f32.mrf.mxu1  ;;  %v6720_v25 = vld [vmem:[#allocation2 + $0x120] ss:$2 sm:$0xff]  ;;  %v6784_v35 = vld [vmem:[#allocation2 + $0x121] ss:$2 sm:$0xff]  ;;  %6660 = vst.msk [vmem:[#allocation2 + $0x140] sm:$0xff] %vm3117_vm8, %v6596_v4  ;;  %v6599_v50 = vmax.f32 %v6433_v31, 0.0  ;;  %v6427_v30 = vadd.f32 %v17590_v44, %v5976_v62  ;;  %v5994_v37 = vadd.f32 %v12264_v28, %v20246_v15  ;;  %v5495_v20 = vadd.f32 %v20247_v54, %v4935_v40 }
 0x61d   :  { %6909 = vst.msk [vmem:[#allocation3 + $0xb1] sm:$0xff] %vm3117_vm8, %v6851_v26  ;;  %v4461_v56 = vadd.f32 %v20249_v27, %v3942_v63  ;;  %v5987_v12 = vpop.f32.mrf.mxu0  ;;  %v6829_v10 = vmax.f32 %v6720_v25, %v6784_v35  ;;  %v17652_v62 = vld [vmem:[#allocation3 + $0x50] sm:$0xff]  ;;  %v20250_v63 = vld [vmem:[#allocation12_spill] sm:$0xff] }
 0x61e   :  { %v6438_v36 = vpop.f32.mrf.mxu1  ;;  %7152 = vrot.lane.b32.xlu0 %v17635_v8, %s12756_s19  ;;  %6663 = vst.msk [vmem:[#allocation2 + $0x158] sm:$0xff] %vm3117_vm8, %v6599_v50  ;;  %v6598_v44 = vmax.f32 %v6427_v30, 0.0  ;;  %v6445_v0 = vadd.f32 %v17595_v32, %v5994_v37  ;;  %v5988_v14 = vadd.f32 %v5987_v12, %v5495_v20  ;;  %v5511_v28 = vadd.f32 %v20250_v63, %v4949_v53  ;;  %v20251_v30 = vld [vmem:[#allocation17_spill] sm:$0xff]  ;;  %v20253_v25 = vld [vmem:[#allocation44_spill] sm:$0xff] }
 0x61f   :  { %7402 = vrot.lane.b32.xlu1 %v17460_v48, %s12760_s1  ;;  %v4963_v57 = vadd.f32 %v17107_v52, %v4461_v56  ;;  %v12267_v4 = vpop.f32.mrf.mxu0  ;;  %v20252_v52 = vld [vmem:[#allocation46_spill] sm:$0xff]  ;;  %v4473_v35 = vadd.f32 %v20253_v25, %v3962_v41  ;;  %v20256_v63 = vld [vmem:[#allocation53_spill] sm:$0xff] }
 0x620   :  { %v17615_v47 = vpop.f32.mrf.mxu1  ;;  %v6722_v40 = vld [vmem:[#allocation2 + $0x130] ss:$2 sm:$0xff]  ;;  %v6786_v26 = vld [vmem:[#allocation2 + $0x131] ss:$2 sm:$0xff]  ;;  %6662 = vst.msk [vmem:[#allocation2 + $0x150] sm:$0xff] %vm3117_vm8, %v6598_v44  ;;  %v6601_v15 = vmax.f32 %v6445_v0, 0.0  ;;  %v6439_v50 = vadd.f32 %v6438_v36, %v5988_v14  ;;  %v6006_v54 = vadd.f32 %v12267_v4, %v20251_v30  ;;  %v3982_v32 = vadd.f32 %v17561_v43, %v20252_v52 }
 0x621   :  { %v6830_v48 = vmax.f32 %v6722_v40, %v6786_v26  ;;  %v5999_v37 = vpop.f32.mrf.mxu0  ;;  %v4977_v56 = vadd.f32 %v17114_v58, %v4473_v35  ;;  %v17669_v0 = vld [vmem:[#allocation3 + $0x60] sm:$0xff] }
 0x622   :  { %v6450_v22 = vpop.f32.mrf.mxu1  ;;  %7404 = vrot.lane.b32.xlu0 %v17652_v62, %s12760_s1  ;;  %6665 = vst.msk [vmem:[#allocation2 + $0x168] sm:$0xff] %vm3117_vm8, %v6601_v15  ;;  %v6600_v33 = vmax.f32 %v6439_v50, 0.0  ;;  %v6457_v36 = vadd.f32 %v17615_v47, %v6006_v54  ;;  %v6000_v27 = vadd.f32 %v5999_v37, %v5511_v28  ;;  %v20254_v26 = vld [vmem:[#allocation19_spill] sm:$0xff]  ;;  %v20255_v47 = vld [vmem:[#allocation14_spill] sm:$0xff]  ;;  %v4002_v28 = vadd.f32 %v17561_v43, %v20256_v63 }
 0x623   :  { %7214 = vrot.lane.b32.xlu1 %v17652_v62, %s12757_s21  ;;  %v6852_v20 = vmax.f32 %v6829_v10, %v6830_v48  ;;  %v12270_v12 = vpop.f32.mrf.mxu0  ;;  %v6724_v41 = vld [vmem:[#allocation2 + $0x140] ss:$2 sm:$0xff]  ;;  %v6788_v14 = vld [vmem:[#allocation2 + $0x141] ss:$2 sm:$0xff]  ;;  %v5527_v58 = vadd.f32 %v20255_v47, %v4963_v57 }
 0x624   :  { %v17633_v60 = vpop.f32.mrf.mxu1  ;;  %6664 = vst.msk [vmem:[#allocation2 + $0x160] sm:$0xff] %vm3117_vm8, %v6600_v33  ;;  %v6603_v10 = vmax.f32 %v6457_v36, 0.0  ;;  %v6451_v40 = vadd.f32 %v6450_v22, %v6000_v27  ;;  %v6018_v4 = vadd.f32 %v12270_v12, %v20254_v26  ;;  %v20257_v48 = vld [vmem:[#allocation51_spill] sm:$0xff]  ;;  %v6831_v35 = vmax.f32 %v6724_v41, %v6788_v14  ;;  %v20258_v36 = vld [vmem:[#allocation16_spill] sm:$0xff]  ;;  %v20259_v26 = vld [vmem:[#allocation21_spill] sm:$0xff] }
 0x625   :  { %6910 = vst.msk [vmem:[#allocation3 + $0xc1] sm:$0xff] %vm3117_vm8, %v6852_v20  ;;  %v4485_v15 = vadd.f32 %v20257_v48, %v3982_v32  ;;  %v6011_v50 = vpop.f32.mrf.mxu0  ;;  %v5543_v32 = vadd.f32 %v20258_v36, %v4977_v56  ;;  %v20261_v41 = vld [vmem:[#allocation58_spill] sm:$0xff] }
 0x626   :  { %v6462_v18 = vpop.f32.mrf.mxu1  ;;  %7216 = vrot.lane.b32.xlu0 %v17669_v0, %s12757_s21  ;;  %6667 = vst.msk [vmem:[#allocation2 + $0x178] sm:$0xff] %vm3117_vm8, %v6603_v10  ;;  %v6602_v22 = vmax.f32 %v6451_v40, 0.0  ;;  %v6469_v54 = vadd.f32 %v17633_v60, %v6018_v4  ;;  %v6012_v52 = vadd.f32 %v6011_v50, %v5527_v58  ;;  %v20260_v60 = vld [vmem:[#allocation60_spill] sm:$0xff]  ;;  %v4497_v14 = vadd.f32 %v20261_v41, %v4002_v28 }
 0x627   :  { %7466 = vrot.lane.b32.xlu1 %v17542_v49, %s12761_s30  ;;  %v4991_v25 = vadd.f32 %v17121_v29, %v4485_v15  ;;  %v6726_v57 = vld [vmem:[#allocation2 + $0x150] ss:$2 sm:$0xff]  ;;  %v6790_v37 = vld [vmem:[#allocation2 + $0x151] ss:$2 sm:$0xff]  ;;  %v12273_v20 = vpop.f32.mrf.mxu0  ;;  %v4022_v29 = vadd.f32 %v17561_v43, %v20260_v60  ;;  %v17697_v50 = vld [vmem:[#allocation3 + $0x61] sm:$0xff] }
 0x628   :  { %v12373_v31 = vpop.f32.mrf.mxu1  ;;  %v6832_v27 = vmax.f32 %v6726_v57, %v6790_v37  ;;  %6666 = vst.msk [vmem:[#allocation2 + $0x170] sm:$0xff] %vm3117_vm8, %v6602_v22  ;;  %v6605_v49 = vmax.f32 %v6469_v54, 0.0  ;;  %v6463_v12 = vadd.f32 %v6462_v18, %v6012_v52  ;;  %v6030_v10 = vadd.f32 %v12273_v20, %v20259_v26  ;;  %v20262_v52 = vld [vmem:[#allocation23_spill] sm:$0xff]  ;;  %v20265_v20 = vld [vmem:[#allocation65_spill] sm:$0xff] }
 0x629   :  { %v6023_v40 = vpop.f32.mrf.mxu0  ;;  %v5005_v63 = vadd.f32 %v17128_v46, %v4497_v14  ;;  %v20264_v46 = vld [vmem:[#allocation72_spill] sm:$0xff]  ;;  %v4509_v36 = vadd.f32 %v20265_v20, %v4022_v29  ;;  %v20266_v26 = vld [vmem:[#allocation27_spill] sm:$0xff] }
 0x62a   :  { %v6474_v53 = vpop.f32.mrf.mxu1  ;;  %7468 = vrot.lane.b32.xlu0 %v17597_v21, %s12761_s30  ;;  %v6853_v4 = vmax.f32 %v6831_v35, %v6832_v27  ;;  %6669 = vst.msk [vmem:[#allocation2 + $0x188] sm:$0xff] %vm3117_vm8, %v6605_v49  ;;  %v6604_v47 = vmax.f32 %v6463_v12, 0.0  ;;  %v6481_v18 = vadd.f32 %v12373_v31, %v6030_v10  ;;  %v6024_v58 = vadd.f32 %v6023_v40, %v5543_v32  ;;  %v20263_v31 = vld [vmem:[#allocation18_spill] sm:$0xff]  ;;  %v20267_v40 = vld [vmem:[#allocation20_spill] sm:$0xff] }
 0x62b   :  { %7278 = vrot.lane.b32.xlu1 %v17597_v21, %s12758_s22  ;;  %v12276_v48 = vpop.f32.mrf.mxu0  ;;  %v6728_v28 = vld [vmem:[#allocation2 + $0x160] ss:$2 sm:$0xff]  ;;  %v6792_v22 = vld [vmem:[#allocation2 + $0x161] ss:$2 sm:$0xff]  ;;  %v5559_v57 = vadd.f32 %v20263_v31, %v4991_v25  ;;  %v4042_v37 = vadd.f32 %v17561_v43, %v20264_v46  ;;  %v5019_v10 = vadd.f32 %v20266_v26, %v4509_v36  ;;  %v5575_v29 = vadd.f32 %v20267_v40, %v5005_v63 }
 0x62c   :  { %v17667_v44 = vpop.f32.mrf.mxu1  ;;  %6911 = vst.msk [vmem:[#allocation3 + $0xd1] sm:$0xff] %vm3117_vm8, %v6853_v4  ;;  %6668 = vst.msk [vmem:[#allocation2 + $0x180] sm:$0xff] %vm3117_vm8, %v6604_v47  ;;  %v6607_v21 = vmax.f32 %v6481_v18, 0.0  ;;  %v6475_v54 = vadd.f32 %v6474_v53, %v6024_v58  ;;  %v6042_v35 = vadd.f32 %v12276_v48, %v20262_v52  ;;  %v6833_v60 = vmax.f32 %v6728_v28, %v6792_v22  ;;  %v20268_v18 = vld [vmem:[#allocation25_spill] sm:$0xff] }
 0x62d   :  { %v6035_v32 = vpop.f32.mrf.mxu0  ;;  %v20270_v52 = vld [vmem:[#allocation33_spill] sm:$0xff] }
 0x62e   :  { %v6486_v30 = vpop.f32.mrf.mxu1  ;;  %7090 = vrot.lane.b32.xlu0 %v17697_v50, %s12754_s20  ;;  %6671 = vst.msk [vmem:[#allocation2 + $0x198] sm:$0xff] %vm3117_vm8, %v6607_v21  ;;  %v6606_v53 = vmax.f32 %v6475_v54, 0.0  ;;  %v6493_v49 = vadd.f32 %v17667_v44, %v6042_v35  ;;  %v6036_v12 = vadd.f32 %v6035_v32, %v5559_v57  ;;  %v20269_v44 = vld [vmem:[#allocation67_spill] sm:$0xff]  ;;  %v17723_v57 = vld [vmem:[#allocation3 + $0x71] sm:$0xff]  ;;  %v20271_v32 = vld [vmem:[#allocation32_spill] sm:$0xff] }
 0x62f   :  { %7530 = vrot.lane.b32.xlu1 %v17617_v42, %s12762_s28  ;;  %v6730_v25 = vld [vmem:[#allocation2 + $0x170] ss:$2 sm:$0xff]  ;;  %v6794_v41 = vld [vmem:[#allocation2 + $0x171] ss:$2 sm:$0xff]  ;;  %v12279_v14 = vpop.f32.mrf.mxu0  ;;  %v4521_v48 = vadd.f32 %v20269_v44, %v4042_v37 }
 0x630   :  { %v12379_v33 = vpop.f32.mrf.mxu1  ;;  %v6834_v4 = vmax.f32 %v6730_v25, %v6794_v41  ;;  %6670 = vst.msk [vmem:[#allocation2 + $0x190] sm:$0xff] %vm3117_vm8, %v6606_v53  ;;  %v6609_v42 = vmax.f32 %v6493_v49, 0.0  ;;  %v6487_v47 = vadd.f32 %v6486_v30, %v6036_v12  ;;  %v6054_v58 = vadd.f32 %v12279_v14, %v20268_v18  ;;  %v20273_v41 = vld [vmem:[#allocation74_spill] sm:$0xff]  ;;  %v20274_v14 = vld [vmem:[#allocation43_spill] sm:$0xff] }
 0x631   :  { %v6047_v28 = vpop.f32.mrf.mxu0  ;;  %v5033_v35 = vadd.f32 %v20270_v52, %v4521_v48  ;;  %v5047_v40 = vadd.f32 %v20274_v14, %v20273_v41  ;;  %v17736_v18 = vld [vmem:[#allocation3 + $0x62] sm:$0xff] }
 0x632   :  { %v6498_v56 = vpop.f32.mrf.mxu1  ;;  %7342 = vrot.lane.b32.xlu0 %v17635_v8, %s12759_s26  ;;  %v6854_v22 = vmax.f32 %v6833_v60, %v6834_v4  ;;  %6673 = vst.msk [vmem:[#allocation2 + $0x1a8] sm:$0xff] %vm3117_vm8, %v6609_v42  ;;  %v6608_v63 = vmax.f32 %v6487_v47, 0.0  ;;  %v6505_v21 = vadd.f32 %v12379_v33, %v6054_v58  ;;  %v6048_v54 = vadd.f32 %v6047_v28, %v5575_v29  ;;  %v20272_v33 = vld [vmem:[#allocation22_spill] sm:$0xff] }
 0x633   :  { %7280 = vrot.lane.b32.xlu1 %v17697_v50, %s12758_s22  ;;  %v12282_v31 = vpop.f32.mrf.mxu0  ;;  %v6732_v46 = vld [vmem:[#allocation2 + $0x180] ss:$2 sm:$0xff]  ;;  %v6796_v37 = vld [vmem:[#allocation2 + $0x181] ss:$2 sm:$0xff]  ;;  %v5591_v49 = vadd.f32 %v20272_v33, %v5019_v10  ;;  %v20276_v28 = vld [vmem:[#allocation38_spill] sm:$0xff] }
 0x634   :  { %v12382_v15 = vpop.f32.mrf.mxu1  ;;  %6912 = vst.msk [vmem:[#allocation3 + $0xe1] sm:$0xff] %vm3117_vm8, %v6854_v22  ;;  %6672 = vst.msk [vmem:[#allocation2 + $0x1a0] sm:$0xff] %vm3117_vm8, %v6608_v63  ;;  %v6611_v20 = vmax.f32 %v6505_v21, 0.0  ;;  %v6499_v36 = vadd.f32 %v6498_v56, %v6048_v54  ;;  %v6066_v53 = vadd.f32 %v12282_v31, %v20271_v32  ;;  %v6835_v56 = vmax.f32 %v6732_v46, %v6796_v37  ;;  %v20275_v10 = vld [vmem:[#allocation24_spill] sm:$0xff]  ;;  %v20278_v31 = vld [vmem:[#allocation50_spill] sm:$0xff] }
 0x635   :  { %v6059_v12 = vpop.f32.mrf.mxu0  ;;  %v5607_v58 = vadd.f32 %v20275_v10, %v5033_v35  ;;  %v20277_v35 = vld [vmem:[#allocation79_spill] sm:$0xff]  ;;  %v17759_v10 = vld [vmem:[#allocation3 + $0x70] sm:$0xff] }
 0x636   :  { %v6510_v27 = vpop.f32.mrf.mxu1  ;;  %7092 = vrot.lane.b32.xlu0 %v17723_v57, %s12754_s20  ;;  %6675 = vst.msk [vmem:[#allocation2 + $0x1b8] sm:$0xff] %vm3117_vm8, %v6611_v20  ;;  %v6610_v26 = vmax.f32 %v6499_v36, 0.0  ;;  %v6517_v60 = vadd.f32 %v12382_v15, %v6066_v53  ;;  %v6060_v25 = vadd.f32 %v6059_v12, %v5591_v49  ;;  %v5061_v46 = vadd.f32 %v20278_v31, %v20277_v35  ;;  %v17748_v20 = vld [vmem:[#allocation3 + $0x72] sm:$0xff]  ;;  %v6972_v35 = vld [vmem:[#allocation3 + $0x80] sm:$0xff] }
 0x637   :  { %7532 = vrot.lane.b32.xlu1 %v17635_v8, %s12762_s28  ;;  %v6734_v29 = vld [vmem:[#allocation2 + $0x190] ss:$2 sm:$0xff]  ;;  %v6798_v4 = vld [vmem:[#allocation2 + $0x191] ss:$2 sm:$0xff]  ;;  %v12285_v47 = vpop.f32.mrf.mxu0 }
 0x638   :  { %v12385_v43 = vpop.f32.mrf.mxu1  ;;  %v6836_v44 = vmax.f32 %v6734_v29, %v6798_v4  ;;  %6674 = vst.msk [vmem:[#allocation2 + $0x1b0] sm:$0xff] %vm3117_vm8, %v6610_v26  ;;  %v6613_v8 = vmax.f32 %v6517_v60, 0.0  ;;  %v6511_v48 = vadd.f32 %v6510_v27, %v6060_v25  ;;  %v6078_v15 = vadd.f32 %v12285_v47, %v20276_v28  ;;  %v20279_v49 = vld [vmem:[#allocation45_spill] sm:$0xff]  ;;  %v20282_v28 = vld [vmem:[#allocation52_spill] sm:$0xff] }
 0x639   :  { %v6071_v22 = vpop.f32.mrf.mxu0 }
 0x63a   :  { %v6522_v30 = vpop.f32.mrf.mxu1  ;;  %7344 = vrot.lane.b32.xlu0 %v17736_v18, %s12759_s26  ;;  %v6855_v63 = vmax.f32 %v6835_v56, %v6836_v44  ;;  %6677 = vst.msk [vmem:[#allocation2 + $0x1c8] sm:$0xff] %vm3117_vm8, %v6613_v8  ;;  %v6612_v21 = vmax.f32 %v6511_v48, 0.0  ;;  %v6529_v54 = vadd.f32 %v12385_v43, %v6078_v15  ;;  %v6072_v52 = vadd.f32 %v6071_v22, %v5607_v58  ;;  %v20280_v43 = vld [vmem:[#allocation28_spill] sm:$0xff]  ;;  %v20281_v58 = vld [vmem:[#allocation37_spill] sm:$0xff] }
 0x63b   :  { %7154 = vrot.lane.b32.xlu1 %v17736_v18, %s12756_s19  ;;  %v12288_v27 = vpop.f32.mrf.mxu0  ;;  %v6736_v36 = vld [vmem:[#allocation2 + $0x1a0] ss:$2 sm:$0xff]  ;;  %v6800_v32 = vld [vmem:[#allocation2 + $0x1a1] ss:$2 sm:$0xff]  ;;  %v5623_v26 = vadd.f32 %v20280_v43, %v5047_v40  ;;  %v5639_v44 = vadd.f32 %v20281_v58, %v5061_v46 }
 0x63c   :  { %v12388_v42 = vpop.f32.mrf.mxu1  ;;  %6913 = vst.msk [vmem:[#allocation3 + $0xf1] sm:$0xff] %vm3117_vm8, %v6855_v63  ;;  %6676 = vst.msk [vmem:[#allocation2 + $0x1c0] sm:$0xff] %vm3117_vm8, %v6612_v21  ;;  %v6615_v53 = vmax.f32 %v6529_v54, 0.0  ;;  %v6523_v33 = vadd.f32 %v6522_v30, %v6072_v52  ;;  %v6090_v12 = vadd.f32 %v12288_v27, %v20279_v49  ;;  %v6837_v56 = vmax.f32 %v6736_v36, %v6800_v32 }
 0x63d   :  { %v6083_v60 = vpop.f32.mrf.mxu0 }
 0x63e   :  { %v6534_v37 = vpop.f32.mrf.mxu1  ;;  %7156 = vrot.lane.b32.xlu0 %v17748_v20, %s12756_s19  ;;  %6679 = vst.msk [vmem:[#allocation2 + $0x1d8] sm:$0xff] %vm3117_vm8, %v6615_v53  ;;  %v6614_v25 = vmax.f32 %v6523_v33, 0.0  ;;  %v6541_v41 = vadd.f32 %v12388_v42, %v6090_v12  ;;  %v6084_v14 = vadd.f32 %v6083_v60, %v5623_v26  ;;  %v6941_v12 = vld [vmem:[#allocation3 + $0xa1] sm:$0xff]  ;;  %v7079_v26 = vpop.permute.xlu0 %7078 }
 0x63f   :  { %7406 = vrot.lane.b32.xlu1 %v17669_v0, %s12760_s1  ;;  %v6738_v29 = vld [vmem:[#allocation2 + $0x1b0] ss:$2 sm:$0xff]  ;;  %v6802_v4 = vld [vmem:[#allocation2 + $0x1b1] ss:$2 sm:$0xff]  ;;  %v12291_v47 = vpop.f32.mrf.mxu0 }
 0x640   :  { %v12391_v30 = vpop.f32.mrf.mxu1  ;;  %v6838_v8 = vmax.f32 %v6738_v29, %v6802_v4  ;;  %6678 = vst.msk [vmem:[#allocation2 + $0x1d0] sm:$0xff] %vm3117_vm8, %v6614_v25  ;;  %v6617_v40 = vmax.f32 %v6541_v41, 0.0  ;;  %v6535_v48 = vadd.f32 %v6534_v37, %v6084_v14  ;;  %v6102_v15 = vadd.f32 %v12291_v47, %v20282_v28  ;;  %v6957_v47 = vld [vmem:[#allocation3 + $0xa2] sm:$0xff]  ;;  %v7021_v28 = vld [vmem:[#allocation3 + $0x90] sm:$0xff] }
 0x641   :  { %v6095_v42 = vpop.f32.mrf.mxu0 }
 0x642   :  { %7408 = vrot.lane.b32.xlu0 %v17759_v10, %s12760_s1  ;;  %v6856_v22 = vmax.f32 %v6837_v56, %v6838_v8  ;;  %6681 = vst.msk [vmem:[#allocation2 + $0x1e8] sm:$0xff] %vm3117_vm8, %v6617_v40  ;;  %v6616_v63 = vmax.f32 %v6535_v48, 0.0  ;;  %v6553_v21 = vadd.f32 %v12391_v30, %v6102_v15  ;;  %v6096_v54 = vadd.f32 %v6095_v42, %v5639_v44  ;;  %v6546_v52 = vpop.f32.mrf.mxu1  ;;  %v7143_v29 = vpop.permute.xlu0 %7142  ;;  %v6942_v30 = vld [vmem:[#allocation3 + $0xb1] sm:$0xff]  ;;  %v7004_v44 = vld [vmem:[#allocation3 + $0x82] sm:$0xff] }
 0x643   :  { %7218 = vrot.lane.b32.xlu1 %v17759_v10, %s12757_s21  ;;  %v6740_v37 = vld [vmem:[#allocation2 + $0x1c0] ss:$2 sm:$0xff]  ;;  %v6804_v27 = vld [vmem:[#allocation2 + $0x1c1] ss:$2 sm:$0xff]  ;;  %v6958_v40 = vld [vmem:[#allocation3 + $0xb2] sm:$0xff] }
 0x644   :  { %6914 = vst.msk [vmem:[#allocation3 + $0x101] sm:$0xff] %vm3117_vm8, %v6856_v22  ;;  %6680 = vst.msk [vmem:[#allocation2 + $0x1e0] sm:$0xff] %vm3117_vm8, %v6616_v63  ;;  %v6619_v31 = vmax.f32 %v6553_v21, 0.0  ;;  %v6547_v46 = vadd.f32 %v6546_v52, %v6096_v54  ;;  %v6839_v33 = vmax.f32 %v6740_v37, %v6804_v27  ;;  %v17810_v63 = vld [vmem:[#allocation3 + $0xc0] sm:$0xff]  ;;  %v7037_v21 = vld [vmem:[#allocation3 + $0x91] sm:$0xff] }
 0x646   :  { %7220 = vrot.lane.b32.xlu0 %v6972_v35, %s12757_s21  ;;  %6683 = vst.msk [vmem:[#allocation2 + $0x1f8] sm:$0xff] %vm3117_vm8, %v6619_v31  ;;  %v6618_v36 = vmax.f32 %v6547_v46, 0.0  ;;  %v6943_v46 = vld [vmem:[#allocation3 + $0xc1] sm:$0xff] }
 0x647   :  { %7470 = vrot.lane.b32.xlu1 %v17697_v50, %s12761_s30  ;;  %v6742_v32 = vld [vmem:[#allocation2 + $0x1d0] ss:$2 sm:$0xff]  ;;  %v6806_v53 = vld [vmem:[#allocation2 + $0x1d1] ss:$2 sm:$0xff] }
 0x648   :  { %v6840_v49 = vmax.f32 %v6742_v32, %v6806_v53  ;;  %6682 = vst.msk [vmem:[#allocation2 + $0x1f0] sm:$0xff] %vm3117_vm8, %v6618_v36  ;;  %v6917_v36 = vld [vmem:[#allocation3] sm:$0xff]  ;;  %v7053_v53 = vld [vmem:[#allocation3 + $0x92] sm:$0xff] }
 0x64a   :  { %7472 = vrot.lane.b32.xlu0 %v17723_v57, %s12761_s30  ;;  %v6857_v43 = vmax.f32 %v6839_v33, %v6840_v49  ;;  %v6944_v49 = vld [vmem:[#allocation3 + $0xd1] sm:$0xff] }
 0x64b   :  { %7282 = vrot.lane.b32.xlu1 %v17723_v57, %s12758_s22  ;;  %v6744_v50 = vld [vmem:[#allocation2 + $0x1e0] ss:$2 sm:$0xff]  ;;  %v6808_v60 = vld [vmem:[#allocation2 + $0x1e1] ss:$2 sm:$0xff] }
 0x64c   :  { %6915 = vst.msk [vmem:[#allocation3 + $0x111] sm:$0xff] %vm3117_vm8, %v6857_v43  ;;  %v6841_v14 = vmax.f32 %v6744_v50, %v6808_v60  ;;  %v6988_v57 = vld [vmem:[#allocation3 + $0x81] sm:$0xff] }
 0x64d   :  { %v7006_v60 = vld [vmem:[#allocation3 + $0xc2] sm:$0xff] }
 0x64e   :  { %7094 = vrot.lane.b32.xlu0 %v6941_v12, %s12754_s20  ;;  %v7574_v12 = vsel %vm3117_vm8, %v6917_v36, %v7079_v26 }
 0x64f   :  { %7534 = vrot.lane.b32.xlu1 %v17736_v18, %s12762_s28  ;;  %v6746_v25 = vld [vmem:[#allocation2 + $0x1f0] ss:$2 sm:$0xff]  ;;  %v6810_v41 = vld [vmem:[#allocation2 + $0x1f1] ss:$2 sm:$0xff] }
 0x650   :  { %v6842_v56 = vmax.f32 %v6746_v25, %v6810_v41  ;;  %v7591_v25 = vsel %vm7590_vm11, %v7574_v12, %v7143_v29 }
 0x652   :  { %7346 = vrot.lane.b32.xlu0 %v17748_v20, %s12759_s26  ;;  %v6858_v4 = vmax.f32 %v6841_v14, %v6842_v56  ;;  %v17840_v56 = vld [vmem:[#allocation3 + $0xd2] sm:$0xff] }
 0x653   :  { %7284 = vrot.lane.b32.xlu1 %v6988_v57, %s12758_s22 }
 0x654   :  { %6916 = vst.msk [vmem:[#allocation3 + $0x121] sm:$0xff] %vm3117_vm8, %v6858_v4  ;;  %v6918_v4 = vld [vmem:[#allocation3 + $0x10] sm:$0xff] }
 0x656   :  { %7096 = vrot.lane.b32.xlu0 %v6942_v30, %s12754_s20  ;;  %v7207_v18 = vpop.permute.xlu0 %7206 }
 0x657   :  { %7536 = vrot.lane.b32.xlu1 %v17748_v20, %s12762_s28  ;;  %v17791_v58 = vpop.permute.xlu1 %7080  ;;  %v17802_v20 = vld [vmem:[#allocation3 + $0xb0] sm:$0xff]  ;;  %v7608_v14 = vsel %vm7607_vm12, %v7591_v25, %v7207_v18 }
 0x65a   :  { %7348 = vrot.lane.b32.xlu0 %v7004_v44, %s12759_s26  ;;  %v7271_v48 = vpop.permute.xlu0 %7270 }
 0x65b   :  { %7158 = vrot.lane.b32.xlu1 %v6957_v47, %s12756_s19  ;;  %v17795_v8 = vpop.permute.xlu1 %7144  ;;  %v7575_v47 = vsel %vm3117_vm8, %v6918_v4, %v17791_v58 }
 0x65e   :  { %7160 = vrot.lane.b32.xlu0 %v6958_v40, %s12756_s19  ;;  %v17806_v42 = vpop.permute.xlu0 %7272 }
 0x65f   :  { %7410 = vrot.lane.b32.xlu1 %v6972_v35, %s12760_s1 }
 0x660   :  { %v17799_v15 = vpop.permute.xlu1 %7208 }
 0x662   :  { %7412 = vrot.lane.b32.xlu0 %v7021_v28, %s12760_s1  ;;  %v7592_v28 = vsel %vm7590_vm11, %v7575_v47, %v17795_v8  ;;  %v17872_v8 = vld [vmem:[#allocation3 + $0xe0] sm:$0xff] }
 0x663   :  { %7222 = vrot.lane.b32.xlu1 %v17802_v20, %s12757_s21 }
 0x664   :  { %v17808_v22 = vpop.permute.xlu1 %7082 }
 0x666   :  { %7224 = vrot.lane.b32.xlu0 %v17810_v63, %s12757_s21  ;;  %v17815_v54 = vpop.permute.xlu0 %7084 }
 0x667   :  { %7474 = vrot.lane.b32.xlu1 %v6988_v57, %s12761_s30  ;;  %v7625_v57 = vsel %vm7624_vm13, %v7608_v14, %v7271_v48  ;;  %v17854_v48 = vld [vmem:[#allocation3 + $0xd0] sm:$0xff] }
 0x668   :  { %v7335_v52 = vpop.permute.xlu1 %7334 }
 0x669   :  { %v7642_v29 = vsel %vm7641_vm14, %v7625_v57, %v7335_v52  ;;  %v7609_v52 = vsel %vm7607_vm12, %v7592_v28, %v17799_v15 }
 0x66a   :  { %7476 = vrot.lane.b32.xlu0 %v7037_v21, %s12761_s30  ;;  %v7337_v35 = vpop.permute.xlu0 %7336  ;;  %v7626_v12 = vsel %vm7624_vm13, %v7609_v52, %v17806_v42 }
 0x66b   :  { %7286 = vrot.lane.b32.xlu1 %v6942_v30, %s12758_s22  ;;  %v7643_v15 = vsel %vm7641_vm14, %v7626_v12, %v7337_v35 }
 0x66c   :  { %v17819_v31 = vpop.permute.xlu1 %7146 }
 0x66e   :  { %7098 = vrot.lane.b32.xlu0 %v6943_v46, %s12754_s20  ;;  %v17823_v37 = vpop.permute.xlu0 %7148 }
 0x66f   :  { %7538 = vrot.lane.b32.xlu1 %v7004_v44, %s12762_s28 }
 0x670   :  { %v7399_v27 = vpop.permute.xlu1 %7398 }
 0x671   :  { %v7659_v30 = vsel %vm7658_vm15, %v7642_v29, %v7399_v27 }
 0x672   :  { %7350 = vrot.lane.b32.xlu0 %v6958_v40, %s12759_s26  ;;  %v7401_v32 = vpop.permute.xlu0 %7400 }
 0x673   :  { %7288 = vrot.lane.b32.xlu1 %v6943_v46, %s12758_s22  ;;  %v7660_v25 = vsel %vm7658_vm15, %v7643_v15, %v7401_v32  ;;  %v17930_v15 = vld [vmem:[#allocation3 + $0xf1] sm:$0xff] }
 0x674   :  { %v17827_v33 = vpop.permute.xlu1 %7210 }
 0x676   :  { %7100 = vrot.lane.b32.xlu0 %v6944_v49, %s12754_s20  ;;  %v17832_v43 = vpop.permute.xlu0 %7212 }
 0x677   :  { %7540 = vrot.lane.b32.xlu1 %v7053_v53, %s12762_s28 }
 0x678   :  { %v7463_v50 = vpop.permute.xlu1 %7462 }
 0x679   :  { %v7676_v44 = vsel %vm7675_vm0, %v7659_v30, %v7463_v50 }
 0x67a   :  { %7352 = vrot.lane.b32.xlu0 %v7006_v60, %s12759_s26 }
 0x67b   :  { %7162 = vrot.lane.b32.xlu1 %v7006_v60, %s12756_s19  ;;  %v7465_v41 = vpop.permute.xlu0 %7464 }
 0x67c   :  { %v17838_v26 = vpop.permute.xlu1 %7274  ;;  %v7677_v42 = vsel %vm7675_vm0, %v7660_v25, %v7465_v41 }
 0x67e   :  { %7164 = vrot.lane.b32.xlu0 %v17840_v56, %s12756_s19 }
 0x67f   :  { %7414 = vrot.lane.b32.xlu1 %v17810_v63, %s12760_s1  ;;  %v17849_v18 = vpop.permute.xlu0 %7086 }
 0x680   :  { %v7527_v40 = vpop.permute.xlu1 %7526 }
 0x681   :  { %v7693_v21 = vsel %vm7692_vm1, %v7676_v44, %v7527_v40  ;;  %v17906_v40 = vld [vmem:[#allocation3 + $0xe1] sm:$0xff] }
 0x682   :  { %7416 = vrot.lane.b32.xlu0 %v17854_v48, %s12760_s1  ;;  %v7727_v27 = vsel %vm7725_vm3, %v7693_v21, 0 }
 0x683   :  { %7226 = vrot.lane.b32.xlu1 %v17854_v48, %s12757_s21  ;;  %v17866_v58 = vand.u32 4294901760, %v7727_v27 }
 0x684   :  { %v17868_v36 = vpop.permute.xlu0 %7338 }
 0x685   :  { %v17870_v53 = vpop.permute.xlu1 %7276  ;;  %v17877_v50 = vsub.f32 %v7727_v27, %v17866_v58  ;;  %12452 = vmatprep.mubr.f32.mxu1 %v17866_v58 }
 0x686   :  { %7228 = vrot.lane.b32.xlu0 %v17872_v8, %s12757_s21 }
 0x687   :  { %7478 = vrot.lane.b32.xlu1 %v6943_v46, %s12761_s30  ;;  %v19679_v57 = vand.u32 4294901760, %v17877_v50 }
 0x688   :  { %v17885_v14 = vpop.permute.xlu0 %7088 }
 0x689   :  { %v7529_v29 = vpop.permute.xlu1 %7528  ;;  %v7851_v30 = vsub.f32 %v17877_v50, %v19679_v57 }
 0x68a   :  { %v7694_v4 = vsel %vm7692_vm1, %v7677_v42, %v7529_v29  ;;  %7480 = vrot.lane.b32.xlu0 %v6944_v49, %s12761_s30  ;;  %v6919_v29 = vld [vmem:[#allocation3 + $0x20] sm:$0xff] }
 0x68b   :  { %v7730_v35 = vsel %vm7725_vm3, %v7694_v4, 0  ;;  %7290 = vrot.lane.b32.xlu1 %v6944_v49, %s12758_s22  ;;  %v7852_v47 = vand.u32 4294901760, %v7851_v30  ;;  %v17943_v4 = vld [vmem:[#allocation3 + $0xe2] sm:$0xff] }
 0x68c   :  { %v17896_v46 = vand.u32 4294901760, %v7730_v35  ;;  %v17898_v32 = vpop.permute.xlu0 %7340 }
 0x68d   :  { %v17900_v44 = vpop.permute.xlu1 %7150  ;;  %12410 = vmatprep.mubr.f32.mxu0 %v7852_v47  ;;  %v17965_v47 = vld [vmem:[#allocation3 + $0xf2] sm:$0xff] }
 0x68e   :  { %v17903_v41 = vsub.f32 %v7730_v35, %v17896_v46  ;;  %12453 = vmatmul.mubr.f32.vlgmr.msra.gmra.mxu1 %v17896_v46  ;;  %7102 = vrot.lane.b32.xlu0 %v17906_v40, %s12754_s20 }
 0x68f   :  { %7542 = vrot.lane.b32.xlu1 %v7006_v60, %s12762_s28  ;;  %12519 = vmatpush3.msra.mxu1 %v17301_v59 }
 0x690   :  { %v19678_v49 = vand.u32 4294901760, %v17903_v41  ;;  %v17912_v28 = vpop.permute.xlu0 %7152  ;;  %12520 = vmatprep.subr.mxu1 %v17320_v11 }
 0x691   :  { %v7403_v21 = vpop.permute.xlu1 %7402  ;;  %12521 = vmatpush3.msra.mxu1 %v17320_v11 }
 0x692   :  { %v7861_v52 = vsub.f32 %v17903_v41, %v19678_v49  ;;  %7354 = vrot.lane.b32.xlu0 %v17840_v56, %s12759_s26  ;;  %12522 = vmatprep.subr.mxu1 %v17350_v13 }
 0x693   :  { %7292 = vrot.lane.b32.xlu1 %v17906_v40, %s12758_s22  ;;  %12523 = vmatpush3.msra.mxu1 %v17350_v13 }
 0x694   :  { %v7862_v60 = vand.u32 4294901760, %v7861_v52  ;;  %v17924_v27 = vpop.permute.xlu0 %7404  ;;  %12524 = vmatprep.subr.mxu1 %v17382_v16 }
 0x695   :  { %v17927_v12 = vpop.permute.xlu1 %7214  ;;  %12525 = vmatpush3.msra.mxu1 %v17382_v16 }
 0x696   :  { %12411 = vmatmul.mubr.f32.vlgmr.msra.gmra.mxu0 %v7862_v60  ;;  %7104 = vrot.lane.b32.xlu0 %v17930_v15, %s12754_s20  ;;  %v17984_v60 = vld [vmem:[#allocation3 + $0xf0] sm:$0xff] }
 0x697   :  { %7544 = vrot.lane.b32.xlu1 %v17840_v56, %s12762_s28  ;;  %12477 = vmatpush3.msra.mxu0 %v17318_v9  ;;  %v7576_v56 = vsel %vm3117_vm8, %v6919_v29, %v17808_v22 }
 0x698   :  { %v17937_v25 = vpop.permute.xlu0 %7216  ;;  %12478 = vmatprep.subr.mxu0 %v17342_v39  ;;  %12526 = vmatprep.subr.mxu1 %v17425_v55  ;;  %v7593_v9 = vsel %vm7590_vm11, %v7576_v56, %v17819_v31 }
 0x699   :  { %v7467_v42 = vpop.permute.xlu1 %7466  ;;  %12479 = vmatpush3.msra.mxu0 %v17342_v39  ;;  %12527 = vmatpush3.msra.mxu1 %v17425_v55  ;;  %v7610_v39 = vsel %vm7607_vm12, %v7593_v9, %v17827_v33 }
 0x69a   :  { %7356 = vrot.lane.b32.xlu0 %v17943_v4, %s12759_s26  ;;  %12480 = vmatprep.subr.mxu0 %v17380_v61  ;;  %v7627_v22 = vsel %vm7624_vm13, %v7610_v39, %v17838_v26 }
 0x69b   :  { %7166 = vrot.lane.b32.xlu1 %v17943_v4, %s12756_s19  ;;  %12528 = vmatprep.subr.mxu1 %v17427_v17  ;;  %v7644_v31 = vsel %vm7641_vm14, %v7627_v22, %v17868_v36  ;;  %v18015_v22 = vld [vmem:[#allocation3 + $0x100] sm:$0xff] }
 0x69c   :  { %v7469_v30 = vpop.permute.xlu0 %7468  ;;  %12481 = vmatpush3.msra.mxu0 %v17380_v61  ;;  %12529 = vmatpush3.msra.mxu1 %v17427_v17  ;;  %v7661_v61 = vsel %vm7658_vm15, %v7644_v31, %v7403_v21  ;;  %v12701_v21 = vld [vmem:[#allocation3 + $0x30] sm:$0xff] }
 0x69d   :  { %v17959_v35 = vpop.permute.xlu1 %7278  ;;  %12482 = vmatprep.subr.mxu0 %v17400_v2  ;;  %12530 = vmatprep.subr.mxu1 %v17440_v45  ;;  %v7678_v26 = vsel %vm7675_vm0, %v7661_v61, %v7467_v42 }
 0x69e   :  { %7168 = vrot.lane.b32.xlu0 %v17965_v47, %s12756_s19  ;;  %12483 = vmatpush3.msra.mxu0 %v17400_v2  ;;  %v7577_v2 = vsel %vm3117_vm8, %v12701_v21, %v17815_v54  ;;  %v6947_v21 = vld [vmem:[#allocation3 + $0x101] sm:$0xff] }
 0x69f   :  { %7418 = vrot.lane.b32.xlu1 %v17872_v8, %s12760_s1  ;;  %12531 = vmatpush3.msra.mxu1 %v17440_v45  ;;  %v7594_v42 = vsel %vm7590_vm11, %v7577_v2, %v17823_v37 }
 0x6a0   :  { %v17976_v33 = vpop.permute.xlu0 %7090  ;;  %12484 = vmatprep.subr.mxu0 %v17452_v23  ;;  %12532 = vmatprep.subr.mxu1 %v17501_v34  ;;  %v7611_v54 = vsel %vm7607_vm12, %v7594_v42, %v17832_v43 }
 0x6a1   :  { %v7531_v52 = vpop.permute.xlu1 %7530  ;;  %12485 = vmatpush3.msra.mxu0 %v17452_v23  ;;  %12533 = vmatpush3.msra.mxu1 %v17501_v34  ;;  %v7628_v37 = vsel %vm7624_vm13, %v7611_v54, %v17870_v53 }
 0x6a2   :  { %v7695_v36 = vsel %vm7692_vm1, %v7678_v26, %v7531_v52  ;;  %7420 = vrot.lane.b32.xlu0 %v17984_v60, %s12760_s1  ;;  %12486 = vmatprep.subr.mxu0 %v17455_v24  ;;  %v7645_v43 = vsel %vm7641_vm14, %v7628_v37, %v17898_v32 }
 0x6a3   :  { %v7733_v29 = vsel %vm7725_vm3, %v7695_v36, 0  ;;  %7230 = vrot.lane.b32.xlu1 %v17984_v60, %s12757_s21  ;;  %12534 = vmatprep.subr.mxu1 %v17506_v7 }
 0x6a4   :  { %v17997_v56 = vand.u32 4294901760, %v7733_v29  ;;  %v17999_v23 = vpop.permute.xlu0 %7342  ;;  %12487 = vmatpush3.msra.mxu0 %v17455_v24  ;;  %12535 = vmatpush3.msra.mxu1 %v17506_v7  ;;  %v7662_v24 = vsel %vm7658_vm15, %v7645_v43, %v17924_v27 }
 0x6a5   :  { %v18005_v9 = vpop.permute.xlu1 %7280  ;;  %12488 = vmatprep.subr.mxu0 %v17477_v1  ;;  %12602 = vmatprep.subr.mxu1 %v17301_v59  ;;  %v7679_v61 = vsel %vm7675_vm0, %v7662_v24, %v7469_v30 }
 0x6a6   :  { %v18012_v39 = vsub.f32 %v7733_v29, %v17997_v56  ;;  %12455 = vmatprep.mubr.f32.mxu1 %v17997_v56  ;;  %7232 = vrot.lane.b32.xlu0 %v18015_v22, %s12757_s21 }
 0x6a7   :  { %7482 = vrot.lane.b32.xlu1 %v17906_v40, %s12761_s30  ;;  %12489 = vmatpush3.msra.mxu0 %v17477_v1 }
 0x6a8   :  { %v18026_v53 = vpop.permute.xlu0 %7092  ;;  %v19677_v31 = vand.u32 4294901760, %v18012_v39  ;;  %12490 = vmatprep.subr.mxu0 %v17516_v6 }
 0x6a9   :  { %v7533_v32 = vpop.permute.xlu1 %7532  ;;  %12491 = vmatpush3.msra.mxu0 %v17516_v6 }
 0x6aa   :  { %v7696_v26 = vsel %vm7692_vm1, %v7679_v61, %v7533_v32  ;;  %v7871_v40 = vsub.f32 %v18012_v39, %v19677_v31  ;;  %7484 = vrot.lane.b32.xlu0 %v17930_v15, %s12761_s30  ;;  %12492 = vmatprep.subr.mxu0 %v17533_v38  ;;  %v7010_v61 = vld [vmem:[#allocation3 + $0x102] sm:$0xff] }
 0x6ab   :  { %v7736_v27 = vsel %vm7725_vm3, %v7696_v26, 0  ;;  %7294 = vrot.lane.b32.xlu1 %v17930_v15, %s12758_s22  ;;  %12493 = vmatpush3.msra.mxu0 %v17533_v38  ;;  %v12702_v32 = vld [vmem:[#allocation3 + $0x40] sm:$0xff] }
 0x6ac   :  { %v18043_v1 = vand.u32 4294901760, %v7736_v27  ;;  %v7345_v30 = vpop.permute.xlu0 %7344  ;;  %v7872_v52 = vand.u32 4294901760, %v7871_v40  ;;  %12560 = vmatprep.subr.mxu0 %v17339_v5  ;;  %v7578_v26 = vsel %vm3117_vm8, %v12702_v32, %v17849_v18 }
 0x6ad   :  { %v18046_v36 = vpop.permute.xlu1 %7154  ;;  %v7595_v40 = vsel %vm7590_vm11, %v7578_v26, %v17900_v44 }
 0x6ae   :  { %v18050_v6 = vsub.f32 %v7736_v27, %v18043_v1  ;;  %12413 = vmatprep.mubr.f32.mxu0 %v7872_v52  ;;  %12456 = vmatmul.mubr.f32.gmra.mxu1 %v18043_v1  ;;  %v7612_v52 = vsel %vm7607_vm12, %v7595_v40, %v17927_v12 }
 0x6af   :  { %7106 = vrot.lane.b32.xlu0 %v6947_v21, %s12754_s20  ;;  %7546 = vrot.lane.b32.xlu1 %v17943_v4, %s12762_s28  ;;  %v6948_v4 = vld [vmem:[#allocation3 + $0x111] sm:$0xff] }
 0x6b0   :  { %v19674_v15 = vand.u32 4294901760, %v18050_v6  ;;  %v18057_v2 = vpop.permute.xlu0 %7156 }
 0x6b1   :  { %v7407_v29 = vpop.permute.xlu1 %7406 }
 0x6b2   :  { %v7881_v38 = vsub.f32 %v18050_v6, %v19674_v15  ;;  %v18095_v15 = vld [vmem:[#allocation3 + $0x110] sm:$0xff] }
 0x6b3   :  { %7358 = vrot.lane.b32.xlu0 %v17965_v47, %s12759_s26  ;;  %7296 = vrot.lane.b32.xlu1 %v6947_v21, %s12758_s22 }
 0x6b4   :  { %v7409_v42 = vpop.permute.xlu0 %7408  ;;  %v7882_v54 = vand.u32 4294901760, %v7881_v38  ;;  %v7629_v38 = vsel %vm7624_vm13, %v7612_v52, %v17959_v35  ;;  %v7579_v35 = vsel %vm3117_vm8, %v17652_v62, %v17885_v14 }
 0x6b5   :  { %v18066_v37 = vpop.permute.xlu1 %7218  ;;  %v7646_v18 = vsel %vm7641_vm14, %v7629_v38, %v17999_v23 }
 0x6b6   :  { %12414 = vmatmul.mubr.f32.gmra.mxu0 %v7882_v54  ;;  %v6964_v54 = vld [vmem:[#allocation3 + $0x112] sm:$0xff]  ;;  %v7663_v44 = vsel %vm7658_vm15, %v7646_v18, %v7407_v29  ;;  %v7596_v29 = vsel %vm7590_vm11, %v7579_v35, %v17912_v28 }
 0x6b7   :  { %7108 = vrot.lane.b32.xlu0 %v6948_v4, %s12754_s20  ;;  %7548 = vrot.lane.b32.xlu1 %v17965_v47, %s12762_s28  ;;  %v7613_v38 = vsel %vm7607_vm12, %v7596_v29, %v17937_v25 }
 0x6b8   :  { %v18071_v43 = vpop.permute.xlu0 %7220  ;;  %v7630_v62 = vsel %vm7624_vm13, %v7613_v38, %v18005_v9 }
 0x6b9   :  { %v7471_v24 = vpop.permute.xlu1 %7470 }
 0x6ba   :  { %v7680_v12 = vsel %vm7675_vm0, %v7663_v44, %v7471_v24  ;;  %v6980_v44 = vld [vmem:[#allocation3 + $0x120] sm:$0xff] }
 0x6bb   :  { %7360 = vrot.lane.b32.xlu0 %v7010_v61, %s12759_s26  ;;  %7170 = vrot.lane.b32.xlu1 %v7010_v61, %s12756_s19 }
 0x6bc   :  { %v7473_v27 = vpop.permute.xlu0 %7472 }
 0x6bd   :  { %v18081_v47 = vpop.permute.xlu1 %7282 }
 0x6bf   :  { %7172 = vrot.lane.b32.xlu0 %v6964_v54, %s12756_s19  ;;  %7422 = vrot.lane.b32.xlu1 %v18015_v22, %s12760_s1 }
 0x6c0   :  { %v18091_v32 = vpop.permute.xlu0 %7094 }
 0x6c1   :  { %v7535_v26 = vpop.permute.xlu1 %7534 }
 0x6c2   :  { %v7697_v40 = vsel %vm7692_vm1, %v7680_v12, %v7535_v26  ;;  %v7647_v12 = vsel %vm7641_vm14, %v7630_v62, %v7345_v30  ;;  %v6996_v62 = vld [vmem:[#allocation3 + $0x121] sm:$0xff] }
 0x6c3   :  { %v7739_v23 = vsel %vm7725_vm3, %v7697_v40, 0  ;;  %7424 = vrot.lane.b32.xlu0 %v18095_v15, %s12760_s1  ;;  %7234 = vrot.lane.b32.xlu1 %v18095_v15, %s12757_s21  ;;  %v7664_v28 = vsel %vm7658_vm15, %v7647_v12, %v7409_v42 }
 0x6c4   :  { %v18107_v24 = vand.u32 4294901760, %v7739_v23  ;;  %v7347_v52 = vpop.permute.xlu0 %7346  ;;  %v7681_v9 = vsel %vm7675_vm0, %v7664_v28, %v7473_v27 }
 0x6c5   :  { %v18111_v18 = vpop.permute.xlu1 %7284 }
 0x6c6   :  { %v18116_v14 = vsub.f32 %v7739_v23, %v18107_v24  ;;  %12458 = vmatprep.mubr.f32.mxu1 %v18107_v24 }
 0x6c7   :  { %7236 = vrot.lane.b32.xlu0 %v6980_v44, %s12757_s21  ;;  %7486 = vrot.lane.b32.xlu1 %v6947_v21, %s12761_s30 }
 0x6c8   :  { %v18123_v25 = vpop.permute.xlu0 %7096  ;;  %v19675_v26 = vand.u32 4294901760, %v18116_v14 }
 0x6c9   :  { %v7537_v40 = vpop.permute.xlu1 %7536 }
 0x6ca   :  { %v7698_v35 = vsel %vm7692_vm1, %v7681_v9, %v7537_v40  ;;  %v7891_v23 = vsub.f32 %v18116_v14, %v19675_v26 }
 0x6cb   :  { %v7742_v30 = vsel %vm7725_vm3, %v7698_v35, 0  ;;  %7488 = vrot.lane.b32.xlu0 %v6948_v4, %s12761_s30  ;;  %7298 = vrot.lane.b32.xlu1 %v6948_v4, %s12758_s22 }
 0x6cc   :  { %v18134_v21 = vand.u32 4294901760, %v7742_v30  ;;  %v7349_v42 = vpop.permute.xlu0 %7348  ;;  %v7892_v29 = vand.u32 4294901760, %v7891_v23 }
 0x6cd   :  { %v18136_v38 = vpop.permute.xlu1 %7158 }
 0x6ce   :  { %20283 = vst [vmem:[#allocation73_spill] sm:$0xff] %v18134_v21  ;;  %v18139_v27 = vsub.f32 %v7742_v30, %v18134_v21  ;;  %12416 = vmatprep.mubr.f32.mxu0 %v7892_v29  ;;  %12459 = vmatmul.mubr.f32.gmra.mxu1 %v18134_v21  ;;  %v7012_v30 = vld [vmem:[#allocation3 + $0x122] sm:$0xff]  ;;  %v7029_v29 = vld [vmem:[#allocation3 + $0x130] sm:$0xff] }
 0x6cf   :  { %7300 = vrot.lane.b32.xlu0 %v6996_v62, %s12758_s22  ;;  %7550 = vrot.lane.b32.xlu1 %v7010_v61, %s12762_s28 }
 0x6d0   :  { %v19676_v12 = vand.u32 4294901760, %v18139_v27  ;;  %v18145_v4 = vpop.permute.xlu0 %7160 }
 0x6d1   :  { %v7411_v28 = vpop.permute.xlu1 %7410 }
 0x6d2   :  { %v7901_v9 = vsub.f32 %v18139_v27, %v19676_v12  ;;  %v7580_v12 = vsel %vm3117_vm8, %v17669_v0, %v17976_v33 }
 0x6d3   :  { %7552 = vrot.lane.b32.xlu0 %v6964_v54, %s12762_s28  ;;  %7362 = vrot.lane.b32.xlu1 %v6964_v54, %s12759_s26  ;;  %v7597_v54 = vsel %vm7590_vm11, %v7580_v12, %v18046_v36  ;;  %v7061_v36 = vld [vmem:[#allocation3 + $0x132] sm:$0xff] }
 0x6d4   :  { %v7413_v40 = vpop.permute.xlu0 %7412  ;;  %v7902_v35 = vand.u32 4294901760, %v7901_v9 }
 0x6d5   :  { %v18152_v23 = vpop.permute.xlu1 %7222 }
 0x6d6   :  { %12417 = vmatmul.mubr.f32.gmra.mxu0 %v7902_v35  ;;  %v7045_v35 = vld [vmem:[#allocation3 + $0x131] sm:$0xff] }
 0x6d7   :  { %7426 = vrot.lane.b32.xlu0 %v6980_v44, %s12760_s1  ;;  %7364 = vrot.lane.b32.xlu1 %v7012_v30, %s12759_s26  ;;  %v7614_v44 = vsel %vm7607_vm12, %v7597_v54, %v18066_v37 }
 0x6d8   :  { %v18156_v61 = vpop.permute.xlu0 %7224  ;;  %v7631_v49 = vsel %vm7624_vm13, %v7614_v44, %v18081_v47  ;;  %v7581_v47 = vsel %vm3117_vm8, %v17759_v10, %v18026_v53 }
 0x6d9   :  { %v7475_v26 = vpop.permute.xlu1 %7474  ;;  %v7648_v57 = vsel %vm7641_vm14, %v7631_v49, %v7347_v52  ;;  %v7598_v52 = vsel %vm7590_vm11, %v7581_v47, %v18057_v2 }
 0x6da   :  { %v7665_v0 = vsel %vm7658_vm15, %v7648_v57, %v7411_v28 }
 0x6db   :  { %7490 = vrot.lane.b32.xlu0 %v6996_v62, %s12761_s30  ;;  %7428 = vrot.lane.b32.xlu1 %v7029_v29, %s12760_s1  ;;  %v7682_v62 = vsel %vm7675_vm0, %v7665_v0, %v7475_v26  ;;  %v7615_v26 = vsel %vm7607_vm12, %v7598_v52, %v18071_v43 }
 0x6dc   :  { %v7477_v9 = vpop.permute.xlu0 %7476  ;;  %v7632_v29 = vsel %vm7624_vm13, %v7615_v26, %v18111_v18 }
 0x6dd   :  { %v7287_v31 = vpop.permute.xlu1 %7286  ;;  %v7649_v10 = vsel %vm7641_vm14, %v7632_v29, %v7349_v42 }
 0x6de   :  { %v7666_v53 = vsel %vm7658_vm15, %v7649_v10, %v7413_v40 }
 0x6df   :  { %7554 = vrot.lane.b32.xlu0 %v7012_v30, %s12762_s28  ;;  %7492 = vrot.lane.b32.xlu1 %v7045_v35, %s12761_s30  ;;  %v7683_v44 = vsel %vm7675_vm0, %v7666_v53, %v7477_v9  ;;  %v6925_v53 = vld [vmem:[#allocation3 + $0xa0] sm:$0xff] }
 0x6e0   :  { %v18173_v33 = vpop.permute.xlu0 %7098 }
 0x6e1   :  { %v7539_v12 = vpop.permute.xlu1 %7538 }
 0x6e2   :  { %v7699_v37 = vsel %vm7692_vm1, %v7682_v62, %v7539_v12 }
 0x6e3   :  { %v7745_v49 = vsel %vm7725_vm3, %v7699_v37, 0  ;;  %7556 = vrot.lane.b32.xlu1 %v7061_v36, %s12762_s28 }
 0x6e4   :  { %v18184_v57 = vand.u32 4294901760, %v7745_v49  ;;  %v7351_v28 = vpop.permute.xlu0 %7350 }
 0x6e5   :  { %v7289_v30 = vpop.permute.xlu1 %7288 }
 0x6e6   :  { %20284 = vst [vmem:[#allocation78_spill] sm:$0xff] %v18184_v57  ;;  %v18191_v54 = vsub.f32 %v7745_v49, %v18184_v57  ;;  %12461 = vmatprep.mubr.f32.mxu1 %v18184_v57 }
 0x6e8   :  { %v18196_v2 = vpop.permute.xlu0 %7100  ;;  %v19680_v35 = vand.u32 4294901760, %v18191_v54 }
 0x6e9   :  { %v7541_v43 = vpop.permute.xlu1 %7540 }
 0x6ea   :  { %v7700_v0 = vsel %vm7692_vm1, %v7683_v44, %v7541_v43  ;;  %v7911_v18 = vsub.f32 %v18191_v54, %v19680_v35 }
 0x6eb   :  { %v7748_v36 = vsel %vm7725_vm3, %v7700_v0, 0  ;;  %v7582_v0 = vsel %vm3117_vm8, %v6925_v53, %v18091_v32 }
 0x6ec   :  { %v18205_v62 = vand.u32 4294901760, %v7748_v36  ;;  %v7353_v42 = vpop.permute.xlu0 %7352  ;;  %v7912_v12 = vand.u32 4294901760, %v7911_v18  ;;  %v7599_v18 = vsel %vm7590_vm11, %v7582_v0, %v18136_v38  ;;  %v7583_v38 = vsel %vm3117_vm8, %v17802_v20, %v18123_v25 }
 0x6ed   :  { %v18207_v40 = vpop.permute.xlu1 %7162 }
 0x6ee   :  { %20285 = vst [vmem:[#allocation80_spill] sm:$0xff] %v18205_v62  ;;  %v18210_v37 = vsub.f32 %v7748_v36, %v18205_v62  ;;  %12419 = vmatprep.mubr.f32.mxu0 %v7912_v12  ;;  %12462 = vmatmul.mubr.f32.gmra.mxu1 %v18205_v62  ;;  %v7616_v12 = vsel %vm7607_vm12, %v7599_v18, %v18152_v23 }
 0x6f0   :  { %v19681_v9 = vand.u32 4294901760, %v18210_v37  ;;  %v18214_v47 = vpop.permute.xlu0 %7164 }
 0x6f1   :  { %v7415_v49 = vpop.permute.xlu1 %7414 }
 0x6f2   :  { %v7921_v52 = vsub.f32 %v18210_v37, %v19681_v9  ;;  %v7633_v9 = vsel %vm7624_vm13, %v7616_v12, %v7287_v31  ;;  %v7600_v31 = vsel %vm7590_vm11, %v7583_v38, %v18145_v4 }
 0x6f4   :  { %v7417_v26 = vpop.permute.xlu0 %7416  ;;  %v7922_v29 = vand.u32 4294901760, %v7921_v52  ;;  %v7650_v52 = vsel %vm7641_vm14, %v7633_v9, %v7351_v28  ;;  %v7617_v28 = vsel %vm7607_vm12, %v7600_v31, %v18156_v61 }
 0x6f5   :  { %v7227_v10 = vpop.permute.xlu1 %7226 }
 0x6f6   :  { %12420 = vmatmul.mubr.f32.gmra.mxu0 %v7922_v29  ;;  %v7667_v29 = vsel %vm7658_vm15, %v7650_v52, %v7415_v49 }
 0x6f8   :  { %v18219_v44 = vpop.permute.xlu0 %7228 }
 0x6f9   :  { %v7479_v43 = vpop.permute.xlu1 %7478 }
 0x6fa   :  { %v7684_v62 = vsel %vm7675_vm0, %v7667_v29, %v7479_v43  ;;  %v7634_v43 = vsel %vm7624_vm13, %v7617_v28, %v7289_v30 }
 0x6fb   :  { %v7651_v20 = vsel %vm7641_vm14, %v7634_v43, %v7353_v42 }
 0x6fc   :  { %v7481_v36 = vpop.permute.xlu0 %7480  ;;  %v7668_v25 = vsel %vm7658_vm15, %v7651_v20, %v7417_v26 }
 0x6fd   :  { %v7291_v35 = vpop.permute.xlu1 %7290 }
 0x700   :  { %v18231_v57 = vpop.permute.xlu0 %7102 }
 0x701   :  { %v7543_v21 = vpop.permute.xlu1 %7542 }
 0x702   :  { %v7701_v32 = vsel %vm7692_vm1, %v7684_v62, %v7543_v21  ;;  %v7685_v62 = vsel %vm7675_vm0, %v7668_v25, %v7481_v36 }
 0x703   :  { %v7751_v23 = vsel %vm7725_vm3, %v7701_v32, 0 }
 0x704   :  { %v18240_v53 = vand.u32 4294901760, %v7751_v23  ;;  %v7355_v9 = vpop.permute.xlu0 %7354 }
 0x705   :  { %v7293_v49 = vpop.permute.xlu1 %7292 }
 0x706   :  { %20286 = vst [vmem:[#allocation85_spill] sm:$0xff] %v18240_v53  ;;  %v18246_v21 = vsub.f32 %v7751_v23, %v18240_v53  ;;  %12464 = vmatprep.mubr.f32.mxu1 %v18240_v53 }
 0x708   :  { %v19688_v4 = vand.u32 4294901760, %v18246_v21  ;;  %v18253_v0 = vpop.permute.xlu0 %7104 }
 0x709   :  { %v7545_v61 = vpop.permute.xlu1 %7544 }
 0x70a   :  { %v7702_v18 = vsel %vm7692_vm1, %v7685_v62, %v7545_v61  ;;  %v7931_v30 = vsub.f32 %v18246_v21, %v19688_v4  ;;  %v7584_v61 = vsel %vm3117_vm8, %v17810_v63, %v18173_v33  ;;  %v7585_v33 = vsel %vm3117_vm8, %v17854_v48, %v18196_v2 }
 0x70b   :  { %v7754_v12 = vsel %vm7725_vm3, %v7702_v18, 0  ;;  %v7601_v18 = vsel %vm7590_vm11, %v7584_v61, %v18207_v40 }
 0x70c   :  { %v18260_v52 = vand.u32 4294901760, %v7754_v12  ;;  %v7932_v42 = vand.u32 4294901760, %v7931_v30  ;;  %v7357_v29 = vpop.permute.xlu0 %7356  ;;  %v7618_v30 = vsel %vm7607_vm12, %v7601_v18, %v7227_v10 }
 0x70d   :  { %v18262_v26 = vpop.permute.xlu1 %7166  ;;  %v7635_v4 = vsel %vm7624_vm13, %v7618_v30, %v7291_v35  ;;  %v7602_v35 = vsel %vm7590_vm11, %v7585_v33, %v18214_v47 }
 0x70e   :  { %20287 = vst [vmem:[#allocation87_spill] sm:$0xff] %v18260_v52  ;;  %v18265_v32 = vsub.f32 %v7754_v12, %v18260_v52  ;;  %12422 = vmatprep.mubr.f32.mxu0 %v7932_v42  ;;  %12465 = vmatmul.mubr.f32.gmra.mxu1 %v18260_v52 }
 0x710   :  { %v19689_v36 = vand.u32 4294901760, %v18265_v32  ;;  %v18269_v38 = vpop.permute.xlu0 %7168 }
 0x711   :  { %v7419_v23 = vpop.permute.xlu1 %7418 }
 0x712   :  { %v7941_v31 = vsub.f32 %v18265_v32, %v19689_v36 }
 0x714   :  { %v7942_v28 = vand.u32 4294901760, %v7941_v31  ;;  %v7421_v43 = vpop.permute.xlu0 %7420  ;;  %v7652_v31 = vsel %vm7641_vm14, %v7635_v4, %v7355_v9  ;;  %v7619_v9 = vsel %vm7607_vm12, %v7602_v35, %v18219_v44 }
 0x715   :  { %v7231_v20 = vpop.permute.xlu1 %7230  ;;  %v7669_v36 = vsel %vm7658_vm15, %v7652_v31, %v7419_v23  ;;  %v7636_v23 = vsel %vm7624_vm13, %v7619_v9, %v7293_v49 }
 0x716   :  { %12423 = vmatmul.mubr.f32.gmra.mxu0 %v7942_v28  ;;  %v7653_v48 = vsel %vm7641_vm14, %v7636_v23, %v7357_v29 }
 0x717   :  { %v7670_v2 = vsel %vm7658_vm15, %v7653_v48, %v7421_v43 }
 0x718   :  { %v7233_v25 = vpop.permute.xlu0 %7232 }
 0x719   :  { %v7483_v62 = vpop.permute.xlu1 %7482 }
 0x71a   :  { %v7686_v28 = vsel %vm7675_vm0, %v7669_v36, %v7483_v62 }
 0x71c   :  { %v7485_v12 = vpop.permute.xlu0 %7484 }
 0x71d   :  { %v7295_v42 = vpop.permute.xlu1 %7294  ;;  %v7687_v62 = vsel %vm7675_vm0, %v7670_v2, %v7485_v12 }
 0x721   :  { %v18284_v52 = vpop.permute.xlu0 %7106  ;;  %v7547_v53 = vpop.permute.xlu1 %7546 }
 0x722   :  { %v7703_v63 = vsel %vm7692_vm1, %v7686_v28, %v7547_v53 }
 0x723   :  { %v7757_v40 = vsel %vm7725_vm3, %v7703_v63, 0 }
 0x724   :  { %v18293_v10 = vand.u32 4294901760, %v7757_v40 }
 0x725   :  { %v7359_v4 = vpop.permute.xlu0 %7358  ;;  %v7297_v36 = vpop.permute.xlu1 %7296 }
 0x726   :  { %v18299_v53 = vsub.f32 %v7757_v40, %v18293_v10  ;;  %12467 = vmatprep.mubr.f32.mxu1 %v18293_v10 }
 0x728   :  { %v19694_v47 = vand.u32 4294901760, %v18299_v53 }
 0x729   :  { %v18306_v61 = vpop.permute.xlu0 %7108  ;;  %v7549_v44 = vpop.permute.xlu1 %7548 }
 0x72a   :  { %v7704_v18 = vsel %vm7692_vm1, %v7687_v62, %v7549_v44  ;;  %v7951_v49 = vsub.f32 %v18299_v53, %v19694_v47  ;;  %v7586_v44 = vsel %vm3117_vm8, %v17872_v8, %v18231_v57 }
 0x72b   :  { %v7760_v30 = vsel %vm7725_vm3, %v7704_v18, 0  ;;  %v7603_v18 = vsel %vm7590_vm11, %v7586_v44, %v18262_v26 }
 0x72c   :  { %v18313_v31 = vand.u32 4294901760, %v7760_v30  ;;  %v7952_v29 = vand.u32 4294901760, %v7951_v49  ;;  %v7620_v49 = vsel %vm7607_vm12, %v7603_v18, %v7231_v20 }
 0x72d   :  { %v7361_v28 = vpop.permute.xlu0 %7360  ;;  %v7171_v43 = vpop.permute.xlu1 %7170  ;;  %v7637_v47 = vsel %vm7624_vm13, %v7620_v49, %v7295_v42 }
 0x72e   :  { %v18316_v63 = vsub.f32 %v7760_v30, %v18313_v31  ;;  %12425 = vmatprep.mubr.f32.mxu0 %v7952_v29  ;;  %12468 = vmatmul.mubr.f32.gmra.mxu1 %v18313_v31 }
 0x730   :  { %v19695_v12 = vand.u32 4294901760, %v18316_v63 }
 0x731   :  { %v7173_v33 = vpop.permute.xlu0 %7172  ;;  %v7423_v40 = vpop.permute.xlu1 %7422 }
 0x732   :  { %v7961_v35 = vsub.f32 %v18316_v63, %v19695_v12 }
 0x734   :  { %v7962_v9 = vand.u32 4294901760, %v7961_v35  ;;  %v7587_v35 = vsel %vm3117_vm8, %v17984_v60, %v18253_v0 }
 0x735   :  { %v7425_v23 = vpop.permute.xlu0 %7424  ;;  %v7235_v48 = vpop.permute.xlu1 %7234  ;;  %v7604_v12 = vsel %vm7590_vm11, %v7587_v35, %v18269_v38 }
 0x736   :  { %12426 = vmatmul.mubr.f32.gmra.mxu0 %v7962_v9  ;;  %v7654_v9 = vsel %vm7641_vm14, %v7637_v47, %v7359_v4  ;;  %v7621_v57 = vsel %vm7607_vm12, %v7604_v12, %v7233_v25 }
 0x737   :  { %v7671_v8 = vsel %vm7658_vm15, %v7654_v9, %v7423_v40  ;;  %v7638_v18 = vsel %vm7624_vm13, %v7621_v57, %v7297_v36 }
 0x738   :  { %v7655_v49 = vsel %vm7641_vm14, %v7638_v18, %v7361_v28 }
 0x739   :  { %v7237_v2 = vpop.permute.xlu0 %7236  ;;  %v7487_v62 = vpop.permute.xlu1 %7486  ;;  %v7672_v0 = vsel %vm7658_vm15, %v7655_v49, %v7425_v23 }
 0x73a   :  { %v7688_v26 = vsel %vm7675_vm0, %v7671_v8, %v7487_v62  ;;  %v7588_v8 = vsel %vm3117_vm8, %v18015_v22, %v18284_v52  ;;  %v7589_v22 = vsel %vm3117_vm8, %v18095_v15, %v18306_v61  ;;  %vm9233_vm8 = vcmask 916480  }
 0x73b   :  { %v7605_v57 = vsel %vm7590_vm11, %v7588_v8, %v7171_v43  ;;  %v7606_v43 = vsel %vm7590_vm11, %v7589_v22, %v7173_v33 }
 0x73c   :  { %v7622_v18 = vsel %vm7607_vm12, %v7605_v57, %v7235_v48 }
 0x73d   :  { %v7489_v30 = vpop.permute.xlu0 %7488  ;;  %v7299_v29 = vpop.permute.xlu1 %7298 }
 0x73e   :  { %v7689_v38 = vsel %vm7675_vm0, %v7672_v0, %v7489_v30 }
 0x741   :  { %v7301_v20 = vpop.permute.xlu0 %7300  ;;  %v7551_v44 = vpop.permute.xlu1 %7550 }
 0x742   :  { %v7705_v42 = vsel %vm7692_vm1, %v7688_v26, %v7551_v44 }
 0x743   :  { %v7763_v60 = vsel %vm7725_vm3, %v7705_v42, 0 }
 0x744   :  { %v18344_v4 = vand.u32 4294901760, %v7763_v60 }
 0x745   :  { %v7553_v47 = vpop.permute.xlu0 %7552  ;;  %v7363_v25 = vpop.permute.xlu1 %7362 }
 0x746   :  { %v18348_v12 = vsub.f32 %v7763_v60, %v18344_v4  ;;  %v7706_v40 = vsel %vm7692_vm1, %v7689_v38, %v7553_v47  ;;  %12470 = vmatprep.mubr.f32.mxu1 %v18344_v4  ;;  %v7639_v60 = vsel %vm7624_vm13, %v7622_v18, %v7299_v29  ;;  %v7623_v47 = vsel %vm7607_vm12, %v7606_v43, %v7237_v2 }
 0x747   :  { %v7766_v36 = vsel %vm7725_vm3, %v7706_v40, 0  ;;  %v7656_v52 = vsel %vm7641_vm14, %v7639_v60, %v7363_v25  ;;  %v20288_v60 = vand.u32 4294901760, %v17877_v50 }
 0x748   :  { %v18353_v28 = vand.u32 4294901760, %v7766_v36  ;;  %v7970_v62 = vand.u32 4294901760, %v18348_v12 }
 0x749   :  { %v7427_v23 = vpop.permute.xlu0 %7426  ;;  %v7365_v35 = vpop.permute.xlu1 %7364 }
 0x74a   :  { %v18357_v9 = vsub.f32 %v7766_v36, %v18353_v28  ;;  %12471 = vmatmul.mubr.f32.gmra.mxu1 %v18353_v28  ;;  %v7971_v30 = vsub.f32 %v18348_v12, %v7970_v62  ;;  %v7673_v38 = vsel %vm7658_vm15, %v7656_v52, %v7427_v23  ;;  %v20289_v52 = vand.u32 4294901760, %v17903_v41 }
 0x74c   :  { %v7980_v26 = vand.u32 4294901760, %v18357_v9  ;;  %v7972_v44 = vand.u32 4294901760, %v7971_v30  ;;  %v7640_v30 = vsel %vm7624_vm13, %v7623_v47, %v7301_v20  ;;  %v20291_v47 = vand.u32 4294901760, %v18050_v6 }
 0x74d   :  { %v7491_v42 = vpop.permute.xlu0 %7490  ;;  %v7429_v49 = vpop.permute.xlu1 %7428  ;;  %v7657_v15 = vsel %vm7641_vm14, %v7640_v30, %v7365_v35 }
 0x74e   :  { %12428 = vmatprep.mubr.f32.mxu0 %v7972_v44  ;;  %v7981_v0 = vsub.f32 %v18357_v9, %v7980_v26  ;;  %v7690_v29 = vsel %vm7675_vm0, %v7673_v38, %v7491_v42  ;;  %v7674_v33 = vsel %vm7658_vm15, %v7657_v15, %v7429_v49  ;;  %v20290_v38 = vand.u32 4294901760, %v18012_v39 }
 0x750   :  { %v7982_v48 = vand.u32 4294901760, %v7981_v0 }
 0x751   :  { %v7555_v40 = vpop.permute.xlu0 %7554  ;;  %v7493_v36 = vpop.permute.xlu1 %7492 }
 0x752   :  { %v7707_v8 = vsel %vm7692_vm1, %v7690_v29, %v7555_v40  ;;  %12429 = vmatmul.mubr.f32.gmra.mxu0 %v7982_v48  ;;  %v7691_v23 = vsel %vm7675_vm0, %v7674_v33, %v7493_v36  ;;  %v20292_v29 = vand.u32 4294901760, %v18116_v14 }
 0x753   :  { %v7769_v61 = vsel %vm7725_vm3, %v7707_v8, 0 }
 0x754   :  { %v18386_v25 = vand.u32 4294901760, %v7769_v61 }
 0x755   :  { %v7557_v2 = vpop.permute.xlu1 %7556 }
 0x756   :  { %v18390_v57 = vsub.f32 %v7769_v61, %v18386_v25  ;;  %v7708_v44 = vsel %vm7692_vm1, %v7691_v23, %v7557_v2  ;;  %12473 = vmatprep.mubr.f32.mxu1 %v18386_v25 }
 0x757   :  { %v7772_v20 = vsel %vm7725_vm3, %v7708_v44, 0 }
 0x758   :  { %v18395_v18 = vand.u32 4294901760, %v7772_v20  ;;  %v7990_v35 = vand.u32 4294901760, %v18390_v57 }
 0x75a   :  { %v18399_v42 = vsub.f32 %v7772_v20, %v18395_v18  ;;  %12474 = vmatmul.mubr.f32.gmra.mxu1 %v18395_v18  ;;  %v7991_v49 = vsub.f32 %v18390_v57, %v7990_v35 }
 0x75b   :  { %12536 = vmatprep.mubr.f32.mxu1 %v20288_v60 }
 0x75c   :  { %v8000_v0 = vand.u32 4294901760, %v18399_v42  ;;  %v7992_v22 = vand.u32 4294901760, %v7991_v49 }
 0x75e   :  { %12431 = vmatprep.mubr.f32.mxu0 %v7992_v22  ;;  %12537 = vmatmul.mubr.f32.vlgmr.msra.gmra.mxu1 %v20289_v52  ;;  %v8001_v43 = vsub.f32 %v18399_v42, %v8000_v0 }
 0x75f   :  { %12539 = vmatprep.mubr.f32.mxu1 %v20290_v38  ;;  %12603 = vmatpush3.msra.mxu1 %v17301_v59  ;;  %v20293_v59 = vand.u32 4294901760, %v18139_v27 }
 0x760   :  { %v8002_v48 = vand.u32 4294901760, %v8001_v43  ;;  %12604 = vmatprep.subr.mxu1 %v17320_v11 }
 0x761   :  { %12605 = vmatpush3.msra.mxu1 %v17320_v11  ;;  %v20294_v11 = vand.u32 4294901760, %v18191_v54 }
 0x762   :  { %12432 = vmatmul.mubr.f32.gmra.mxu0 %v8002_v48  ;;  %12540 = vmatmul.mubr.f32.gmra.mxu1 %v20291_v47 }
 0x763   :  { %12494 = vmatprep.mubr.f32.mxu0 %v17877_v50  ;;  %12542 = vmatprep.mubr.f32.mxu1 %v20292_v29  ;;  %v20298_v50 = vand.u32 4294901760, %v18299_v53 }
 0x764   :  { %12606 = vmatprep.subr.mxu1 %v17350_v13 }
 0x765   :  { %12607 = vmatpush3.msra.mxu1 %v17350_v13  ;;  %v20295_v13 = vand.u32 4294901760, %v18210_v37 }
 0x766   :  { %12495 = vmatmul.mubr.f32.vlgmr.msra.gmra.mxu0 %v17903_v41  ;;  %12543 = vmatmul.mubr.f32.gmra.mxu1 %v20293_v59  ;;  %v20307_v41 = vld [vmem:[#allocation80_spill] sm:$0xff] }
 0x767   :  { %12561 = vmatpush3.msra.mxu0 %v17339_v5  ;;  %12497 = vmatprep.mubr.f32.mxu0 %v18012_v39  ;;  %v20296_v5 = vand.u32 4294901760, %v18246_v21  ;;  %v20308_v39 = vld [vmem:[#allocation85_spill] sm:$0xff] }
 0x768   :  { %12545 = vmatprep.mubr.f32.mxu1 %v20294_v11  ;;  %12562 = vmatprep.subr.mxu0 %v17365_v3 }
 0x769   :  { %12563 = vmatpush3.msra.mxu0 %v17365_v3  ;;  %12608 = vmatprep.subr.mxu1 %v17382_v16  ;;  %v20297_v3 = vand.u32 4294901760, %v18265_v32 }
 0x76a   :  { %12498 = vmatmul.mubr.f32.gmra.mxu0 %v18050_v6  ;;  %12546 = vmatmul.mubr.f32.gmra.mxu1 %v20295_v13  ;;  %v12412_v6 = vpop.f32.mrf.mxu0 }
 0x76b   :  { %12500 = vmatprep.mubr.f32.mxu0 %v18116_v14  ;;  %12548 = vmatprep.mubr.f32.mxu1 %v20296_v5 }
 0x76c   :  { %12564 = vmatprep.subr.mxu0 %v17420_v19  ;;  %12609 = vmatpush3.msra.mxu1 %v17382_v16  ;;  %v20299_v16 = vand.u32 4294901760, %v18316_v63  ;;  %v7854_v14 = vpop.f32.mrf.mxu0 }
 0x76d   :  { %12565 = vmatpush3.msra.mxu0 %v17420_v19  ;;  %12610 = vmatprep.subr.mxu1 %v17425_v55  ;;  %v20300_v19 = vld [vmem:[#allocation57_spill] sm:$0xff] }
 0x76e   :  { %12501 = vmatmul.mubr.f32.gmra.mxu0 %v18139_v27  ;;  %12549 = vmatmul.mubr.f32.gmra.mxu1 %v20297_v3 }
 0x76f   :  { %12503 = vmatprep.mubr.f32.mxu0 %v18191_v54  ;;  %12551 = vmatprep.mubr.f32.mxu1 %v20298_v50 }
 0x770   :  { %12566 = vmatprep.subr.mxu0 %v17423_v51  ;;  %12611 = vmatpush3.msra.mxu1 %v17425_v55  ;;  %v20302_v55 = vld [vmem:[#allocation64_spill] sm:$0xff] }
 0x771   :  { %12567 = vmatpush3.msra.mxu0 %v17423_v51  ;;  %12612 = vmatprep.subr.mxu1 %v17427_v17  ;;  %v20301_v51 = vld [vmem:[#allocation59_spill] sm:$0xff] }
 0x772   :  { %12504 = vmatmul.mubr.f32.gmra.mxu0 %v18210_v37  ;;  %12552 = vmatmul.mubr.f32.gmra.mxu1 %v20299_v16 }
 0x773   :  { %12506 = vmatprep.mubr.f32.mxu0 %v18246_v21  ;;  %12554 = vmatprep.mubr.f32.mxu1 %v7970_v62 }
 0x774   :  { %12568 = vmatprep.subr.mxu0 %v20300_v19  ;;  %12613 = vmatpush3.msra.mxu1 %v17427_v17  ;;  %v20303_v17 = vld [vmem:[#allocation66_spill] sm:$0xff] }
 0x775   :  { %12569 = vmatpush3.msra.mxu0 %v20300_v19  ;;  %12614 = vmatprep.subr.mxu1 %v17440_v45  ;;  %v18598_v19 = vld [vmem:[%s19407_s4] ss:$0 sm:$0xff] }
 0x776   :  { %12507 = vmatmul.mubr.f32.gmra.mxu0 %v18265_v32  ;;  %12555 = vmatmul.mubr.f32.gmra.mxu1 %v7980_v26  ;;  %v12415_v54 = vpop.f32.mrf.mxu0 }
 0x777   :  { %12509 = vmatprep.mubr.f32.mxu0 %v18299_v53  ;;  %12557 = vmatprep.mubr.f32.mxu1 %v7990_v35 }
 0x778   :  { %12570 = vmatprep.subr.mxu0 %v20301_v51  ;;  %12615 = vmatpush3.msra.mxu1 %v17440_v45  ;;  %v20304_v45 = vld [vmem:[#allocation71_spill] sm:$0xff]  ;;  %v7874_v21 = vpop.f32.mrf.mxu0 }
 0x779   :  { %12571 = vmatpush3.msra.mxu0 %v20301_v51  ;;  %12616 = vmatprep.subr.mxu1 %v17501_v34 }
 0x77a   :  { %12510 = vmatmul.mubr.f32.gmra.mxu0 %v18316_v63  ;;  %12558 = vmatmul.mubr.f32.gmra.mxu1 %v8000_v0 }
 0x77b   :  { %12512 = vmatprep.mubr.f32.mxu0 %v18348_v12  ;;  %12572 = vmatprep.subr.mxu0 %v20302_v55 }
 0x77c   :  { %12617 = vmatpush3.msra.mxu1 %v17501_v34  ;;  %12620 = vmatprep.mubr.f32.mxu1 %v17866_v58  ;;  %v20305_v34 = vld [vmem:[#allocation73_spill] sm:$0xff] }
 0x77d   :  { %12573 = vmatpush3.msra.mxu0 %v20302_v55  ;;  %12618 = vmatprep.subr.mxu1 %v17506_v7 }
 0x77e   :  { %12619 = vmatpush3.msra.mxu1 %v17506_v7  ;;  %12513 = vmatmul.mubr.f32.gmra.mxu0 %v18357_v9  ;;  %v20306_v7 = vld [vmem:[#allocation78_spill] sm:$0xff] }
 0x77f   :  { %12574 = vmatprep.subr.mxu0 %v20303_v17  ;;  %12621 = vmatmul.mubr.f32.vlgmr.msra.gmra.mxu1 %v17896_v46 }
 0x780   :  { %12515 = vmatprep.mubr.f32.mxu0 %v18390_v57  ;;  %12575 = vmatpush3.msra.mxu0 %v20303_v17 }
 0x781   :  { %12623 = vmatprep.mubr.f32.mxu1 %v17997_v56  ;;  %12576 = vmatprep.subr.mxu0 %v20304_v45 }
 0x782   :  { %12516 = vmatmul.mubr.f32.gmra.mxu0 %v18399_v42 }
 0x783   :  { %12624 = vmatmul.mubr.f32.gmra.mxu1 %v18043_v1  ;;  %12577 = vmatpush3.msra.mxu0 %v20304_v45 }
 0x784   :  { %12578 = vmatprep.mubr.f32.mxu0 %v17866_v58  ;;  %12626 = vmatprep.mubr.f32.mxu1 %v18107_v24  ;;  %v20309_v58 = vld [vmem:[#allocation87_spill] sm:$0xff] }
 0x786   :  { %12579 = vmatmul.mubr.f32.vlgmr.msra.gmra.mxu0 %v17896_v46  ;;  %v18515_v46 = vpop.f32.mrf.mxu1 }
 0x787   :  { %12627 = vmatmul.mubr.f32.gmra.mxu1 %v20305_v34  ;;  %12581 = vmatprep.mubr.f32.mxu0 %v17997_v56 }
 0x788   :  { %12629 = vmatprep.mubr.f32.mxu1 %v20306_v7  ;;  %v18517_v56 = vpop.f32.mrf.mxu1 }
 0x78a   :  { %12582 = vmatmul.mubr.f32.gmra.mxu0 %v18043_v1  ;;  %v18519_v1 = vpop.f32.mrf.mxu1 }
 0x78b   :  { %12630 = vmatmul.mubr.f32.gmra.mxu1 %v20307_v41  ;;  %12584 = vmatprep.mubr.f32.mxu0 %v18107_v24 }
 0x78c   :  { %12632 = vmatprep.mubr.f32.mxu1 %v20308_v39  ;;  %v18521_v24 = vpop.f32.mrf.mxu1 }
 0x78e   :  { %12585 = vmatmul.mubr.f32.gmra.mxu0 %v20305_v34  ;;  %v18523_v27 = vpop.f32.mrf.mxu1  ;;  %v7865_v34 = vadd.f32 %v12412_v6, %v18598_v19 }
 0x78f   :  { %12633 = vmatmul.mubr.f32.gmra.mxu1 %v20309_v58  ;;  %12587 = vmatprep.mubr.f32.mxu0 %v20306_v7 }
 0x790   :  { %12635 = vmatprep.mubr.f32.mxu1 %v18293_v10  ;;  %v18525_v37 = vpop.f32.mrf.mxu1 }
 0x792   :  { %12588 = vmatmul.mubr.f32.gmra.mxu0 %v20307_v41 }
 0x793   :  { %12636 = vmatmul.mubr.f32.gmra.mxu1 %v18313_v31  ;;  %12590 = vmatprep.mubr.f32.mxu0 %v20308_v39  ;;  %v7855_v39 = vadd.f32 %v18598_v19, %v7854_v14 }
 0x794   :  { %12638 = vmatprep.mubr.f32.mxu1 %v18344_v4 }
 0x795   :  { %v8121_v6 = vadd.f32 %v18517_v56, %v7855_v39 }
 0x796   :  { %12591 = vmatmul.mubr.f32.gmra.mxu0 %v20309_v58 }
 0x797   :  { %12639 = vmatmul.mubr.f32.gmra.mxu1 %v18353_v28  ;;  %12593 = vmatprep.mubr.f32.mxu0 %v18293_v10  ;;  %v12418_v10 = vpop.f32.mrf.mxu0 }
 0x798   :  { %12641 = vmatprep.mubr.f32.mxu1 %v18386_v25 }
 0x79a   :  { %12594 = vmatmul.mubr.f32.gmra.mxu0 %v18313_v31  ;;  %v18531_v31 = vpop.f32.mrf.mxu0 }
 0x79b   :  { %12642 = vmatmul.mubr.f32.gmra.mxu1 %v18395_v18  ;;  %12596 = vmatprep.mubr.f32.mxu0 %v18344_v4 }
 0x79e   :  { %12597 = vmatmul.mubr.f32.gmra.mxu0 %v18353_v28 }
 0x79f   :  { %12599 = vmatprep.mubr.f32.mxu0 %v18386_v25 }
 0x7a2   :  { %12600 = vmatmul.mubr.f32.gmra.mxu0 %v18395_v18 }
 0x7ae   :  { %v18527_v32 = vpop.f32.mrf.mxu1 }
 0x7b0   :  { %v18529_v53 = vpop.f32.mrf.mxu1 }
 0x7b6   :  { %v18535_v4 = vpop.f32.mrf.mxu0 }
 0x7b7   :  { %v7925_v56 = vadd.f32 %v18535_v4, %v18598_v19 }
 0x7b8   :  { %v18539_v28 = vpop.f32.mrf.mxu0 }
 0x7ce   :  { %v18533_v63 = vpop.f32.mrf.mxu1 }
 0x7d0   :  { %v18537_v12 = vpop.f32.mrf.mxu1 }
 0x7d6   :  { %v18543_v9 = vpop.f32.mrf.mxu0 }
 0x7d7   :  { %v7945_v4 = vadd.f32 %v18543_v9, %v18598_v19 }
 0x7d8   :  { %v18547_v40 = vpop.f32.mrf.mxu0 }
 0x7ee   :  { %v18541_v62 = vpop.f32.mrf.mxu1 }
 0x7f0   :  { %v18545_v26 = vpop.f32.mrf.mxu1 }
 0x7f6   :  { %v18551_v30 = vpop.f32.mrf.mxu0 }
 0x7f8   :  { %v18555_v15 = vpop.f32.mrf.mxu0 }
 0x80a   :  { %v18549_v36 = vpop.f32.mrf.mxu1 }
 0x80c   :  { %v18553_v8 = vpop.f32.mrf.mxu1 }
 0x80d   :  { %20310 = vst [vmem:[#allocation92_spill] sm:$0xff] %v18553_v8 }
 0x812   :  { %v18559_v33 = vpop.f32.mrf.mxu0 }
 0x814   :  { %v18563_v2 = vpop.f32.mrf.mxu0 }
 0x81a   :  { %v18557_v61 = vpop.f32.mrf.mxu1 }
 0x81b   :  { %20311 = vst [vmem:[#allocation29_spill] sm:$0xff] %v18557_v61  ;;  %v7875_v61 = vadd.f32 %v18598_v19, %v7874_v21 }
 0x81c   :  { %v18561_v25 = vpop.f32.mrf.mxu1 }
 0x81d   :  { %20312 = vst [vmem:[#allocation94_spill] sm:$0xff] %v18561_v25  ;;  %v8127_v25 = vadd.f32 %v18515_v46, %v7865_v34  ;;  %v7895_v46 = vadd.f32 %v18598_v19, %v18531_v31  ;;  %v8133_v21 = vadd.f32 %v18521_v24, %v7875_v61  ;;  %v7915_v31 = vadd.f32 %v18598_v19, %v18539_v28 }
 0x81e   :  { %v12538_v23 = vpop.f32.mrf.mxu1 }
 0x820   :  { %v8487_v57 = vpop.f32.mrf.mxu1 }
 0x822   :  { %v18565_v44 = vpop.f32.mrf.mxu0  ;;  %v18567_v20 = vpop.f32.mrf.mxu1 }
 0x824   :  { %v18569_v18 = vpop.f32.mrf.mxu0  ;;  %v18571_v35 = vpop.f32.mrf.mxu1 }
 0x825   :  { %20313 = vst [vmem:[#allocation99_spill] sm:$0xff] %v18569_v18 }
 0x826   :  { %v12496_v42 = vpop.f32.mrf.mxu0  ;;  %v18573_v49 = vpop.f32.mrf.mxu1 }
 0x828   :  { %v8300_v60 = vpop.f32.mrf.mxu0  ;;  %v18575_v0 = vpop.f32.mrf.mxu1 }
 0x829   :  { %v8301_v14 = vadd.f32 %v8300_v60, %v8121_v6  ;;  %v8145_v6 = vadd.f32 %v18525_v37, %v7895_v46  ;;  %v8157_v46 = vadd.f32 %v18529_v53, %v7915_v31 }
 0x82a   :  { %v12499_v22 = vpop.f32.mrf.mxu0  ;;  %v18577_v52 = vpop.f32.mrf.mxu1 }
 0x82c   :  { %v8314_v43 = vpop.f32.mrf.mxu0  ;;  %v18579_v38 = vpop.f32.mrf.mxu1 }
 0x82e   :  { %v12502_v48 = vpop.f32.mrf.mxu0  ;;  %v18581_v47 = vpop.f32.mrf.mxu1 }
 0x830   :  { %v8328_v29 = vpop.f32.mrf.mxu0  ;;  %v18583_v59 = vpop.f32.mrf.mxu1 }
 0x832   :  { %v12505_v11 = vpop.f32.mrf.mxu0  ;;  %v18585_v13 = vpop.f32.mrf.mxu1 }
 0x833   :  { %20314 = vst [vmem:[#allocation101_spill] sm:$0xff] %v18585_v13 }
 0x834   :  { %v18587_v5 = vpop.f32.mrf.mxu0  ;;  %v18589_v3 = vpop.f32.mrf.mxu1 }
 0x835   :  { %20315 = vst [vmem:[#allocation30_spill] sm:$0xff] %v18589_v3 }
 0x836   :  { %v18591_v50 = vpop.f32.mrf.mxu0  ;;  %v18593_v16 = vpop.f32.mrf.mxu1 }
 0x837   :  { %20316 = vst [vmem:[#allocation34_spill] sm:$0xff] %v18593_v16  ;;  %v7885_v16 = vadd.f32 %v12415_v54, %v18598_v19 }
 0x838   :  { %v18600_v51 = vpop.f32.mrf.mxu0  ;;  %v18602_v55 = vpop.f32.mrf.mxu1 }
 0x839   :  { %20317 = vst [vmem:[#allocation26_spill] sm:$0xff] %v18602_v55 }
 0x83a   :  { %v18604_v17 = vpop.f32.mrf.mxu0  ;;  %v18606_v45 = vpop.f32.mrf.mxu1 }
 0x83b   :  { %20318 = vst [vmem:[#allocation106_spill] sm:$0xff] %v18606_v45  ;;  %v8308_v45 = vadd.f32 %v12496_v42, %v8127_v25 }
 0x83c   :  { %v18609_v7 = vpop.f32.mrf.mxu0  ;;  %v18611_v41 = vpop.f32.mrf.mxu1 }
 0x83d   :  { %20319 = vst [vmem:[#allocation40_spill] sm:$0xff] %v18611_v41  ;;  %v7905_v41 = vadd.f32 %v12418_v10, %v18598_v19  ;;  %v8496_v42 = vadd.f32 %v12538_v23, %v8308_v45 }
 0x83e   :  { %v18614_v58 = vpop.f32.mrf.mxu0 }
 0x83f   :  { %20320 = vst [vmem:[#allocation108_spill] sm:$0xff] %v18614_v58  ;;  %v12622_v3 = vpop.f32.mrf.mxu1  ;;  %v8139_v58 = vadd.f32 %v18519_v1, %v7885_v16  ;;  %v8151_v10 = vadd.f32 %v18523_v27, %v7905_v41  ;;  %v8488_v16 = vadd.f32 %v8487_v57, %v8301_v14  ;;  %v8163_v27 = vadd.f32 %v18527_v32, %v7925_v56 }
 0x840   :  { %v18618_v55 = vpop.f32.mrf.mxu0 }
 0x841   :  { %v8875_v13 = vpop.f32.mrf.mxu1  ;;  %v8322_v34 = vadd.f32 %v12499_v22, %v8139_v58  ;;  %v8336_v58 = vadd.f32 %v12502_v48, %v8151_v10  ;;  %v7935_v48 = vadd.f32 %v18598_v19, %v18547_v40  ;;  %v7955_v10 = vadd.f32 %v18598_v19, %v18555_v15 }
 0x842   :  { %v18622_v8 = vpop.f32.mrf.mxu0 }
 0x843   :  { %20321 = vst [vmem:[#allocation31_spill] sm:$0xff] %v18622_v8  ;;  %v12625_v18 = vpop.f32.mrf.mxu1  ;;  %v8315_v8 = vadd.f32 %v8314_v43, %v8133_v21  ;;  %v8512_v45 = vadd.f32 %v18567_v20, %v8322_v34  ;;  %v8329_v43 = vadd.f32 %v8328_v29, %v8145_v6 }
 0x844   :  { %v18628_v54 = vpop.f32.mrf.mxu0 }
 0x845   :  { %v8887_v25 = vpop.f32.mrf.mxu1  ;;  %v8504_v37 = vadd.f32 %v18571_v35, %v8315_v8  ;;  %v8175_v8 = vadd.f32 %v18533_v63, %v7945_v4  ;;  %v8520_v40 = vadd.f32 %v18575_v0, %v8329_v43 }
 0x846   :  { %v12580_v39 = vpop.f32.mrf.mxu0 }
 0x847   :  { %v8712_v60 = vadd.f32 %v12580_v39, %v8496_v42  ;;  %v12628_v1 = vpop.f32.mrf.mxu1  ;;  %v8528_v42 = vadd.f32 %v18573_v49, %v8336_v58  ;;  %v8169_v49 = vadd.f32 %v18537_v12, %v7935_v48  ;;  %v8364_v63 = vadd.f32 %v18591_v50, %v8175_v8 }
 0x848   :  { %v8705_v22 = vpop.f32.mrf.mxu0 }
 0x849   :  { %v8882_v24 = vadd.f32 %v12622_v3, %v8712_v60  ;;  %v8706_v61 = vadd.f32 %v8705_v22, %v8488_v16  ;;  %v8899_v23 = vpop.f32.mrf.mxu1  ;;  %v8350_v3 = vadd.f32 %v12505_v11, %v8163_v27  ;;  %v8343_v11 = vadd.f32 %v18587_v5, %v8157_v46 }
 0x84a   :  { %v12583_v41 = vpop.f32.mrf.mxu0  ;;  %v8357_v6 = vadd.f32 %v18600_v51, %v8169_v49  ;;  %v8560_v43 = vadd.f32 %v18581_v47, %v8364_v63  ;;  %v20322_v47 = vld [vmem:[#allocation99_spill] sm:$0xff]  ;;  %v20329_v63 = vld [vmem:[#allocation94_spill] sm:$0xff] }
 0x84b   :  { %v8970_v57 = vmax.f32 %v8882_v24, 0.0  ;;  %v8876_v14 = vadd.f32 %v8875_v13, %v8706_v61  ;;  %v8724_v21 = vadd.f32 %v12583_v41, %v8512_v45  ;;  %v12631_v28 = vpop.f32.mrf.mxu1  ;;  %v7965_v13 = vadd.f32 %v18551_v30, %v18598_v19 }
 0x84c   :  { %v8717_v20 = vpop.f32.mrf.mxu0  ;;  %v8544_v30 = vadd.f32 %v18577_v52, %v8350_v3  ;;  %v8536_v24 = vadd.f32 %v18579_v38, %v8343_v11  ;;  %v7995_v48 = vadd.f32 %v18598_v19, %v20322_v47 }
 0x84d   :  { %8986 = vst.msk [vmem:[#allocation4 + $0x8] sm:$0xff] %vm7590_vm11, %v8970_v57  ;;  %v8969_v9 = vmax.f32 %v8876_v14, 0.0  ;;  %v8894_v29 = vadd.f32 %v12625_v18, %v8724_v21  ;;  %v8718_v34 = vadd.f32 %v8717_v20, %v8504_v37  ;;  %v8911_v32 = vpop.f32.mrf.mxu1  ;;  %v8187_v15 = vadd.f32 %v18541_v62, %v7965_v13  ;;  %v20325_v20 = vld [vmem:[#allocation101_spill] sm:$0xff] }
 0x84e   :  { %v12586_v35 = vpop.f32.mrf.mxu0 }
 0x84f   :  { %8985 = vst.msk [vmem:[#allocation4] sm:$0xff] %vm7590_vm11, %v8969_v9  ;;  %v8972_v53 = vmax.f32 %v8894_v29, 0.0  ;;  %v8888_v56 = vadd.f32 %v8887_v25, %v8718_v34  ;;  %v8736_v39 = vadd.f32 %v12586_v35, %v8528_v42  ;;  %v12634_v18 = vpop.f32.mrf.mxu1  ;;  %v7985_v25 = vadd.f32 %v18559_v33, %v18598_v19 }
 0x850   :  { %v8729_v60 = vpop.f32.mrf.mxu0  ;;  %v8378_v61 = vadd.f32 %v18604_v17, %v8187_v15  ;;  %v8181_v33 = vadd.f32 %v18545_v26, %v7955_v10  ;;  %v8552_v26 = vadd.f32 %v18583_v59, %v8357_v6 }
 0x851   :  { %8988 = vst.msk [vmem:[#allocation4 + $0x18] sm:$0xff] %vm7590_vm11, %v8972_v53  ;;  %v8971_v0 = vmax.f32 %v8888_v56, 0.0  ;;  %v8906_v5 = vadd.f32 %v12628_v1, %v8736_v39  ;;  %v8730_v16 = vadd.f32 %v8729_v60, %v8520_v40  ;;  %v8923_v31 = vpop.f32.mrf.mxu1  ;;  %v7975_v1 = vadd.f32 %v18598_v19, %v18563_v2  ;;  %v20327_v53 = vld [vmem:[#allocation30_spill] sm:$0xff] }
 0x852   :  { %v12589_v22 = vpop.f32.mrf.mxu0  ;;  %v8371_v38 = vadd.f32 %v18609_v7, %v8181_v33  ;;  %v8199_v27 = vadd.f32 %v18549_v36, %v7985_v25  ;;  %v20324_v7 = vld [vmem:[#allocation92_spill] sm:$0xff]  ;;  %v8576_v9 = vadd.f32 %v20325_v20, %v8378_v61  ;;  %v20331_v61 = vld [vmem:[#allocation26_spill] sm:$0xff] }
 0x853   :  { %8987 = vst.msk [vmem:[#allocation4 + $0x10] sm:$0xff] %vm7590_vm11, %v8971_v0  ;;  %v8974_v12 = vmax.f32 %v8906_v5, 0.0  ;;  %v8900_v52 = vadd.f32 %v8899_v23, %v8730_v16  ;;  %v8748_v58 = vadd.f32 %v12589_v22, %v8544_v30  ;;  %v12637_v50 = vpop.f32.mrf.mxu1  ;;  %v8005_v23 = vadd.f32 %v18565_v44, %v18598_v19  ;;  %v20323_v44 = vld [vmem:[#allocation108_spill] sm:$0xff]  ;;  %v20328_v30 = vld [vmem:[#allocation31_spill] sm:$0xff]  ;;  %v20330_v5 = vld [vmem:[#allocation34_spill] sm:$0xff] }
 0x854   :  { %v8741_v45 = vpop.f32.mrf.mxu0  ;;  %v8392_v3 = vadd.f32 %v20323_v44, %v8199_v27  ;;  %v8193_v46 = vadd.f32 %v20324_v7, %v7975_v1  ;;  %v8568_v56 = vadd.f32 %v20327_v53, %v8371_v38  ;;  %v8205_v0 = vadd.f32 %v20329_v63, %v7995_v48  ;;  %v9272_v53 = vld [vmem:[%s19408_s5 + $0xf0] sm:$0xff] }
 0x855   :  { %8990 = vst.msk [vmem:[#allocation4 + $0x28] sm:$0xff] %vm7590_vm11, %v8974_v12  ;;  %v8973_v62 = vmax.f32 %v8900_v52, 0.0  ;;  %v8918_v51 = vadd.f32 %v12631_v28, %v8748_v58  ;;  %v8742_v4 = vadd.f32 %v8741_v45, %v8536_v24  ;;  %v8935_v17 = vpop.f32.mrf.mxu1 }
 0x856   :  { %v9001_v2 = vld [vmem:[#allocation4] ss:$2 sm:$0xff]  ;;  %v9017_v41 = vld [vmem:[#allocation4 + $0x1] ss:$2 sm:$0xff]  ;;  %v12592_v57 = vpop.f32.mrf.mxu0  ;;  %v8385_v13 = vadd.f32 %v18618_v55, %v8193_v46  ;;  %v8592_v16 = vadd.f32 %v20330_v5, %v8392_v3  ;;  %v8399_v52 = vadd.f32 %v18628_v54, %v8205_v0  ;;  %v18726_v0 = vand.u32 4294901760, %v9272_v53 }
 0x857   :  { %v9032_v14 = vmax.f32 %v9001_v2, %v9017_v41  ;;  %8989 = vst.msk [vmem:[#allocation4 + $0x20] sm:$0xff] %vm7590_vm11, %v8973_v62  ;;  %v8976_v21 = vmax.f32 %v8918_v51, 0.0  ;;  %v8912_v28 = vadd.f32 %v8911_v32, %v8742_v4  ;;  %v8760_v37 = vadd.f32 %v12592_v57, %v8560_v43  ;;  %v20326_v32 = vld [vmem:[#allocation29_spill] sm:$0xff]  ;;  %v12640_v19 = vpop.f32.mrf.mxu1 }
 0x858   :  { %v8753_v36 = vpop.f32.mrf.mxu0  ;;  %v8211_v8 = vadd.f32 %v20326_v32, %v8005_v23  ;;  %v8584_v33 = vadd.f32 %v20331_v61, %v8385_v13  ;;  %v20332_v23 = vld [vmem:[#allocation106_spill] sm:$0xff]  ;;  %v9271_v5 = vld [vmem:[%s19408_s5 + $0xe8] sm:$0xff] }
 0x859   :  { %v9048_v29 = vrot.slane %v9032_v14, 4  ;;  %8992 = vst.msk [vmem:[#allocation4 + $0x38] sm:$0xff] %vm7590_vm11, %v8976_v21  ;;  %v8975_v59 = vmax.f32 %v8912_v28, 0.0  ;;  %v8930_v34 = vadd.f32 %v12634_v18, %v8760_v37  ;;  %v8754_v42 = vadd.f32 %v8753_v36, %v8552_v26  ;;  %v20333_v28 = vld [vmem:[#allocation40_spill] sm:$0xff] }
 0x85a   :  { %v9003_v35 = vld [vmem:[#allocation4 + $0x10] ss:$2 sm:$0xff]  ;;  %v9019_v40 = vld [vmem:[#allocation4 + $0x11] ss:$2 sm:$0xff]  ;;  %v12595_v11 = vpop.f32.mrf.mxu0  ;;  %v8406_v18 = vadd.f32 %v20328_v30, %v8211_v8  ;;  %v8600_v37 = vadd.f32 %v20333_v28, %v8399_v52  ;;  %v18746_v52 = vsub.f32 %v9272_v53, %v18726_v0 }
 0x85b   :  { %v9033_v39 = vmax.f32 %v9003_v35, %v9019_v40  ;;  %8991 = vst.msk [vmem:[#allocation4 + $0x30] sm:$0xff] %vm7590_vm11, %v8975_v59  ;;  %v8978_v10 = vmax.f32 %v8930_v34, 0.0  ;;  %v8924_v49 = vadd.f32 %v8923_v31, %v8754_v42  ;;  %v8772_v60 = vadd.f32 %v12595_v11, %v8576_v9  ;;  %v8947_v31 = vpop.f32.mrf.mxu1  ;;  %v9273_v35 = vld [vmem:[%s19408_s5 + $0xf8] sm:$0xff] }
 0x85c   :  { %v8765_v55 = vpop.f32.mrf.mxu0  ;;  %v9064_v25 = vmax.f32 %v9032_v14, %v9048_v29  ;;  %v9257_v40 = vld [vmem:[%s19408_s5 + $0x78] sm:$0xff] }
 0x85d   :  { %v9049_v6 = vrot.slane %v9033_v39, 4  ;;  %8994 = vst.msk [vmem:[#allocation4 + $0x48] sm:$0xff] %vm7590_vm11, %v8978_v10  ;;  %v8977_v15 = vmax.f32 %v8924_v49, 0.0  ;;  %v8942_v22 = vadd.f32 %v12637_v50, %v8772_v60  ;;  %v8766_v12 = vadd.f32 %v8765_v55, %v8568_v56  ;;  %v12643_v14 = vpop.f32.mrf.mxu1  ;;  %v9256_v55 = vld [vmem:[%s19408_s5 + $0x70] sm:$0xff] }
 0x85e   :  { %v9005_v58 = vld [vmem:[#allocation4 + $0x20] ss:$2 sm:$0xff]  ;;  %v9021_v24 = vld [vmem:[#allocation4 + $0x21] ss:$2 sm:$0xff]  ;;  %v12598_v1 = vpop.f32.mrf.mxu0  ;;  %9073 = vst.msk [vmem:[#allocation5] sm:$0xf] %vm9072_vm4, %v9064_v25  ;;  %v8608_v50 = vadd.f32 %v20332_v23, %v8406_v18 }
 0x85f   :  { %v9034_v45 = vmax.f32 %v9005_v58, %v9021_v24  ;;  %8993 = vst.msk [vmem:[#allocation4 + $0x40] sm:$0xff] %vm7590_vm11, %v8977_v15  ;;  %v8980_v62 = vmax.f32 %v8942_v22, 0.0  ;;  %v8936_v51 = vadd.f32 %v8935_v17, %v8766_v12  ;;  %v8784_v4 = vadd.f32 %v12598_v1, %v8592_v16  ;;  %v8959_v34 = vpop.f32.mrf.mxu1  ;;  %v9255_v22 = vld [vmem:[%s19408_s5 + $0x68] sm:$0xff] }
 0x860   :  { %v8777_v43 = vpop.f32.mrf.mxu0  ;;  %v9065_v38 = vmax.f32 %v9033_v39, %v9049_v6  ;;  %v18711_v11 = vand.u32 4294901760, %v9257_v40  ;;  %v18737_v6 = vand.u32 4294901760, %v9256_v55  ;;  %v18739_v15 = vand.u32 4294901760, %v9271_v5 }
 0x861   :  { %v9050_v27 = vrot.slane %v9034_v45, 4  ;;  %8996 = vst.msk [vmem:[#allocation4 + $0x58] sm:$0xff] %vm7590_vm11, %v8980_v62  ;;  %v8979_v54 = vmax.f32 %v8936_v51, 0.0  ;;  %v8954_v2 = vadd.f32 %v12640_v19, %v8784_v4  ;;  %v8778_v41 = vadd.f32 %v8777_v43, %v8584_v33 }
 0x862   :  { %v9007_v57 = vld [vmem:[#allocation4 + $0x30] ss:$2 sm:$0xff]  ;;  %v9023_v26 = vld [vmem:[#allocation4 + $0x31] ss:$2 sm:$0xff]  ;;  %v12601_v21 = vpop.f32.mrf.mxu0  ;;  %9074 = vst.msk [vmem:[#allocation5 + $0x4] sm:$0xf] %vm9072_vm4, %v9065_v38  ;;  %v18722_v30 = vsub.f32 %v9257_v40, %v18711_v11  ;;  %v18758_v33 = vsub.f32 %v9256_v55, %v18737_v6 }
 0x863   :  { %v9035_v17 = vmax.f32 %v9007_v57, %v9023_v26  ;;  %8995 = vst.msk [vmem:[#allocation4 + $0x50] sm:$0xff] %vm7590_vm11, %v8979_v54  ;;  %v8982_v47 = vmax.f32 %v8954_v2, 0.0  ;;  %v8948_v48 = vadd.f32 %v8947_v31, %v8778_v41  ;;  %v8796_v44 = vadd.f32 %v12601_v21, %v8608_v50 }
 0x864   :  { %v8789_v3 = vpop.f32.mrf.mxu0  ;;  %v9066_v7 = vmax.f32 %v9034_v45, %v9050_v27  ;;  %v18709_v19 = vand.u32 4294901760, %v9273_v35  ;;  %v19712_v25 = vand.u32 4294901760, %v18722_v30  ;;  %v18748_v58 = vand.u32 4294901760, %v9255_v22 }
 0x865   :  { %v9051_v46 = vrot.slane %v9035_v17, 4  ;;  %8998 = vst.msk [vmem:[#allocation4 + $0x68] sm:$0xff] %vm7590_vm11, %v8982_v47  ;;  %v8981_v36 = vmax.f32 %v8948_v48, 0.0  ;;  %v8966_v20 = vadd.f32 %v12643_v14, %v8796_v44  ;;  %v8790_v9 = vadd.f32 %v8789_v3, %v8600_v37 }
 0x866   :  { %v9009_v29 = vld [vmem:[#allocation4 + $0x40] ss:$2 sm:$0xff]  ;;  %v9025_v59 = vld [vmem:[#allocation4 + $0x41] ss:$2 sm:$0xff]  ;;  %9075 = vst.msk [vmem:[#allocation5 + $0x8] sm:$0xf] %vm9072_vm4, %v9066_v7  ;;  %v18719_v60 = vsub.f32 %v9273_v35, %v18709_v19  ;;  %11570 = vmatprep.subr.mxu0 %v18709_v19  ;;  %v9397_v61 = vsub.f32 %v18722_v30, %v19712_v25  ;;  %v18761_v45 = vsub.f32 %v9271_v5, %v18739_v15 }
 0x867   :  { %v9036_v42 = vmax.f32 %v9009_v29, %v9025_v59  ;;  %8997 = vst.msk [vmem:[#allocation4 + $0x60] sm:$0xff] %vm7590_vm11, %v8981_v36  ;;  %v8984_v13 = vmax.f32 %v8966_v20, 0.0  ;;  %v8960_v32 = vadd.f32 %v8959_v34, %v8790_v9  ;;  %v9067_v8 = vmax.f32 %v9035_v17, %v9051_v46  ;;  %20334 = vst [vmem:[#allocation113_spill] sm:$0xff] %v18709_v19  ;;  %v9083_v46 = vld [vmem:[#allocation5 + $0x1] sm:$0x1]  ;;  %v9253_v35 = vld [vmem:[%s19408_s5 + $0x58] sm:$0xff] }
 0x868   :  { %20335 = vst [vmem:[#allocation35_spill] sm:$0xff] %v18719_v60  ;;  %11571 = vmatpush3.msra.mxu0 %v18711_v11  ;;  %v19713_v16 = vand.u32 4294901760, %v18719_v60  ;;  %v19710_v4 = vand.u32 4294901760, %v18746_v52  ;;  %v18766_v43 = vsub.f32 %v9255_v22, %v18748_v58  ;;  %v9398_v38 = vand.u32 4294901760, %v9397_v61  ;;  %v9270_v29 = vld [vmem:[%s19408_s5 + $0xe0] sm:$0xff] }
 0x869   :  { %v9052_v56 = vrot.slane %v9036_v42, 4  ;;  %9000 = vst.msk [vmem:[#allocation4 + $0x78] sm:$0xff] %vm7590_vm11, %v8984_v13  ;;  %v8983_v39 = vmax.f32 %v8960_v32, 0.0  ;;  %11572 = vmatprep.subr.mxu0 %v18726_v0  ;;  %v19709_v41 = vand.u32 4294901760, %v18758_v33  ;;  %v19708_v57 = vand.u32 4294901760, %v18761_v45  ;;  %v9254_v32 = vld [vmem:[%s19408_s5 + $0x60] sm:$0xff] }
 0x86a   :  { %9076 = vst.msk [vmem:[#allocation5 + $0xc] sm:$0xf] %vm9072_vm4, %v9067_v8  ;;  %v9011_v10 = vld [vmem:[#allocation4 + $0x50] ss:$2 sm:$0xff]  ;;  %v9027_v49 = vld [vmem:[#allocation4 + $0x51] ss:$2 sm:$0xff]  ;;  %v9509_v1 = vsub.f32 %v18719_v60, %v19713_v16  ;;  %11573 = vmatpush3.msra.mxu0 %v18737_v6  ;;  %v9516_v27 = vsub.f32 %v18746_v52, %v19710_v4 }
 0x86b   :  { %v9068_v18 = vmax.f32 %v9036_v42, %v9052_v56  ;;  %v9037_v63 = vmax.f32 %v9011_v10, %v9027_v49  ;;  %8999 = vst.msk [vmem:[#allocation4 + $0x70] sm:$0xff] %vm7590_vm11, %v8983_v39  ;;  %11574 = vmatprep.subr.mxu0 %v18739_v15  ;;  %v19707_v28 = vand.u32 4294901760, %v18766_v43  ;;  %v9404_v48 = vsub.f32 %v18758_v33, %v19709_v41  ;;  %v9269_v8 = vld [vmem:[%s19408_s5 + $0xd8] sm:$0xff]  ;;  %v9085_v39 = vld [vmem:[#allocation5 + $0x2] sm:$0x1] }
 0x86c   :  { %11575 = vmatpush3.msra.mxu0 %v18748_v58  ;;  %v9510_v50 = vand.u32 4294901760, %v9509_v1  ;;  %v9517_v21 = vand.u32 4294901760, %v9516_v27  ;;  %v9523_v44 = vsub.f32 %v18761_v45, %v19708_v57  ;;  %v18802_v55 = vand.u32 4294901760, %v9270_v29 }
 0x86d   :  { %v9053_v12 = vrot.slane %v9037_v63, 4  ;;  %9077 = vst.msk [vmem:[#allocation5 + $0x10] sm:$0xf] %vm9072_vm4, %v9068_v18  ;;  %v9405_v36 = vand.u32 4294901760, %v9404_v48  ;;  %v9411_v9 = vsub.f32 %v18766_v43, %v19707_v28  ;;  %v18804_v5 = vand.u32 4294901760, %v9254_v32 }
 0x86e   :  { %v9013_v24 = vld [vmem:[#allocation4 + $0x60] ss:$2 sm:$0xff]  ;;  %v9029_v31 = vld [vmem:[#allocation4 + $0x61] ss:$2 sm:$0xff]  ;;  %11605 = vmatprep.subr.mxu1 %v9510_v50  ;;  %v9524_v20 = vand.u32 4294901760, %v9523_v44  ;;  %v18806_v22 = vand.u32 4294901760, %v9269_v8  ;;  %11576 = vmatprep.subr.mxu0 %v18802_v55 }
 0x86f   :  { %v9069_v62 = vmax.f32 %v9037_v63, %v9053_v12  ;;  %v9038_v51 = vmax.f32 %v9013_v24, %v9029_v31  ;;  %11606 = vmatpush3.msra.mxu1 %v9398_v38  ;;  %v9412_v49 = vand.u32 4294901760, %v9411_v9  ;;  %v9087_v24 = vld [vmem:[#allocation5 + $0x3] sm:$0x1]  ;;  %v9090_v31 = vld [vmem:[#allocation5 + $0x4] sm:$0x1]  ;;  %v18809_v61 = vand.u32 4294901760, %v9253_v35  ;;  %11577 = vmatpush3.msra.mxu0 %v18804_v5 }
 0x870   :  { %11607 = vmatprep.subr.mxu1 %v9517_v21  ;;  %v18814_v38 = vsub.f32 %v9270_v29, %v18802_v55  ;;  %v18817_v27 = vsub.f32 %v9254_v32, %v18804_v5  ;;  %v9094_v21 = vld [vmem:[#allocation5 + $0x6] sm:$0x1]  ;;  %v9096_v9 = vld [vmem:[#allocation5 + $0x7] sm:$0x1]  ;;  %11578 = vmatprep.subr.mxu0 %v18806_v22 }
 0x871   :  { %v9054_v23 = vrot.slane %v9038_v51, 4  ;;  %9078 = vst.msk [vmem:[#allocation5 + $0x14] sm:$0xf] %vm9072_vm4, %v9069_v62  ;;  %11608 = vmatpush3.msra.mxu1 %v9405_v36  ;;  %11579 = vmatpush3.msra.mxu0 %v18809_v61 }
 0x872   :  { %v9015_v54 = vld [vmem:[#allocation4 + $0x70] ss:$2 sm:$0xff]  ;;  %v9031_v2 = vld [vmem:[#allocation4 + $0x71] ss:$2 sm:$0xff]  ;;  %11609 = vmatprep.subr.mxu1 %v9524_v20  ;;  %v19704_v44 = vand.u32 4294901760, %v18814_v38 }
 0x873   :  { %v9070_v26 = vmax.f32 %v9038_v51, %v9054_v23  ;;  %v9039_v14 = vmax.f32 %v9015_v54, %v9031_v2  ;;  %11610 = vmatpush3.msra.mxu1 %v9412_v49  ;;  %v18820_v54 = vsub.f32 %v9269_v8, %v18806_v22 }
 0x874   :  { %v9084_v37 = vld [vmem:[#allocation5 + $0x11] sm:$0x1]  ;;  %v9086_v17 = vld [vmem:[#allocation5 + $0x12] sm:$0x1]  ;;  %v9088_v47 = vld [vmem:[#allocation5 + $0x13] sm:$0x1] }
 0x875   :  { %v9055_v3 = vrot.slane %v9039_v14, 4  ;;  %v9124_v7 = vrot.slane %v9084_v37, 7  ;;  %9079 = vst.msk [vmem:[#allocation5 + $0x18] sm:$0xf] %vm9072_vm4, %v9070_v26  ;;  %v9131_v42 = vrot.slane %v9086_v17, 7  ;;  %v9138_v13 = vrot.slane %v9088_v47, 7 }
 0x876   :  { %v18824_v17 = vsub.f32 %v9253_v35, %v18809_v61  ;;  %v9101_v47 = vld [vmem:[#allocation5 + $0x9] sm:$0x1] }
 0x877   :  { %v9071_v59 = vmax.f32 %v9039_v14, %v9055_v3  ;;  %v9125_v34 = vsel %vm9119_vm5, %v9124_v7, %v9083_v46  ;;  %v9132_v12 = vsel %vm9119_vm5, %v9131_v42, %v9085_v39  ;;  %v9139_v51 = vsel %vm9119_vm5, %v9138_v13, %v9087_v24  ;;  %v9092_v14 = vld [vmem:[#allocation5 + $0x5] sm:$0x1]  ;;  %v9108_v42 = vld [vmem:[#allocation5 + $0xc] sm:$0x1]  ;;  %v9110_v39 = vld [vmem:[#allocation5 + $0xd] sm:$0x1] }
 0x878   :  { %9126 = vrot.lane.b32.xlu1 %v9125_v34, %s12756_s19  ;;  %v9091_v40 = vld [vmem:[#allocation5 + $0x14] sm:$0x1]  ;;  %v9093_v53 = vld [vmem:[#allocation5 + $0x15] sm:$0x1]  ;;  %v9095_v56 = vld [vmem:[#allocation5 + $0x16] sm:$0x1] }
 0x879   :  { %9080 = vst.msk [vmem:[#allocation5 + $0x1c] sm:$0xf] %vm9072_vm4, %v9071_v59  ;;  %v9145_v10 = vrot.slane %v9091_v40, 7  ;;  %v9152_v18 = vrot.slane %v9093_v53, 7  ;;  %v9097_v63 = vld [vmem:[#allocation5 + $0x17] sm:$0x1]  ;;  %v9530_v40 = vsub.f32 %v18814_v38, %v19704_v44 }
 0x87a   :  { %v9159_v1 = vrot.slane %v9095_v56, 7  ;;  %v9166_v37 = vrot.slane %v9097_v63, 7  ;;  %v19703_v3 = vand.u32 4294901760, %v18817_v27  ;;  %v19702_v7 = vand.u32 4294901760, %v18820_v54  ;;  %v9103_v59 = vld [vmem:[#allocation5 + $0xa] sm:$0x1] }
 0x87b   :  { %v9146_v26 = vsel %vm9119_vm5, %v9145_v10, %v9090_v31  ;;  %v18828_v48 = vsel %vm9119_vm5, %v9152_v18, %v9092_v14  ;;  %v19698_v29 = vand.u32 4294901760, %v18824_v17  ;;  %v9105_v34 = vld [vmem:[#allocation5 + $0xb] sm:$0x1]  ;;  %v9268_v63 = vld [vmem:[%s19408_s5 + $0xd0] sm:$0xff]  ;;  %v9531_v31 = vand.u32 4294901760, %v9530_v40 }
 0x87c   :  { %9133 = vrot.lane.b32.xlu1 %v9132_v12, %s12758_s22  ;;  %v9102_v62 = vld [vmem:[#allocation5 + $0x19] sm:$0x1]  ;;  %v9104_v23 = vld [vmem:[#allocation5 + $0x1a] sm:$0x1]  ;;  %v9106_v50 = vld [vmem:[#allocation5 + $0x1b] sm:$0x1]  ;;  %v18840_v32 = vsel %vm9119_vm5, %v9159_v1, %v9094_v21  ;;  %v9418_v53 = vsub.f32 %v18817_v27, %v19703_v3  ;;  %v9537_v18 = vsub.f32 %v18820_v54, %v19702_v7  ;;  %v18859_v24 = vsel %vm9119_vm5, %v9166_v37, %v9096_v9 }
 0x87d   :  { %v9178_v2 = vrot.slane %v9102_v62, 7  ;;  %v9185_v36 = vrot.slane %v9104_v23, 7  ;;  %v9192_v20 = vrot.slane %v9106_v50, 7  ;;  %v9252_v12 = vld [vmem:[%s19408_s5 + $0x50] sm:$0xff]  ;;  %v9425_v62 = vsub.f32 %v18824_v17, %v19698_v29  ;;  %v9251_v23 = vld [vmem:[%s19408_s5 + $0x48] sm:$0xff]  ;;  %v9266_v50 = vld [vmem:[%s19408_s5 + $0xc0] sm:$0xff]  ;;  %11611 = vmatprep.subr.mxu1 %v9531_v31 }
 0x87e   :  { %v9419_v1 = vand.u32 4294901760, %v9418_v53  ;;  %v9112_v37 = vld [vmem:[#allocation5 + $0xe] sm:$0x1]  ;;  %v9265_v9 = vld [vmem:[%s19408_s5 + $0xb8] sm:$0xff]  ;;  %v18898_v40 = vand.u32 4294901760, %v9266_v50  ;;  %v9248_v29 = vld [vmem:[%s19408_s5 + $0x30] sm:$0xff] }
 0x87f   :  { %v9179_v46 = vsel %vm9119_vm5, %v9178_v2, %v9101_v47  ;;  %v9186_v2 = vsel %vm9119_vm5, %v9185_v36, %v9103_v59  ;;  %v9193_v14 = vsel %vm9119_vm5, %v9192_v20, %v9105_v34  ;;  %v9538_v47 = vand.u32 4294901760, %v9537_v18  ;;  %v9263_v3 = vld [vmem:[%s19408_s5 + $0xa8] sm:$0xff] }
 0x880   :  { %9180 = vrot.lane.b32.xlu0 %v9179_v46, %s12756_s19  ;;  %9140 = vrot.lane.b32.xlu1 %v9139_v51, %s12760_s1  ;;  %v9109_v13 = vld [vmem:[#allocation5 + $0x1c] sm:$0x1]  ;;  %v9111_v8 = vld [vmem:[#allocation5 + $0x1d] sm:$0x1]  ;;  %v9113_v35 = vld [vmem:[#allocation5 + $0x1e] sm:$0x1] }
 0x881   :  { %v9199_v56 = vrot.slane %v9109_v13, 7  ;;  %v9206_v10 = vrot.slane %v9111_v8, 7  ;;  %v9213_v49 = vrot.slane %v9113_v35, 7  ;;  %v9267_v51 = vld [vmem:[%s19408_s5 + $0xc8] sm:$0xff]  ;;  %v9250_v46 = vld [vmem:[%s19408_s5 + $0x40] sm:$0xff]  ;;  %v18890_v34 = vand.u32 4294901760, %v9268_v63  ;;  %11612 = vmatpush3.msra.mxu1 %v9419_v1 }
 0x882   :  { %v9115_v59 = vld [vmem:[#allocation5 + $0x1f] sm:$0x1]  ;;  %v9426_v13 = vand.u32 4294901760, %v9425_v62  ;;  %v18894_v8 = vand.u32 4294901760, %v9267_v51  ;;  %v18896_v35 = vand.u32 4294901760, %v9251_v23  ;;  %11613 = vmatprep.subr.mxu1 %v9538_v47  ;;  %v19006_v4 = vand.u32 4294901760, %v9263_v3 }
 0x883   :  { %v9200_v21 = vsel %vm9119_vm5, %v9199_v56, %v9108_v42  ;;  %v18885_v36 = vsel %vm9119_vm5, %v9206_v10, %v9110_v39  ;;  %v18888_v20 = vsel %vm9119_vm5, %v9213_v49, %v9112_v37  ;;  %v18892_v42 = vand.u32 4294901760, %v9252_v12  ;;  %v9249_v10 = vld [vmem:[%s19408_s5 + $0x38] sm:$0xff]  ;;  %11580 = vmatprep.subr.mxu0 %v18890_v34 }
 0x884   :  { %9187 = vrot.lane.b32.xlu0 %v9186_v2, %s12758_s22  ;;  %9147 = vrot.lane.b32.xlu1 %v9146_v26, %s12762_s28  ;;  %v18901_v26 = vsub.f32 %v9268_v63, %v18890_v34  ;;  %v18906_v56 = vand.u32 4294901760, %v9250_v46  ;;  %v18908_v39 = vand.u32 4294901760, %v9265_v9  ;;  %v9220_v49 = vrot.slane %v9115_v59, 7 }
 0x885   :  { %v18904_v53 = vsub.f32 %v9252_v12, %v18892_v42  ;;  %v18915_v18 = vsub.f32 %v9267_v51, %v18894_v8  ;;  %v18918_v63 = vsub.f32 %v9251_v23, %v18896_v35  ;;  %v18921_v12 = vsub.f32 %v9266_v50, %v18898_v40  ;;  %11581 = vmatpush3.msra.mxu0 %v18892_v42 }
 0x886   :  { %v19697_v31 = vand.u32 4294901760, %v18901_v26  ;;  %v18930_v62 = vsub.f32 %v9250_v46, %v18906_v56  ;;  %v18933_v51 = vsub.f32 %v9265_v9, %v18908_v39  ;;  %11614 = vmatpush3.msra.mxu1 %v9426_v13  ;;  %11582 = vmatprep.subr.mxu0 %v18894_v8  ;;  %v19029_v25 = vsub.f32 %v9263_v3, %v19006_v4 }
 0x887   :  { %v19696_v1 = vand.u32 4294901760, %v18904_v53  ;;  %v19701_v23 = vand.u32 4294901760, %v18915_v18  ;;  %v19700_v50 = vand.u32 4294901760, %v18918_v63  ;;  %v19699_v2 = vand.u32 4294901760, %v18921_v12  ;;  %11583 = vmatpush3.msra.mxu0 %v18896_v35 }
 0x888   :  { %9194 = vrot.lane.b32.xlu0 %v9193_v14, %s12760_s1  ;;  %9154 = vrot.lane.b32.xlu1 %v18828_v48, %s12763_s17  ;;  %20336 = vst [vmem:[#allocation115_spill] sm:$0xff] %v18930_v62  ;;  %20337 = vst [vmem:[#allocation41_spill] sm:$0xff] %v18933_v51  ;;  %v18938_v14 = vand.u32 4294901760, %v9249_v10  ;;  %v9544_v48 = vsub.f32 %v18901_v26, %v19697_v31  ;;  %v19705_v47 = vand.u32 4294901760, %v18930_v62  ;;  %v19706_v46 = vand.u32 4294901760, %v18933_v51  ;;  %v9264_v31 = vld [vmem:[%s19408_s5 + $0xb0] sm:$0xff] }
 0x889   :  { %v9432_v37 = vsub.f32 %v18904_v53, %v19696_v1  ;;  %v9551_v9 = vsub.f32 %v18915_v18, %v19701_v23  ;;  %v9439_v59 = vsub.f32 %v18918_v63, %v19700_v50  ;;  %v9558_v13 = vsub.f32 %v18921_v12, %v19699_v2  ;;  %11584 = vmatprep.subr.mxu0 %v18898_v40  ;;  %v9114_v2 = vld [vmem:[#allocation5 + $0xf] sm:$0x1] }
 0x88a   :  { %v18960_v1 = vsub.f32 %v9249_v10, %v18938_v14  ;;  %v9545_v50 = vand.u32 4294901760, %v9544_v48  ;;  %v9446_v23 = vsub.f32 %v18930_v62, %v19705_v47  ;;  %v9565_v7 = vsub.f32 %v18933_v51, %v19706_v46  ;;  %v9262_v47 = vld [vmem:[%s19408_s5 + $0xa0] sm:$0xff]  ;;  %11585 = vmatpush3.msra.mxu0 %v18906_v56  ;;  %20342 = vst [vmem:[#allocation122_spill] sm:$0xff] %v19029_v25 }
 0x88b   :  { %v9433_v10 = vand.u32 4294901760, %v9432_v37  ;;  %v9552_v48 = vand.u32 4294901760, %v9551_v9  ;;  %v9440_v37 = vand.u32 4294901760, %v9439_v59  ;;  %v9246_v46 = vld [vmem:[%s19408_s5 + $0x20] sm:$0xff]  ;;  %v9559_v28 = vand.u32 4294901760, %v9558_v13  ;;  %11586 = vmatprep.subr.mxu0 %v18908_v39 }
 0x88c   :  { %20338 = vst [vmem:[#allocation47_spill] sm:$0xff] %v18960_v1  ;;  %9201 = vrot.lane.b32.xlu0 %v9200_v21, %s12762_s28  ;;  %9161 = vrot.lane.b32.xlu1 %v18840_v32, %s12764_s3  ;;  %v9247_v21 = vld [vmem:[%s19408_s5 + $0x28] sm:$0xff]  ;;  %v18985_v32 = vsel %vm9119_vm5, %v9220_v49, %v9114_v2  ;;  %v19711_v44 = vand.u32 4294901760, %v18960_v1  ;;  %v9447_v57 = vand.u32 4294901760, %v9446_v23  ;;  %v18995_v41 = vand.u32 4294901760, %v9264_v31  ;;  %v9261_v2 = vld [vmem:[%s19408_s5 + $0x98] sm:$0xff] }
 0x88d   :  { %11615 = vmatprep.subr.mxu1 %v9545_v50  ;;  %v18997_v49 = vand.u32 4294901760, %v9248_v29  ;;  %v9566_v9 = vand.u32 4294901760, %v9565_v7  ;;  %v19008_v50 = vand.u32 4294901760, %v9247_v21  ;;  %11587 = vmatpush3.msra.mxu0 %v18938_v14  ;;  %v19021_v13 = vand.u32 4294901760, %v9262_v47 }
 0x88e   :  { %11616 = vmatpush3.msra.mxu1 %v9433_v10  ;;  %v9453_v59 = vsub.f32 %v18960_v1, %v19711_v44  ;;  %v19016_v23 = vsub.f32 %v9264_v31, %v18995_v41  ;;  %v19023_v10 = vand.u32 4294901760, %v9246_v46  ;;  %v9245_v44 = vld [vmem:[%s19408_s5 + $0x18] sm:$0xff]  ;;  %v19034_v31 = vand.u32 4294901760, %v9261_v2  ;;  %11588 = vmatprep.subr.mxu0 %v18995_v41 }
 0x88f   :  { %v19019_v7 = vsub.f32 %v9248_v29, %v18997_v49  ;;  %11617 = vmatprep.subr.mxu1 %v9552_v48  ;;  %v19040_v1 = vsub.f32 %v9262_v47, %v19021_v13  ;;  %11589 = vmatpush3.msra.mxu0 %v18997_v49  ;;  %v19720_v3 = vand.u32 4294901760, %v19029_v25 }
 0x890   :  { %9208 = vrot.lane.b32.xlu0 %v18885_v36, %s12763_s17  ;;  %9168 = vrot.lane.b32.xlu1 %v18859_v24, %s12765_s11  ;;  %20339 = vst [vmem:[#allocation36_spill] sm:$0xff] %v19016_v23  ;;  %20341 = vst [vmem:[#allocation54_spill] sm:$0xff] %v19023_v10  ;;  %v9454_v36 = vand.u32 4294901760, %v9453_v59  ;;  %v19032_v24 = vsub.f32 %v9247_v21, %v19008_v50  ;;  %v19718_v29 = vand.u32 4294901760, %v19016_v23 }
 0x891   :  { %20340 = vst [vmem:[#allocation120_spill] sm:$0xff] %v19019_v7  ;;  %11618 = vmatpush3.msra.mxu1 %v9440_v37  ;;  %v19719_v16 = vand.u32 4294901760, %v19019_v7  ;;  %20344 = vst [vmem:[#allocation127_spill] sm:$0xff] %v19040_v1  ;;  %v19043_v48 = vsub.f32 %v9246_v46, %v19023_v10  ;;  %v19049_v59 = vsub.f32 %v9261_v2, %v19034_v31  ;;  %v19051_v37 = vand.u32 4294901760, %v9245_v44 }
 0x892   :  { %20343 = vst [vmem:[#allocation42_spill] sm:$0xff] %v19032_v24  ;;  %11619 = vmatprep.subr.mxu1 %v9559_v28  ;;  %11590 = vmatprep.subr.mxu0 %v19006_v4  ;;  %v9572_v47 = vsub.f32 %v19016_v23, %v19718_v29  ;;  %v19725_v46 = vand.u32 4294901760, %v19040_v1  ;;  %v9579_v21 = vsub.f32 %v19029_v25, %v19720_v3  ;;  %v9243_v25 = vld [vmem:[%s19408_s5 + $0x8] sm:$0xff] }
 0x893   :  { %20345 = vst [vmem:[#allocation48_spill] sm:$0xff] %v19043_v48  ;;  %20346 = vst [vmem:[#allocation61_spill] sm:$0xff] %v19049_v59  ;;  %11620 = vmatpush3.msra.mxu1 %v9447_v57  ;;  %v9460_v28 = vsub.f32 %v19019_v7, %v19719_v16  ;;  %v19072_v29 = vsub.f32 %v9245_v44, %v19051_v37  ;;  %v9260_v16 = vld [vmem:[%s19408_s5 + $0x90] sm:$0xff]  ;;  %11591 = vmatpush3.msra.mxu0 %v19008_v50  ;;  %v20349_v44 = vand.u32 4294901760, %v19043_v48 }
 0x894   :  { %9215 = vrot.lane.b32.xlu0 %v18888_v20, %s12764_s3  ;;  %11621 = vmatprep.subr.mxu1 %v9566_v9  ;;  %v20347_v20 = vand.u32 4294901760, %v19032_v24  ;;  %v9244_v9 = vld [vmem:[%s19408_s5 + $0x10] sm:$0xff]  ;;  %v9573_v3 = vand.u32 4294901760, %v9572_v47  ;;  %v19107_v7 = vand.u32 4294901760, %v9260_v16  ;;  %v19116_v62 = vand.u32 4294901760, %v9243_v25 }
 0x895   :  { %20348 = vst [vmem:[#allocation129_spill] sm:$0xff] %v19072_v29  ;;  %11622 = vmatpush3.msra.mxu1 %v9454_v36  ;;  %v9461_v2 = vand.u32 4294901760, %v9460_v28  ;;  %v9474_v51 = vsub.f32 %v19043_v48, %v20349_v44  ;;  %11592 = vmatprep.subr.mxu0 %v19021_v13  ;;  %v9580_v36 = vand.u32 4294901760, %v9579_v21  ;;  %v20350_v28 = vand.u32 4294901760, %v19049_v59  ;;  %v9258_v44 = vld [vmem:[%s19408_s5 + $0x80] sm:$0xff] }
 0x896   :  { %v9467_v57 = vsub.f32 %v19032_v24, %v20347_v20  ;;  %v9586_v20 = vsub.f32 %v19040_v1, %v19725_v46  ;;  %v9259_v24 = vld [vmem:[%s19408_s5 + $0x88] sm:$0xff]  ;;  %11593 = vmatpush3.msra.mxu0 %v19023_v10  ;;  %v9242_v48 = vld [vmem:[%s19408_s5] sm:$0xff]  ;;  %11623 = vmatprep.subr.mxu1 %v9573_v3  ;;  %v19125_v3 = vand.u32 4294901760, %v9258_v44 }
 0x897   :  { %v9593_v46 = vsub.f32 %v19049_v59, %v20350_v28  ;;  %v19109_v28 = vand.u32 4294901760, %v9244_v9  ;;  %11624 = vmatpush3.msra.mxu1 %v9461_v2  ;;  %v20351_v59 = vand.u32 4294901760, %v19072_v29  ;;  %v19114_v10 = vand.u32 4294901760, %v9259_v24  ;;  %11594 = vmatprep.subr.mxu0 %v19034_v31 }
 0x898   :  { %v9468_v47 = vand.u32 4294901760, %v9467_v57  ;;  %9222 = vrot.lane.b32.xlu0 %v18985_v32, %s12765_s11  ;;  %v9587_v21 = vand.u32 4294901760, %v9586_v20  ;;  %v9475_v57 = vand.u32 4294901760, %v9474_v51  ;;  %11625 = vmatprep.subr.mxu1 %v9580_v36  ;;  %v19120_v32 = vsub.f32 %v9260_v16, %v19107_v7  ;;  %20354 = vst [vmem:[#allocation134_spill] sm:$0xff] %v19125_v3 }
 0x899   :  { %v9594_v1 = vand.u32 4294901760, %v9593_v46  ;;  %v9481_v23 = vsub.f32 %v19072_v29, %v20351_v59  ;;  %v19123_v51 = vsub.f32 %v9244_v9, %v19109_v28  ;;  %v19127_v46 = vand.u32 4294901760, %v9242_v48  ;;  %11595 = vmatpush3.msra.mxu0 %v19051_v37 }
 0x89a   :  { %20352 = vst [vmem:[#allocation55_spill] sm:$0xff] %v19120_v32  ;;  %11626 = vmatpush3.msra.mxu1 %v9468_v47  ;;  %v19131_v2 = vsub.f32 %v9259_v24, %v19114_v10  ;;  %v19134_v20 = vsub.f32 %v9243_v25, %v19116_v62  ;;  %11596 = vmatprep.subr.mxu0 %v19107_v7  ;;  %v19742_v16 = vand.u32 4294901760, %v19120_v32 }
 0x89b   :  { %20353 = vst [vmem:[#allocation49_spill] sm:$0xff] %v19123_v51  ;;  %20355 = vst [vmem:[#allocation68_spill] sm:$0xff] %v19127_v46  ;;  %v9482_v59 = vand.u32 4294901760, %v9481_v23  ;;  %11627 = vmatprep.subr.mxu1 %v9587_v21  ;;  %v19743_v9 = vand.u32 4294901760, %v19123_v51  ;;  %v19140_v36 = vsub.f32 %v9258_v44, %v19125_v3  ;;  %v19143_v29 = vsub.f32 %v9242_v48, %v19127_v46 }
 0x89c   :  { %20356 = vst [vmem:[#allocation136_spill] sm:$0xff] %v19131_v2  ;;  %20357 = vst [vmem:[#allocation56_spill] sm:$0xff] %v19134_v20  ;;  %11597 = vmatpush3.msra.mxu0 %v19109_v28  ;;  %11628 = vmatpush3.msra.mxu1 %v9475_v57  ;;  %v19746_v23 = vand.u32 4294901760, %v19131_v2  ;;  %v19747_v25 = vand.u32 4294901760, %v19134_v20  ;;  %v9600_v24 = vsub.f32 %v19120_v32, %v19742_v16 }
 0x89d   :  { %20358 = vst [vmem:[#allocation141_spill] sm:$0xff] %v19140_v36  ;;  %20359 = vst [vmem:[#allocation62_spill] sm:$0xff] %v19143_v29  ;;  %11598 = vmatprep.subr.mxu0 %v19114_v10  ;;  %11629 = vmatprep.subr.mxu1 %v9594_v1  ;;  %v9488_v47 = vsub.f32 %v19123_v51, %v19743_v9  ;;  %v19750_v48 = vand.u32 4294901760, %v19140_v36  ;;  %v19751_v44 = vand.u32 4294901760, %v19143_v29 }
 0x89e   :  { %11599 = vmatpush3.msra.mxu0 %v19116_v62  ;;  %11630 = vmatpush3.msra.mxu1 %v9482_v59  ;;  %v9607_v21 = vsub.f32 %v19131_v2, %v19746_v23  ;;  %v9495_v1 = vsub.f32 %v19134_v20, %v19747_v25  ;;  %v9601_v57 = vand.u32 4294901760, %v9600_v24 }
 0x89f   :  { %11600 = vmatprep.subr.mxu0 %v19125_v3  ;;  %v9489_v16 = vand.u32 4294901760, %v9488_v47  ;;  %v9614_v9 = vsub.f32 %v19140_v36, %v19750_v48  ;;  %v9502_v59 = vsub.f32 %v19143_v29, %v19751_v44  ;;  %v9082_v29 = vld [vmem:[#allocation5 + $0x10] sm:$0x1] }
 0x8a0   :  { %11601 = vmatpush3.msra.mxu0 %v19127_v46  ;;  %v9608_v51 = vand.u32 4294901760, %v9607_v21  ;;  %v9496_v23 = vand.u32 4294901760, %v9495_v1  ;;  %11631 = vmatprep.subr.mxu1 %v9601_v57  ;;  %v9118_v1 = vrot.slane %v9082_v29, 7  ;;  %v9081_v57 = vld [vmem:[#allocation5] sm:$0x1] }
 0x8a1   :  { %11640 = vmatprep.subr.mxu0 %v18719_v60  ;;  %v9615_v25 = vand.u32 4294901760, %v9614_v9  ;;  %11632 = vmatpush3.msra.mxu1 %v9489_v16  ;;  %v9503_v20 = vand.u32 4294901760, %v9502_v59  ;;  %v9100_v9 = vld [vmem:[#allocation5 + $0x18] sm:$0x1] }
 0x8a2   :  { %11633 = vmatprep.subr.mxu1 %v9608_v51  ;;  %v9120_v16 = vsel %vm9119_vm5, %v9118_v1, %v9081_v57  ;;  %v9173_v32 = vrot.slane %v9100_v9, 7 }
 0x8a3   :  { %11634 = vmatpush3.msra.mxu1 %v9496_v23 }
 0x8a4   :  { %11635 = vmatprep.subr.mxu1 %v9615_v25 }
 0x8a5   :  { %11636 = vmatpush3.msra.mxu1 %v9503_v20 }
 0x8a6   :  { %11675 = vmatprep.subr.mxu1 %v18709_v19 }
 0x8ea   :  { %v9127_v24 = vpop.permute.xlu1 %9126 }
 0x8eb   :  { %v9225_v51 = vsel %vm7590_vm11, %v9120_v16, %v9127_v24  ;;  %v9099_v24 = vld [vmem:[#allocation5 + $0x8] sm:$0x1] }
 0x8ee   :  { %v9134_v47 = vpop.permute.xlu1 %9133 }
 0x8ef   :  { %v9226_v20 = vsel %vm7624_vm13, %v9225_v51, %v9134_v47  ;;  %v9174_v47 = vsel %vm9119_vm5, %v9173_v32, %v9099_v24  ;;  %v20360_v24 = vld [vmem:[#allocation115_spill] sm:$0xff] }
 0x8f2   :  { %v9181_v48 = vpop.permute.xlu0 %9180  ;;  %v9141_v44 = vpop.permute.xlu1 %9140 }
 0x8f3   :  { %v9227_v59 = vsel %vm7658_vm15, %v9226_v20, %v9141_v44  ;;  %v9235_v51 = vsel %vm7590_vm11, %v9174_v47, %v9181_v48  ;;  %v20362_v47 = vld [vmem:[#allocation41_spill] sm:$0xff]  ;;  %vm10143_vm11 = vcmask 9216  }
 0x8f6   :  { %v9188_v36 = vpop.permute.xlu0 %9187  ;;  %v9148_v21 = vpop.permute.xlu1 %9147 }
 0x8f7   :  { %v9228_v19 = vsel %vm7692_vm1, %v9227_v59, %v9148_v21  ;;  %v9236_v44 = vsel %vm7624_vm13, %v9235_v51, %v9188_v36  ;;  %v20363_v51 = vld [vmem:[#allocation47_spill] sm:$0xff] }
 0x8fa   :  { %v9195_v2 = vpop.permute.xlu0 %9194  ;;  %v9155_v60 = vpop.permute.xlu1 %9154 }
 0x8fb   :  { %v9230_v29 = vsel %vm9229_vm6, %v9228_v19, %v9155_v60  ;;  %v9237_v21 = vsel %vm7658_vm15, %v9236_v44, %v9195_v2  ;;  %v20364_v44 = vld [vmem:[#allocation36_spill] sm:$0xff] }
 0x8fe   :  { %v9202_v23 = vpop.permute.xlu0 %9201  ;;  %v9162_v25 = vpop.permute.xlu1 %9161 }
 0x8ff   :  { %v9232_v46 = vsel %vm9231_vm7, %v9230_v29, %v9162_v25  ;;  %v9238_v19 = vsel %vm7692_vm1, %v9237_v21, %v9202_v23  ;;  %v20366_v21 = vld [vmem:[#allocation122_spill] sm:$0xff] }
 0x902   :  { %v9209_v1 = vpop.permute.xlu0 %9208  ;;  %v9169_v57 = vpop.permute.xlu1 %9168 }
 0x903   :  { %v9234_v16 = vsel %vm9233_vm8, %v9232_v46, %v9169_v57  ;;  %v9239_v60 = vsel %vm9229_vm6, %v9238_v19, %v9209_v1  ;;  %v20367_v19 = vld [vmem:[#allocation42_spill] sm:$0xff] }
 0x904   :  { %v19184_v3 = vand.u32 4294901760, %v9234_v16 }
 0x906   :  { %v9216_v9 = vpop.permute.xlu0 %9215  ;;  %v19191_v20 = vsub.f32 %v9234_v16, %v19184_v3  ;;  %v20361_v16 = vld [vmem:[#allocation54_spill] sm:$0xff] }
 0x907   :  { %v9240_v46 = vsel %vm9231_vm7, %v9239_v60, %v9216_v9  ;;  %v20365_v9 = vld [vmem:[#allocation120_spill] sm:$0xff]  ;;  %v20368_v60 = vld [vmem:[#allocation127_spill] sm:$0xff] }
 0x908   :  { %v9385_v59 = vand.u32 4294901760, %v19191_v20 }
 0x90a   :  { %v9223_v25 = vpop.permute.xlu0 %9222  ;;  %v9386_v23 = vsub.f32 %v19191_v20, %v9385_v59 }
 0x90b   :  { %v9241_v32 = vsel %vm9233_vm8, %v9240_v46, %v9223_v25  ;;  %v20369_v46 = vld [vmem:[#allocation134_spill] sm:$0xff]  ;;  %v20370_v25 = vld [vmem:[#allocation48_spill] sm:$0xff] }
 0x90c   :  { %v19195_v48 = vand.u32 4294901760, %v9241_v32  ;;  %v9387_v57 = vand.u32 4294901760, %v9386_v23  ;;  %v20374_v23 = vld [vmem:[#allocation129_spill] sm:$0xff] }
 0x90e   :  { %v9378_v36 = vsub.f32 %v9241_v32, %v19195_v48  ;;  %9618 = vmatprep.mubr.f32.mxu1 %v19195_v48  ;;  %v20371_v32 = vld [vmem:[#allocation68_spill] sm:$0xff] }
 0x90f   :  { %9620 = vmatmul.mubr.f32.vlgmr.msra.gmra.mxu1 %v19184_v3 }
 0x910   :  { %11676 = vmatpush3.msra.mxu1 %v18711_v11  ;;  %v9379_v2 = vand.u32 4294901760, %v9378_v36 }
 0x911   :  { %11677 = vmatprep.subr.mxu1 %v18726_v0 }
 0x912   :  { %11678 = vmatpush3.msra.mxu1 %v18737_v6  ;;  %9862 = vmatprep.mubr.f32.mxu1 %v9379_v2  ;;  %v9380_v29 = vsub.f32 %v9378_v36, %v9379_v2  ;;  %v20373_v2 = vld [vmem:[#allocation113_spill] sm:$0xff] }
 0x913   :  { %11679 = vmatprep.subr.mxu1 %v18739_v15 }
 0x914   :  { %11680 = vmatpush3.msra.mxu1 %v18748_v58  ;;  %v9381_v1 = vand.u32 4294901760, %v9380_v29  ;;  %v20375_v29 = vld [vmem:[#allocation55_spill] sm:$0xff] }
 0x915   :  { %11681 = vmatprep.subr.mxu1 %v18802_v55 }
 0x916   :  { %11682 = vmatpush3.msra.mxu1 %v18804_v5  ;;  %9382 = vmatprep.mubr.f32.mxu0 %v9381_v1  ;;  %v20376_v1 = vld [vmem:[#allocation49_spill] sm:$0xff] }
 0x917   :  { %11683 = vmatprep.subr.mxu1 %v18806_v22  ;;  %9388 = vmatmul.mubr.f32.vlgmr.msra.gmra.mxu0 %v9387_v57  ;;  %v20377_v57 = vld [vmem:[#allocation136_spill] sm:$0xff] }
 0x918   :  { %11641 = vmatpush3.msra.mxu0 %v18722_v30  ;;  %11684 = vmatpush3.msra.mxu1 %v18809_v61 }
 0x919   :  { %11642 = vmatprep.subr.mxu0 %v18746_v52  ;;  %9755 = vmatprep.mubr.f32.mxu0 %v9378_v36  ;;  %v20372_v36 = vld [vmem:[#allocation61_spill] sm:$0xff] }
 0x91a   :  { %11685 = vmatprep.subr.mxu1 %v18890_v34  ;;  %11643 = vmatpush3.msra.mxu0 %v18758_v33 }
 0x91b   :  { %11686 = vmatpush3.msra.mxu1 %v18892_v42  ;;  %11644 = vmatprep.subr.mxu0 %v18761_v45 }
 0x91c   :  { %11687 = vmatprep.subr.mxu1 %v18894_v8  ;;  %11645 = vmatpush3.msra.mxu0 %v18766_v43 }
 0x91d   :  { %11688 = vmatpush3.msra.mxu1 %v18896_v35  ;;  %11646 = vmatprep.subr.mxu0 %v18814_v38 }
 0x91e   :  { %11689 = vmatprep.subr.mxu1 %v18898_v40  ;;  %11647 = vmatpush3.msra.mxu0 %v18817_v27 }
 0x91f   :  { %11690 = vmatpush3.msra.mxu1 %v18906_v56  ;;  %11648 = vmatprep.subr.mxu0 %v18820_v54 }
 0x920   :  { %11691 = vmatprep.subr.mxu1 %v18908_v39  ;;  %11649 = vmatpush3.msra.mxu0 %v18824_v17 }
 0x921   :  { %11692 = vmatpush3.msra.mxu1 %v18938_v14  ;;  %11650 = vmatprep.subr.mxu0 %v18901_v26 }
 0x922   :  { %11693 = vmatprep.subr.mxu1 %v18995_v41  ;;  %11651 = vmatpush3.msra.mxu0 %v18904_v53 }
 0x923   :  { %11694 = vmatpush3.msra.mxu1 %v18997_v49  ;;  %11652 = vmatprep.subr.mxu0 %v18915_v18 }
 0x924   :  { %11695 = vmatprep.subr.mxu1 %v19006_v4  ;;  %11653 = vmatpush3.msra.mxu0 %v18918_v63 }
 0x925   :  { %11696 = vmatpush3.msra.mxu1 %v19008_v50  ;;  %11654 = vmatprep.subr.mxu0 %v18921_v12 }
 0x926   :  { %11697 = vmatprep.subr.mxu1 %v19021_v13  ;;  %11655 = vmatpush3.msra.mxu0 %v20360_v24 }
 0x927   :  { %11698 = vmatpush3.msra.mxu1 %v20361_v16  ;;  %11656 = vmatprep.subr.mxu0 %v20362_v47 }
 0x928   :  { %11699 = vmatprep.subr.mxu1 %v19034_v31  ;;  %11657 = vmatpush3.msra.mxu0 %v20363_v51 }
 0x929   :  { %11700 = vmatpush3.msra.mxu1 %v19051_v37  ;;  %11658 = vmatprep.subr.mxu0 %v20364_v44 }
 0x92a   :  { %11701 = vmatprep.subr.mxu1 %v19107_v7  ;;  %11659 = vmatpush3.msra.mxu0 %v20365_v9 }
 0x92b   :  { %11702 = vmatpush3.msra.mxu1 %v19109_v28  ;;  %11660 = vmatprep.subr.mxu0 %v20366_v21 }
 0x92c   :  { %11703 = vmatprep.subr.mxu1 %v19114_v10  ;;  %11661 = vmatpush3.msra.mxu0 %v20367_v19 }
 0x92d   :  { %11704 = vmatpush3.msra.mxu1 %v19116_v62  ;;  %11662 = vmatprep.subr.mxu0 %v20368_v60 }
 0x92e   :  { %11705 = vmatprep.subr.mxu1 %v20369_v46  ;;  %11663 = vmatpush3.msra.mxu0 %v20370_v25 }
 0x92f   :  { %11706 = vmatpush3.msra.mxu1 %v20371_v32  ;;  %11664 = vmatprep.subr.mxu0 %v20372_v36 }
 0x930   :  { %9866 = vmatmul.mubr.f32.vlgmr.msra.gmra.mxu1 %v9385_v59  ;;  %11745 = vmatprep.subr.mxu1 %v20373_v2  ;;  %v20378_v59 = vld [vmem:[#allocation56_spill] sm:$0xff]  ;;  %v20379_v2 = vld [vmem:[#allocation141_spill] sm:$0xff] }
 0x931   :  { %11665 = vmatpush3.msra.mxu0 %v20374_v23  ;;  %11746 = vmatpush3.msra.mxu1 %v18711_v11  ;;  %v20380_v11 = vld [vmem:[#allocation62_spill] sm:$0xff] }
 0x932   :  { %10136 = vmatprep.mubr.f32.mxu1 %v19195_v48  ;;  %11666 = vmatprep.subr.mxu0 %v20375_v29 }
 0x933   :  { %11747 = vmatprep.subr.mxu1 %v18726_v0  ;;  %11667 = vmatpush3.msra.mxu0 %v20376_v1  ;;  %v20381_v0 = vld [vmem:[#allocation35_spill] sm:$0xff] }
 0x934   :  { %11748 = vmatpush3.msra.mxu1 %v18737_v6  ;;  %11668 = vmatprep.subr.mxu0 %v20377_v57  ;;  %v20382_v6 = vand.u32 4294901760, %v20381_v0 }
 0x935   :  { %11749 = vmatprep.subr.mxu1 %v18739_v15  ;;  %11669 = vmatpush3.msra.mxu0 %v20378_v59  ;;  %v20383_v15 = vand.u32 4294901760, %v18722_v30  ;;  %v20387_v30 = vand.u32 4294901760, %v18766_v43  ;;  %v20391_v43 = vand.u32 4294901760, %v18824_v17  ;;  %v20398_v17 = vand.u32 4294901760, %v20362_v47 }
 0x936   :  { %11750 = vmatpush3.msra.mxu1 %v18748_v58  ;;  %11670 = vmatprep.subr.mxu0 %v20379_v2  ;;  %v20384_v58 = vand.u32 4294901760, %v18746_v52  ;;  %v20388_v52 = vand.u32 4294901760, %v18814_v38  ;;  %v20394_v38 = vand.u32 4294901760, %v18915_v18  ;;  %v20409_v18 = vmov 0.0  }
 0x937   :  { %11751 = vmatprep.subr.mxu1 %v18802_v55  ;;  %11671 = vmatpush3.msra.mxu0 %v20380_v11  ;;  %v20385_v55 = vand.u32 4294901760, %v18758_v33  ;;  %v20389_v33 = vand.u32 4294901760, %v18817_v27  ;;  %v20395_v27 = vand.u32 4294901760, %v18918_v63  ;;  %v20410_v63 = vand.u32 4294901760, %v20376_v1 }
 0x938   :  { %11752 = vmatpush3.msra.mxu1 %v18804_v5  ;;  %9758 = vmatmul.mubr.f32.vlgmr.msra.gmra.mxu0 %v19191_v20  ;;  %v20386_v5 = vand.u32 4294901760, %v18761_v45  ;;  %v20390_v45 = vand.u32 4294901760, %v18820_v54  ;;  %v20396_v54 = vand.u32 4294901760, %v18921_v12  ;;  %v20411_v12 = vand.u32 4294901760, %v20377_v57 }
 0x939   :  { %11710 = vmatprep.subr.mxu0 %v20382_v6  ;;  %11753 = vmatprep.subr.mxu1 %v18806_v22  ;;  %v20392_v22 = vand.u32 4294901760, %v18901_v26  ;;  %v20405_v26 = vand.u32 4294901760, %v20370_v25 }
 0x93a   :  { %11711 = vmatpush3.msra.mxu0 %v20383_v15  ;;  %10032 = vmatprep.mubr.f32.mxu0 %v19195_v48 }
 0x93b   :  { %11754 = vmatpush3.msra.mxu1 %v18809_v61  ;;  %11712 = vmatprep.subr.mxu0 %v20384_v58  ;;  %v20393_v61 = vand.u32 4294901760, %v18904_v53  ;;  %v20406_v53 = vand.u32 4294901760, %v20372_v36 }
 0x93c   :  { %11755 = vmatprep.subr.mxu1 %v18890_v34  ;;  %11713 = vmatpush3.msra.mxu0 %v20385_v55  ;;  %v20400_v34 = vand.u32 4294901760, %v20364_v44 }
 0x93d   :  { %11756 = vmatpush3.msra.mxu1 %v18892_v42  ;;  %11714 = vmatprep.subr.mxu0 %v20386_v5  ;;  %v20401_v42 = vand.u32 4294901760, %v20365_v9 }
 0x93e   :  { %11757 = vmatprep.subr.mxu1 %v18894_v8  ;;  %11715 = vmatpush3.msra.mxu0 %v20387_v30  ;;  %v20402_v8 = vand.u32 4294901760, %v20366_v21 }
 0x93f   :  { %11758 = vmatpush3.msra.mxu1 %v18896_v35  ;;  %11716 = vmatprep.subr.mxu0 %v20388_v52  ;;  %v20403_v35 = vand.u32 4294901760, %v20367_v19 }
 0x940   :  { %11759 = vmatprep.subr.mxu1 %v18898_v40  ;;  %11717 = vmatpush3.msra.mxu0 %v20389_v33  ;;  %v20404_v40 = vand.u32 4294901760, %v20368_v60 }
 0x941   :  { %11760 = vmatpush3.msra.mxu1 %v18906_v56  ;;  %11718 = vmatprep.subr.mxu0 %v20390_v45  ;;  %v20407_v56 = vand.u32 4294901760, %v20374_v23 }
 0x942   :  { %11761 = vmatprep.subr.mxu1 %v18908_v39  ;;  %11719 = vmatpush3.msra.mxu0 %v20391_v43  ;;  %v20408_v39 = vand.u32 4294901760, %v20375_v29 }
 0x943   :  { %11762 = vmatpush3.msra.mxu1 %v18938_v14  ;;  %11720 = vmatprep.subr.mxu0 %v20392_v22  ;;  %v20413_v14 = vand.u32 4294901760, %v20379_v2 }
 0x944   :  { %11763 = vmatprep.subr.mxu1 %v18995_v41  ;;  %11721 = vmatpush3.msra.mxu0 %v20393_v61  ;;  %v20397_v41 = vand.u32 4294901760, %v20360_v24 }
 0x945   :  { %11764 = vmatpush3.msra.mxu1 %v18997_v49  ;;  %11722 = vmatprep.subr.mxu0 %v20394_v38  ;;  %v20414_v49 = vand.u32 4294901760, %v20380_v11 }
 0x946   :  { %11765 = vmatprep.subr.mxu1 %v19006_v4  ;;  %11723 = vmatpush3.msra.mxu0 %v20395_v27  ;;  %v20399_v4 = vand.u32 4294901760, %v20363_v51  ;;  %v11022_v51 = vld [vmem:[%s19409_s6] ss:$0 sm:$0xff]  ;;  %s12767_s6 = smov [#allocation6]  }
 0x947   :  { %11766 = vmatpush3.msra.mxu1 %v19008_v50  ;;  %11724 = vmatprep.subr.mxu0 %v20396_v54  ;;  %v10145_v50 = vld [vmem:[%s19410_s7] sm:$0x3]  ;;  %s10614_s28 = sshll.u32 %s12767_s6, 4  ;;  %s10615_s28 = int_to_ptr.vmem [resolvable:$true] %s10614_s28 }
 0x948   :  { %11767 = vmatprep.subr.mxu1 %v19021_v13  ;;  %11725 = vmatpush3.msra.mxu0 %v20397_v41  ;;  %s12703_s19 = scalar_lea.vmem %s10615_s28, 32  ;;  %p12708_p1 = scmp.lt.s32.totalorder %s10615_s28, %s10615_s28 }
 0x949   :  { %11768 = vmatpush3.msra.mxu1 %v20361_v16  ;;  %11726 = vmatprep.subr.mxu0 %v20398_v17  ;;  %p12704_p0 = scmp.ne.s32.totalorder %s10615_s28, %s12703_s19  ;;  %p12709_p2 = scmp.lt.s32.totalorder %s12703_s19, %s12703_s19 }
 0x94a   :  { %11769 = vmatprep.subr.mxu1 %v19034_v31  ;;  %11727 = vmatpush3.msra.mxu0 %v20399_v4 }
 0x94b   :  { %11770 = vmatpush3.msra.mxu1 %v19051_v37  ;;  %11728 = vmatprep.subr.mxu0 %v20400_v34  ;;  %p12710_p3 = por %p12709_p2, %p12708_p1 }
 0x94c   :  { %11771 = vmatprep.subr.mxu1 %v19107_v7  ;;  %11729 = vmatpush3.msra.mxu0 %v20401_v42  ;;  %v10158_v7 = vsel %vm10156_vm9, %v10145_v50, 0 }
 0x94d   :  { %11772 = vmatpush3.msra.mxu1 %v19109_v28  ;;  %11730 = vmatprep.subr.mxu0 %v20402_v8  ;;  %v10191_v13 = vand.u32 4294901760, %v10158_v7  ;;  %p12711_p4 = pnand %p12710_p3, %p12704_p0 }
 0x94e   :  { %11773 = vmatprep.subr.mxu1 %v19114_v10  ;;  %11731 = vmatpush3.msra.mxu0 %v20403_v35 }
 0x94f   :  { %11774 = vmatpush3.msra.mxu1 %v19116_v62  ;;  %11732 = vmatprep.subr.mxu0 %v20404_v40  ;;  %v20412_v62 = vand.u32 4294901760, %v20378_v59  ;;  %v10268_v10 = vsub.f32 %v10158_v7, %v10191_v13 }
 0x950   :  { %11775 = vmatprep.subr.mxu1 %v20369_v46  ;;  %11733 = vmatpush3.msra.mxu0 %v20405_v26 }
 0x951   :  { %11776 = vmatpush3.msra.mxu1 %v20371_v32  ;;  %11734 = vmatprep.subr.mxu0 %v20406_v53  ;;  %v10269_v31 = vand.u32 4294901760, %v10268_v10 }
 0x952   :  { %10138 = vmatmul.mubr.f32.vlgmr.msra.gmra.mxu1 %v19184_v3  ;;  %11735 = vmatpush3.msra.mxu0 %v20407_v56 }
 0x953   :  { %11736 = vmatprep.subr.mxu0 %v20408_v39  ;;  %12649 = vmatprep.subr.mxu1 %v20409_v18  ;;  %v10270_v37 = vsub.f32 %v10268_v10, %v10269_v31 }
 0x954   :  { %11737 = vmatpush3.msra.mxu0 %v20410_v63  ;;  %12651 = vmatprep.mubr.msk.f32.mxu1 %vm12766_vm10, %v20409_v18 }
 0x955   :  { %11738 = vmatprep.subr.mxu0 %v20411_v12  ;;  %v10271_v28 = vand.u32 4294901760, %v10270_v37 }
 0x956   :  { %11739 = vmatpush3.msra.mxu0 %v20412_v62 }
 0x957   :  { %11740 = vmatprep.subr.mxu0 %v20413_v14  ;;  %12650 = vmatpush3.msra.mxu1 %v10271_v28 }
 0x958   :  { %11741 = vmatpush3.msra.mxu0 %v20414_v49  ;;  %12659 = vmatprep.subr.mxu1 %v20409_v18 }
 0x959   :  { %10034 = vmatmul.mubr.f32.vlgmr.msra.gmra.mxu0 %v19184_v3  ;;  %12644 = vmatprep.subr.mxu0 %v20409_v18 }
 0x95a   :  { %12645 = vmatpush3.msra.mxu0 %v10191_v13  ;;  %12646 = vmatprep.mubr.msk.f32.mxu0 %vm12766_vm10, %v20409_v18 }
 0x95b   :  { %12654 = vmatprep.subr.mxu0 %v20409_v18 }
 0x9cf   :  { %v11637_v20 = vpop.f32.mrf.mxu1 }
 0x9d1   :  { %v11638_v47 = vpop.f32.mrf.mxu1 }
 0x9d2   :  { %v11639_v19 = vadd.f32 %v11638_v47, %v11637_v20 }
 0x9d7   :  { %v11602_v3 = vpop.f32.mrf.mxu0 }
 0x9d9   :  { %v11603_v48 = vpop.f32.mrf.mxu0 }
 0x9da   :  { %v11604_v16 = vadd.f32 %v11603_v48, %v11602_v3 }
 0x9dc   :  { %v9390_v21 = vadd.f32 %v11604_v16, %v11022_v51 }
 0x9de   :  { %v9622_v25 = vadd.f32 %v11639_v19, %v9390_v21 }
 0x9f0   :  { %v11707_v44 = vpop.f32.mrf.mxu1 }
 0x9f2   :  { %v11708_v46 = vpop.f32.mrf.mxu1 }
 0x9f3   :  { %v11709_v29 = vadd.f32 %v11708_v46, %v11707_v44 }
 0x9f8   :  { %v11672_v24 = vpop.f32.mrf.mxu0 }
 0x9fa   :  { %v11673_v9 = vpop.f32.mrf.mxu0 }
 0x9fb   :  { %v11674_v60 = vadd.f32 %v11673_v9, %v11672_v24 }
 0x9fd   :  { %v9760_v36 = vadd.f32 %v11674_v60, %v9622_v25 }
 0x9ff   :  { %v9868_v59 = vadd.f32 %v11709_v29, %v9760_v36 }
 0xa12   :  { %v11777_v32 = vpop.f32.mrf.mxu1 }
 0xa14   :  { %v11778_v1 = vpop.f32.mrf.mxu1 }
 0xa15   :  { %v11779_v11 = vadd.f32 %v11778_v1, %v11777_v32 }
 0xa19   :  { %v11742_v23 = vpop.f32.mrf.mxu0 }
 0xa1b   :  { %v11743_v57 = vpop.f32.mrf.mxu0 }
 0xa1c   :  { %v11744_v2 = vadd.f32 %v11743_v57, %v11742_v23 }
 0xa1e   :  { %v10036_v0 = vadd.f32 %v11744_v2, %v9868_v59 }
 0xa20   :  { %v10140_v6 = vadd.f32 %v11779_v11, %v10036_v0 }
 0xa22   :  { %v10154_v15 = vsel %vm2727_vm2, %v10140_v6, 0  ;;  %10144 = vst.msk [vmem:[#allocation6] sm:$0x3] %vm10143_vm11, %v10140_v6 }
 0xa23   :  { %v10226_v58 = vand.u32 4294901760, %v10154_v15 }
 0xa25   :  { %v10227_v55 = vsub.f32 %v10154_v15, %v10226_v58  ;;  %12652 = vmatmul.mubr.f32.vlgmr.msra.gmra.mxu1 %v10226_v58 }
 0xa26   :  { %12660 = vmatpush3.msra.mxu1 %v10191_v13  ;;  %12661 = vmatprep.mubr.msk.f32.mxu1 %vm12766_vm10, %v20409_v18 }
 0xa27   :  { %v10228_v5 = vand.u32 4294901760, %v10227_v55  ;;  %12669 = vmatprep.subr.mxu1 %v20409_v18 }
 0xa29   :  { %v10229_v30 = vsub.f32 %v10227_v55, %v10228_v5  ;;  %12662 = vmatmul.mubr.f32.vlgmr.msra.gmra.mxu1 %v10228_v5 }
 0xa2a   :  { %12670 = vmatpush3.msra.mxu1 %v10191_v13  ;;  %12671 = vmatprep.mubr.msk.f32.mxu1 %vm12766_vm10, %v20409_v18 }
 0xa2b   :  { %v10230_v52 = vand.u32 4294901760, %v10229_v30 }
 0xa2d   :  { %12647 = vmatmul.mubr.f32.vlgmr.msra.gmra.mxu0 %v10230_v52  ;;  %12672 = vmatmul.mubr.f32.vlgmr.msra.gmra.mxu1 %v10226_v58 }
 0xa2e   :  { %12655 = vmatpush3.msra.mxu0 %v10268_v10  ;;  %12656 = vmatprep.mubr.msk.f32.mxu0 %vm12766_vm10, %v20409_v18 }
 0xa2f   :  { %12664 = vmatprep.subr.mxu0 %v20409_v18 }
 0xa31   :  { %12657 = vmatmul.mubr.f32.vlgmr.msra.gmra.mxu0 %v10227_v55 }
 0xa32   :  { %12665 = vmatpush3.msra.mxu0 %v10269_v31  ;;  %12666 = vmatprep.mubr.msk.f32.mxu0 %vm12766_vm10, %v20409_v18 }
 0xa35   :  { %12667 = vmatmul.mubr.f32.vlgmr.msra.gmra.mxu0 %v10226_v58 }
 0xa36   :  { %12714 = shalt.err (!%p12711_p4)
}
 0xa37   :  { %10617 = dma.vmem_to_hbm [thread:$0]  %s10615_s28, 32, %s19412_s9, [#allocation7]   ;;  %v11023_v61 = vld [vmem:[%s19411_s8] ss:$0 sm:$0xff]  ;;  %vm10606_vm2 = vcmask 74752  }
 0xa38   :  { %s12768_s9 = smov [#allocation8]  }
 0xa39   :  { %s10624_s15 = sshll.u32 %s12768_s9, 4  ;;  %s10625_s15 = int_to_ptr.vmem [resolvable:$true] %s10624_s15 }
 0xa3a   :  { %s12723_s8 = scalar_lea.vmem %s10625_s15, 32  ;;  %p12728_p6 = scmp.lt.s32.totalorder %s10625_s15, %s10625_s15 }
 0xa3b   :  { %p12724_p5 = scmp.ne.s32.totalorder %s10625_s15, %s12723_s8  ;;  %p12729_p7 = scmp.lt.s32.totalorder %s12723_s8, %s12723_s8 }
 0xa3d   :  { %p12730_p8 = por %p12729_p7, %p12728_p6 }
 0xa3f   :  { %p12731_p9 = pnand %p12730_p8, %p12724_p5 }
 0xae5   :  { %v10308_v33 = vpop.f32.mrf.mxu1 }
 0xae7   :  { %v12653_v45 = vpop.f32.mrf.mxu1 }
 0xae9   :  { %v10456_v43 = vpop.f32.mrf.mxu1 }
 0xaeb   :  { %v12663_v22 = vpop.f32.mrf.mxu1 }
 0xaed   :  { %v10232_v38 = vpop.f32.mrf.mxu0  ;;  %v10602_v27 = vpop.f32.mrf.mxu1 }
 0xaee   :  { %v10233_v54 = vadd.f32 %v11023_v61, %v10232_v38 }
 0xaef   :  { %v12648_v41 = vpop.f32.mrf.mxu0  ;;  %v12673_v17 = vpop.f32.mrf.mxu1 }
 0xaf0   :  { %v10309_v4 = vadd.f32 %v10308_v33, %v10233_v54 }
 0xaf1   :  { %v10382_v34 = vpop.f32.mrf.mxu0 }
 0xaf2   :  { %v10383_v42 = vadd.f32 %v10382_v34, %v10309_v4 }
 0xaf3   :  { %v12658_v8 = vpop.f32.mrf.mxu0 }
 0xaf4   :  { %v10457_v35 = vadd.f32 %v10456_v43, %v10383_v42 }
 0xaf5   :  { %v10530_v40 = vpop.f32.mrf.mxu0 }
 0xaf6   :  { %v10531_v26 = vadd.f32 %v10530_v40, %v10457_v35 }
 0xaf7   :  { %v12668_v53 = vpop.f32.mrf.mxu0 }
 0xaf8   :  { %v10603_v56 = vadd.f32 %v10602_v27, %v10531_v26 }
 0xafa   :  { %10607 = vst.msk [vmem:[#allocation8] sm:$0x3] %vm10606_vm2, %v10603_v56 }
 0xafb   :  { %12734 = shalt.err (!%p12731_p9)
}
 0xafc   :  { %10627 = dma.vmem_to_hbm [thread:$0]  %s10625_s15, 32, %s19413_s10, [#allocation9]  }
 0xafd   :  { %12743 = dma.done.wait [#allocation7], 32  }
 0xafe   :  { %12744 = vsyncadd [#allocation7], 4294967264 }
 0xaff   :  { %12745 = dma.done.wait [#allocation9], 32  }
 0xb00   :  { %12746 = vsyncadd [#allocation9], 4294967264 }
 0xb01   :  { %10634 = vsyncpa [#allocation7], 1 }
 0xb02   :  { %10635 = vsyncpa [#allocation9], 1 }

</bundles_post_ra>
